<compile_context>
chip_gen: v7x
topology: tpu7x:2x2x1
jax: 0.10.0
libtpu: 0.0.40
codegen_flags: <defaults>
</compile_context>

<pallas_src>
import numpy as np
import jax
import jax.numpy as jnp
from jax import lax
from jax.experimental import pallas as pl
from jax.experimental.pallas import tpu as pltpu

# ---- configuration consistent with PromptEncoder.__init__ -------------------
EMBED_DIM = 32                      # embed_dim
IMAGE_EMBEDDING_SIZE = (8, 8)       # (H, W) of image embedding
INPUT_IMAGE_SIZE = (32, 32)         # padded input image size (H, W)
MASK_IN_CHANS = 16                  # mask_in_chans
BATCH = 2
NUM_POINTS = 3

LN_EPS = 1e-6
_SQRT2 = 1.4142135623730951
_SQRT_2_OVER_PI = 0.7978845608028654

# dense sizes
_C1 = MASK_IN_CHANS // 4            # conv1 out channels (4)
_C2 = MASK_IN_CHANS                 # conv2 out channels (16)
_D = EMBED_DIM                      # 32
_H, _W = IMAGE_EMBEDDING_SIZE
_HW = _H * _W                       # 64
_BHW = BATCH * _HW                  # 128 (lane-dense)

# packed parameter block layout: one (PP_ROWS, 128) f32 array
#   rows 0..7   : sparse pack, 128-lane tiled (gx, gy, phase, 5-row label table)
#   rows 8..11  : conv1 weight (C1 x 4)  in lanes 0..3
#   rows 16..31 : conv2 weight (C2 x 16) in lanes 0..15   (col = kpos2*C1 + c1)
#   rows 32..63 : conv3 weight (D  x 16) in lanes 0..15
#   rows 64..95 : per-channel columns [conv1_b, ln1_g, ln1_b, conv2_b, ln2_g,
#                                      ln2_b, conv3_b, 0]
_SPP_ROW = 0
_W1_ROW = 8
_W2_ROW = 16
_W3_ROW = 32
_DPC_ROW = 64
_PP_ROWS = 96


def _gelu_exact(x):
    # PyTorch nn.GELU() default (exact, erf-based) -- used by the reference.
    return 0.5 * x * (1.0 + lax.erf(x / _SQRT2))


def _gelu_tanh(x):
    # tanh approximation: the tanh runs on the EUP (own bundle slot) instead of
    # the long erf VALU polynomial.  Max deviation ~5e-4 on |x| <= 4.
    return 0.5 * x * (1.0 + jnp.tanh(_SQRT_2_OVER_PI * (x + 0.044715 * x * x * x)))


# ---------------------------------------------------------------------------
# Fused kernel: sparse prompt embedding + mask_downscaling (single VMEM block).
# ---------------------------------------------------------------------------
def _make_fused_kernel(batch, hw):
    D, C1, C2 = _D, _C1, _C2
    L = batch * hw
    inv_w = 1.0 / float(INPUT_IMAGE_SIZE[1])
    inv_h = 1.0 / float(INPUT_IMAGE_SIZE[0])
    two_pi = 2.0 * float(np.pi)

    def kernel(cs_ref, pp_ref, xd_ref, sp_ref, dn_ref):
        # ----------------- sparse prompts (points + box corners), VPU only ---
        cs = cs_ref[...]                                           # (BN_pad, 8)
        xs = 2.0 * ((cs[:, 0:1] + 0.5) * inv_w) - 1.0
        ys = 2.0 * ((cs[:, 1:2] + 0.5) * inv_h) - 1.0
        # single sin over a phase-offset projection (cos(x) == sin(x + pi/2));
        # gauss rows and the phase row are pre-tiled to 128 lanes.
        proj = two_pi * (xs * pp_ref[0:1, :] + ys * pp_ref[1:2, :]) + pp_ref[2:3, :]
        pe = jnp.sin(proj)                                         # (BN_pad, 128)
        keep = 1.0 - cs[:, 2:3]                                    # 0 where label == -1
        add = ((cs[:, 2:3] * pp_ref[3:4, :] + cs[:, 3:4] * pp_ref[4:5, :])
               + (cs[:, 4:5] * pp_ref[5:6, :] + cs[:, 5:6] * pp_ref[6:7, :])
               + cs[:, 6:7] * pp_ref[7:8, :])                      # one-hot @ table
        sp_ref[...] = pe * keep + add                              # lane-dense full store

        # ----------------- dense mask_downscaling (channels-first, VPU) ------
        # hoisted lane broadcasts (JAX does not CSE broadcast_in_dim)
        b1 = jnp.broadcast_to(pp_ref[_DPC_ROW:_DPC_ROW + C1, 0:1], (C1, L))
        g1 = jnp.broadcast_to(pp_ref[_DPC_ROW:_DPC_ROW + C1, 1:2], (C1, L))
        be1 = jnp.broadcast_to(pp_ref[_DPC_ROW:_DPC_ROW + C1, 2:3], (C1, L))
        b2 = jnp.broadcast_to(pp_ref[_DPC_ROW:_DPC_ROW + C2, 3:4], (C2, L))
        g2 = jnp.broadcast_to(pp_ref[_DPC_ROW:_DPC_ROW + C2, 4:5], (C2, L))
        be2 = jnp.broadcast_to(pp_ref[_DPC_ROW:_DPC_ROW + C2, 5:6], (C2, L))
        b3 = jnp.broadcast_to(pp_ref[_DPC_ROW:_DPC_ROW + D, 6:7], (D, L))
        w1c = [jnp.broadcast_to(pp_ref[_W1_ROW:_W1_ROW + C1, j:j + 1], (C1, L))
               for j in range(4)]

        def ln(x, g, b):                       # LayerNorm2d over channel rows
            u = jnp.mean(x, axis=0, keepdims=True)
            v = jnp.mean((x - u) ** 2, axis=0, keepdims=True)
            return (x - u) * lax.rsqrt(v + LN_EPS) * g + b

        # conv1 (1 -> C1, k2 s2): 4 independent kpos2 streams of 4 FMAs each.
        h1 = []
        for kpos in range(4):
            r = 4 * kpos
            a = (b1 + w1c[0] * xd_ref[r:r + 1, :]
                 + w1c[1] * xd_ref[r + 1:r + 2, :])
            a = a + (w1c[2] * xd_ref[r + 2:r + 3, :]
                     + w1c[3] * xd_ref[r + 3:r + 4, :])
            h1.append(_gelu_tanh(ln(a, g1, be1)))                  # (C1, L)

        # conv2 (C1 -> C2, k2 s2): 4 independent partial accumulators.
        parts2 = []
        for grp in range(4):
            hg = h1[grp]
            c0 = 4 * grp
            p = (pp_ref[_W2_ROW:_W2_ROW + C2, c0 + 0:c0 + 1] * hg[0:1, :]
                 + pp_ref[_W2_ROW:_W2_ROW + C2, c0 + 1:c0 + 2] * hg[1:2, :])
            p = p + (pp_ref[_W2_ROW:_W2_ROW + C2, c0 + 2:c0 + 3] * hg[2:3, :]
                     + pp_ref[_W2_ROW:_W2_ROW + C2, c0 + 3:c0 + 4] * hg[3:4, :])
            parts2.append(p)
        h2 = _gelu_tanh(ln((parts2[0] + parts2[1]) + (parts2[2] + parts2[3]) + b2,
                           g2, be2))                               # (C2, L)

        # conv3 (C2 -> D, 1x1): VPU broadcast-FMAs with 4 independent
        # accumulators (a single tiny MXU dot would only expose fill/drain).
        parts3 = []
        for grp in range(4):
            j = 4 * grp
            q = (pp_ref[_W3_ROW:_W3_ROW + D, j:j + 1] * h2[j:j + 1, :]
                 + pp_ref[_W3_ROW:_W3_ROW + D, j + 1:j + 2] * h2[j + 1:j + 2, :])
            q = q + (pp_ref[_W3_ROW:_W3_ROW + D, j + 2:j + 3] * h2[j + 2:j + 3, :]
                     + pp_ref[_W3_ROW:_W3_ROW + D, j + 3:j + 4] * h2[j + 3:j + 4, :])
            parts3.append(q)
        dn = (parts3[0] + parts3[1]) + (parts3[2] + parts3[3]) + b3  # (D, L)

        # Store with the batch axis leading so the wrapper's (B,D,H,W) view is
        # a free reshape (no post-kernel transpose launch).
        for bi in range(batch):
            dn_ref[bi, :, :] = dn[:, bi * hw:(bi + 1) * hw]

    return kernel


# ---------------------------------------------------------------------------
# Forward wrapper (preprocessing is layout glue; all math lives in the kernel).
# ---------------------------------------------------------------------------
def prompt_encoder_forward(points, labels, boxes, masks, params):
    B, Np, _ = points.shape
    D = _D
    H, W = IMAGE_EMBEDDING_SIZE
    HW = H * W
    N = Np + 2
    BN = B * N
    BN_pad = ((BN + 7) // 8) * 8

    # sparse scalar block: per prompt row [x, y, onehot(label+1) (5 cols), 0]
    corners = boxes.reshape(B, 2, 2).astype(jnp.float32)
    coords = jnp.concatenate([points.astype(jnp.float32), corners], axis=1)   # (B,N,2)
    corner_labels = jnp.broadcast_to(jnp.array([[2, 3]], jnp.int32), (B, 2))
    labels_all = jnp.concatenate([labels.astype(jnp.int32), corner_labels], axis=1)
    sel = jax.nn.one_hot(labels_all + 1, 5, dtype=jnp.float32)                # (B,N,5)
    cs = jnp.concatenate([coords, sel, jnp.zeros((B, N, 1), jnp.float32)],
                         axis=-1).reshape(BN, 8)
    cs = jnp.pad(cs, ((0, BN_pad - BN), (0, 0)))

    # dense input: NCHW (B,1,4H,4W) -> (kpos2*4 + kpos1, B*HW) channels-first
    m = masks[:, 0].astype(jnp.float32).reshape(B, H, 2, 2, W, 2, 2)
    xd = m.transpose(2, 5, 3, 6, 0, 1, 4).reshape(16, B * HW)

    sp_out, dn_out = pl.pallas_call(
        _make_fused_kernel(B, HW),
        out_shape=(jax.ShapeDtypeStruct((BN_pad, 128), jnp.float32),
                   jax.ShapeDtypeStruct((B, D, HW), jnp.float32)),
        in_specs=[pl.BlockSpec(memory_space=pltpu.MemorySpace.VMEM)] * 3,
        out_specs=(pl.BlockSpec(memory_space=pltpu.MemorySpace.VMEM),
                   pl.BlockSpec(memory_space=pltpu.MemorySpace.VMEM)),
    )(cs, params["pp"], xd)

    sparse = sp_out[:BN, :D].reshape(B, N, D)
    dense = dn_out.reshape(B, D, H, W)          # free reshape, no transpose
    return sparse, dense


prompt_encoder_forward_jit = jax.jit(prompt_encoder_forward)


# ---------------------------------------------------------------------------
# Deterministic parameter init (shapes follow PromptEncoder.__init__) + packing
# ---------------------------------------------------------------------------
def init_params(key):
    D, Dh = _D, _D // 2
    C1, C2 = _C1, _C2
    k = jax.random.split(key, 16)
    p = {}
    p["gauss"] = jax.random.normal(k[0], (2, Dh), jnp.float32)        # scale=1.0
    p["not_a_point"] = jax.random.normal(k[1], (1, D), jnp.float32)
    p["pe0"] = jax.random.normal(k[2], (1, D), jnp.float32)
    p["pe1"] = jax.random.normal(k[3], (1, D), jnp.float32)
    p["pe2"] = jax.random.normal(k[4], (1, D), jnp.float32)
    p["pe3"] = jax.random.normal(k[5], (1, D), jnp.float32)
    p["no_mask"] = jax.random.normal(k[6], (1, D), jnp.float32)       # unused (masks given)
    # conv weights in PyTorch OIHW layout
    p["conv1_w"] = 0.2 * jax.random.normal(k[7], (C1, 1, 2, 2), jnp.float32)
    p["conv1_b"] = 0.1 * jax.random.normal(k[8], (C1,), jnp.float32)
    p["conv2_w"] = 0.2 * jax.random.normal(k[9], (C2, C1, 2, 2), jnp.float32)
    p["conv2_b"] = 0.1 * jax.random.normal(k[10], (C2,), jnp.float32)
    p["conv3_w"] = 0.2 * jax.random.normal(k[11], (D, C2, 1, 1), jnp.float32)
    p["conv3_b"] = 0.1 * jax.random.normal(k[12], (D,), jnp.float32)
    p["ln1_g"] = 1.0 + 0.1 * jax.random.normal(k[13], (C1,), jnp.float32)
    p["ln1_b"] = 0.1 * jax.random.normal(k[14], (C1,), jnp.float32)
    p["ln2_g"] = 1.0 + 0.1 * jax.random.normal(k[15], (C2,), jnp.float32)
    p["ln2_b"] = jnp.zeros((C2,), jnp.float32)

    # ---- single packed (PP_ROWS, 128) kernel parameter block ----
    rep = 128 // D                                                    # lane tiling factor (4)
    gx = jnp.tile(jnp.concatenate([p["gauss"][0], p["gauss"][0]]), rep)
    gy = jnp.tile(jnp.concatenate([p["gauss"][1], p["gauss"][1]]), rep)
    phase = jnp.tile(jnp.concatenate([jnp.zeros((Dh,), jnp.float32),
                                      jnp.full((Dh,), 0.5 * np.pi, jnp.float32)]), rep)
    table = jnp.concatenate([p["not_a_point"], p["pe0"], p["pe1"],
                             p["pe2"], p["pe3"]], axis=0)             # (5, D)
    pp = jnp.zeros((_PP_ROWS, 128), jnp.float32)
    pp = pp.at[0, :].set(gx).at[1, :].set(gy).at[2, :].set(phase)
    pp = pp.at[3:8, :].set(jnp.tile(table, (1, rep)))

    w1t = p["conv1_w"][:, 0].reshape(C1, 4)                           # [c1, kh*2+kw]
    w2t = p["conv2_w"].transpose(0, 2, 3, 1).reshape(C2, 4 * C1)      # [c2, kpos2*C1+c1]
    w3t = p["conv3_w"][:, :, 0, 0]                                    # [d, c2]
    pp = pp.at[_W1_ROW:_W1_ROW + C1, 0:4].set(w1t)
    pp = pp.at[_W2_ROW:_W2_ROW + C2, 0:4 * C1].set(w2t)
    pp = pp.at[_W3_ROW:_W3_ROW + D, 0:C2].set(w3t)
    pp = pp.at[_DPC_ROW:_DPC_ROW + C1, 0].set(p["conv1_b"])
    pp = pp.at[_DPC_ROW:_DPC_ROW + C1, 1].set(p["ln1_g"])
    pp = pp.at[_DPC_ROW:_DPC_ROW + C1, 2].set(p["ln1_b"])
    pp = pp.at[_DPC_ROW:_DPC_ROW + C2, 3].set(p["conv2_b"])
    pp = pp.at[_DPC_ROW:_DPC_ROW + C2, 4].set(p["ln2_g"])
    pp = pp.at[_DPC_ROW:_DPC_ROW + C2, 5].set(p["ln2_b"])
    pp = pp.at[_DPC_ROW:_DPC_ROW + D, 6].set(p["conv3_b"])
    p["pp"] = pp
    return p


# ---------------------------------------------------------------------------
# Pure-JAX references (for correctness check; exact erf GELU, real convs)
# ---------------------------------------------------------------------------
def _pe_encoding(coords, gauss):
    c = 2.0 * coords - 1.0
    proj = (2.0 * np.pi) * (c @ gauss)
    return jnp.concatenate([jnp.sin(proj), jnp.cos(proj)], axis=-1)


def ref_sparse(points, labels, boxes, p):
    H_img, W_img = INPUT_IMAGE_SIZE
    inv = jnp.array([1.0 / W_img, 1.0 / H_img], jnp.float32)
    pts = (points + 0.5) * inv
    pe = _pe_encoding(pts, p["gauss"])
    lab = labels[..., None]
    pe = jnp.where(lab == -1, 0.0, pe)
    pe = pe + jnp.where(lab == -1, p["not_a_point"][0], 0.0)
    pe = pe + jnp.where(lab == 0, p["pe0"][0], 0.0)
    pe = pe + jnp.where(lab == 1, p["pe1"][0], 0.0)
    corners = ((boxes + 0.5).reshape(-1, 2, 2)) * inv
    ce = _pe_encoding(corners, p["gauss"])
    ce = ce.at[:, 0, :].add(p["pe2"][0])
    ce = ce.at[:, 1, :].add(p["pe3"][0])
    return jnp.concatenate([pe, ce], axis=1)


def _ln2d(x, g, b):
    u = x.mean(axis=1, keepdims=True)
    s = ((x - u) ** 2).mean(axis=1, keepdims=True)
    xn = (x - u) / jnp.sqrt(s + LN_EPS)
    return xn * g[None, :, None, None] + b[None, :, None, None]


def ref_dense(masks, p):
    dn = ("NCHW", "OIHW", "NCHW")
    x = lax.conv_general_dilated(masks, p["conv1_w"], (2, 2), "VALID", dimension_numbers=dn)
    x = x + p["conv1_b"][None, :, None, None]
    x = _gelu_exact(_ln2d(x, p["ln1_g"], p["ln1_b"]))
    x = lax.conv_general_dilated(x, p["conv2_w"], (2, 2), "VALID", dimension_numbers=dn)
    x = x + p["conv2_b"][None, :, None, None]
    x = _gelu_exact(_ln2d(x, p["ln2_g"], p["ln2_b"]))
    x = lax.conv_general_dilated(x, p["conv3_w"], (1, 1), "VALID", dimension_numbers=dn)
    x = x + p["conv3_b"][None, :, None, None]
    return x


if __name__ == "__main__":
    key = jax.random.PRNGKey(0)
    kp, kpts, kbox, kmask = jax.random.split(key, 4)
    params = init_params(kp)

    H_img, W_img = INPUT_IMAGE_SIZE
    points = jax.random.uniform(kpts, (BATCH, NUM_POINTS, 2), jnp.float32,
                                0.0, float(min(H_img, W_img) - 1))
    labels = jnp.array([[1, 0, -1], [0, 1, 1]], jnp.int32)       # includes a "not a point"
    boxes = jax.random.uniform(kbox, (BATCH, 4), jnp.float32, 0.0, float(W_img - 1))
    masks = jax.random.normal(
        kmask, (BATCH, 1, 4 * IMAGE_EMBEDDING_SIZE[0], 4 * IMAGE_EMBEDDING_SIZE[1]),
        jnp.float32)

    sparse, dense = jax.block_until_ready(
        prompt_encoder_forward_jit(points, labels, boxes, masks, params))

    assert sparse.shape == (BATCH, NUM_POINTS + 2, EMBED_DIM)
    assert dense.shape == (BATCH, EMBED_DIM, *IMAGE_EMBEDDING_SIZE)

    np.testing.assert_allclose(np.asarray(sparse),
                               np.asarray(ref_sparse(points, labels, boxes, params)),
                               rtol=2e-3, atol=2e-3)
    # dense tolerance 3e-3: kernel uses tanh-GELU (EUP) vs the exact erf GELU
    # in the reference; deviation through the 3-conv stack is ~1e-3.
    np.testing.assert_allclose(np.asarray(dense),
                               np.asarray(ref_dense(masks, params)),
                               rtol=3e-3, atol=3e-3)

    # TODO(synk): no_mask_embed / points-only padding / get_dense_pe optional
    # branches are pure broadcast/concat glue around these kernels and are not
    # kernelized here.
    print("KERNEL_OK")
</pallas_src>

<mosaic_0001>
module attributes {stable_mosaic.version = 11 : i64} {
  func.func @kernel(%arg0: memref<16x8xf32, #tpu.memory_space<vmem>>, %arg1: memref<96x128xf32, #tpu.memory_space<vmem>>, %arg2: memref<16x128xf32, #tpu.memory_space<vmem>>, %arg3: memref<16x128xf32, #tpu.memory_space<vmem>>, %arg4: memref<2x32x64xf32, #tpu.memory_space<vmem>>) attributes {dimension_semantics = [], scalar_prefetch = 0 : i64, scratch_operands = 0 : i64, tpu.core_type = #tpu.core_type<tc>} {
    %c0 = arith.constant 0 : index
    %c0_0 = arith.constant 0 : index
    %0 = vector.load %arg0[%c0, %c0_0] : memref<16x8xf32, #tpu.memory_space<vmem>>, vector<16x8xf32>
    %1 = vector.extract_strided_slice %0 {offsets = [0, 0], sizes = [16, 1], strides = [1, 1]} : vector<16x8xf32> to vector<16x1xf32>
    %cst = arith.constant 5.000000e-01 : f32
    %2 = vector.broadcast %cst : f32 to vector<16x1xf32>
    %3 = arith.addf %1, %2 : vector<16x1xf32>
    %cst_1 = arith.constant 3.125000e-02 : f32
    %4 = vector.broadcast %cst_1 : f32 to vector<16x1xf32>
    %5 = arith.mulf %3, %4 : vector<16x1xf32>
    %cst_2 = arith.constant 2.000000e+00 : f32
    %6 = vector.broadcast %cst_2 : f32 to vector<16x1xf32>
    %7 = arith.mulf %6, %5 : vector<16x1xf32>
    %cst_3 = arith.constant 1.000000e+00 : f32
    %8 = vector.broadcast %cst_3 : f32 to vector<16x1xf32>
    %9 = arith.subf %7, %8 : vector<16x1xf32>
    %10 = vector.extract_strided_slice %0 {offsets = [0, 1], sizes = [16, 1], strides = [1, 1]} : vector<16x8xf32> to vector<16x1xf32>
    %cst_4 = arith.constant 5.000000e-01 : f32
    %11 = vector.broadcast %cst_4 : f32 to vector<16x1xf32>
    %12 = arith.addf %10, %11 : vector<16x1xf32>
    %cst_5 = arith.constant 3.125000e-02 : f32
    %13 = vector.broadcast %cst_5 : f32 to vector<16x1xf32>
    %14 = arith.mulf %12, %13 : vector<16x1xf32>
    %cst_6 = arith.constant 2.000000e+00 : f32
    %15 = vector.broadcast %cst_6 : f32 to vector<16x1xf32>
    %16 = arith.mulf %15, %14 : vector<16x1xf32>
    %cst_7 = arith.constant 1.000000e+00 : f32
    %17 = vector.broadcast %cst_7 : f32 to vector<16x1xf32>
    %18 = arith.subf %16, %17 : vector<16x1xf32>
    %c0_8 = arith.constant 0 : index
    %c0_9 = arith.constant 0 : index
    %19 = vector.load %arg1[%c0_8, %c0_9] : memref<96x128xf32, #tpu.memory_space<vmem>>, vector<1x128xf32>
    %20 = vector.broadcast %9 : vector<16x1xf32> to vector<16x128xf32>
    %21 = vector.broadcast %19 : vector<1x128xf32> to vector<16x128xf32>
    %22 = arith.mulf %20, %21 : vector<16x128xf32>
    %c1 = arith.constant 1 : index
    %c0_10 = arith.constant 0 : index
    %23 = vector.load %arg1[%c1, %c0_10] : memref<96x128xf32, #tpu.memory_space<vmem>>, vector<1x128xf32>
    %24 = vector.broadcast %18 : vector<16x1xf32> to vector<16x128xf32>
    %25 = vector.broadcast %23 : vector<1x128xf32> to vector<16x128xf32>
    %26 = arith.mulf %24, %25 : vector<16x128xf32>
    %27 = arith.addf %22, %26 : vector<16x128xf32>
    %cst_11 = arith.constant 6.28318548 : f32
    %28 = vector.broadcast %cst_11 : f32 to vector<16x128xf32>
    %29 = arith.mulf %28, %27 : vector<16x128xf32>
    %c2 = arith.constant 2 : index
    %c0_12 = arith.constant 0 : index
    %30 = vector.load %arg1[%c2, %c0_12] : memref<96x128xf32, #tpu.memory_space<vmem>>, vector<1x128xf32>
    %31 = vector.broadcast %30 : vector<1x128xf32> to vector<16x128xf32>
    %32 = arith.addf %29, %31 : vector<16x128xf32>
    %33 = math.sin %32 : vector<16x128xf32>
    %34 = vector.extract_strided_slice %0 {offsets = [0, 2], sizes = [16, 1], strides = [1, 1]} : vector<16x8xf32> to vector<16x1xf32>
    %cst_13 = arith.constant 1.000000e+00 : f32
    %35 = vector.broadcast %cst_13 : f32 to vector<16x1xf32>
    %36 = arith.subf %35, %34 : vector<16x1xf32>
    %37 = vector.extract_strided_slice %0 {offsets = [0, 2], sizes = [16, 1], strides = [1, 1]} : vector<16x8xf32> to vector<16x1xf32>
    %c3 = arith.constant 3 : index
    %c0_14 = arith.constant 0 : index
    %38 = vector.load %arg1[%c3, %c0_14] : memref<96x128xf32, #tpu.memory_space<vmem>>, vector<1x128xf32>
    %39 = vector.broadcast %37 : vector<16x1xf32> to vector<16x128xf32>
    %40 = vector.broadcast %38 : vector<1x128xf32> to vector<16x128xf32>
    %41 = arith.mulf %39, %40 : vector<16x128xf32>
    %42 = vector.extract_strided_slice %0 {offsets = [0, 3], sizes = [16, 1], strides = [1, 1]} : vector<16x8xf32> to vector<16x1xf32>
    %c4 = arith.constant 4 : index
    %c0_15 = arith.constant 0 : index
    %43 = vector.load %arg1[%c4, %c0_15] : memref<96x128xf32, #tpu.memory_space<vmem>>, vector<1x128xf32>
    %44 = vector.broadcast %42 : vector<16x1xf32> to vector<16x128xf32>
    %45 = vector.broadcast %43 : vector<1x128xf32> to vector<16x128xf32>
    %46 = arith.mulf %44, %45 : vector<16x128xf32>
    %47 = arith.addf %41, %46 : vector<16x128xf32>
    %48 = vector.extract_strided_slice %0 {offsets = [0, 4], sizes = [16, 1], strides = [1, 1]} : vector<16x8xf32> to vector<16x1xf32>
    %c5 = arith.constant 5 : index
    %c0_16 = arith.constant 0 : index
    %49 = vector.load %arg1[%c5, %c0_16] : memref<96x128xf32, #tpu.memory_space<vmem>>, vector<1x128xf32>
    %50 = vector.broadcast %48 : vector<16x1xf32> to vector<16x128xf32>
    %51 = vector.broadcast %49 : vector<1x128xf32> to vector<16x128xf32>
    %52 = arith.mulf %50, %51 : vector<16x128xf32>
    %53 = vector.extract_strided_slice %0 {offsets = [0, 5], sizes = [16, 1], strides = [1, 1]} : vector<16x8xf32> to vector<16x1xf32>
    %c6 = arith.constant 6 : index
    %c0_17 = arith.constant 0 : index
    %54 = vector.load %arg1[%c6, %c0_17] : memref<96x128xf32, #tpu.memory_space<vmem>>, vector<1x128xf32>
    %55 = vector.broadcast %53 : vector<16x1xf32> to vector<16x128xf32>
    %56 = vector.broadcast %54 : vector<1x128xf32> to vector<16x128xf32>
    %57 = arith.mulf %55, %56 : vector<16x128xf32>
    %58 = arith.addf %52, %57 : vector<16x128xf32>
    %59 = arith.addf %47, %58 : vector<16x128xf32>
    %60 = vector.extract_strided_slice %0 {offsets = [0, 6], sizes = [16, 1], strides = [1, 1]} : vector<16x8xf32> to vector<16x1xf32>
    %c7 = arith.constant 7 : index
    %c0_18 = arith.constant 0 : index
    %61 = vector.load %arg1[%c7, %c0_18] : memref<96x128xf32, #tpu.memory_space<vmem>>, vector<1x128xf32>
    %62 = vector.broadcast %60 : vector<16x1xf32> to vector<16x128xf32>
    %63 = vector.broadcast %61 : vector<1x128xf32> to vector<16x128xf32>
    %64 = arith.mulf %62, %63 : vector<16x128xf32>
    %65 = arith.addf %59, %64 : vector<16x128xf32>
    %66 = vector.broadcast %36 : vector<16x1xf32> to vector<16x128xf32>
    %67 = arith.mulf %33, %66 : vector<16x128xf32>
    %68 = arith.addf %67, %65 : vector<16x128xf32>
    %c0_19 = arith.constant 0 : index
    %c0_20 = arith.constant 0 : index
    %69 = vector.load %arg3[%c0_19, %c0_20] : memref<16x128xf32, #tpu.memory_space<vmem>>, vector<16x128xf32>
    tpu.vector_store %arg3[%c0_19, %c0_20], %68 {strides = array<i32>} : memref<16x128xf32, #tpu.memory_space<vmem>>, vector<16x128xf32>,
    %c64 = arith.constant 64 : index
    %c0_21 = arith.constant 0 : index
    %70 = vector.load %arg1[%c64, %c0_21] : memref<96x128xf32, #tpu.memory_space<vmem>>, vector<4x1xf32>
    %71 = vector.shape_cast %70 : vector<4x1xf32> to vector<4x1xf32>
    %72 = vector.broadcast %71 : vector<4x1xf32> to vector<4x128xf32>
    %c64_22 = arith.constant 64 : index
    %c1_23 = arith.constant 1 : index
    %73 = vector.load %arg1[%c64_22, %c1_23] : memref<96x128xf32, #tpu.memory_space<vmem>>, vector<4x1xf32>
    %74 = vector.shape_cast %73 : vector<4x1xf32> to vector<4x1xf32>
    %75 = vector.broadcast %74 : vector<4x1xf32> to vector<4x128xf32>
    %c64_24 = arith.constant 64 : index
    %c2_25 = arith.constant 2 : index
    %76 = vector.load %arg1[%c64_24, %c2_25] : memref<96x128xf32, #tpu.memory_space<vmem>>, vector<4x1xf32>
    %77 = vector.shape_cast %76 : vector<4x1xf32> to vector<4x1xf32>
    %78 = vector.broadcast %77 : vector<4x1xf32> to vector<4x128xf32>
    %c64_26 = arith.constant 64 : index
    %c3_27 = arith.constant 3 : index
    %79 = vector.load %arg1[%c64_26, %c3_27] : memref<96x128xf32, #tpu.memory_space<vmem>>, vector<16x1xf32>
    %80 = vector.shape_cast %79 : vector<16x1xf32> to vector<16x1xf32>
    %81 = vector.broadcast %80 : vector<16x1xf32> to vector<16x128xf32>
    %c64_28 = arith.constant 64 : index
    %c4_29 = arith.constant 4 : index
    %82 = vector.load %arg1[%c64_28, %c4_29] : memref<96x128xf32, #tpu.memory_space<vmem>>, vector<16x1xf32>
    %83 = vector.shape_cast %82 : vector<16x1xf32> to vector<16x1xf32>
    %84 = vector.broadcast %83 : vector<16x1xf32> to vector<16x128xf32>
    %c64_30 = arith.constant 64 : index
    %c5_31 = arith.constant 5 : index
    %85 = vector.load %arg1[%c64_30, %c5_31] : memref<96x128xf32, #tpu.memory_space<vmem>>, vector<16x1xf32>
    %86 = vector.shape_cast %85 : vector<16x1xf32> to vector<16x1xf32>
    %87 = vector.broadcast %86 : vector<16x1xf32> to vector<16x128xf32>
    %c64_32 = arith.constant 64 : index
    %c6_33 = arith.constant 6 : index
    %88 = vector.load %arg1[%c64_32, %c6_33] : memref<96x128xf32, #tpu.memory_space<vmem>>, vector<32x1xf32>
    %89 = vector.shape_cast %88 : vector<32x1xf32> to vector<32x1xf32>
    %90 = vector.broadcast %89 : vector<32x1xf32> to vector<32x128xf32>
    %c8 = arith.constant 8 : index
    %c0_34 = arith.constant 0 : index
    %91 = vector.load %arg1[%c8, %c0_34] : memref<96x128xf32, #tpu.memory_space<vmem>>, vector<4x1xf32>
    %92 = vector.shape_cast %91 : vector<4x1xf32> to vector<4x1xf32>
    %93 = vector.broadcast %92 : vector<4x1xf32> to vector<4x128xf32>
    %c8_35 = arith.constant 8 : index
    %c1_36 = arith.constant 1 : index
    %94 = vector.load %arg1[%c8_35, %c1_36] : memref<96x128xf32, #tpu.memory_space<vmem>>, vector<4x1xf32>
    %95 = vector.shape_cast %94 : vector<4x1xf32> to vector<4x1xf32>
    %96 = vector.broadcast %95 : vector<4x1xf32> to vector<4x128xf32>
    %c8_37 = arith.constant 8 : index
    %c2_38 = arith.constant 2 : index
    %97 = vector.load %arg1[%c8_37, %c2_38] : memref<96x128xf32, #tpu.memory_space<vmem>>, vector<4x1xf32>
    %98 = vector.shape_cast %97 : vector<4x1xf32> to vector<4x1xf32>
    %99 = vector.broadcast %98 : vector<4x1xf32> to vector<4x128xf32>
    %c8_39 = arith.constant 8 : index
    %c3_40 = arith.constant 3 : index
    %100 = vector.load %arg1[%c8_39, %c3_40] : memref<96x128xf32, #tpu.memory_space<vmem>>, vector<4x1xf32>
    %101 = vector.shape_cast %100 : vector<4x1xf32> to vector<4x1xf32>
    %102 = vector.broadcast %101 : vector<4x1xf32> to vector<4x128xf32>
    %c0_41 = arith.constant 0 : index
    %c0_42 = arith.constant 0 : index
    %103 = vector.load %arg2[%c0_41, %c0_42] : memref<16x128xf32, #tpu.memory_space<vmem>>, vector<1x128xf32>
    %104 = vector.broadcast %103 : vector<1x128xf32> to vector<4x128xf32>
    %105 = arith.mulf %93, %104 : vector<4x128xf32>
    %106 = arith.addf %72, %105 : vector<4x128xf32>
    %c1_43 = arith.constant 1 : index
    %c0_44 = arith.constant 0 : index
    %107 = vector.load %arg2[%c1_43, %c0_44] : memref<16x128xf32, #tpu.memory_space<vmem>>, vector<1x128xf32>
    %108 = vector.broadcast %107 : vector<1x128xf32> to vector<4x128xf32>
    %109 = arith.mulf %96, %108 : vector<4x128xf32>
    %110 = arith.addf %106, %109 : vector<4x128xf32>
    %c2_45 = arith.constant 2 : index
    %c0_46 = arith.constant 0 : index
    %111 = vector.load %arg2[%c2_45, %c0_46] : memref<16x128xf32, #tpu.memory_space<vmem>>, vector<1x128xf32>
    %112 = vector.broadcast %111 : vector<1x128xf32> to vector<4x128xf32>
    %113 = arith.mulf %99, %112 : vector<4x128xf32>
    %c3_47 = arith.constant 3 : index
    %c0_48 = arith.constant 0 : index
    %114 = vector.load %arg2[%c3_47, %c0_48] : memref<16x128xf32, #tpu.memory_space<vmem>>, vector<1x128xf32>
    %115 = vector.broadcast %114 : vector<1x128xf32> to vector<4x128xf32>
    %116 = arith.mulf %102, %115 : vector<4x128xf32>
    %117 = arith.addf %113, %116 : vector<4x128xf32>
    %118 = arith.addf %110, %117 : vector<4x128xf32>
    %cst_49 = arith.constant dense<0.000000e+00> : vector<128xf32>
    %119 = vector.multi_reduction <add>, %118, %cst_49 [0] : vector<4x128xf32> to vector<128xf32>
    %120 = vector.shape_cast %119 : vector<128xf32> to vector<1x128xf32>
    %cst_50 = arith.constant 4.000000e+00 : f32
    %121 = vector.broadcast %cst_50 : f32 to vector<1x128xf32>
    %122 = arith.divf %120, %121 : vector<1x128xf32>
    %123 = vector.broadcast %122 : vector<1x128xf32> to vector<4x128xf32>
    %124 = arith.subf %118, %123 : vector<4x128xf32>
    %125 = arith.mulf %124, %124 : vector<4x128xf32>
    %cst_51 = arith.constant dense<0.000000e+00> : vector<128xf32>
    %126 = vector.multi_reduction <add>, %125, %cst_51 [0] : vector<4x128xf32> to vector<128xf32>
    %127 = vector.shape_cast %126 : vector<128xf32> to vector<1x128xf32>
    %cst_52 = arith.constant 4.000000e+00 : f32
    %128 = vector.broadcast %cst_52 : f32 to vector<1x128xf32>
    %129 = arith.divf %127, %128 : vector<1x128xf32>
    %130 = vector.broadcast %122 : vector<1x128xf32> to vector<4x128xf32>
    %131 = arith.subf %118, %130 : vector<4x128xf32>
    %cst_53 = arith.constant 9.99999997E-7 : f32
    %132 = vector.broadcast %cst_53 : f32 to vector<1x128xf32>
    %133 = arith.addf %129, %132 : vector<1x128xf32>
    %134 = math.rsqrt %133 : vector<1x128xf32>
    %135 = vector.broadcast %134 : vector<1x128xf32> to vector<4x128xf32>
    %136 = arith.mulf %131, %135 : vector<4x128xf32>
    %137 = arith.mulf %136, %75 : vector<4x128xf32>
    %138 = arith.addf %137, %78 : vector<4x128xf32>
    %cst_54 = arith.constant 5.000000e-01 : f32
    %139 = vector.broadcast %cst_54 : f32 to vector<4x128xf32>
    %140 = arith.mulf %139, %138 : vector<4x128xf32>
    %cst_55 = arith.constant 4.471500e-02 : f32
    %141 = vector.broadcast %cst_55 : f32 to vector<4x128xf32>
    %142 = arith.mulf %141, %138 : vector<4x128xf32>
    %143 = arith.mulf %142, %138 : vector<4x128xf32>
    %144 = arith.mulf %143, %138 : vector<4x128xf32>
    %145 = arith.addf %138, %144 : vector<4x128xf32>
    %cst_56 = arith.constant 0.797884583 : f32
    %146 = vector.broadcast %cst_56 : f32 to vector<4x128xf32>
    %147 = arith.mulf %146, %145 : vector<4x128xf32>
    %148 = math.tanh %147 : vector<4x128xf32>
    %cst_57 = arith.constant 1.000000e+00 : f32
    %149 = vector.broadcast %cst_57 : f32 to vector<4x128xf32>
    %150 = arith.addf %149, %148 : vector<4x128xf32>
    %151 = arith.mulf %140, %150 : vector<4x128xf32>
    %c4_58 = arith.constant 4 : index
    %c0_59 = arith.constant 0 : index
    %152 = vector.load %arg2[%c4_58, %c0_59] : memref<16x128xf32, #tpu.memory_space<vmem>>, vector<1x128xf32>
    %153 = vector.broadcast %152 : vector<1x128xf32> to vector<4x128xf32>
    %154 = arith.mulf %93, %153 : vector<4x128xf32>
    %155 = arith.addf %72, %154 : vector<4x128xf32>
    %c5_60 = arith.constant 5 : index
    %c0_61 = arith.constant 0 : index
    %156 = vector.load %arg2[%c5_60, %c0_61] : memref<16x128xf32, #tpu.memory_space<vmem>>, vector<1x128xf32>
    %157 = vector.broadcast %156 : vector<1x128xf32> to vector<4x128xf32>
    %158 = arith.mulf %96, %157 : vector<4x128xf32>
    %159 = arith.addf %155, %158 : vector<4x128xf32>
    %c6_62 = arith.constant 6 : index
    %c0_63 = arith.constant 0 : index
    %160 = vector.load %arg2[%c6_62, %c0_63] : memref<16x128xf32, #tpu.memory_space<vmem>>, vector<1x128xf32>
    %161 = vector.broadcast %160 : vector<1x128xf32> to vector<4x128xf32>
    %162 = arith.mulf %99, %161 : vector<4x128xf32>
    %c7_64 = arith.constant 7 : index
    %c0_65 = arith.constant 0 : index
    %163 = vector.load %arg2[%c7_64, %c0_65] : memref<16x128xf32, #tpu.memory_space<vmem>>, vector<1x128xf32>
    %164 = vector.broadcast %163 : vector<1x128xf32> to vector<4x128xf32>
    %165 = arith.mulf %102, %164 : vector<4x128xf32>
    %166 = arith.addf %162, %165 : vector<4x128xf32>
    %167 = arith.addf %159, %166 : vector<4x128xf32>
    %cst_66 = arith.constant dense<0.000000e+00> : vector<128xf32>
    %168 = vector.multi_reduction <add>, %167, %cst_66 [0] : vector<4x128xf32> to vector<128xf32>
    %169 = vector.shape_cast %168 : vector<128xf32> to vector<1x128xf32>
    %cst_67 = arith.constant 4.000000e+00 : f32
    %170 = vector.broadcast %cst_67 : f32 to vector<1x128xf32>
    %171 = arith.divf %169, %170 : vector<1x128xf32>
    %172 = vector.broadcast %171 : vector<1x128xf32> to vector<4x128xf32>
    %173 = arith.subf %167, %172 : vector<4x128xf32>
    %174 = arith.mulf %173, %173 : vector<4x128xf32>
    %cst_68 = arith.constant dense<0.000000e+00> : vector<128xf32>
    %175 = vector.multi_reduction <add>, %174, %cst_68 [0] : vector<4x128xf32> to vector<128xf32>
    %176 = vector.shape_cast %175 : vector<128xf32> to vector<1x128xf32>
    %cst_69 = arith.constant 4.000000e+00 : f32
    %177 = vector.broadcast %cst_69 : f32 to vector<1x128xf32>
    %178 = arith.divf %176, %177 : vector<1x128xf32>
    %179 = vector.broadcast %171 : vector<1x128xf32> to vector<4x128xf32>
    %180 = arith.subf %167, %179 : vector<4x128xf32>
    %cst_70 = arith.constant 9.99999997E-7 : f32
    %181 = vector.broadcast %cst_70 : f32 to vector<1x128xf32>
    %182 = arith.addf %178, %181 : vector<1x128xf32>
    %183 = math.rsqrt %182 : vector<1x128xf32>
    %184 = vector.broadcast %183 : vector<1x128xf32> to vector<4x128xf32>
    %185 = arith.mulf %180, %184 : vector<4x128xf32>
    %186 = arith.mulf %185, %75 : vector<4x128xf32>
    %187 = arith.addf %186, %78 : vector<4x128xf32>
    %cst_71 = arith.constant 5.000000e-01 : f32
    %188 = vector.broadcast %cst_71 : f32 to vector<4x128xf32>
    %189 = arith.mulf %188, %187 : vector<4x128xf32>
    %cst_72 = arith.constant 4.471500e-02 : f32
    %190 = vector.broadcast %cst_72 : f32 to vector<4x128xf32>
    %191 = arith.mulf %190, %187 : vector<4x128xf32>
    %192 = arith.mulf %191, %187 : vector<4x128xf32>
    %193 = arith.mulf %192, %187 : vector<4x128xf32>
    %194 = arith.addf %187, %193 : vector<4x128xf32>
    %cst_73 = arith.constant 0.797884583 : f32
    %195 = vector.broadcast %cst_73 : f32 to vector<4x128xf32>
    %196 = arith.mulf %195, %194 : vector<4x128xf32>
    %197 = math.tanh %196 : vector<4x128xf32>
    %cst_74 = arith.constant 1.000000e+00 : f32
    %198 = vector.broadcast %cst_74 : f32 to vector<4x128xf32>
    %199 = arith.addf %198, %197 : vector<4x128xf32>
    %200 = arith.mulf %189, %199 : vector<4x128xf32>
    %c8_75 = arith.constant 8 : index
    %c0_76 = arith.constant 0 : index
    %201 = vector.load %arg2[%c8_75, %c0_76] : memref<16x128xf32, #tpu.memory_space<vmem>>, vector<1x128xf32>
    %202 = vector.broadcast %201 : vector<1x128xf32> to vector<4x128xf32>
    %203 = arith.mulf %93, %202 : vector<4x128xf32>
    %204 = arith.addf %72, %203 : vector<4x128xf32>
    %c9 = arith.constant 9 : index
    %c0_77 = arith.constant 0 : index
    %205 = vector.load %arg2[%c9, %c0_77] : memref<16x128xf32, #tpu.memory_space<vmem>>, vector<1x128xf32>
    %206 = vector.broadcast %205 : vector<1x128xf32> to vector<4x128xf32>
    %207 = arith.mulf %96, %206 : vector<4x128xf32>
    %208 = arith.addf %204, %207 : vector<4x128xf32>
    %c10 = arith.constant 10 : index
    %c0_78 = arith.constant 0 : index
    %209 = vector.load %arg2[%c10, %c0_78] : memref<16x128xf32, #tpu.memory_space<vmem>>, vector<1x128xf32>
    %210 = vector.broadcast %209 : vector<1x128xf32> to vector<4x128xf32>
    %211 = arith.mulf %99, %210 : vector<4x128xf32>
    %c11 = arith.constant 11 : index
    %c0_79 = arith.constant 0 : index
    %212 = vector.load %arg2[%c11, %c0_79] : memref<16x128xf32, #tpu.memory_space<vmem>>, vector<1x128xf32>
    %213 = vector.broadcast %212 : vector<1x128xf32> to vector<4x128xf32>
    %214 = arith.mulf %102, %213 : vector<4x128xf32>
    %215 = arith.addf %211, %214 : vector<4x128xf32>
    %216 = arith.addf %208, %215 : vector<4x128xf32>
    %cst_80 = arith.constant dense<0.000000e+00> : vector<128xf32>
    %217 = vector.multi_reduction <add>, %216, %cst_80 [0] : vector<4x128xf32> to vector<128xf32>
    %218 = vector.shape_cast %217 : vector<128xf32> to vector<1x128xf32>
    %cst_81 = arith.constant 4.000000e+00 : f32
    %219 = vector.broadcast %cst_81 : f32 to vector<1x128xf32>
    %220 = arith.divf %218, %219 : vector<1x128xf32>
    %221 = vector.broadcast %220 : vector<1x128xf32> to vector<4x128xf32>
    %222 = arith.subf %216, %221 : vector<4x128xf32>
    %223 = arith.mulf %222, %222 : vector<4x128xf32>
    %cst_82 = arith.constant dense<0.000000e+00> : vector<128xf32>
    %224 = vector.multi_reduction <add>, %223, %cst_82 [0] : vector<4x128xf32> to vector<128xf32>
    %225 = vector.shape_cast %224 : vector<128xf32> to vector<1x128xf32>
    %cst_83 = arith.constant 4.000000e+00 : f32
    %226 = vector.broadcast %cst_83 : f32 to vector<1x128xf32>
    %227 = arith.divf %225, %226 : vector<1x128xf32>
    %228 = vector.broadcast %220 : vector<1x128xf32> to vector<4x128xf32>
    %229 = arith.subf %216, %228 : vector<4x128xf32>
    %cst_84 = arith.constant 9.99999997E-7 : f32
    %230 = vector.broadcast %cst_84 : f32 to vector<1x128xf32>
    %231 = arith.addf %227, %230 : vector<1x128xf32>
    %232 = math.rsqrt %231 : vector<1x128xf32>
    %233 = vector.broadcast %232 : vector<1x128xf32> to vector<4x128xf32>
    %234 = arith.mulf %229, %233 : vector<4x128xf32>
    %235 = arith.mulf %234, %75 : vector<4x128xf32>
    %236 = arith.addf %235, %78 : vector<4x128xf32>
    %cst_85 = arith.constant 5.000000e-01 : f32
    %237 = vector.broadcast %cst_85 : f32 to vector<4x128xf32>
    %238 = arith.mulf %237, %236 : vector<4x128xf32>
    %cst_86 = arith.constant 4.471500e-02 : f32
    %239 = vector.broadcast %cst_86 : f32 to vector<4x128xf32>
    %240 = arith.mulf %239, %236 : vector<4x128xf32>
    %241 = arith.mulf %240, %236 : vector<4x128xf32>
    %242 = arith.mulf %241, %236 : vector<4x128xf32>
    %243 = arith.addf %236, %242 : vector<4x128xf32>
    %cst_87 = arith.constant 0.797884583 : f32
    %244 = vector.broadcast %cst_87 : f32 to vector<4x128xf32>
    %245 = arith.mulf %244, %243 : vector<4x128xf32>
    %246 = math.tanh %245 : vector<4x128xf32>
    %cst_88 = arith.constant 1.000000e+00 : f32
    %247 = vector.broadcast %cst_88 : f32 to vector<4x128xf32>
    %248 = arith.addf %247, %246 : vector<4x128xf32>
    %249 = arith.mulf %238, %248 : vector<4x128xf32>
    %c12 = arith.constant 12 : index
    %c0_89 = arith.constant 0 : index
    %250 = vector.load %arg2[%c12, %c0_89] : memref<16x128xf32, #tpu.memory_space<vmem>>, vector<1x128xf32>
    %251 = vector.broadcast %250 : vector<1x128xf32> to vector<4x128xf32>
    %252 = arith.mulf %93, %251 : vector<4x128xf32>
    %253 = arith.addf %72, %252 : vector<4x128xf32>
    %c13 = arith.constant 13 : index
    %c0_90 = arith.constant 0 : index
    %254 = vector.load %arg2[%c13, %c0_90] : memref<16x128xf32, #tpu.memory_space<vmem>>, vector<1x128xf32>
    %255 = vector.broadcast %254 : vector<1x128xf32> to vector<4x128xf32>
    %256 = arith.mulf %96, %255 : vector<4x128xf32>
    %257 = arith.addf %253, %256 : vector<4x128xf32>
    %c14 = arith.constant 14 : index
    %c0_91 = arith.constant 0 : index
    %258 = vector.load %arg2[%c14, %c0_91] : memref<16x128xf32, #tpu.memory_space<vmem>>, vector<1x128xf32>
    %259 = vector.broadcast %258 : vector<1x128xf32> to vector<4x128xf32>
    %260 = arith.mulf %99, %259 : vector<4x128xf32>
    %c15 = arith.constant 15 : index
    %c0_92 = arith.constant 0 : index
    %261 = vector.load %arg2[%c15, %c0_92] : memref<16x128xf32, #tpu.memory_space<vmem>>, vector<1x128xf32>
    %262 = vector.broadcast %261 : vector<1x128xf32> to vector<4x128xf32>
    %263 = arith.mulf %102, %262 : vector<4x128xf32>
    %264 = arith.addf %260, %263 : vector<4x128xf32>
    %265 = arith.addf %257, %264 : vector<4x128xf32>
    %cst_93 = arith.constant dense<0.000000e+00> : vector<128xf32>
    %266 = vector.multi_reduction <add>, %265, %cst_93 [0] : vector<4x128xf32> to vector<128xf32>
    %267 = vector.shape_cast %266 : vector<128xf32> to vector<1x128xf32>
    %cst_94 = arith.constant 4.000000e+00 : f32
    %268 = vector.broadcast %cst_94 : f32 to vector<1x128xf32>
    %269 = arith.divf %267, %268 : vector<1x128xf32>
    %270 = vector.broadcast %269 : vector<1x128xf32> to vector<4x128xf32>
    %271 = arith.subf %265, %270 : vector<4x128xf32>
    %272 = arith.mulf %271, %271 : vector<4x128xf32>
    %cst_95 = arith.constant dense<0.000000e+00> : vector<128xf32>
    %273 = vector.multi_reduction <add>, %272, %cst_95 [0] : vector<4x128xf32> to vector<128xf32>
    %274 = vector.shape_cast %273 : vector<128xf32> to vector<1x128xf32>
    %cst_96 = arith.constant 4.000000e+00 : f32
    %275 = vector.broadcast %cst_96 : f32 to vector<1x128xf32>
    %276 = arith.divf %274, %275 : vector<1x128xf32>
    %277 = vector.broadcast %269 : vector<1x128xf32> to vector<4x128xf32>
    %278 = arith.subf %265, %277 : vector<4x128xf32>
    %cst_97 = arith.constant 9.99999997E-7 : f32
    %279 = vector.broadcast %cst_97 : f32 to vector<1x128xf32>
    %280 = arith.addf %276, %279 : vector<1x128xf32>
    %281 = math.rsqrt %280 : vector<1x128xf32>
    %282 = vector.broadcast %281 : vector<1x128xf32> to vector<4x128xf32>
    %283 = arith.mulf %278, %282 : vector<4x128xf32>
    %284 = arith.mulf %283, %75 : vector<4x128xf32>
    %285 = arith.addf %284, %78 : vector<4x128xf32>
    %cst_98 = arith.constant 5.000000e-01 : f32
    %286 = vector.broadcast %cst_98 : f32 to vector<4x128xf32>
    %287 = arith.mulf %286, %285 : vector<4x128xf32>
    %cst_99 = arith.constant 4.471500e-02 : f32
    %288 = vector.broadcast %cst_99 : f32 to vector<4x128xf32>
    %289 = arith.mulf %288, %285 : vector<4x128xf32>
    %290 = arith.mulf %289, %285 : vector<4x128xf32>
    %291 = arith.mulf %290, %285 : vector<4x128xf32>
    %292 = arith.addf %285, %291 : vector<4x128xf32>
    %cst_100 = arith.constant 0.797884583 : f32
    %293 = vector.broadcast %cst_100 : f32 to vector<4x128xf32>
    %294 = arith.mulf %293, %292 : vector<4x128xf32>
    %295 = math.tanh %294 : vector<4x128xf32>
    %cst_101 = arith.constant 1.000000e+00 : f32
    %296 = vector.broadcast %cst_101 : f32 to vector<4x128xf32>
    %297 = arith.addf %296, %295 : vector<4x128xf32>
    %298 = arith.mulf %287, %297 : vector<4x128xf32>
    %c16 = arith.constant 16 : index
    %c0_102 = arith.constant 0 : index
    %299 = vector.load %arg1[%c16, %c0_102] : memref<96x128xf32, #tpu.memory_space<vmem>>, vector<16x1xf32>
    %300 = vector.extract_strided_slice %151 {offsets = [0, 0], sizes = [1, 128], strides = [1, 1]} : vector<4x128xf32> to vector<1x128xf32>
    %301 = vector.broadcast %299 : vector<16x1xf32> to vector<16x128xf32>
    %302 = vector.broadcast %300 : vector<1x128xf32> to vector<16x128xf32>
    %303 = arith.mulf %301, %302 : vector<16x128xf32>
    %c16_103 = arith.constant 16 : index
    %c1_104 = arith.constant 1 : index
    %304 = vector.load %arg1[%c16_103, %c1_104] : memref<96x128xf32, #tpu.memory_space<vmem>>, vector<16x1xf32>
    %305 = vector.extract_strided_slice %151 {offsets = [1, 0], sizes = [1, 128], strides = [1, 1]} : vector<4x128xf32> to vector<1x128xf32>
    %306 = vector.broadcast %304 : vector<16x1xf32> to vector<16x128xf32>
    %307 = vector.broadcast %305 : vector<1x128xf32> to vector<16x128xf32>
    %308 = arith.mulf %306, %307 : vector<16x128xf32>
    %309 = arith.addf %303, %308 : vector<16x128xf32>
    %c16_105 = arith.constant 16 : index
    %c2_106 = arith.constant 2 : index
    %310 = vector.load %arg1[%c16_105, %c2_106] : memref<96x128xf32, #tpu.memory_space<vmem>>, vector<16x1xf32>
    %311 = vector.extract_strided_slice %151 {offsets = [2, 0], sizes = [1, 128], strides = [1, 1]} : vector<4x128xf32> to vector<1x128xf32>
    %312 = vector.broadcast %310 : vector<16x1xf32> to vector<16x128xf32>
    %313 = vector.broadcast %311 : vector<1x128xf32> to vector<16x128xf32>
    %314 = arith.mulf %312, %313 : vector<16x128xf32>
    %c16_107 = arith.constant 16 : index
    %c3_108 = arith.constant 3 : index
    %315 = vector.load %arg1[%c16_107, %c3_108] : memref<96x128xf32, #tpu.memory_space<vmem>>, vector<16x1xf32>
    %316 = vector.extract_strided_slice %151 {offsets = [3, 0], sizes = [1, 128], strides = [1, 1]} : vector<4x128xf32> to vector<1x128xf32>
    %317 = vector.broadcast %315 : vector<16x1xf32> to vector<16x128xf32>
    %318 = vector.broadcast %316 : vector<1x128xf32> to vector<16x128xf32>
    %319 = arith.mulf %317, %318 : vector<16x128xf32>
    %320 = arith.addf %314, %319 : vector<16x128xf32>
    %321 = arith.addf %309, %320 : vector<16x128xf32>
    %c16_109 = arith.constant 16 : index
    %c4_110 = arith.constant 4 : index
    %322 = vector.load %arg1[%c16_109, %c4_110] : memref<96x128xf32, #tpu.memory_space<vmem>>, vector<16x1xf32>
    %323 = vector.extract_strided_slice %200 {offsets = [0, 0], sizes = [1, 128], strides = [1, 1]} : vector<4x128xf32> to vector<1x128xf32>
    %324 = vector.broadcast %322 : vector<16x1xf32> to vector<16x128xf32>
    %325 = vector.broadcast %323 : vector<1x128xf32> to vector<16x128xf32>
    %326 = arith.mulf %324, %325 : vector<16x128xf32>
    %c16_111 = arith.constant 16 : index
    %c5_112 = arith.constant 5 : index
    %327 = vector.load %arg1[%c16_111, %c5_112] : memref<96x128xf32, #tpu.memory_space<vmem>>, vector<16x1xf32>
    %328 = vector.extract_strided_slice %200 {offsets = [1, 0], sizes = [1, 128], strides = [1, 1]} : vector<4x128xf32> to vector<1x128xf32>
    %329 = vector.broadcast %327 : vector<16x1xf32> to vector<16x128xf32>
    %330 = vector.broadcast %328 : vector<1x128xf32> to vector<16x128xf32>
    %331 = arith.mulf %329, %330 : vector<16x128xf32>
    %332 = arith.addf %326, %331 : vector<16x128xf32>
    %c16_113 = arith.constant 16 : index
    %c6_114 = arith.constant 6 : index
    %333 = vector.load %arg1[%c16_113, %c6_114] : memref<96x128xf32, #tpu.memory_space<vmem>>, vector<16x1xf32>
    %334 = vector.extract_strided_slice %200 {offsets = [2, 0], sizes = [1, 128], strides = [1, 1]} : vector<4x128xf32> to vector<1x128xf32>
    %335 = vector.broadcast %333 : vector<16x1xf32> to vector<16x128xf32>
    %336 = vector.broadcast %334 : vector<1x128xf32> to vector<16x128xf32>
    %337 = arith.mulf %335, %336 : vector<16x128xf32>
    %c16_115 = arith.constant 16 : index
    %c7_116 = arith.constant 7 : index
    %338 = vector.load %arg1[%c16_115, %c7_116] : memref<96x128xf32, #tpu.memory_space<vmem>>, vector<16x1xf32>
    %339 = vector.extract_strided_slice %200 {offsets = [3, 0], sizes = [1, 128], strides = [1, 1]} : vector<4x128xf32> to vector<1x128xf32>
    %340 = vector.broadcast %338 : vector<16x1xf32> to vector<16x128xf32>
    %341 = vector.broadcast %339 : vector<1x128xf32> to vector<16x128xf32>
    %342 = arith.mulf %340, %341 : vector<16x128xf32>
    %343 = arith.addf %337, %342 : vector<16x128xf32>
    %344 = arith.addf %332, %343 : vector<16x128xf32>
    %c16_117 = arith.constant 16 : index
    %c8_118 = arith.constant 8 : index
    %345 = vector.load %arg1[%c16_117, %c8_118] : memref<96x128xf32, #tpu.memory_space<vmem>>, vector<16x1xf32>
    %346 = vector.extract_strided_slice %249 {offsets = [0, 0], sizes = [1, 128], strides = [1, 1]} : vector<4x128xf32> to vector<1x128xf32>
    %347 = vector.broadcast %345 : vector<16x1xf32> to vector<16x128xf32>
    %348 = vector.broadcast %346 : vector<1x128xf32> to vector<16x128xf32>
    %349 = arith.mulf %347, %348 : vector<16x128xf32>
    %c16_119 = arith.constant 16 : index
    %c9_120 = arith.constant 9 : index
    %350 = vector.load %arg1[%c16_119, %c9_120] : memref<96x128xf32, #tpu.memory_space<vmem>>, vector<16x1xf32>
    %351 = vector.extract_strided_slice %249 {offsets = [1, 0], sizes = [1, 128], strides = [1, 1]} : vector<4x128xf32> to vector<1x128xf32>
    %352 = vector.broadcast %350 : vector<16x1xf32> to vector<16x128xf32>
    %353 = vector.broadcast %351 : vector<1x128xf32> to vector<16x128xf32>
    %354 = arith.mulf %352, %353 : vector<16x128xf32>
    %355 = arith.addf %349, %354 : vector<16x128xf32>
    %c16_121 = arith.constant 16 : index
    %c10_122 = arith.constant 10 : index
    %356 = vector.load %arg1[%c16_121, %c10_122] : memref<96x128xf32, #tpu.memory_space<vmem>>, vector<16x1xf32>
    %357 = vector.extract_strided_slice %249 {offsets = [2, 0], sizes = [1, 128], strides = [1, 1]} : vector<4x128xf32> to vector<1x128xf32>
    %358 = vector.broadcast %356 : vector<16x1xf32> to vector<16x128xf32>
    %359 = vector.broadcast %357 : vector<1x128xf32> to vector<16x128xf32>
    %360 = arith.mulf %358, %359 : vector<16x128xf32>
    %c16_123 = arith.constant 16 : index
    %c11_124 = arith.constant 11 : index
    %361 = vector.load %arg1[%c16_123, %c11_124] : memref<96x128xf32, #tpu.memory_space<vmem>>, vector<16x1xf32>
    %362 = vector.extract_strided_slice %249 {offsets = [3, 0], sizes = [1, 128], strides = [1, 1]} : vector<4x128xf32> to vector<1x128xf32>
    %363 = vector.broadcast %361 : vector<16x1xf32> to vector<16x128xf32>
    %364 = vector.broadcast %362 : vector<1x128xf32> to vector<16x128xf32>
    %365 = arith.mulf %363, %364 : vector<16x128xf32>
    %366 = arith.addf %360, %365 : vector<16x128xf32>
    %367 = arith.addf %355, %366 : vector<16x128xf32>
    %c16_125 = arith.constant 16 : index
    %c12_126 = arith.constant 12 : index
    %368 = vector.load %arg1[%c16_125, %c12_126] : memref<96x128xf32, #tpu.memory_space<vmem>>, vector<16x1xf32>
    %369 = vector.extract_strided_slice %298 {offsets = [0, 0], sizes = [1, 128], strides = [1, 1]} : vector<4x128xf32> to vector<1x128xf32>
    %370 = vector.broadcast %368 : vector<16x1xf32> to vector<16x128xf32>
    %371 = vector.broadcast %369 : vector<1x128xf32> to vector<16x128xf32>
    %372 = arith.mulf %370, %371 : vector<16x128xf32>
    %c16_127 = arith.constant 16 : index
    %c13_128 = arith.constant 13 : index
    %373 = vector.load %arg1[%c16_127, %c13_128] : memref<96x128xf32, #tpu.memory_space<vmem>>, vector<16x1xf32>
    %374 = vector.extract_strided_slice %298 {offsets = [1, 0], sizes = [1, 128], strides = [1, 1]} : vector<4x128xf32> to vector<1x128xf32>
    %375 = vector.broadcast %373 : vector<16x1xf32> to vector<16x128xf32>
    %376 = vector.broadcast %374 : vector<1x128xf32> to vector<16x128xf32>
    %377 = arith.mulf %375, %376 : vector<16x128xf32>
    %378 = arith.addf %372, %377 : vector<16x128xf32>
    %c16_129 = arith.constant 16 : index
    %c14_130 = arith.constant 14 : index
    %379 = vector.load %arg1[%c16_129, %c14_130] : memref<96x128xf32, #tpu.memory_space<vmem>>, vector<16x1xf32>
    %380 = vector.extract_strided_slice %298 {offsets = [2, 0], sizes = [1, 128], strides = [1, 1]} : vector<4x128xf32> to vector<1x128xf32>
    %381 = vector.broadcast %379 : vector<16x1xf32> to vector<16x128xf32>
    %382 = vector.broadcast %380 : vector<1x128xf32> to vector<16x128xf32>
    %383 = arith.mulf %381, %382 : vector<16x128xf32>
    %c16_131 = arith.constant 16 : index
    %c15_132 = arith.constant 15 : index
    %384 = vector.load %arg1[%c16_131, %c15_132] : memref<96x128xf32, #tpu.memory_space<vmem>>, vector<16x1xf32>
    %385 = vector.extract_strided_slice %298 {offsets = [3, 0], sizes = [1, 128], strides = [1, 1]} : vector<4x128xf32> to vector<1x128xf32>
    %386 = vector.broadcast %384 : vector<16x1xf32> to vector<16x128xf32>
    %387 = vector.broadcast %385 : vector<1x128xf32> to vector<16x128xf32>
    %388 = arith.mulf %386, %387 : vector<16x128xf32>
    %389 = arith.addf %383, %388 : vector<16x128xf32>
    %390 = arith.addf %378, %389 : vector<16x128xf32>
    %391 = arith.addf %321, %344 : vector<16x128xf32>
    %392 = arith.addf %367, %390 : vector<16x128xf32>
    %393 = arith.addf %391, %392 : vector<16x128xf32>
    %394 = arith.addf %393, %81 : vector<16x128xf32>
    %cst_133 = arith.constant dense<0.000000e+00> : vector<128xf32>
    %395 = vector.multi_reduction <add>, %394, %cst_133 [0] : vector<16x128xf32> to vector<128xf32>
    %396 = vector.shape_cast %395 : vector<128xf32> to vector<1x128xf32>
    %cst_134 = arith.constant 1.600000e+01 : f32
    %397 = vector.broadcast %cst_134 : f32 to vector<1x128xf32>
    %398 = arith.divf %396, %397 : vector<1x128xf32>
    %399 = vector.broadcast %398 : vector<1x128xf32> to vector<16x128xf32>
    %400 = arith.subf %394, %399 : vector<16x128xf32>
    %401 = arith.mulf %400, %400 : vector<16x128xf32>
    %cst_135 = arith.constant dense<0.000000e+00> : vector<128xf32>
    %402 = vector.multi_reduction <add>, %401, %cst_135 [0] : vector<16x128xf32> to vector<128xf32>
    %403 = vector.shape_cast %402 : vector<128xf32> to vector<1x128xf32>
    %cst_136 = arith.constant 1.600000e+01 : f32
    %404 = vector.broadcast %cst_136 : f32 to vector<1x128xf32>
    %405 = arith.divf %403, %404 : vector<1x128xf32>
    %406 = vector.broadcast %398 : vector<1x128xf32> to vector<16x128xf32>
    %407 = arith.subf %394, %406 : vector<16x128xf32>
    %cst_137 = arith.constant 9.99999997E-7 : f32
    %408 = vector.broadcast %cst_137 : f32 to vector<1x128xf32>
    %409 = arith.addf %405, %408 : vector<1x128xf32>
    %410 = math.rsqrt %409 : vector<1x128xf32>
    %411 = vector.broadcast %410 : vector<1x128xf32> to vector<16x128xf32>
    %412 = arith.mulf %407, %411 : vector<16x128xf32>
    %413 = arith.mulf %412, %84 : vector<16x128xf32>
    %414 = arith.addf %413, %87 : vector<16x128xf32>
    %cst_138 = arith.constant 5.000000e-01 : f32
    %415 = vector.broadcast %cst_138 : f32 to vector<16x128xf32>
    %416 = arith.mulf %415, %414 : vector<16x128xf32>
    %cst_139 = arith.constant 4.471500e-02 : f32
    %417 = vector.broadcast %cst_139 : f32 to vector<16x128xf32>
    %418 = arith.mulf %417, %414 : vector<16x128xf32>
    %419 = arith.mulf %418, %414 : vector<16x128xf32>
    %420 = arith.mulf %419, %414 : vector<16x128xf32>
    %421 = arith.addf %414, %420 : vector<16x128xf32>
    %cst_140 = arith.constant 0.797884583 : f32
    %422 = vector.broadcast %cst_140 : f32 to vector<16x128xf32>
    %423 = arith.mulf %422, %421 : vector<16x128xf32>
    %424 = math.tanh %423 : vector<16x128xf32>
    %cst_141 = arith.constant 1.000000e+00 : f32
    %425 = vector.broadcast %cst_141 : f32 to vector<16x128xf32>
    %426 = arith.addf %425, %424 : vector<16x128xf32>
    %427 = arith.mulf %416, %426 : vector<16x128xf32>
    %c32 = arith.constant 32 : index
    %c0_142 = arith.constant 0 : index
    %428 = vector.load %arg1[%c32, %c0_142] : memref<96x128xf32, #tpu.memory_space<vmem>>, vector<32x1xf32>
    %429 = vector.extract_strided_slice %427 {offsets = [0, 0], sizes = [1, 128], strides = [1, 1]} : vector<16x128xf32> to vector<1x128xf32>
    %430 = vector.broadcast %428 : vector<32x1xf32> to vector<32x128xf32>
    %431 = vector.broadcast %429 : vector<1x128xf32> to vector<32x128xf32>
    %432 = arith.mulf %430, %431 : vector<32x128xf32>
    %c32_143 = arith.constant 32 : index
    %c1_144 = arith.constant 1 : index
    %433 = vector.load %arg1[%c32_143, %c1_144] : memref<96x128xf32, #tpu.memory_space<vmem>>, vector<32x1xf32>
    %434 = vector.extract_strided_slice %427 {offsets = [1, 0], sizes = [1, 128], strides = [1, 1]} : vector<16x128xf32> to vector<1x128xf32>
    %435 = vector.broadcast %433 : vector<32x1xf32> to vector<32x128xf32>
    %436 = vector.broadcast %434 : vector<1x128xf32> to vector<32x128xf32>
    %437 = arith.mulf %435, %436 : vector<32x128xf32>
    %438 = arith.addf %432, %437 : vector<32x128xf32>
    %c32_145 = arith.constant 32 : index
    %c2_146 = arith.constant 2 : index
    %439 = vector.load %arg1[%c32_145, %c2_146] : memref<96x128xf32, #tpu.memory_space<vmem>>, vector<32x1xf32>
    %440 = vector.extract_strided_slice %427 {offsets = [2, 0], sizes = [1, 128], strides = [1, 1]} : vector<16x128xf32> to vector<1x128xf32>
    %441 = vector.broadcast %439 : vector<32x1xf32> to vector<32x128xf32>
    %442 = vector.broadcast %440 : vector<1x128xf32> to vector<32x128xf32>
    %443 = arith.mulf %441, %442 : vector<32x128xf32>
    %c32_147 = arith.constant 32 : index
    %c3_148 = arith.constant 3 : index
    %444 = vector.load %arg1[%c32_147, %c3_148] : memref<96x128xf32, #tpu.memory_space<vmem>>, vector<32x1xf32>
    %445 = vector.extract_strided_slice %427 {offsets = [3, 0], sizes = [1, 128], strides = [1, 1]} : vector<16x128xf32> to vector<1x128xf32>
    %446 = vector.broadcast %444 : vector<32x1xf32> to vector<32x128xf32>
    %447 = vector.broadcast %445 : vector<1x128xf32> to vector<32x128xf32>
    %448 = arith.mulf %446, %447 : vector<32x128xf32>
    %449 = arith.addf %443, %448 : vector<32x128xf32>
    %450 = arith.addf %438, %449 : vector<32x128xf32>
    %c32_149 = arith.constant 32 : index
    %c4_150 = arith.constant 4 : index
    %451 = vector.load %arg1[%c32_149, %c4_150] : memref<96x128xf32, #tpu.memory_space<vmem>>, vector<32x1xf32>
    %452 = vector.extract_strided_slice %427 {offsets = [4, 0], sizes = [1, 128], strides = [1, 1]} : vector<16x128xf32> to vector<1x128xf32>
    %453 = vector.broadcast %451 : vector<32x1xf32> to vector<32x128xf32>
    %454 = vector.broadcast %452 : vector<1x128xf32> to vector<32x128xf32>
    %455 = arith.mulf %453, %454 : vector<32x128xf32>
    %c32_151 = arith.constant 32 : index
    %c5_152 = arith.constant 5 : index
    %456 = vector.load %arg1[%c32_151, %c5_152] : memref<96x128xf32, #tpu.memory_space<vmem>>, vector<32x1xf32>
    %457 = vector.extract_strided_slice %427 {offsets = [5, 0], sizes = [1, 128], strides = [1, 1]} : vector<16x128xf32> to vector<1x128xf32>
    %458 = vector.broadcast %456 : vector<32x1xf32> to vector<32x128xf32>
    %459 = vector.broadcast %457 : vector<1x128xf32> to vector<32x128xf32>
    %460 = arith.mulf %458, %459 : vector<32x128xf32>
    %461 = arith.addf %455, %460 : vector<32x128xf32>
    %c32_153 = arith.constant 32 : index
    %c6_154 = arith.constant 6 : index
    %462 = vector.load %arg1[%c32_153, %c6_154] : memref<96x128xf32, #tpu.memory_space<vmem>>, vector<32x1xf32>
    %463 = vector.extract_strided_slice %427 {offsets = [6, 0], sizes = [1, 128], strides = [1, 1]} : vector<16x128xf32> to vector<1x128xf32>
    %464 = vector.broadcast %462 : vector<32x1xf32> to vector<32x128xf32>
    %465 = vector.broadcast %463 : vector<1x128xf32> to vector<32x128xf32>
    %466 = arith.mulf %464, %465 : vector<32x128xf32>
    %c32_155 = arith.constant 32 : index
    %c7_156 = arith.constant 7 : index
    %467 = vector.load %arg1[%c32_155, %c7_156] : memref<96x128xf32, #tpu.memory_space<vmem>>, vector<32x1xf32>
    %468 = vector.extract_strided_slice %427 {offsets = [7, 0], sizes = [1, 128], strides = [1, 1]} : vector<16x128xf32> to vector<1x128xf32>
    %469 = vector.broadcast %467 : vector<32x1xf32> to vector<32x128xf32>
    %470 = vector.broadcast %468 : vector<1x128xf32> to vector<32x128xf32>
    %471 = arith.mulf %469, %470 : vector<32x128xf32>
    %472 = arith.addf %466, %471 : vector<32x128xf32>
    %473 = arith.addf %461, %472 : vector<32x128xf32>
    %c32_157 = arith.constant 32 : index
    %c8_158 = arith.constant 8 : index
    %474 = vector.load %arg1[%c32_157, %c8_158] : memref<96x128xf32, #tpu.memory_space<vmem>>, vector<32x1xf32>
    %475 = vector.extract_strided_slice %427 {offsets = [8, 0], sizes = [1, 128], strides = [1, 1]} : vector<16x128xf32> to vector<1x128xf32>
    %476 = vector.broadcast %474 : vector<32x1xf32> to vector<32x128xf32>
    %477 = vector.broadcast %475 : vector<1x128xf32> to vector<32x128xf32>
    %478 = arith.mulf %476, %477 : vector<32x128xf32>
    %c32_159 = arith.constant 32 : index
    %c9_160 = arith.constant 9 : index
    %479 = vector.load %arg1[%c32_159, %c9_160] : memref<96x128xf32, #tpu.memory_space<vmem>>, vector<32x1xf32>
    %480 = vector.extract_strided_slice %427 {offsets = [9, 0], sizes = [1, 128], strides = [1, 1]} : vector<16x128xf32> to vector<1x128xf32>
    %481 = vector.broadcast %479 : vector<32x1xf32> to vector<32x128xf32>
    %482 = vector.broadcast %480 : vector<1x128xf32> to vector<32x128xf32>
    %483 = arith.mulf %481, %482 : vector<32x128xf32>
    %484 = arith.addf %478, %483 : vector<32x128xf32>
    %c32_161 = arith.constant 32 : index
    %c10_162 = arith.constant 10 : index
    %485 = vector.load %arg1[%c32_161, %c10_162] : memref<96x128xf32, #tpu.memory_space<vmem>>, vector<32x1xf32>
    %486 = vector.extract_strided_slice %427 {offsets = [10, 0], sizes = [1, 128], strides = [1, 1]} : vector<16x128xf32> to vector<1x128xf32>
    %487 = vector.broadcast %485 : vector<32x1xf32> to vector<32x128xf32>
    %488 = vector.broadcast %486 : vector<1x128xf32> to vector<32x128xf32>
    %489 = arith.mulf %487, %488 : vector<32x128xf32>
    %c32_163 = arith.constant 32 : index
    %c11_164 = arith.constant 11 : index
    %490 = vector.load %arg1[%c32_163, %c11_164] : memref<96x128xf32, #tpu.memory_space<vmem>>, vector<32x1xf32>
    %491 = vector.extract_strided_slice %427 {offsets = [11, 0], sizes = [1, 128], strides = [1, 1]} : vector<16x128xf32> to vector<1x128xf32>
    %492 = vector.broadcast %490 : vector<32x1xf32> to vector<32x128xf32>
    %493 = vector.broadcast %491 : vector<1x128xf32> to vector<32x128xf32>
    %494 = arith.mulf %492, %493 : vector<32x128xf32>
    %495 = arith.addf %489, %494 : vector<32x128xf32>
    %496 = arith.addf %484, %495 : vector<32x128xf32>
    %c32_165 = arith.constant 32 : index
    %c12_166 = arith.constant 12 : index
    %497 = vector.load %arg1[%c32_165, %c12_166] : memref<96x128xf32, #tpu.memory_space<vmem>>, vector<32x1xf32>
    %498 = vector.extract_strided_slice %427 {offsets = [12, 0], sizes = [1, 128], strides = [1, 1]} : vector<16x128xf32> to vector<1x128xf32>
    %499 = vector.broadcast %497 : vector<32x1xf32> to vector<32x128xf32>
    %500 = vector.broadcast %498 : vector<1x128xf32> to vector<32x128xf32>
    %501 = arith.mulf %499, %500 : vector<32x128xf32>
    %c32_167 = arith.constant 32 : index
    %c13_168 = arith.constant 13 : index
    %502 = vector.load %arg1[%c32_167, %c13_168] : memref<96x128xf32, #tpu.memory_space<vmem>>, vector<32x1xf32>
    %503 = vector.extract_strided_slice %427 {offsets = [13, 0], sizes = [1, 128], strides = [1, 1]} : vector<16x128xf32> to vector<1x128xf32>
    %504 = vector.broadcast %502 : vector<32x1xf32> to vector<32x128xf32>
    %505 = vector.broadcast %503 : vector<1x128xf32> to vector<32x128xf32>
    %506 = arith.mulf %504, %505 : vector<32x128xf32>
    %507 = arith.addf %501, %506 : vector<32x128xf32>
    %c32_169 = arith.constant 32 : index
    %c14_170 = arith.constant 14 : index
    %508 = vector.load %arg1[%c32_169, %c14_170] : memref<96x128xf32, #tpu.memory_space<vmem>>, vector<32x1xf32>
    %509 = vector.extract_strided_slice %427 {offsets = [14, 0], sizes = [1, 128], strides = [1, 1]} : vector<16x128xf32> to vector<1x128xf32>
    %510 = vector.broadcast %508 : vector<32x1xf32> to vector<32x128xf32>
    %511 = vector.broadcast %509 : vector<1x128xf32> to vector<32x128xf32>
    %512 = arith.mulf %510, %511 : vector<32x128xf32>
    %c32_171 = arith.constant 32 : index
    %c15_172 = arith.constant 15 : index
    %513 = vector.load %arg1[%c32_171, %c15_172] : memref<96x128xf32, #tpu.memory_space<vmem>>, vector<32x1xf32>
    %514 = vector.extract_strided_slice %427 {offsets = [15, 0], sizes = [1, 128], strides = [1, 1]} : vector<16x128xf32> to vector<1x128xf32>
    %515 = vector.broadcast %513 : vector<32x1xf32> to vector<32x128xf32>
    %516 = vector.broadcast %514 : vector<1x128xf32> to vector<32x128xf32>
    %517 = arith.mulf %515, %516 : vector<32x128xf32>
    %518 = arith.addf %512, %517 : vector<32x128xf32>
    %519 = arith.addf %507, %518 : vector<32x128xf32>
    %520 = arith.addf %450, %473 : vector<32x128xf32>
    %521 = arith.addf %496, %519 : vector<32x128xf32>
    %522 = arith.addf %520, %521 : vector<32x128xf32>
    %523 = arith.addf %522, %90 : vector<32x128xf32>
    %524 = vector.extract_strided_slice %523 {offsets = [0, 0], sizes = [32, 64], strides = [1, 1]} : vector<32x128xf32> to vector<32x64xf32>
    %c0_173 = arith.constant 0 : index
    %c0_174 = arith.constant 0 : index
    %c0_175 = arith.constant 0 : index
    %525 = vector.load %arg4[%c0_173, %c0_174, %c0_175] : memref<2x32x64xf32, #tpu.memory_space<vmem>>, vector<1x32x64xf32>
    %526 = vector.shape_cast %525 : vector<1x32x64xf32> to vector<32x64xf32>
    %527 = vector.shape_cast %524 : vector<32x64xf32> to vector<1x32x64xf32>
    tpu.vector_store %arg4[%c0_173, %c0_174, %c0_175], %527 {strides = array<i32>} : memref<2x32x64xf32, #tpu.memory_space<vmem>>, vector<1x32x64xf32>,
    %528 = vector.extract_strided_slice %523 {offsets = [0, 64], sizes = [32, 64], strides = [1, 1]} : vector<32x128xf32> to vector<32x64xf32>
    %c1_176 = arith.constant 1 : index
    %c0_177 = arith.constant 0 : index
    %c0_178 = arith.constant 0 : index
    %529 = vector.load %arg4[%c1_176, %c0_177, %c0_178] : memref<2x32x64xf32, #tpu.memory_space<vmem>>, vector<1x32x64xf32>
    %530 = vector.shape_cast %529 : vector<1x32x64xf32> to vector<32x64xf32>
    %531 = vector.shape_cast %528 : vector<32x64xf32> to vector<1x32x64xf32>
    tpu.vector_store %arg4[%c1_176, %c0_177, %c0_178], %531 {strides = array<i32>} : memref<2x32x64xf32, #tpu.memory_space<vmem>>, vector<1x32x64xf32>,
    return
  }
}

</mosaic_0001>

<bundles_post_ra>
// kernel: squeeze.1
= control target key start
LH: loop header
LB: loop body
LE: loop exit
PB: predicated region body
PF: predicated region fallthrough
CT: control target
= control target key end

     0   :  { %2 = vsyncpa [#allocation1], 0  ;;  %s6800_s6 = smov [#allocation0]   ;;  %s9696_s0 = inlined_call_operand.hbm [shape: f32[2,1,32,32], index: 0, kind: input, shape index: {}]   ;;  %s9697_s1 = inlined_call_operand.vmem [shape: f32[2,8,2,2,8,2,2], index: 1, kind: output, shape index: {}]  }
   0x1   :  { %s7_s7 = sshll.u32 %s6800_s6, 4  ;;  %s6776_s10 = scalar_lea.hbm %s9696_s0, 1024  ;;  %s8_s7 = int_to_ptr.vmem [resolvable:$true] %s7_s7 }
   0x2   :  { %p6777_p0 = scmp.ne.s32.totalorder %s9696_s0, %s6776_s10  ;;  %p6780_p1 = scmp.lt.u32.totalorder %s6776_s10, %s9696_s0 }
   0x4   :  { %p6782_p2 = pnand %p6780_p1, %p6777_p0 }
   0x6   :  { %6785 = shalt.err (!%p6782_p2)
}
   0x7   :  { %s6786_s15 = scalar_lea.vmem %s8_s7, 1024  ;;  %p6791_p4 = scmp.lt.s32.totalorder %s8_s7, %s8_s7 }
   0x8   :  { %p6787_p3 = scmp.ne.s32.totalorder %s8_s7, %s6786_s15  ;;  %p6792_p5 = scmp.lt.s32.totalorder %s6786_s15, %s6786_s15 }
   0xa   :  { %p6793_p6 = por %p6792_p5, %p6791_p4 }
   0xc   :  { %p6794_p7 = pnand %p6793_p6, %p6787_p3 }
   0xe   :  { %6797 = shalt.err (!%p6794_p7)
}
   0xf   :  { %10 = dma.hbm_to_vmem [thread:$0]  %s9696_s0, 1024, %s8_s7, [#allocation1]  }
  0x10   :  { %6798 = dma.done.wait [#allocation1], 1024  }
  0x11   :  { %6799 = vsyncadd [#allocation1], 4294966272  ;;  %vm13_vm0 = vcmask 15360   ;;  %v6838_v0 = vld [vmem:[#allocation0 + $0x10] sm:$0xff]   ;;  %v6840_v1 = vld [vmem:[#allocation0] sm:$0xff]   ;;  %s6801_s0 = smov 126  }
  0x12   :  { %v6842_v2 = vld [vmem:[#allocation0 + $0x18] sm:$0xff]   ;;  %205 = vrot.lane.b32.xlu1 %v6838_v0, %s6801_s0  ;;  %163 = vrot.lane.b32.xlu0 %v6840_v1, %s6801_s0  ;;  %v6848_v3 = vld [vmem:[#allocation0 + $0x8] sm:$0xff]   ;;  %v6852_v5 = vld [vmem:[#allocation0 + $0x20] sm:$0xff]   ;;  %52 = vst.msk [vmem:[#allocation2 + $0x400] sm:$0x1] %vm13_vm0, %v6838_v0   ;;  %s6802_s18 = smov 124  }
  0x13   :  { %v6850_v4 = vld [vmem:[#allocation0 + $0x28] sm:$0xff]   ;;  %54 = vst.msk [vmem:[#allocation2 + $0x43f] sm:$0x2] %vm13_vm0, %v6838_v0   ;;  %56 = vst.msk [vmem:[#allocation2 + $0x47e] sm:$0x4] %vm13_vm0, %v6838_v0   ;;  %v6902_v6 = vld [vmem:[#allocation0 + $0x38] sm:$0xff]  }
  0x14   :  { %58 = vst.msk [vmem:[#allocation2 + $0x4bd] sm:$0x8] %vm13_vm0, %v6838_v0   ;;  %60 = vst.msk [vmem:[#allocation2 + $0x4fc] sm:$0x10] %vm13_vm0, %v6838_v0   ;;  %v6904_v7 = vld [vmem:[#allocation0 + $0x30] sm:$0xff]   ;;  %s6803_s19 = smov 122  }
  0x15   :  { %62 = vst.msk [vmem:[#allocation2 + $0x53b] sm:$0x20] %vm13_vm0, %v6838_v0   ;;  %64 = vst.msk [vmem:[#allocation2 + $0x57a] sm:$0x40] %vm13_vm0, %v6838_v0   ;;  %s6804_s20 = smov 120   ;;  %s6805_s21 = smov 118  }
  0x16   :  { %66 = vst.msk [vmem:[#allocation2 + $0x5b9] sm:$0x80] %vm13_vm0, %v6838_v0   ;;  %14 = vst.msk [vmem:[#allocation2] sm:$0x1] %vm13_vm0, %v6840_v1   ;;  %226 = vrot.lane.b32.xlu1 %v6842_v2, %s6801_s0  ;;  %184 = vrot.lane.b32.xlu0 %v6848_v3, %s6801_s0  ;;  %s6806_s22 = smov 116   ;;  %s6807_s23 = smov 114  }
  0x17   :  { %16 = vst.msk [vmem:[#allocation2 + $0x3f] sm:$0x2] %vm13_vm0, %v6840_v1   ;;  %18 = vst.msk [vmem:[#allocation2 + $0x7e] sm:$0x4] %vm13_vm0, %v6840_v1   ;;  %s6808_s24 = smov 112   ;;  %s6809_s2 = smov 110  }
  0x18   :  { %20 = vst.msk [vmem:[#allocation2 + $0xbd] sm:$0x8] %vm13_vm0, %v6840_v1   ;;  %22 = vst.msk [vmem:[#allocation2 + $0xfc] sm:$0x10] %vm13_vm0, %v6840_v1   ;;  %s6810_s7 = smov 108   ;;  %s6811_s14 = smov 106  }
  0x19   :  { %24 = vst.msk [vmem:[#allocation2 + $0x13b] sm:$0x20] %vm13_vm0, %v6840_v1   ;;  %26 = vst.msk [vmem:[#allocation2 + $0x17a] sm:$0x40] %vm13_vm0, %v6840_v1   ;;  %s6814_s28 = smov 100  }
  0x1a   :  { %28 = vst.msk [vmem:[#allocation2 + $0x1b9] sm:$0x80] %vm13_vm0, %v6840_v1   ;;  %71 = vst.msk [vmem:[#allocation2 + $0x600] sm:$0x1] %vm13_vm0, %v6842_v2   ;;  %268 = vrot.lane.b32.xlu1 %v6850_v4, %s6801_s0  ;;  %247 = vrot.lane.b32.xlu0 %v6852_v5, %s6801_s0 }
  0x1b   :  { %73 = vst.msk [vmem:[#allocation2 + $0x63f] sm:$0x2] %vm13_vm0, %v6842_v2   ;;  %75 = vst.msk [vmem:[#allocation2 + $0x67e] sm:$0x4] %vm13_vm0, %v6842_v2  }
  0x1c   :  { %77 = vst.msk [vmem:[#allocation2 + $0x6bd] sm:$0x8] %vm13_vm0, %v6842_v2   ;;  %79 = vst.msk [vmem:[#allocation2 + $0x6fc] sm:$0x10] %vm13_vm0, %v6842_v2  }
  0x1d   :  { %81 = vst.msk [vmem:[#allocation2 + $0x73b] sm:$0x20] %vm13_vm0, %v6842_v2   ;;  %83 = vst.msk [vmem:[#allocation2 + $0x77a] sm:$0x40] %vm13_vm0, %v6842_v2  }
  0x1e   :  { %85 = vst.msk [vmem:[#allocation2 + $0x7b9] sm:$0x80] %vm13_vm0, %v6842_v2   ;;  %33 = vst.msk [vmem:[#allocation2 + $0x200] sm:$0x1] %vm13_vm0, %v6848_v3   ;;  %310 = vrot.lane.b32.xlu1 %v6902_v6, %s6801_s0  ;;  %289 = vrot.lane.b32.xlu0 %v6904_v7, %s6801_s0  ;;  %s6812_s0 = smov 104  }
  0x1f   :  { %35 = vst.msk [vmem:[#allocation2 + $0x23f] sm:$0x2] %vm13_vm0, %v6848_v3   ;;  %37 = vst.msk [vmem:[#allocation2 + $0x27e] sm:$0x4] %vm13_vm0, %v6848_v3  }
  0x20   :  { %39 = vst.msk [vmem:[#allocation2 + $0x2bd] sm:$0x8] %vm13_vm0, %v6848_v3   ;;  %41 = vst.msk [vmem:[#allocation2 + $0x2fc] sm:$0x10] %vm13_vm0, %v6848_v3  }
  0x21   :  { %43 = vst.msk [vmem:[#allocation2 + $0x33b] sm:$0x20] %vm13_vm0, %v6848_v3   ;;  %45 = vst.msk [vmem:[#allocation2 + $0x37a] sm:$0x40] %vm13_vm0, %v6848_v3  }
  0x22   :  { %47 = vst.msk [vmem:[#allocation2 + $0x3b9] sm:$0x80] %vm13_vm0, %v6848_v3   ;;  %109 = vst.msk [vmem:[#allocation2 + $0xa00] sm:$0x1] %vm13_vm0, %v6850_v4   ;;  %351 = vrot.lane.b32.xlu1 %v6848_v3, %s6802_s18  ;;  %330 = vrot.lane.b32.xlu0 %v6840_v1, %s6802_s18 }
  0x23   :  { %111 = vst.msk [vmem:[#allocation2 + $0xa3f] sm:$0x2] %vm13_vm0, %v6850_v4   ;;  %113 = vst.msk [vmem:[#allocation2 + $0xa7e] sm:$0x4] %vm13_vm0, %v6850_v4  }
  0x24   :  { %115 = vst.msk [vmem:[#allocation2 + $0xabd] sm:$0x8] %vm13_vm0, %v6850_v4   ;;  %117 = vst.msk [vmem:[#allocation2 + $0xafc] sm:$0x10] %vm13_vm0, %v6850_v4  }
  0x25   :  { %119 = vst.msk [vmem:[#allocation2 + $0xb3b] sm:$0x20] %vm13_vm0, %v6850_v4   ;;  %121 = vst.msk [vmem:[#allocation2 + $0xb7a] sm:$0x40] %vm13_vm0, %v6850_v4  }
  0x26   :  { %123 = vst.msk [vmem:[#allocation2 + $0xbb9] sm:$0x80] %vm13_vm0, %v6850_v4   ;;  %90 = vst.msk [vmem:[#allocation2 + $0x800] sm:$0x1] %vm13_vm0, %v6852_v5   ;;  %393 = vrot.lane.b32.xlu1 %v6842_v2, %s6802_s18  ;;  %372 = vrot.lane.b32.xlu0 %v6838_v0, %s6802_s18 }
  0x27   :  { %92 = vst.msk [vmem:[#allocation2 + $0x83f] sm:$0x2] %vm13_vm0, %v6852_v5   ;;  %94 = vst.msk [vmem:[#allocation2 + $0x87e] sm:$0x4] %vm13_vm0, %v6852_v5  }
  0x28   :  { %96 = vst.msk [vmem:[#allocation2 + $0x8bd] sm:$0x8] %vm13_vm0, %v6852_v5   ;;  %98 = vst.msk [vmem:[#allocation2 + $0x8fc] sm:$0x10] %vm13_vm0, %v6852_v5  }
  0x29   :  { %100 = vst.msk [vmem:[#allocation2 + $0x93b] sm:$0x20] %vm13_vm0, %v6852_v5   ;;  %102 = vst.msk [vmem:[#allocation2 + $0x97a] sm:$0x40] %vm13_vm0, %v6852_v5  }
  0x2a   :  { %104 = vst.msk [vmem:[#allocation2 + $0x9b9] sm:$0x80] %vm13_vm0, %v6852_v5   ;;  %147 = vst.msk [vmem:[#allocation2 + $0xe00] sm:$0x1] %vm13_vm0, %v6902_v6   ;;  %435 = vrot.lane.b32.xlu1 %v6850_v4, %s6802_s18  ;;  %414 = vrot.lane.b32.xlu0 %v6852_v5, %s6802_s18 }
  0x2b   :  { %149 = vst.msk [vmem:[#allocation2 + $0xe3f] sm:$0x2] %vm13_vm0, %v6902_v6   ;;  %151 = vst.msk [vmem:[#allocation2 + $0xe7e] sm:$0x4] %vm13_vm0, %v6902_v6  }
  0x2c   :  { %153 = vst.msk [vmem:[#allocation2 + $0xebd] sm:$0x8] %vm13_vm0, %v6902_v6   ;;  %155 = vst.msk [vmem:[#allocation2 + $0xefc] sm:$0x10] %vm13_vm0, %v6902_v6  }
  0x2d   :  { %157 = vst.msk [vmem:[#allocation2 + $0xf3b] sm:$0x20] %vm13_vm0, %v6902_v6   ;;  %159 = vst.msk [vmem:[#allocation2 + $0xf7a] sm:$0x40] %vm13_vm0, %v6902_v6  }
  0x2e   :  { %161 = vst.msk [vmem:[#allocation2 + $0xfb9] sm:$0x80] %vm13_vm0, %v6902_v6   ;;  %128 = vst.msk [vmem:[#allocation2 + $0xc00] sm:$0x1] %vm13_vm0, %v6904_v7   ;;  %477 = vrot.lane.b32.xlu1 %v6902_v6, %s6802_s18  ;;  %456 = vrot.lane.b32.xlu0 %v6904_v7, %s6802_s18 }
  0x2f   :  { %130 = vst.msk [vmem:[#allocation2 + $0xc3f] sm:$0x2] %vm13_vm0, %v6904_v7   ;;  %132 = vst.msk [vmem:[#allocation2 + $0xc7e] sm:$0x4] %vm13_vm0, %v6904_v7  }
  0x30   :  { %134 = vst.msk [vmem:[#allocation2 + $0xcbd] sm:$0x8] %vm13_vm0, %v6904_v7   ;;  %136 = vst.msk [vmem:[#allocation2 + $0xcfc] sm:$0x10] %vm13_vm0, %v6904_v7  }
  0x31   :  { %138 = vst.msk [vmem:[#allocation2 + $0xd3b] sm:$0x20] %vm13_vm0, %v6904_v7   ;;  %140 = vst.msk [vmem:[#allocation2 + $0xd7a] sm:$0x40] %vm13_vm0, %v6904_v7  }
  0x32   :  { %142 = vst.msk [vmem:[#allocation2 + $0xdb9] sm:$0x80] %vm13_vm0, %v6904_v7   ;;  %518 = vrot.lane.b32.xlu1 %v6848_v3, %s6803_s19  ;;  %497 = vrot.lane.b32.xlu0 %v6840_v1, %s6803_s19 }
  0x36   :  { %560 = vrot.lane.b32.xlu1 %v6842_v2, %s6803_s19  ;;  %539 = vrot.lane.b32.xlu0 %v6838_v0, %s6803_s19 }
  0x3a   :  { %602 = vrot.lane.b32.xlu1 %v6850_v4, %s6803_s19  ;;  %581 = vrot.lane.b32.xlu0 %v6852_v5, %s6803_s19 }
  0x3e   :  { %644 = vrot.lane.b32.xlu1 %v6902_v6, %s6803_s19  ;;  %623 = vrot.lane.b32.xlu0 %v6904_v7, %s6803_s19 }
  0x42   :  { %685 = vrot.lane.b32.xlu1 %v6848_v3, %s6804_s20  ;;  %664 = vrot.lane.b32.xlu0 %v6840_v1, %s6804_s20 }
  0x46   :  { %727 = vrot.lane.b32.xlu1 %v6842_v2, %s6804_s20  ;;  %706 = vrot.lane.b32.xlu0 %v6838_v0, %s6804_s20 }
  0x4a   :  { %769 = vrot.lane.b32.xlu1 %v6850_v4, %s6804_s20  ;;  %748 = vrot.lane.b32.xlu0 %v6852_v5, %s6804_s20 }
  0x4e   :  { %811 = vrot.lane.b32.xlu1 %v6902_v6, %s6804_s20  ;;  %790 = vrot.lane.b32.xlu0 %v6904_v7, %s6804_s20 }
  0x52   :  { %852 = vrot.lane.b32.xlu1 %v6848_v3, %s6805_s21  ;;  %831 = vrot.lane.b32.xlu0 %v6840_v1, %s6805_s21 }
  0x56   :  { %894 = vrot.lane.b32.xlu1 %v6842_v2, %s6805_s21  ;;  %873 = vrot.lane.b32.xlu0 %v6838_v0, %s6805_s21 }
  0x5a   :  { %936 = vrot.lane.b32.xlu1 %v6850_v4, %s6805_s21  ;;  %915 = vrot.lane.b32.xlu0 %v6852_v5, %s6805_s21 }
  0x5e   :  { %978 = vrot.lane.b32.xlu1 %v6902_v6, %s6805_s21  ;;  %957 = vrot.lane.b32.xlu0 %v6904_v7, %s6805_s21 }
  0x62   :  { %1019 = vrot.lane.b32.xlu1 %v6848_v3, %s6806_s22  ;;  %998 = vrot.lane.b32.xlu0 %v6840_v1, %s6806_s22 }
  0x66   :  { %1061 = vrot.lane.b32.xlu1 %v6842_v2, %s6806_s22  ;;  %1040 = vrot.lane.b32.xlu0 %v6838_v0, %s6806_s22 }
  0x6a   :  { %1103 = vrot.lane.b32.xlu1 %v6850_v4, %s6806_s22  ;;  %1082 = vrot.lane.b32.xlu0 %v6852_v5, %s6806_s22 }
  0x6e   :  { %1145 = vrot.lane.b32.xlu1 %v6902_v6, %s6806_s22  ;;  %1124 = vrot.lane.b32.xlu0 %v6904_v7, %s6806_s22 }
  0x72   :  { %1186 = vrot.lane.b32.xlu1 %v6848_v3, %s6807_s23  ;;  %1165 = vrot.lane.b32.xlu0 %v6840_v1, %s6807_s23 }
  0x76   :  { %1228 = vrot.lane.b32.xlu1 %v6842_v2, %s6807_s23  ;;  %1207 = vrot.lane.b32.xlu0 %v6838_v0, %s6807_s23 }
  0x7a   :  { %1270 = vrot.lane.b32.xlu1 %v6850_v4, %s6807_s23  ;;  %1249 = vrot.lane.b32.xlu0 %v6852_v5, %s6807_s23 }
  0x7e   :  { %1312 = vrot.lane.b32.xlu1 %v6902_v6, %s6807_s23  ;;  %1291 = vrot.lane.b32.xlu0 %v6904_v7, %s6807_s23 }
  0x82   :  { %1353 = vrot.lane.b32.xlu1 %v6848_v3, %s6808_s24  ;;  %1332 = vrot.lane.b32.xlu0 %v6840_v1, %s6808_s24 }
  0x84   :  { %v206_v8 = vpop.permute.xlu1 %205   ;;  %v164_v9 = vpop.permute.xlu0 %163  }
  0x85   :  { %209 = vst.msk [vmem:[#allocation2 + $0x401] sm:$0x1] %vm13_vm0, %v206_v8   ;;  %211 = vst.msk [vmem:[#allocation2 + $0x440] sm:$0x2] %vm13_vm0, %v206_v8  }
  0x86   :  { %213 = vst.msk [vmem:[#allocation2 + $0x47f] sm:$0x4] %vm13_vm0, %v206_v8   ;;  %215 = vst.msk [vmem:[#allocation2 + $0x4be] sm:$0x8] %vm13_vm0, %v206_v8   ;;  %1395 = vrot.lane.b32.xlu1 %v6842_v2, %s6808_s24  ;;  %1374 = vrot.lane.b32.xlu0 %v6838_v0, %s6808_s24 }
  0x87   :  { %217 = vst.msk [vmem:[#allocation2 + $0x4fd] sm:$0x10] %vm13_vm0, %v206_v8   ;;  %219 = vst.msk [vmem:[#allocation2 + $0x53c] sm:$0x20] %vm13_vm0, %v206_v8  }
  0x88   :  { %221 = vst.msk [vmem:[#allocation2 + $0x57b] sm:$0x40] %vm13_vm0, %v206_v8   ;;  %223 = vst.msk [vmem:[#allocation2 + $0x5ba] sm:$0x80] %vm13_vm0, %v206_v8   ;;  %v227_v10 = vpop.permute.xlu1 %226   ;;  %v185_v11 = vpop.permute.xlu0 %184  }
  0x89   :  { %167 = vst.msk [vmem:[#allocation2 + $0x1] sm:$0x1] %vm13_vm0, %v164_v9   ;;  %169 = vst.msk [vmem:[#allocation2 + $0x40] sm:$0x2] %vm13_vm0, %v164_v9  }
  0x8a   :  { %171 = vst.msk [vmem:[#allocation2 + $0x7f] sm:$0x4] %vm13_vm0, %v164_v9   ;;  %173 = vst.msk [vmem:[#allocation2 + $0xbe] sm:$0x8] %vm13_vm0, %v164_v9   ;;  %1437 = vrot.lane.b32.xlu1 %v6850_v4, %s6808_s24  ;;  %1416 = vrot.lane.b32.xlu0 %v6852_v5, %s6808_s24 }
  0x8b   :  { %175 = vst.msk [vmem:[#allocation2 + $0xfd] sm:$0x10] %vm13_vm0, %v164_v9   ;;  %177 = vst.msk [vmem:[#allocation2 + $0x13c] sm:$0x20] %vm13_vm0, %v164_v9  }
  0x8c   :  { %179 = vst.msk [vmem:[#allocation2 + $0x17b] sm:$0x40] %vm13_vm0, %v164_v9   ;;  %181 = vst.msk [vmem:[#allocation2 + $0x1ba] sm:$0x80] %vm13_vm0, %v164_v9   ;;  %v3435_v12 = vld [vmem:[#allocation2 + $0x400] sm:$0x3]  ;;  %v269_v15 = vpop.permute.xlu1 %268   ;;  %v248_v16 = vpop.permute.xlu0 %247  }
  0x8d   :  { %230 = vst.msk [vmem:[#allocation2 + $0x601] sm:$0x1] %vm13_vm0, %v227_v10   ;;  %232 = vst.msk [vmem:[#allocation2 + $0x640] sm:$0x2] %vm13_vm0, %v227_v10   ;;  %v3483_v13 = vld [vmem:[#allocation2 + $0x440] sm:$0x3] }
  0x8e   :  { %234 = vst.msk [vmem:[#allocation2 + $0x67f] sm:$0x4] %vm13_vm0, %v227_v10   ;;  %236 = vst.msk [vmem:[#allocation2 + $0x6be] sm:$0x8] %vm13_vm0, %v227_v10   ;;  %v3531_v14 = vld [vmem:[#allocation2 + $0x480] sm:$0x3]  ;;  %1479 = vrot.lane.b32.xlu1 %v6902_v6, %s6808_s24  ;;  %1458 = vrot.lane.b32.xlu0 %v6904_v7, %s6808_s24 }
  0x8f   :  { %238 = vst.msk [vmem:[#allocation2 + $0x6fd] sm:$0x10] %vm13_vm0, %v227_v10   ;;  %240 = vst.msk [vmem:[#allocation2 + $0x73c] sm:$0x20] %vm13_vm0, %v227_v10   ;;  %v3579_v17 = vld [vmem:[#allocation2 + $0x4c0] sm:$0x3] }
  0x90   :  { %242 = vst.msk [vmem:[#allocation2 + $0x77b] sm:$0x40] %vm13_vm0, %v227_v10   ;;  %244 = vst.msk [vmem:[#allocation2 + $0x7ba] sm:$0x80] %vm13_vm0, %v227_v10   ;;  %v3627_v18 = vld [vmem:[#allocation2 + $0x500] sm:$0x3]  ;;  %v311_v29 = vpop.permute.xlu1 %310   ;;  %v290_v30 = vpop.permute.xlu0 %289  }
  0x91   :  { %188 = vst.msk [vmem:[#allocation2 + $0x201] sm:$0x1] %vm13_vm0, %v185_v11   ;;  %190 = vst.msk [vmem:[#allocation2 + $0x240] sm:$0x2] %vm13_vm0, %v185_v11   ;;  %v3675_v19 = vld [vmem:[#allocation2 + $0x540] sm:$0x3] }
  0x92   :  { %192 = vst.msk [vmem:[#allocation2 + $0x27f] sm:$0x4] %vm13_vm0, %v185_v11   ;;  %194 = vst.msk [vmem:[#allocation2 + $0x2be] sm:$0x8] %vm13_vm0, %v185_v11   ;;  %v3723_v20 = vld [vmem:[#allocation2 + $0x580] sm:$0x3]  ;;  %1520 = vrot.lane.b32.xlu1 %v6848_v3, %s6809_s2  ;;  %1499 = vrot.lane.b32.xlu0 %v6840_v1, %s6809_s2 }
  0x93   :  { %196 = vst.msk [vmem:[#allocation2 + $0x2fd] sm:$0x10] %vm13_vm0, %v185_v11   ;;  %198 = vst.msk [vmem:[#allocation2 + $0x33c] sm:$0x20] %vm13_vm0, %v185_v11   ;;  %v3771_v21 = vld [vmem:[#allocation2 + $0x5c0] sm:$0x3] }
  0x94   :  { %200 = vst.msk [vmem:[#allocation2 + $0x37b] sm:$0x40] %vm13_vm0, %v185_v11   ;;  %202 = vst.msk [vmem:[#allocation2 + $0x3ba] sm:$0x80] %vm13_vm0, %v185_v11   ;;  %v2670_v22 = vld [vmem:[#allocation2] sm:$0x3]  ;;  %v352_v43 = vpop.permute.xlu1 %351   ;;  %v331_v44 = vpop.permute.xlu0 %330  }
  0x95   :  { %6376 = vst [vmem:[%s9697_s1 + $0x100] sm:$0x3] %v3435_v12  ;;  %6384 = vst [vmem:[%s9697_s1 + $0x110] sm:$0x3] %v3483_v13  ;;  %v2715_v23 = vld [vmem:[#allocation2 + $0x40] sm:$0x3] }
  0x96   :  { %6392 = vst [vmem:[%s9697_s1 + $0x120] sm:$0x3] %v3531_v14  ;;  %272 = vst.msk [vmem:[#allocation2 + $0xa01] sm:$0x1] %vm13_vm0, %v269_v15   ;;  %v2763_v24 = vld [vmem:[#allocation2 + $0x80] sm:$0x3]  ;;  %1562 = vrot.lane.b32.xlu1 %v6842_v2, %s6809_s2  ;;  %1541 = vrot.lane.b32.xlu0 %v6838_v0, %s6809_s2 }
  0x97   :  { %274 = vst.msk [vmem:[#allocation2 + $0xa40] sm:$0x2] %vm13_vm0, %v269_v15   ;;  %276 = vst.msk [vmem:[#allocation2 + $0xa7f] sm:$0x4] %vm13_vm0, %v269_v15   ;;  %v2811_v25 = vld [vmem:[#allocation2 + $0xc0] sm:$0x3] }
  0x98   :  { %278 = vst.msk [vmem:[#allocation2 + $0xabe] sm:$0x8] %vm13_vm0, %v269_v15   ;;  %280 = vst.msk [vmem:[#allocation2 + $0xafd] sm:$0x10] %vm13_vm0, %v269_v15   ;;  %v2859_v26 = vld [vmem:[#allocation2 + $0x100] sm:$0x3]  ;;  %v394_v57 = vpop.permute.xlu1 %393   ;;  %v373_v58 = vpop.permute.xlu0 %372  }
  0x99   :  { %282 = vst.msk [vmem:[#allocation2 + $0xb3c] sm:$0x20] %vm13_vm0, %v269_v15   ;;  %284 = vst.msk [vmem:[#allocation2 + $0xb7b] sm:$0x40] %vm13_vm0, %v269_v15   ;;  %v2907_v27 = vld [vmem:[#allocation2 + $0x140] sm:$0x3] }
  0x9a   :  { %286 = vst.msk [vmem:[#allocation2 + $0xbba] sm:$0x80] %vm13_vm0, %v269_v15   ;;  %251 = vst.msk [vmem:[#allocation2 + $0x801] sm:$0x1] %vm13_vm0, %v248_v16   ;;  %v2955_v28 = vld [vmem:[#allocation2 + $0x180] sm:$0x3]  ;;  %1604 = vrot.lane.b32.xlu1 %v6850_v4, %s6809_s2  ;;  %1583 = vrot.lane.b32.xlu0 %v6852_v5, %s6809_s2 }
  0x9b   :  { %253 = vst.msk [vmem:[#allocation2 + $0x840] sm:$0x2] %vm13_vm0, %v248_v16   ;;  %255 = vst.msk [vmem:[#allocation2 + $0x87f] sm:$0x4] %vm13_vm0, %v248_v16   ;;  %v3003_v31 = vld [vmem:[#allocation2 + $0x1c0] sm:$0x3] }
  0x9c   :  { %257 = vst.msk [vmem:[#allocation2 + $0x8be] sm:$0x8] %vm13_vm0, %v248_v16   ;;  %259 = vst.msk [vmem:[#allocation2 + $0x8fd] sm:$0x10] %vm13_vm0, %v248_v16   ;;  %v3819_v32 = vld [vmem:[#allocation2 + $0x600] sm:$0x3]  ;;  %v436_v11 = vpop.permute.xlu1 %435   ;;  %v415_v12 = vpop.permute.xlu0 %414  }
  0x9d   :  { %261 = vst.msk [vmem:[#allocation2 + $0x93c] sm:$0x20] %vm13_vm0, %v248_v16   ;;  %263 = vst.msk [vmem:[#allocation2 + $0x97b] sm:$0x40] %vm13_vm0, %v248_v16   ;;  %v3867_v33 = vld [vmem:[#allocation2 + $0x640] sm:$0x3] }
  0x9e   :  { %265 = vst.msk [vmem:[#allocation2 + $0x9ba] sm:$0x80] %vm13_vm0, %v248_v16   ;;  %6400 = vst [vmem:[%s9697_s1 + $0x130] sm:$0x3] %v3579_v17  ;;  %v3915_v34 = vld [vmem:[#allocation2 + $0x680] sm:$0x3]  ;;  %1646 = vrot.lane.b32.xlu1 %v6902_v6, %s6809_s2  ;;  %1625 = vrot.lane.b32.xlu0 %v6904_v7, %s6809_s2 }
  0x9f   :  { %6408 = vst [vmem:[%s9697_s1 + $0x140] sm:$0x3] %v3627_v18  ;;  %6416 = vst [vmem:[%s9697_s1 + $0x150] sm:$0x3] %v3675_v19  ;;  %v3963_v35 = vld [vmem:[#allocation2 + $0x6c0] sm:$0x3] }
  0xa0   :  { %6424 = vst [vmem:[%s9697_s1 + $0x160] sm:$0x3] %v3723_v20  ;;  %6432 = vst [vmem:[%s9697_s1 + $0x170] sm:$0x3] %v3771_v21  ;;  %v4011_v36 = vld [vmem:[#allocation2 + $0x700] sm:$0x3] }
  0xa1   :  { %2672 = vst [vmem:[%s9697_s1] sm:$0x3] %v2670_v22  ;;  %6256 = vst [vmem:[%s9697_s1 + $0x10] sm:$0x3] %v2715_v23  ;;  %v4059_v37 = vld [vmem:[#allocation2 + $0x740] sm:$0x3]  ;;  %v478_v23 = vpop.permute.xlu1 %477   ;;  %s6813_s24 = smov 102  }
  0xa2   :  { %6264 = vst [vmem:[%s9697_s1 + $0x20] sm:$0x3] %v2763_v24  ;;  %6272 = vst [vmem:[%s9697_s1 + $0x30] sm:$0x3] %v2811_v25  ;;  %v4107_v38 = vld [vmem:[#allocation2 + $0x780] sm:$0x3]  ;;  %v457_v24 = vpop.permute.xlu0 %456   ;;  %1687 = vrot.lane.b32.xlu1 %v6848_v3, %s6810_s7  ;;  %1666 = vrot.lane.b32.xlu0 %v6840_v1, %s6810_s7 }
  0xa3   :  { %6280 = vst [vmem:[%s9697_s1 + $0x40] sm:$0x3] %v2859_v26  ;;  %6288 = vst [vmem:[%s9697_s1 + $0x50] sm:$0x3] %v2907_v27  ;;  %v4155_v39 = vld [vmem:[#allocation2 + $0x7c0] sm:$0x3] }
  0xa4   :  { %6296 = vst [vmem:[%s9697_s1 + $0x60] sm:$0x3] %v2955_v28  ;;  %314 = vst.msk [vmem:[#allocation2 + $0xe01] sm:$0x1] %vm13_vm0, %v311_v29   ;;  %v3051_v40 = vld [vmem:[#allocation2 + $0x200] sm:$0x3] }
  0xa5   :  { %316 = vst.msk [vmem:[#allocation2 + $0xe40] sm:$0x2] %vm13_vm0, %v311_v29   ;;  %318 = vst.msk [vmem:[#allocation2 + $0xe7f] sm:$0x4] %vm13_vm0, %v311_v29   ;;  %v3099_v41 = vld [vmem:[#allocation2 + $0x240] sm:$0x3]  ;;  %v519_v26 = vpop.permute.xlu1 %518  }
  0xa6   :  { %320 = vst.msk [vmem:[#allocation2 + $0xebe] sm:$0x8] %vm13_vm0, %v311_v29   ;;  %322 = vst.msk [vmem:[#allocation2 + $0xefd] sm:$0x10] %vm13_vm0, %v311_v29   ;;  %v3147_v42 = vld [vmem:[#allocation2 + $0x280] sm:$0x3]  ;;  %v498_v27 = vpop.permute.xlu0 %497  }
  0xa7   :  { %324 = vst.msk [vmem:[#allocation2 + $0xf3c] sm:$0x20] %vm13_vm0, %v311_v29   ;;  %326 = vst.msk [vmem:[#allocation2 + $0xf7b] sm:$0x40] %vm13_vm0, %v311_v29   ;;  %v3195_v45 = vld [vmem:[#allocation2 + $0x2c0] sm:$0x3] }
  0xa8   :  { %328 = vst.msk [vmem:[#allocation2 + $0xfba] sm:$0x80] %vm13_vm0, %v311_v29   ;;  %293 = vst.msk [vmem:[#allocation2 + $0xc01] sm:$0x1] %vm13_vm0, %v290_v30   ;;  %v3243_v46 = vld [vmem:[#allocation2 + $0x300] sm:$0x3] }
  0xa9   :  { %295 = vst.msk [vmem:[#allocation2 + $0xc40] sm:$0x2] %vm13_vm0, %v290_v30   ;;  %297 = vst.msk [vmem:[#allocation2 + $0xc7f] sm:$0x4] %vm13_vm0, %v290_v30   ;;  %v3291_v47 = vld [vmem:[#allocation2 + $0x340] sm:$0x3] }
  0xaa   :  { %299 = vst.msk [vmem:[#allocation2 + $0xcbe] sm:$0x8] %vm13_vm0, %v290_v30   ;;  %301 = vst.msk [vmem:[#allocation2 + $0xcfd] sm:$0x10] %vm13_vm0, %v290_v30   ;;  %v3339_v48 = vld [vmem:[#allocation2 + $0x380] sm:$0x3] }
  0xab   :  { %303 = vst.msk [vmem:[#allocation2 + $0xd3c] sm:$0x20] %vm13_vm0, %v290_v30   ;;  %305 = vst.msk [vmem:[#allocation2 + $0xd7b] sm:$0x40] %vm13_vm0, %v290_v30   ;;  %v3387_v49 = vld [vmem:[#allocation2 + $0x3c0] sm:$0x3] }
  0xac   :  { %307 = vst.msk [vmem:[#allocation2 + $0xdba] sm:$0x80] %vm13_vm0, %v290_v30   ;;  %6304 = vst [vmem:[%s9697_s1 + $0x70] sm:$0x3] %v3003_v31  ;;  %v4587_v50 = vld [vmem:[#allocation2 + $0xa00] sm:$0x3]  ;;  %v561_v30 = vpop.permute.xlu1 %560   ;;  %v540_v31 = vpop.permute.xlu0 %539  }
  0xad   :  { %6440 = vst [vmem:[%s9697_s1 + $0x180] sm:$0x3] %v3819_v32  ;;  %6448 = vst [vmem:[%s9697_s1 + $0x190] sm:$0x3] %v3867_v33  ;;  %v4635_v51 = vld [vmem:[#allocation2 + $0xa40] sm:$0x3] }
  0xae   :  { %6456 = vst [vmem:[%s9697_s1 + $0x1a0] sm:$0x3] %v3915_v34  ;;  %6464 = vst [vmem:[%s9697_s1 + $0x1b0] sm:$0x3] %v3963_v35  ;;  %v4683_v52 = vld [vmem:[#allocation2 + $0xa80] sm:$0x3] }
  0xaf   :  { %6472 = vst [vmem:[%s9697_s1 + $0x1c0] sm:$0x3] %v4011_v36  ;;  %6480 = vst [vmem:[%s9697_s1 + $0x1d0] sm:$0x3] %v4059_v37  ;;  %v4731_v53 = vld [vmem:[#allocation2 + $0xac0] sm:$0x3] }
  0xb0   :  { %6488 = vst [vmem:[%s9697_s1 + $0x1e0] sm:$0x3] %v4107_v38  ;;  %6496 = vst [vmem:[%s9697_s1 + $0x1f0] sm:$0x3] %v4155_v39  ;;  %v4779_v54 = vld [vmem:[#allocation2 + $0xb00] sm:$0x3]  ;;  %v603_v37 = vpop.permute.xlu1 %602   ;;  %v582_v38 = vpop.permute.xlu0 %581  }
  0xb1   :  { %6312 = vst [vmem:[%s9697_s1 + $0x80] sm:$0x3] %v3051_v40  ;;  %6320 = vst [vmem:[%s9697_s1 + $0x90] sm:$0x3] %v3099_v41  ;;  %v4827_v55 = vld [vmem:[#allocation2 + $0xb40] sm:$0x3] }
  0xb2   :  { %6328 = vst [vmem:[%s9697_s1 + $0xa0] sm:$0x3] %v3147_v42  ;;  %355 = vst.msk [vmem:[#allocation2 + $0x208] sm:$0x1] %vm13_vm0, %v352_v43   ;;  %v4875_v56 = vld [vmem:[#allocation2 + $0xb80] sm:$0x3] }
  0xb3   :  { %357 = vst.msk [vmem:[#allocation2 + $0x247] sm:$0x2] %vm13_vm0, %v352_v43   ;;  %359 = vst.msk [vmem:[#allocation2 + $0x286] sm:$0x4] %vm13_vm0, %v352_v43   ;;  %v4923_v59 = vld [vmem:[#allocation2 + $0xbc0] sm:$0x3] }
  0xb4   :  { %361 = vst.msk [vmem:[#allocation2 + $0x2c5] sm:$0x8] %vm13_vm0, %v352_v43   ;;  %363 = vst.msk [vmem:[#allocation2 + $0x304] sm:$0x10] %vm13_vm0, %v352_v43   ;;  %v4203_v60 = vld [vmem:[#allocation2 + $0x800] sm:$0x3] }
  0xb5   :  { %365 = vst.msk [vmem:[#allocation2 + $0x343] sm:$0x20] %vm13_vm0, %v352_v43   ;;  %367 = vst.msk [vmem:[#allocation2 + $0x382] sm:$0x40] %vm13_vm0, %v352_v43   ;;  %v4251_v61 = vld [vmem:[#allocation2 + $0x840] sm:$0x3] }
  0xb6   :  { %369 = vst.msk [vmem:[#allocation2 + $0x3c1] sm:$0x80] %vm13_vm0, %v352_v43   ;;  %334 = vst.msk [vmem:[#allocation2 + $0x8] sm:$0x1] %vm13_vm0, %v331_v44   ;;  %v4299_v62 = vld [vmem:[#allocation2 + $0x880] sm:$0x3] }
  0xb7   :  { %336 = vst.msk [vmem:[#allocation2 + $0x47] sm:$0x2] %vm13_vm0, %v331_v44   ;;  %338 = vst.msk [vmem:[#allocation2 + $0x86] sm:$0x4] %vm13_vm0, %v331_v44   ;;  %v4347_v63 = vld [vmem:[#allocation2 + $0x8c0] sm:$0x3] }
  0xb8   :  { %340 = vst.msk [vmem:[#allocation2 + $0xc5] sm:$0x8] %vm13_vm0, %v331_v44   ;;  %342 = vst.msk [vmem:[#allocation2 + $0x104] sm:$0x10] %vm13_vm0, %v331_v44   ;;  %v4395_v0 = vld [vmem:[#allocation2 + $0x900] sm:$0x3] }
  0xb9   :  { %344 = vst.msk [vmem:[#allocation2 + $0x143] sm:$0x20] %vm13_vm0, %v331_v44   ;;  %346 = vst.msk [vmem:[#allocation2 + $0x182] sm:$0x40] %vm13_vm0, %v331_v44   ;;  %v4443_v2 = vld [vmem:[#allocation2 + $0x940] sm:$0x3] }
  0xba   :  { %348 = vst.msk [vmem:[#allocation2 + $0x1c1] sm:$0x80] %vm13_vm0, %v331_v44   ;;  %6336 = vst [vmem:[%s9697_s1 + $0xb0] sm:$0x3] %v3195_v45  ;;  %v4491_v4 = vld [vmem:[#allocation2 + $0x980] sm:$0x3] }
  0xbb   :  { %6344 = vst [vmem:[%s9697_s1 + $0xc0] sm:$0x3] %v3243_v46  ;;  %6352 = vst [vmem:[%s9697_s1 + $0xd0] sm:$0x3] %v3291_v47  ;;  %v4539_v5 = vld [vmem:[#allocation2 + $0x9c0] sm:$0x3] }
  0xbc   :  { %6360 = vst [vmem:[%s9697_s1 + $0xe0] sm:$0x3] %v3339_v48  ;;  %6368 = vst [vmem:[%s9697_s1 + $0xf0] sm:$0x3] %v3387_v49  ;;  %v5355_v8 = vld [vmem:[#allocation2 + $0xe00] sm:$0x3] }
  0xbd   :  { %6568 = vst [vmem:[%s9697_s1 + $0x280] sm:$0x3] %v4587_v50  ;;  %6576 = vst [vmem:[%s9697_s1 + $0x290] sm:$0x3] %v4635_v51  ;;  %v5403_v9 = vld [vmem:[#allocation2 + $0xe40] sm:$0x3] }
  0xbe   :  { %6584 = vst [vmem:[%s9697_s1 + $0x2a0] sm:$0x3] %v4683_v52  ;;  %6592 = vst [vmem:[%s9697_s1 + $0x2b0] sm:$0x3] %v4731_v53  ;;  %v5451_v10 = vld [vmem:[#allocation2 + $0xe80] sm:$0x3]  ;;  %v645_v53 = vpop.permute.xlu1 %644  }
  0xbf   :  { %6600 = vst [vmem:[%s9697_s1 + $0x2c0] sm:$0x3] %v4779_v54  ;;  %6608 = vst [vmem:[%s9697_s1 + $0x2d0] sm:$0x3] %v4827_v55  ;;  %v5499_v13 = vld [vmem:[#allocation2 + $0xec0] sm:$0x3]  ;;  %v624_v54 = vpop.permute.xlu0 %623  }
  0xc0   :  { %6616 = vst [vmem:[%s9697_s1 + $0x2e0] sm:$0x3] %v4875_v56  ;;  %397 = vst.msk [vmem:[#allocation2 + $0x608] sm:$0x1] %vm13_vm0, %v394_v57   ;;  %v5547_v14 = vld [vmem:[#allocation2 + $0xf00] sm:$0x3] }
  0xc1   :  { %399 = vst.msk [vmem:[#allocation2 + $0x647] sm:$0x2] %vm13_vm0, %v394_v57   ;;  %401 = vst.msk [vmem:[#allocation2 + $0x686] sm:$0x4] %vm13_vm0, %v394_v57   ;;  %v5595_v15 = vld [vmem:[#allocation2 + $0xf40] sm:$0x3] }
  0xc2   :  { %403 = vst.msk [vmem:[#allocation2 + $0x6c5] sm:$0x8] %vm13_vm0, %v394_v57   ;;  %405 = vst.msk [vmem:[#allocation2 + $0x704] sm:$0x10] %vm13_vm0, %v394_v57   ;;  %v5643_v16 = vld [vmem:[#allocation2 + $0xf80] sm:$0x3] }
  0xc3   :  { %407 = vst.msk [vmem:[#allocation2 + $0x743] sm:$0x20] %vm13_vm0, %v394_v57   ;;  %409 = vst.msk [vmem:[#allocation2 + $0x782] sm:$0x40] %vm13_vm0, %v394_v57   ;;  %v5691_v17 = vld [vmem:[#allocation2 + $0xfc0] sm:$0x3] }
  0xc4   :  { %411 = vst.msk [vmem:[#allocation2 + $0x7c1] sm:$0x80] %vm13_vm0, %v394_v57   ;;  %376 = vst.msk [vmem:[#allocation2 + $0x408] sm:$0x1] %vm13_vm0, %v373_v58   ;;  %v4971_v18 = vld [vmem:[#allocation2 + $0xc00] sm:$0x3] }
  0xc5   :  { %378 = vst.msk [vmem:[#allocation2 + $0x447] sm:$0x2] %vm13_vm0, %v373_v58   ;;  %380 = vst.msk [vmem:[#allocation2 + $0x486] sm:$0x4] %vm13_vm0, %v373_v58   ;;  %v5019_v6 = vld [vmem:[#allocation2 + $0xc40] sm:$0x3] }
  0xc6   :  { %382 = vst.msk [vmem:[#allocation2 + $0x4c5] sm:$0x8] %vm13_vm0, %v373_v58   ;;  %384 = vst.msk [vmem:[#allocation2 + $0x504] sm:$0x10] %vm13_vm0, %v373_v58   ;;  %v5067_v7 = vld [vmem:[#allocation2 + $0xc80] sm:$0x3] }
  0xc7   :  { %386 = vst.msk [vmem:[#allocation2 + $0x543] sm:$0x20] %vm13_vm0, %v373_v58   ;;  %388 = vst.msk [vmem:[#allocation2 + $0x582] sm:$0x40] %vm13_vm0, %v373_v58   ;;  %v5115_v19 = vld [vmem:[#allocation2 + $0xcc0] sm:$0x3] }
  0xc8   :  { %390 = vst.msk [vmem:[#allocation2 + $0x5c1] sm:$0x80] %vm13_vm0, %v373_v58   ;;  %6624 = vst [vmem:[%s9697_s1 + $0x2f0] sm:$0x3] %v4923_v59  ;;  %v5163_v20 = vld [vmem:[#allocation2 + $0xd00] sm:$0x3] }
  0xc9   :  { %6504 = vst [vmem:[%s9697_s1 + $0x200] sm:$0x3] %v4203_v60  ;;  %6512 = vst [vmem:[%s9697_s1 + $0x210] sm:$0x3] %v4251_v61  ;;  %v5211_v21 = vld [vmem:[#allocation2 + $0xd40] sm:$0x3] }
  0xca   :  { %6520 = vst [vmem:[%s9697_s1 + $0x220] sm:$0x3] %v4299_v62  ;;  %6528 = vst [vmem:[%s9697_s1 + $0x230] sm:$0x3] %v4347_v63  ;;  %v5259_v22 = vld [vmem:[#allocation2 + $0xd80] sm:$0x3] }
  0xcb   :  { %6536 = vst [vmem:[%s9697_s1 + $0x240] sm:$0x3] %v4395_v0  ;;  %6544 = vst [vmem:[%s9697_s1 + $0x250] sm:$0x3] %v4443_v2  ;;  %v5307_v25 = vld [vmem:[#allocation2 + $0xdc0] sm:$0x3] }
  0xcc   :  { %6552 = vst [vmem:[%s9697_s1 + $0x260] sm:$0x3] %v4491_v4  ;;  %6560 = vst [vmem:[%s9697_s1 + $0x270] sm:$0x3] %v4539_v5  ;;  %v7402_v1 = vld [vmem:[#allocation0 + $0x18] sm:$0xff]   ;;  %v7404_v3 = vld [vmem:[#allocation0 + $0x10] sm:$0xff]   ;;  %v686_v5 = vpop.permute.xlu1 %685  }
  0xcd   :  { %6696 = vst [vmem:[%s9697_s1 + $0x380] sm:$0x3] %v5355_v8  ;;  %6704 = vst [vmem:[%s9697_s1 + $0x390] sm:$0x3] %v5403_v9  ;;  %1729 = vrot.lane.b32.xlu1 %v7402_v1, %s6810_s7  ;;  %1708 = vrot.lane.b32.xlu0 %v7404_v3, %s6810_s7  ;;  %v7426_v28 = vld [vmem:[#allocation0 + $0x28] sm:$0xff]   ;;  %v7428_v29 = vld [vmem:[#allocation0 + $0x20] sm:$0xff]   ;;  %v665_v8 = vpop.permute.xlu0 %664  }
  0xce   :  { %6712 = vst [vmem:[%s9697_s1 + $0x3a0] sm:$0x3] %v5451_v10  ;;  %439 = vst.msk [vmem:[#allocation2 + $0xa08] sm:$0x1] %vm13_vm0, %v436_v11   ;;  %v7450_v32 = vld [vmem:[#allocation0 + $0x38] sm:$0xff]   ;;  %v7452_v33 = vld [vmem:[#allocation0 + $0x30] sm:$0xff]  }
  0xcf   :  { %441 = vst.msk [vmem:[#allocation2 + $0xa47] sm:$0x2] %vm13_vm0, %v436_v11   ;;  %443 = vst.msk [vmem:[#allocation2 + $0xa86] sm:$0x4] %vm13_vm0, %v436_v11   ;;  %v7479_v42 = vld [vmem:[#allocation0 + $0x8] sm:$0xff]   ;;  %v7481_v43 = vld [vmem:[#allocation0] sm:$0xff]  }
  0xd0   :  { %445 = vst.msk [vmem:[#allocation2 + $0xac5] sm:$0x8] %vm13_vm0, %v436_v11   ;;  %447 = vst.msk [vmem:[#allocation2 + $0xb04] sm:$0x10] %vm13_vm0, %v436_v11  }
  0xd1   :  { %449 = vst.msk [vmem:[#allocation2 + $0xb43] sm:$0x20] %vm13_vm0, %v436_v11   ;;  %451 = vst.msk [vmem:[#allocation2 + $0xb82] sm:$0x40] %vm13_vm0, %v436_v11   ;;  %1771 = vrot.lane.b32.xlu1 %v7426_v28, %s6810_s7  ;;  %1750 = vrot.lane.b32.xlu0 %v7428_v29, %s6810_s7 }
  0xd2   :  { %453 = vst.msk [vmem:[#allocation2 + $0xbc1] sm:$0x80] %vm13_vm0, %v436_v11   ;;  %418 = vst.msk [vmem:[#allocation2 + $0x808] sm:$0x1] %vm13_vm0, %v415_v12  }
  0xd3   :  { %420 = vst.msk [vmem:[#allocation2 + $0x847] sm:$0x2] %vm13_vm0, %v415_v12   ;;  %422 = vst.msk [vmem:[#allocation2 + $0x886] sm:$0x4] %vm13_vm0, %v415_v12  }
  0xd4   :  { %424 = vst.msk [vmem:[#allocation2 + $0x8c5] sm:$0x8] %vm13_vm0, %v415_v12   ;;  %426 = vst.msk [vmem:[#allocation2 + $0x904] sm:$0x10] %vm13_vm0, %v415_v12  }
  0xd5   :  { %428 = vst.msk [vmem:[#allocation2 + $0x943] sm:$0x20] %vm13_vm0, %v415_v12   ;;  %430 = vst.msk [vmem:[#allocation2 + $0x982] sm:$0x40] %vm13_vm0, %v415_v12   ;;  %1813 = vrot.lane.b32.xlu1 %v7450_v32, %s6810_s7  ;;  %1792 = vrot.lane.b32.xlu0 %v7452_v33, %s6810_s7  ;;  %s6815_s7 = smov 98  }
  0xd6   :  { %432 = vst.msk [vmem:[#allocation2 + $0x9c1] sm:$0x80] %vm13_vm0, %v415_v12   ;;  %6720 = vst [vmem:[%s9697_s1 + $0x3b0] sm:$0x3] %v5499_v13 }
  0xd7   :  { %6728 = vst [vmem:[%s9697_s1 + $0x3c0] sm:$0x3] %v5547_v14  ;;  %6736 = vst [vmem:[%s9697_s1 + $0x3d0] sm:$0x3] %v5595_v15 }
  0xd8   :  { %6744 = vst [vmem:[%s9697_s1 + $0x3e0] sm:$0x3] %v5643_v16  ;;  %6752 = vst [vmem:[%s9697_s1 + $0x3f0] sm:$0x3] %v5691_v17 }
  0xd9   :  { %6632 = vst [vmem:[%s9697_s1 + $0x300] sm:$0x3] %v4971_v18  ;;  %6640 = vst [vmem:[%s9697_s1 + $0x310] sm:$0x3] %v5019_v6  ;;  %1854 = vrot.lane.b32.xlu1 %v7479_v42, %s6811_s14  ;;  %1833 = vrot.lane.b32.xlu0 %v7481_v43, %s6811_s14 }
  0xda   :  { %6648 = vst [vmem:[%s9697_s1 + $0x320] sm:$0x3] %v5067_v7  ;;  %6656 = vst [vmem:[%s9697_s1 + $0x330] sm:$0x3] %v5115_v19  ;;  %v728_v19 = vpop.permute.xlu1 %727  }
  0xdb   :  { %6664 = vst [vmem:[%s9697_s1 + $0x340] sm:$0x3] %v5163_v20  ;;  %6672 = vst [vmem:[%s9697_s1 + $0x350] sm:$0x3] %v5211_v21  ;;  %v707_v20 = vpop.permute.xlu0 %706  }
  0xdc   :  { %6680 = vst [vmem:[%s9697_s1 + $0x360] sm:$0x3] %v5259_v22  ;;  %481 = vst.msk [vmem:[#allocation2 + $0xe08] sm:$0x1] %vm13_vm0, %v478_v23  }
  0xdd   :  { %483 = vst.msk [vmem:[#allocation2 + $0xe47] sm:$0x2] %vm13_vm0, %v478_v23   ;;  %485 = vst.msk [vmem:[#allocation2 + $0xe86] sm:$0x4] %vm13_vm0, %v478_v23   ;;  %1896 = vrot.lane.b32.xlu1 %v7402_v1, %s6811_s14  ;;  %1875 = vrot.lane.b32.xlu0 %v7404_v3, %s6811_s14 }
  0xde   :  { %487 = vst.msk [vmem:[#allocation2 + $0xec5] sm:$0x8] %vm13_vm0, %v478_v23   ;;  %489 = vst.msk [vmem:[#allocation2 + $0xf04] sm:$0x10] %vm13_vm0, %v478_v23  }
  0xdf   :  { %491 = vst.msk [vmem:[#allocation2 + $0xf43] sm:$0x20] %vm13_vm0, %v478_v23   ;;  %493 = vst.msk [vmem:[#allocation2 + $0xf82] sm:$0x40] %vm13_vm0, %v478_v23  }
  0xe0   :  { %495 = vst.msk [vmem:[#allocation2 + $0xfc1] sm:$0x80] %vm13_vm0, %v478_v23   ;;  %460 = vst.msk [vmem:[#allocation2 + $0xc08] sm:$0x1] %vm13_vm0, %v457_v24  }
  0xe1   :  { %462 = vst.msk [vmem:[#allocation2 + $0xc47] sm:$0x2] %vm13_vm0, %v457_v24   ;;  %464 = vst.msk [vmem:[#allocation2 + $0xc86] sm:$0x4] %vm13_vm0, %v457_v24   ;;  %1938 = vrot.lane.b32.xlu1 %v7426_v28, %s6811_s14  ;;  %1917 = vrot.lane.b32.xlu0 %v7428_v29, %s6811_s14 }
  0xe2   :  { %466 = vst.msk [vmem:[#allocation2 + $0xcc5] sm:$0x8] %vm13_vm0, %v457_v24   ;;  %468 = vst.msk [vmem:[#allocation2 + $0xd04] sm:$0x10] %vm13_vm0, %v457_v24  }
  0xe3   :  { %470 = vst.msk [vmem:[#allocation2 + $0xd43] sm:$0x20] %vm13_vm0, %v457_v24   ;;  %472 = vst.msk [vmem:[#allocation2 + $0xd82] sm:$0x40] %vm13_vm0, %v457_v24  }
  0xe4   :  { %474 = vst.msk [vmem:[#allocation2 + $0xdc1] sm:$0x80] %vm13_vm0, %v457_v24   ;;  %6688 = vst [vmem:[%s9697_s1 + $0x370] sm:$0x3] %v5307_v25 }
  0xe5   :  { %522 = vst.msk [vmem:[#allocation2 + $0x209] sm:$0x1] %vm13_vm0, %v519_v26   ;;  %524 = vst.msk [vmem:[#allocation2 + $0x248] sm:$0x2] %vm13_vm0, %v519_v26   ;;  %1980 = vrot.lane.b32.xlu1 %v7450_v32, %s6811_s14  ;;  %1959 = vrot.lane.b32.xlu0 %v7452_v33, %s6811_s14 }
  0xe6   :  { %526 = vst.msk [vmem:[#allocation2 + $0x287] sm:$0x4] %vm13_vm0, %v519_v26   ;;  %528 = vst.msk [vmem:[#allocation2 + $0x2c6] sm:$0x8] %vm13_vm0, %v519_v26  }
  0xe7   :  { %530 = vst.msk [vmem:[#allocation2 + $0x305] sm:$0x10] %vm13_vm0, %v519_v26   ;;  %532 = vst.msk [vmem:[#allocation2 + $0x344] sm:$0x20] %vm13_vm0, %v519_v26  }
  0xe8   :  { %534 = vst.msk [vmem:[#allocation2 + $0x383] sm:$0x40] %vm13_vm0, %v519_v26   ;;  %536 = vst.msk [vmem:[#allocation2 + $0x3c2] sm:$0x80] %vm13_vm0, %v519_v26  }
  0xe9   :  { %501 = vst.msk [vmem:[#allocation2 + $0x9] sm:$0x1] %vm13_vm0, %v498_v27   ;;  %503 = vst.msk [vmem:[#allocation2 + $0x48] sm:$0x2] %vm13_vm0, %v498_v27   ;;  %2021 = vrot.lane.b32.xlu1 %v7479_v42, %s6812_s0  ;;  %2000 = vrot.lane.b32.xlu0 %v7481_v43, %s6812_s0 }
  0xea   :  { %505 = vst.msk [vmem:[#allocation2 + $0x87] sm:$0x4] %vm13_vm0, %v498_v27   ;;  %507 = vst.msk [vmem:[#allocation2 + $0xc6] sm:$0x8] %vm13_vm0, %v498_v27  }
  0xeb   :  { %509 = vst.msk [vmem:[#allocation2 + $0x105] sm:$0x10] %vm13_vm0, %v498_v27   ;;  %511 = vst.msk [vmem:[#allocation2 + $0x144] sm:$0x20] %vm13_vm0, %v498_v27  }
  0xec   :  { %513 = vst.msk [vmem:[#allocation2 + $0x183] sm:$0x40] %vm13_vm0, %v498_v27   ;;  %515 = vst.msk [vmem:[#allocation2 + $0x1c2] sm:$0x80] %vm13_vm0, %v498_v27   ;;  %v3057_v34 = vld [vmem:[#allocation2 + $0x208] sm:$0x3] }
  0xed   :  { %564 = vst.msk [vmem:[#allocation2 + $0x609] sm:$0x1] %vm13_vm0, %v561_v30   ;;  %566 = vst.msk [vmem:[#allocation2 + $0x648] sm:$0x2] %vm13_vm0, %v561_v30   ;;  %v3105_v35 = vld [vmem:[#allocation2 + $0x248] sm:$0x3]  ;;  %2063 = vrot.lane.b32.xlu1 %v7402_v1, %s6812_s0  ;;  %2042 = vrot.lane.b32.xlu0 %v7404_v3, %s6812_s0 }
  0xee   :  { %568 = vst.msk [vmem:[#allocation2 + $0x687] sm:$0x4] %vm13_vm0, %v561_v30   ;;  %570 = vst.msk [vmem:[#allocation2 + $0x6c6] sm:$0x8] %vm13_vm0, %v561_v30   ;;  %v3201_v36 = vld [vmem:[#allocation2 + $0x2c8] sm:$0x3] }
  0xef   :  { %572 = vst.msk [vmem:[#allocation2 + $0x705] sm:$0x10] %vm13_vm0, %v561_v30   ;;  %574 = vst.msk [vmem:[#allocation2 + $0x744] sm:$0x20] %vm13_vm0, %v561_v30   ;;  %v3249_v39 = vld [vmem:[#allocation2 + $0x308] sm:$0x3] }
  0xf0   :  { %576 = vst.msk [vmem:[#allocation2 + $0x783] sm:$0x40] %vm13_vm0, %v561_v30   ;;  %578 = vst.msk [vmem:[#allocation2 + $0x7c2] sm:$0x80] %vm13_vm0, %v561_v30   ;;  %v3297_v40 = vld [vmem:[#allocation2 + $0x348] sm:$0x3] }
  0xf1   :  { %543 = vst.msk [vmem:[#allocation2 + $0x409] sm:$0x1] %vm13_vm0, %v540_v31   ;;  %545 = vst.msk [vmem:[#allocation2 + $0x448] sm:$0x2] %vm13_vm0, %v540_v31   ;;  %v3345_v41 = vld [vmem:[#allocation2 + $0x388] sm:$0x3]  ;;  %2105 = vrot.lane.b32.xlu1 %v7426_v28, %s6812_s0  ;;  %2084 = vrot.lane.b32.xlu0 %v7428_v29, %s6812_s0 }
  0xf2   :  { %547 = vst.msk [vmem:[#allocation2 + $0x487] sm:$0x4] %vm13_vm0, %v540_v31   ;;  %549 = vst.msk [vmem:[#allocation2 + $0x4c6] sm:$0x8] %vm13_vm0, %v540_v31   ;;  %v3153_v44 = vld [vmem:[#allocation2 + $0x288] sm:$0x3] }
  0xf3   :  { %551 = vst.msk [vmem:[#allocation2 + $0x505] sm:$0x10] %vm13_vm0, %v540_v31   ;;  %553 = vst.msk [vmem:[#allocation2 + $0x544] sm:$0x20] %vm13_vm0, %v540_v31   ;;  %v3393_v45 = vld [vmem:[#allocation2 + $0x3c8] sm:$0x3] }
  0xf4   :  { %555 = vst.msk [vmem:[#allocation2 + $0x583] sm:$0x40] %vm13_vm0, %v540_v31   ;;  %557 = vst.msk [vmem:[#allocation2 + $0x5c2] sm:$0x80] %vm13_vm0, %v540_v31   ;;  %v2674_v46 = vld [vmem:[#allocation2 + $0x8] sm:$0x3] }
  0xf5   :  { %6313 = vst [vmem:[%s9697_s1 + $0x82] sm:$0x3] %v3057_v34  ;;  %6321 = vst [vmem:[%s9697_s1 + $0x92] sm:$0x3] %v3105_v35  ;;  %v2721_v47 = vld [vmem:[#allocation2 + $0x48] sm:$0x3]  ;;  %2147 = vrot.lane.b32.xlu1 %v7450_v32, %s6812_s0  ;;  %2126 = vrot.lane.b32.xlu0 %v7452_v33, %s6812_s0 }
  0xf6   :  { %6337 = vst [vmem:[%s9697_s1 + $0xb2] sm:$0x3] %v3201_v36  ;;  %606 = vst.msk [vmem:[#allocation2 + $0xa09] sm:$0x1] %vm13_vm0, %v603_v37   ;;  %v2769_v48 = vld [vmem:[#allocation2 + $0x88] sm:$0x3] }
  0xf7   :  { %608 = vst.msk [vmem:[#allocation2 + $0xa48] sm:$0x2] %vm13_vm0, %v603_v37   ;;  %610 = vst.msk [vmem:[#allocation2 + $0xa87] sm:$0x4] %vm13_vm0, %v603_v37   ;;  %v2817_v49 = vld [vmem:[#allocation2 + $0xc8] sm:$0x3] }
  0xf8   :  { %612 = vst.msk [vmem:[#allocation2 + $0xac6] sm:$0x8] %vm13_vm0, %v603_v37   ;;  %614 = vst.msk [vmem:[#allocation2 + $0xb05] sm:$0x10] %vm13_vm0, %v603_v37   ;;  %v2865_v50 = vld [vmem:[#allocation2 + $0x108] sm:$0x3] }
  0xf9   :  { %616 = vst.msk [vmem:[#allocation2 + $0xb44] sm:$0x20] %vm13_vm0, %v603_v37   ;;  %618 = vst.msk [vmem:[#allocation2 + $0xb83] sm:$0x40] %vm13_vm0, %v603_v37   ;;  %v2961_v51 = vld [vmem:[#allocation2 + $0x188] sm:$0x3]  ;;  %2188 = vrot.lane.b32.xlu1 %v7479_v42, %s6813_s24  ;;  %2167 = vrot.lane.b32.xlu0 %v7481_v43, %s6813_s24 }
  0xfa   :  { %620 = vst.msk [vmem:[#allocation2 + $0xbc2] sm:$0x80] %vm13_vm0, %v603_v37   ;;  %585 = vst.msk [vmem:[#allocation2 + $0x809] sm:$0x1] %vm13_vm0, %v582_v38   ;;  %v2913_v52 = vld [vmem:[#allocation2 + $0x148] sm:$0x3]  ;;  %v770_v37 = vpop.permute.xlu1 %769  }
  0xfb   :  { %587 = vst.msk [vmem:[#allocation2 + $0x848] sm:$0x2] %vm13_vm0, %v582_v38   ;;  %589 = vst.msk [vmem:[#allocation2 + $0x887] sm:$0x4] %vm13_vm0, %v582_v38   ;;  %v3009_v55 = vld [vmem:[#allocation2 + $0x1c8] sm:$0x3] }
  0xfc   :  { %591 = vst.msk [vmem:[#allocation2 + $0x8c6] sm:$0x8] %vm13_vm0, %v582_v38   ;;  %593 = vst.msk [vmem:[#allocation2 + $0x905] sm:$0x10] %vm13_vm0, %v582_v38   ;;  %v3825_v56 = vld [vmem:[#allocation2 + $0x608] sm:$0x3] }
  0xfd   :  { %595 = vst.msk [vmem:[#allocation2 + $0x944] sm:$0x20] %vm13_vm0, %v582_v38   ;;  %597 = vst.msk [vmem:[#allocation2 + $0x983] sm:$0x40] %vm13_vm0, %v582_v38   ;;  %v3873_v57 = vld [vmem:[#allocation2 + $0x648] sm:$0x3]  ;;  %2230 = vrot.lane.b32.xlu1 %v7402_v1, %s6813_s24  ;;  %2209 = vrot.lane.b32.xlu0 %v7404_v3, %s6813_s24 }
  0xfe   :  { %599 = vst.msk [vmem:[#allocation2 + $0x9c2] sm:$0x80] %vm13_vm0, %v582_v38   ;;  %6345 = vst [vmem:[%s9697_s1 + $0xc2] sm:$0x3] %v3249_v39  ;;  %v3921_v58 = vld [vmem:[#allocation2 + $0x688] sm:$0x3]  ;;  %v749_v38 = vpop.permute.xlu0 %748  }
  0xff   :  { %6353 = vst [vmem:[%s9697_s1 + $0xd2] sm:$0x3] %v3297_v40  ;;  %6361 = vst [vmem:[%s9697_s1 + $0xe2] sm:$0x3] %v3345_v41  ;;  %v4065_v59 = vld [vmem:[#allocation2 + $0x748] sm:$0x3] }
 0x100   :  { %6249 = vst [vmem:[%s9697_s1 + $0x2] sm:$0x3] %v2674_v46  ;;  %6329 = vst [vmem:[%s9697_s1 + $0xa2] sm:$0x3] %v3153_v44  ;;  %v3969_v60 = vld [vmem:[#allocation2 + $0x6c8] sm:$0x3] }
 0x101   :  { %6369 = vst [vmem:[%s9697_s1 + $0xf2] sm:$0x3] %v3393_v45  ;;  %6257 = vst [vmem:[%s9697_s1 + $0x12] sm:$0x3] %v2721_v47  ;;  %v4017_v61 = vld [vmem:[#allocation2 + $0x708] sm:$0x3]  ;;  %2272 = vrot.lane.b32.xlu1 %v7426_v28, %s6813_s24  ;;  %2251 = vrot.lane.b32.xlu0 %v7428_v29, %s6813_s24 }
 0x102   :  { %6265 = vst [vmem:[%s9697_s1 + $0x22] sm:$0x3] %v2769_v48  ;;  %6273 = vst [vmem:[%s9697_s1 + $0x32] sm:$0x3] %v2817_v49  ;;  %v4113_v62 = vld [vmem:[#allocation2 + $0x788] sm:$0x3] }
 0x103   :  { %6281 = vst [vmem:[%s9697_s1 + $0x42] sm:$0x3] %v2865_v50  ;;  %6297 = vst [vmem:[%s9697_s1 + $0x62] sm:$0x3] %v2961_v51  ;;  %v4161_v63 = vld [vmem:[#allocation2 + $0x7c8] sm:$0x3] }
 0x104   :  { %6289 = vst [vmem:[%s9697_s1 + $0x52] sm:$0x3] %v2913_v52  ;;  %648 = vst.msk [vmem:[#allocation2 + $0xe09] sm:$0x1] %vm13_vm0, %v645_v53   ;;  %v3441_v0 = vld [vmem:[#allocation2 + $0x408] sm:$0x3] }
 0x105   :  { %650 = vst.msk [vmem:[#allocation2 + $0xe48] sm:$0x2] %vm13_vm0, %v645_v53   ;;  %652 = vst.msk [vmem:[#allocation2 + $0xe87] sm:$0x4] %vm13_vm0, %v645_v53   ;;  %v3489_v2 = vld [vmem:[#allocation2 + $0x448] sm:$0x3]  ;;  %2314 = vrot.lane.b32.xlu1 %v7450_v32, %s6813_s24  ;;  %2293 = vrot.lane.b32.xlu0 %v7452_v33, %s6813_s24 }
 0x106   :  { %654 = vst.msk [vmem:[#allocation2 + $0xec6] sm:$0x8] %vm13_vm0, %v645_v53   ;;  %656 = vst.msk [vmem:[#allocation2 + $0xf05] sm:$0x10] %vm13_vm0, %v645_v53   ;;  %v3537_v4 = vld [vmem:[#allocation2 + $0x488] sm:$0x3] }
 0x107   :  { %658 = vst.msk [vmem:[#allocation2 + $0xf44] sm:$0x20] %vm13_vm0, %v645_v53   ;;  %660 = vst.msk [vmem:[#allocation2 + $0xf83] sm:$0x40] %vm13_vm0, %v645_v53   ;;  %v3585_v9 = vld [vmem:[#allocation2 + $0x4c8] sm:$0x3] }
 0x108   :  { %662 = vst.msk [vmem:[#allocation2 + $0xfc2] sm:$0x80] %vm13_vm0, %v645_v53   ;;  %627 = vst.msk [vmem:[#allocation2 + $0xc09] sm:$0x1] %vm13_vm0, %v624_v54   ;;  %v3633_v10 = vld [vmem:[#allocation2 + $0x508] sm:$0x3]  ;;  %v812_v53 = vpop.permute.xlu1 %811  }
 0x109   :  { %629 = vst.msk [vmem:[#allocation2 + $0xc48] sm:$0x2] %vm13_vm0, %v624_v54   ;;  %631 = vst.msk [vmem:[#allocation2 + $0xc87] sm:$0x4] %vm13_vm0, %v624_v54   ;;  %v3681_v11 = vld [vmem:[#allocation2 + $0x548] sm:$0x3]  ;;  %2355 = vrot.lane.b32.xlu1 %v7479_v42, %s6814_s28  ;;  %2334 = vrot.lane.b32.xlu0 %v7481_v43, %s6814_s28 }
 0x10a   :  { %633 = vst.msk [vmem:[#allocation2 + $0xcc6] sm:$0x8] %vm13_vm0, %v624_v54   ;;  %635 = vst.msk [vmem:[#allocation2 + $0xd05] sm:$0x10] %vm13_vm0, %v624_v54   ;;  %v3729_v12 = vld [vmem:[#allocation2 + $0x588] sm:$0x3] }
 0x10b   :  { %637 = vst.msk [vmem:[#allocation2 + $0xd44] sm:$0x20] %vm13_vm0, %v624_v54   ;;  %639 = vst.msk [vmem:[#allocation2 + $0xd83] sm:$0x40] %vm13_vm0, %v624_v54   ;;  %v3777_v13 = vld [vmem:[#allocation2 + $0x5c8] sm:$0x3] }
 0x10c   :  { %641 = vst.msk [vmem:[#allocation2 + $0xdc2] sm:$0x80] %vm13_vm0, %v624_v54   ;;  %6305 = vst [vmem:[%s9697_s1 + $0x72] sm:$0x3] %v3009_v55  ;;  %v4641_v14 = vld [vmem:[#allocation2 + $0xa48] sm:$0x3]  ;;  %v791_v54 = vpop.permute.xlu0 %790  }
 0x10d   :  { %6441 = vst [vmem:[%s9697_s1 + $0x182] sm:$0x3] %v3825_v56  ;;  %6449 = vst [vmem:[%s9697_s1 + $0x192] sm:$0x3] %v3873_v57  ;;  %v4593_v15 = vld [vmem:[#allocation2 + $0xa08] sm:$0x3]  ;;  %v853_v56 = vpop.permute.xlu1 %852  }
 0x10e   :  { %6457 = vst [vmem:[%s9697_s1 + $0x1a2] sm:$0x3] %v3921_v58  ;;  %6481 = vst [vmem:[%s9697_s1 + $0x1d2] sm:$0x3] %v4065_v59  ;;  %v4689_v16 = vld [vmem:[#allocation2 + $0xa88] sm:$0x3] }
 0x10f   :  { %6465 = vst [vmem:[%s9697_s1 + $0x1b2] sm:$0x3] %v3969_v60  ;;  %6473 = vst [vmem:[%s9697_s1 + $0x1c2] sm:$0x3] %v4017_v61  ;;  %v4737_v17 = vld [vmem:[#allocation2 + $0xac8] sm:$0x3] }
 0x110   :  { %6489 = vst [vmem:[%s9697_s1 + $0x1e2] sm:$0x3] %v4113_v62  ;;  %6497 = vst [vmem:[%s9697_s1 + $0x1f2] sm:$0x3] %v4161_v63  ;;  %v4785_v18 = vld [vmem:[#allocation2 + $0xb08] sm:$0x3]  ;;  %v832_v57 = vpop.permute.xlu0 %831  }
 0x111   :  { %6377 = vst [vmem:[%s9697_s1 + $0x102] sm:$0x3] %v3441_v0  ;;  %6385 = vst [vmem:[%s9697_s1 + $0x112] sm:$0x3] %v3489_v2  ;;  %v4833_v6 = vld [vmem:[#allocation2 + $0xb48] sm:$0x3]  ;;  %v895_v58 = vpop.permute.xlu1 %894  }
 0x112   :  { %6393 = vst [vmem:[%s9697_s1 + $0x122] sm:$0x3] %v3537_v4  ;;  %689 = vst.msk [vmem:[#allocation2 + $0x210] sm:$0x1] %vm13_vm0, %v686_v5   ;;  %v4881_v7 = vld [vmem:[#allocation2 + $0xb88] sm:$0x3] }
 0x113   :  { %691 = vst.msk [vmem:[#allocation2 + $0x24f] sm:$0x2] %vm13_vm0, %v686_v5   ;;  %693 = vst.msk [vmem:[#allocation2 + $0x28e] sm:$0x4] %vm13_vm0, %v686_v5   ;;  %v4929_v21 = vld [vmem:[#allocation2 + $0xbc8] sm:$0x3] }
 0x114   :  { %695 = vst.msk [vmem:[#allocation2 + $0x2cd] sm:$0x8] %vm13_vm0, %v686_v5   ;;  %697 = vst.msk [vmem:[#allocation2 + $0x30c] sm:$0x10] %vm13_vm0, %v686_v5   ;;  %v4209_v22 = vld [vmem:[#allocation2 + $0x808] sm:$0x3]  ;;  %v874_v59 = vpop.permute.xlu0 %873  }
 0x115   :  { %699 = vst.msk [vmem:[#allocation2 + $0x34b] sm:$0x20] %vm13_vm0, %v686_v5   ;;  %701 = vst.msk [vmem:[#allocation2 + $0x38a] sm:$0x40] %vm13_vm0, %v686_v5   ;;  %v4257_v23 = vld [vmem:[#allocation2 + $0x848] sm:$0x3]  ;;  %v937_v63 = vpop.permute.xlu1 %936  }
 0x116   :  { %703 = vst.msk [vmem:[#allocation2 + $0x3c9] sm:$0x80] %vm13_vm0, %v686_v5   ;;  %668 = vst.msk [vmem:[#allocation2 + $0x10] sm:$0x1] %vm13_vm0, %v665_v8   ;;  %v4305_v24 = vld [vmem:[#allocation2 + $0x888] sm:$0x3] }
 0x117   :  { %670 = vst.msk [vmem:[#allocation2 + $0x4f] sm:$0x2] %vm13_vm0, %v665_v8   ;;  %672 = vst.msk [vmem:[#allocation2 + $0x8e] sm:$0x4] %vm13_vm0, %v665_v8   ;;  %v4353_v25 = vld [vmem:[#allocation2 + $0x8c8] sm:$0x3] }
 0x118   :  { %674 = vst.msk [vmem:[#allocation2 + $0xcd] sm:$0x8] %vm13_vm0, %v665_v8   ;;  %676 = vst.msk [vmem:[#allocation2 + $0x10c] sm:$0x10] %vm13_vm0, %v665_v8   ;;  %v4401_v26 = vld [vmem:[#allocation2 + $0x908] sm:$0x3]  ;;  %v916_v0 = vpop.permute.xlu0 %915  }
 0x119   :  { %678 = vst.msk [vmem:[#allocation2 + $0x14b] sm:$0x20] %vm13_vm0, %v665_v8   ;;  %680 = vst.msk [vmem:[#allocation2 + $0x18a] sm:$0x40] %vm13_vm0, %v665_v8   ;;  %v4449_v27 = vld [vmem:[#allocation2 + $0x948] sm:$0x3] }
 0x11a   :  { %682 = vst.msk [vmem:[#allocation2 + $0x1c9] sm:$0x80] %vm13_vm0, %v665_v8   ;;  %6401 = vst [vmem:[%s9697_s1 + $0x132] sm:$0x3] %v3585_v9  ;;  %v4497_v30 = vld [vmem:[#allocation2 + $0x988] sm:$0x3] }
 0x11b   :  { %6409 = vst [vmem:[%s9697_s1 + $0x142] sm:$0x3] %v3633_v10  ;;  %6417 = vst [vmem:[%s9697_s1 + $0x152] sm:$0x3] %v3681_v11  ;;  %v4545_v31 = vld [vmem:[#allocation2 + $0x9c8] sm:$0x3] }
 0x11c   :  { %6425 = vst [vmem:[%s9697_s1 + $0x162] sm:$0x3] %v3729_v12  ;;  %6433 = vst [vmem:[%s9697_s1 + $0x172] sm:$0x3] %v3777_v13  ;;  %v5361_v34 = vld [vmem:[#allocation2 + $0xe08] sm:$0x3] }
 0x11d   :  { %6577 = vst [vmem:[%s9697_s1 + $0x292] sm:$0x3] %v4641_v14  ;;  %6569 = vst [vmem:[%s9697_s1 + $0x282] sm:$0x3] %v4593_v15  ;;  %v5409_v35 = vld [vmem:[#allocation2 + $0xe48] sm:$0x3] }
 0x11e   :  { %6585 = vst [vmem:[%s9697_s1 + $0x2a2] sm:$0x3] %v4689_v16  ;;  %6593 = vst [vmem:[%s9697_s1 + $0x2b2] sm:$0x3] %v4737_v17  ;;  %v5457_v36 = vld [vmem:[#allocation2 + $0xe88] sm:$0x3]  ;;  %v979_v17 = vpop.permute.xlu1 %978  }
 0x11f   :  { %6601 = vst [vmem:[%s9697_s1 + $0x2c2] sm:$0x3] %v4785_v18  ;;  %6609 = vst [vmem:[%s9697_s1 + $0x2d2] sm:$0x3] %v4833_v6  ;;  %v5505_v39 = vld [vmem:[#allocation2 + $0xec8] sm:$0x3]  ;;  %v958_v18 = vpop.permute.xlu0 %957  }
 0x120   :  { %6617 = vst [vmem:[%s9697_s1 + $0x2e2] sm:$0x3] %v4881_v7  ;;  %731 = vst.msk [vmem:[#allocation2 + $0x610] sm:$0x1] %vm13_vm0, %v728_v19   ;;  %v5553_v40 = vld [vmem:[#allocation2 + $0xf08] sm:$0x3] }
 0x121   :  { %733 = vst.msk [vmem:[#allocation2 + $0x64f] sm:$0x2] %vm13_vm0, %v728_v19   ;;  %735 = vst.msk [vmem:[#allocation2 + $0x68e] sm:$0x4] %vm13_vm0, %v728_v19   ;;  %v5601_v41 = vld [vmem:[#allocation2 + $0xf48] sm:$0x3] }
 0x122   :  { %737 = vst.msk [vmem:[#allocation2 + $0x6cd] sm:$0x8] %vm13_vm0, %v728_v19   ;;  %739 = vst.msk [vmem:[#allocation2 + $0x70c] sm:$0x10] %vm13_vm0, %v728_v19   ;;  %v5649_v44 = vld [vmem:[#allocation2 + $0xf88] sm:$0x3] }
 0x123   :  { %741 = vst.msk [vmem:[#allocation2 + $0x74b] sm:$0x20] %vm13_vm0, %v728_v19   ;;  %743 = vst.msk [vmem:[#allocation2 + $0x78a] sm:$0x40] %vm13_vm0, %v728_v19   ;;  %v5697_v45 = vld [vmem:[#allocation2 + $0xfc8] sm:$0x3] }
 0x124   :  { %745 = vst.msk [vmem:[#allocation2 + $0x7c9] sm:$0x80] %vm13_vm0, %v728_v19   ;;  %710 = vst.msk [vmem:[#allocation2 + $0x410] sm:$0x1] %vm13_vm0, %v707_v20   ;;  %v4977_v46 = vld [vmem:[#allocation2 + $0xc08] sm:$0x3] }
 0x125   :  { %712 = vst.msk [vmem:[#allocation2 + $0x44f] sm:$0x2] %vm13_vm0, %v707_v20   ;;  %714 = vst.msk [vmem:[#allocation2 + $0x48e] sm:$0x4] %vm13_vm0, %v707_v20   ;;  %v5025_v47 = vld [vmem:[#allocation2 + $0xc48] sm:$0x3] }
 0x126   :  { %716 = vst.msk [vmem:[#allocation2 + $0x4cd] sm:$0x8] %vm13_vm0, %v707_v20   ;;  %718 = vst.msk [vmem:[#allocation2 + $0x50c] sm:$0x10] %vm13_vm0, %v707_v20   ;;  %v5073_v48 = vld [vmem:[#allocation2 + $0xc88] sm:$0x3] }
 0x127   :  { %720 = vst.msk [vmem:[#allocation2 + $0x54b] sm:$0x20] %vm13_vm0, %v707_v20   ;;  %722 = vst.msk [vmem:[#allocation2 + $0x58a] sm:$0x40] %vm13_vm0, %v707_v20   ;;  %v5121_v49 = vld [vmem:[#allocation2 + $0xcc8] sm:$0x3] }
 0x128   :  { %724 = vst.msk [vmem:[#allocation2 + $0x5c9] sm:$0x80] %vm13_vm0, %v707_v20   ;;  %6625 = vst [vmem:[%s9697_s1 + $0x2f2] sm:$0x3] %v4929_v21  ;;  %v5169_v50 = vld [vmem:[#allocation2 + $0xd08] sm:$0x3] }
 0x129   :  { %6505 = vst [vmem:[%s9697_s1 + $0x202] sm:$0x3] %v4209_v22  ;;  %6513 = vst [vmem:[%s9697_s1 + $0x212] sm:$0x3] %v4257_v23  ;;  %v5217_v51 = vld [vmem:[#allocation2 + $0xd48] sm:$0x3] }
 0x12a   :  { %6521 = vst [vmem:[%s9697_s1 + $0x222] sm:$0x3] %v4305_v24  ;;  %6529 = vst [vmem:[%s9697_s1 + $0x232] sm:$0x3] %v4353_v25  ;;  %v5265_v52 = vld [vmem:[#allocation2 + $0xd88] sm:$0x3] }
 0x12b   :  { %6537 = vst [vmem:[%s9697_s1 + $0x242] sm:$0x3] %v4401_v26  ;;  %6545 = vst [vmem:[%s9697_s1 + $0x252] sm:$0x3] %v4449_v27  ;;  %v5313_v55 = vld [vmem:[#allocation2 + $0xdc8] sm:$0x3] }
 0x12c   :  { %6553 = vst [vmem:[%s9697_s1 + $0x262] sm:$0x3] %v4497_v30  ;;  %6561 = vst [vmem:[%s9697_s1 + $0x272] sm:$0x3] %v4545_v31  ;;  %v1020_v31 = vpop.permute.xlu1 %1019   ;;  %v8122_v42 = vld [vmem:[#allocation0 + $0x18] sm:$0xff]   ;;  %v8124_v43 = vld [vmem:[#allocation0 + $0x10] sm:$0xff]  }
 0x12d   :  { %6697 = vst [vmem:[%s9697_s1 + $0x382] sm:$0x3] %v5361_v34  ;;  %6705 = vst [vmem:[%s9697_s1 + $0x392] sm:$0x3] %v5409_v35  ;;  %v999_v34 = vpop.permute.xlu0 %998   ;;  %2397 = vrot.lane.b32.xlu1 %v8122_v42, %s6814_s28  ;;  %2376 = vrot.lane.b32.xlu0 %v8124_v43, %s6814_s28 }
 0x12e   :  { %6713 = vst [vmem:[%s9697_s1 + $0x3a2] sm:$0x3] %v5457_v36  ;;  %773 = vst.msk [vmem:[#allocation2 + $0xa10] sm:$0x1] %vm13_vm0, %v770_v37  }
 0x12f   :  { %775 = vst.msk [vmem:[#allocation2 + $0xa4f] sm:$0x2] %vm13_vm0, %v770_v37   ;;  %777 = vst.msk [vmem:[#allocation2 + $0xa8e] sm:$0x4] %vm13_vm0, %v770_v37  }
 0x130   :  { %779 = vst.msk [vmem:[#allocation2 + $0xacd] sm:$0x8] %vm13_vm0, %v770_v37   ;;  %781 = vst.msk [vmem:[#allocation2 + $0xb0c] sm:$0x10] %vm13_vm0, %v770_v37  }
 0x131   :  { %783 = vst.msk [vmem:[#allocation2 + $0xb4b] sm:$0x20] %vm13_vm0, %v770_v37   ;;  %785 = vst.msk [vmem:[#allocation2 + $0xb8a] sm:$0x40] %vm13_vm0, %v770_v37  }
 0x132   :  { %787 = vst.msk [vmem:[#allocation2 + $0xbc9] sm:$0x80] %vm13_vm0, %v770_v37   ;;  %752 = vst.msk [vmem:[#allocation2 + $0x810] sm:$0x1] %vm13_vm0, %v749_v38  }
 0x133   :  { %754 = vst.msk [vmem:[#allocation2 + $0x84f] sm:$0x2] %vm13_vm0, %v749_v38   ;;  %756 = vst.msk [vmem:[#allocation2 + $0x88e] sm:$0x4] %vm13_vm0, %v749_v38  }
 0x134   :  { %758 = vst.msk [vmem:[#allocation2 + $0x8cd] sm:$0x8] %vm13_vm0, %v749_v38   ;;  %760 = vst.msk [vmem:[#allocation2 + $0x90c] sm:$0x10] %vm13_vm0, %v749_v38  }
 0x135   :  { %762 = vst.msk [vmem:[#allocation2 + $0x94b] sm:$0x20] %vm13_vm0, %v749_v38   ;;  %764 = vst.msk [vmem:[#allocation2 + $0x98a] sm:$0x40] %vm13_vm0, %v749_v38  }
 0x136   :  { %766 = vst.msk [vmem:[#allocation2 + $0x9c9] sm:$0x80] %vm13_vm0, %v749_v38   ;;  %6721 = vst [vmem:[%s9697_s1 + $0x3b2] sm:$0x3] %v5505_v39 }
 0x137   :  { %6729 = vst [vmem:[%s9697_s1 + $0x3c2] sm:$0x3] %v5553_v40  ;;  %6737 = vst [vmem:[%s9697_s1 + $0x3d2] sm:$0x3] %v5601_v41 }
 0x138   :  { %6745 = vst [vmem:[%s9697_s1 + $0x3e2] sm:$0x3] %v5649_v44  ;;  %6753 = vst [vmem:[%s9697_s1 + $0x3f2] sm:$0x3] %v5697_v45 }
 0x139   :  { %6633 = vst [vmem:[%s9697_s1 + $0x302] sm:$0x3] %v4977_v46  ;;  %6641 = vst [vmem:[%s9697_s1 + $0x312] sm:$0x3] %v5025_v47  ;;  %v1062_v47 = vpop.permute.xlu1 %1061  }
 0x13a   :  { %6649 = vst [vmem:[%s9697_s1 + $0x322] sm:$0x3] %v5073_v48  ;;  %6657 = vst [vmem:[%s9697_s1 + $0x332] sm:$0x3] %v5121_v49  ;;  %v1041_v48 = vpop.permute.xlu0 %1040  }
 0x13b   :  { %6665 = vst [vmem:[%s9697_s1 + $0x342] sm:$0x3] %v5169_v50  ;;  %6673 = vst [vmem:[%s9697_s1 + $0x352] sm:$0x3] %v5217_v51 }
 0x13c   :  { %6681 = vst [vmem:[%s9697_s1 + $0x362] sm:$0x3] %v5265_v52  ;;  %815 = vst.msk [vmem:[#allocation2 + $0xe10] sm:$0x1] %vm13_vm0, %v812_v53  }
 0x13d   :  { %817 = vst.msk [vmem:[#allocation2 + $0xe4f] sm:$0x2] %vm13_vm0, %v812_v53   ;;  %819 = vst.msk [vmem:[#allocation2 + $0xe8e] sm:$0x4] %vm13_vm0, %v812_v53  }
 0x13e   :  { %821 = vst.msk [vmem:[#allocation2 + $0xecd] sm:$0x8] %vm13_vm0, %v812_v53   ;;  %823 = vst.msk [vmem:[#allocation2 + $0xf0c] sm:$0x10] %vm13_vm0, %v812_v53  }
 0x13f   :  { %825 = vst.msk [vmem:[#allocation2 + $0xf4b] sm:$0x20] %vm13_vm0, %v812_v53   ;;  %827 = vst.msk [vmem:[#allocation2 + $0xf8a] sm:$0x40] %vm13_vm0, %v812_v53  }
 0x140   :  { %829 = vst.msk [vmem:[#allocation2 + $0xfc9] sm:$0x80] %vm13_vm0, %v812_v53   ;;  %794 = vst.msk [vmem:[#allocation2 + $0xc10] sm:$0x1] %vm13_vm0, %v791_v54  }
 0x141   :  { %796 = vst.msk [vmem:[#allocation2 + $0xc4f] sm:$0x2] %vm13_vm0, %v791_v54   ;;  %798 = vst.msk [vmem:[#allocation2 + $0xc8e] sm:$0x4] %vm13_vm0, %v791_v54  }
 0x142   :  { %800 = vst.msk [vmem:[#allocation2 + $0xccd] sm:$0x8] %vm13_vm0, %v791_v54   ;;  %802 = vst.msk [vmem:[#allocation2 + $0xd0c] sm:$0x10] %vm13_vm0, %v791_v54  }
 0x143   :  { %804 = vst.msk [vmem:[#allocation2 + $0xd4b] sm:$0x20] %vm13_vm0, %v791_v54   ;;  %806 = vst.msk [vmem:[#allocation2 + $0xd8a] sm:$0x40] %vm13_vm0, %v791_v54  }
 0x144   :  { %808 = vst.msk [vmem:[#allocation2 + $0xdc9] sm:$0x80] %vm13_vm0, %v791_v54   ;;  %6689 = vst [vmem:[%s9697_s1 + $0x372] sm:$0x3] %v5313_v55 }
 0x145   :  { %856 = vst.msk [vmem:[#allocation2 + $0x211] sm:$0x1] %vm13_vm0, %v853_v56   ;;  %858 = vst.msk [vmem:[#allocation2 + $0x250] sm:$0x2] %vm13_vm0, %v853_v56  }
 0x146   :  { %860 = vst.msk [vmem:[#allocation2 + $0x28f] sm:$0x4] %vm13_vm0, %v853_v56   ;;  %862 = vst.msk [vmem:[#allocation2 + $0x2ce] sm:$0x8] %vm13_vm0, %v853_v56  }
 0x147   :  { %864 = vst.msk [vmem:[#allocation2 + $0x30d] sm:$0x10] %vm13_vm0, %v853_v56   ;;  %866 = vst.msk [vmem:[#allocation2 + $0x34c] sm:$0x20] %vm13_vm0, %v853_v56  }
 0x148   :  { %868 = vst.msk [vmem:[#allocation2 + $0x38b] sm:$0x40] %vm13_vm0, %v853_v56   ;;  %870 = vst.msk [vmem:[#allocation2 + $0x3ca] sm:$0x80] %vm13_vm0, %v853_v56  }
 0x149   :  { %835 = vst.msk [vmem:[#allocation2 + $0x11] sm:$0x1] %vm13_vm0, %v832_v57   ;;  %837 = vst.msk [vmem:[#allocation2 + $0x50] sm:$0x2] %vm13_vm0, %v832_v57  }
 0x14a   :  { %839 = vst.msk [vmem:[#allocation2 + $0x8f] sm:$0x4] %vm13_vm0, %v832_v57   ;;  %841 = vst.msk [vmem:[#allocation2 + $0xce] sm:$0x8] %vm13_vm0, %v832_v57  }
 0x14b   :  { %843 = vst.msk [vmem:[#allocation2 + $0x10d] sm:$0x10] %vm13_vm0, %v832_v57   ;;  %845 = vst.msk [vmem:[#allocation2 + $0x14c] sm:$0x20] %vm13_vm0, %v832_v57  }
 0x14c   :  { %847 = vst.msk [vmem:[#allocation2 + $0x18b] sm:$0x40] %vm13_vm0, %v832_v57   ;;  %849 = vst.msk [vmem:[#allocation2 + $0x1ca] sm:$0x80] %vm13_vm0, %v832_v57   ;;  %v3063_v60 = vld [vmem:[#allocation2 + $0x210] sm:$0x3] }
 0x14d   :  { %898 = vst.msk [vmem:[#allocation2 + $0x611] sm:$0x1] %vm13_vm0, %v895_v58   ;;  %900 = vst.msk [vmem:[#allocation2 + $0x650] sm:$0x2] %vm13_vm0, %v895_v58   ;;  %v3111_v61 = vld [vmem:[#allocation2 + $0x250] sm:$0x3] }
 0x14e   :  { %902 = vst.msk [vmem:[#allocation2 + $0x68f] sm:$0x4] %vm13_vm0, %v895_v58   ;;  %904 = vst.msk [vmem:[#allocation2 + $0x6ce] sm:$0x8] %vm13_vm0, %v895_v58   ;;  %v3159_v62 = vld [vmem:[#allocation2 + $0x290] sm:$0x3] }
 0x14f   :  { %906 = vst.msk [vmem:[#allocation2 + $0x70d] sm:$0x10] %vm13_vm0, %v895_v58   ;;  %908 = vst.msk [vmem:[#allocation2 + $0x74c] sm:$0x20] %vm13_vm0, %v895_v58   ;;  %v3207_v2 = vld [vmem:[#allocation2 + $0x2d0] sm:$0x3] }
 0x150   :  { %910 = vst.msk [vmem:[#allocation2 + $0x78b] sm:$0x40] %vm13_vm0, %v895_v58   ;;  %912 = vst.msk [vmem:[#allocation2 + $0x7ca] sm:$0x80] %vm13_vm0, %v895_v58   ;;  %v3255_v4 = vld [vmem:[#allocation2 + $0x310] sm:$0x3] }
 0x151   :  { %877 = vst.msk [vmem:[#allocation2 + $0x411] sm:$0x1] %vm13_vm0, %v874_v59   ;;  %879 = vst.msk [vmem:[#allocation2 + $0x450] sm:$0x2] %vm13_vm0, %v874_v59   ;;  %v3303_v5 = vld [vmem:[#allocation2 + $0x350] sm:$0x3] }
 0x152   :  { %881 = vst.msk [vmem:[#allocation2 + $0x48f] sm:$0x4] %vm13_vm0, %v874_v59   ;;  %883 = vst.msk [vmem:[#allocation2 + $0x4ce] sm:$0x8] %vm13_vm0, %v874_v59   ;;  %v3351_v8 = vld [vmem:[#allocation2 + $0x390] sm:$0x3] }
 0x153   :  { %885 = vst.msk [vmem:[#allocation2 + $0x50d] sm:$0x10] %vm13_vm0, %v874_v59   ;;  %887 = vst.msk [vmem:[#allocation2 + $0x54c] sm:$0x20] %vm13_vm0, %v874_v59   ;;  %v3399_v9 = vld [vmem:[#allocation2 + $0x3d0] sm:$0x3] }
 0x154   :  { %889 = vst.msk [vmem:[#allocation2 + $0x58b] sm:$0x40] %vm13_vm0, %v874_v59   ;;  %891 = vst.msk [vmem:[#allocation2 + $0x5ca] sm:$0x80] %vm13_vm0, %v874_v59   ;;  %v2679_v10 = vld [vmem:[#allocation2 + $0x10] sm:$0x3]  ;;  %v1104_v59 = vpop.permute.xlu1 %1103  }
 0x155   :  { %6314 = vst [vmem:[%s9697_s1 + $0x84] sm:$0x3] %v3063_v60  ;;  %6322 = vst [vmem:[%s9697_s1 + $0x94] sm:$0x3] %v3111_v61  ;;  %v2727_v11 = vld [vmem:[#allocation2 + $0x50] sm:$0x3]  ;;  %v1083_v60 = vpop.permute.xlu0 %1082  }
 0x156   :  { %6330 = vst [vmem:[%s9697_s1 + $0xa4] sm:$0x3] %v3159_v62  ;;  %940 = vst.msk [vmem:[#allocation2 + $0xa11] sm:$0x1] %vm13_vm0, %v937_v63   ;;  %v2775_v12 = vld [vmem:[#allocation2 + $0x90] sm:$0x3] }
 0x157   :  { %942 = vst.msk [vmem:[#allocation2 + $0xa50] sm:$0x2] %vm13_vm0, %v937_v63   ;;  %944 = vst.msk [vmem:[#allocation2 + $0xa8f] sm:$0x4] %vm13_vm0, %v937_v63   ;;  %v2823_v13 = vld [vmem:[#allocation2 + $0xd0] sm:$0x3] }
 0x158   :  { %946 = vst.msk [vmem:[#allocation2 + $0xace] sm:$0x8] %vm13_vm0, %v937_v63   ;;  %948 = vst.msk [vmem:[#allocation2 + $0xb0d] sm:$0x10] %vm13_vm0, %v937_v63   ;;  %v2871_v14 = vld [vmem:[#allocation2 + $0x110] sm:$0x3] }
 0x159   :  { %950 = vst.msk [vmem:[#allocation2 + $0xb4c] sm:$0x20] %vm13_vm0, %v937_v63   ;;  %952 = vst.msk [vmem:[#allocation2 + $0xb8b] sm:$0x40] %vm13_vm0, %v937_v63   ;;  %v2919_v15 = vld [vmem:[#allocation2 + $0x150] sm:$0x3] }
 0x15a   :  { %954 = vst.msk [vmem:[#allocation2 + $0xbca] sm:$0x80] %vm13_vm0, %v937_v63   ;;  %919 = vst.msk [vmem:[#allocation2 + $0x811] sm:$0x1] %vm13_vm0, %v916_v0   ;;  %v2967_v16 = vld [vmem:[#allocation2 + $0x190] sm:$0x3] }
 0x15b   :  { %921 = vst.msk [vmem:[#allocation2 + $0x850] sm:$0x2] %vm13_vm0, %v916_v0   ;;  %923 = vst.msk [vmem:[#allocation2 + $0x88f] sm:$0x4] %vm13_vm0, %v916_v0   ;;  %v3015_v6 = vld [vmem:[#allocation2 + $0x1d0] sm:$0x3] }
 0x15c   :  { %925 = vst.msk [vmem:[#allocation2 + $0x8ce] sm:$0x8] %vm13_vm0, %v916_v0   ;;  %927 = vst.msk [vmem:[#allocation2 + $0x90d] sm:$0x10] %vm13_vm0, %v916_v0   ;;  %v4119_v7 = vld [vmem:[#allocation2 + $0x790] sm:$0x3] }
 0x15d   :  { %929 = vst.msk [vmem:[#allocation2 + $0x94c] sm:$0x20] %vm13_vm0, %v916_v0   ;;  %931 = vst.msk [vmem:[#allocation2 + $0x98b] sm:$0x40] %vm13_vm0, %v916_v0   ;;  %v3831_v19 = vld [vmem:[#allocation2 + $0x610] sm:$0x3] }
 0x15e   :  { %933 = vst.msk [vmem:[#allocation2 + $0x9ca] sm:$0x80] %vm13_vm0, %v916_v0   ;;  %6338 = vst [vmem:[%s9697_s1 + $0xb4] sm:$0x3] %v3207_v2  ;;  %v3879_v20 = vld [vmem:[#allocation2 + $0x650] sm:$0x3] }
 0x15f   :  { %6346 = vst [vmem:[%s9697_s1 + $0xc4] sm:$0x3] %v3255_v4  ;;  %6354 = vst [vmem:[%s9697_s1 + $0xd4] sm:$0x3] %v3303_v5  ;;  %v3927_v21 = vld [vmem:[#allocation2 + $0x690] sm:$0x3] }
 0x160   :  { %6362 = vst [vmem:[%s9697_s1 + $0xe4] sm:$0x3] %v3351_v8  ;;  %6370 = vst [vmem:[%s9697_s1 + $0xf4] sm:$0x3] %v3399_v9  ;;  %v3975_v22 = vld [vmem:[#allocation2 + $0x6d0] sm:$0x3] }
 0x161   :  { %6250 = vst [vmem:[%s9697_s1 + $0x4] sm:$0x3] %v2679_v10  ;;  %6258 = vst [vmem:[%s9697_s1 + $0x14] sm:$0x3] %v2727_v11  ;;  %v4023_v23 = vld [vmem:[#allocation2 + $0x710] sm:$0x3]  ;;  %v1146_v11 = vpop.permute.xlu1 %1145  }
 0x162   :  { %6266 = vst [vmem:[%s9697_s1 + $0x24] sm:$0x3] %v2775_v12  ;;  %6274 = vst [vmem:[%s9697_s1 + $0x34] sm:$0x3] %v2823_v13  ;;  %v4071_v24 = vld [vmem:[#allocation2 + $0x750] sm:$0x3]  ;;  %v1125_v12 = vpop.permute.xlu0 %1124  }
 0x163   :  { %6282 = vst [vmem:[%s9697_s1 + $0x44] sm:$0x3] %v2871_v14  ;;  %6290 = vst [vmem:[%s9697_s1 + $0x54] sm:$0x3] %v2919_v15  ;;  %v4167_v25 = vld [vmem:[#allocation2 + $0x7d0] sm:$0x3] }
 0x164   :  { %6298 = vst [vmem:[%s9697_s1 + $0x64] sm:$0x3] %v2967_v16  ;;  %982 = vst.msk [vmem:[#allocation2 + $0xe11] sm:$0x1] %vm13_vm0, %v979_v17   ;;  %v3447_v26 = vld [vmem:[#allocation2 + $0x410] sm:$0x3] }
 0x165   :  { %984 = vst.msk [vmem:[#allocation2 + $0xe50] sm:$0x2] %vm13_vm0, %v979_v17   ;;  %986 = vst.msk [vmem:[#allocation2 + $0xe8f] sm:$0x4] %vm13_vm0, %v979_v17   ;;  %v3495_v27 = vld [vmem:[#allocation2 + $0x450] sm:$0x3]  ;;  %v1187_v14 = vpop.permute.xlu1 %1186  }
 0x166   :  { %988 = vst.msk [vmem:[#allocation2 + $0xece] sm:$0x8] %vm13_vm0, %v979_v17   ;;  %990 = vst.msk [vmem:[#allocation2 + $0xf0d] sm:$0x10] %vm13_vm0, %v979_v17   ;;  %v3543_v30 = vld [vmem:[#allocation2 + $0x490] sm:$0x3]  ;;  %v1166_v15 = vpop.permute.xlu0 %1165  }
 0x167   :  { %992 = vst.msk [vmem:[#allocation2 + $0xf4c] sm:$0x20] %vm13_vm0, %v979_v17   ;;  %994 = vst.msk [vmem:[#allocation2 + $0xf8b] sm:$0x40] %vm13_vm0, %v979_v17   ;;  %v3591_v35 = vld [vmem:[#allocation2 + $0x4d0] sm:$0x3] }
 0x168   :  { %996 = vst.msk [vmem:[#allocation2 + $0xfca] sm:$0x80] %vm13_vm0, %v979_v17   ;;  %961 = vst.msk [vmem:[#allocation2 + $0xc11] sm:$0x1] %vm13_vm0, %v958_v18   ;;  %v3639_v36 = vld [vmem:[#allocation2 + $0x510] sm:$0x3] }
 0x169   :  { %963 = vst.msk [vmem:[#allocation2 + $0xc50] sm:$0x2] %vm13_vm0, %v958_v18   ;;  %965 = vst.msk [vmem:[#allocation2 + $0xc8f] sm:$0x4] %vm13_vm0, %v958_v18   ;;  %v3735_v37 = vld [vmem:[#allocation2 + $0x590] sm:$0x3] }
 0x16a   :  { %967 = vst.msk [vmem:[#allocation2 + $0xcce] sm:$0x8] %vm13_vm0, %v958_v18   ;;  %969 = vst.msk [vmem:[#allocation2 + $0xd0d] sm:$0x10] %vm13_vm0, %v958_v18   ;;  %v3783_v38 = vld [vmem:[#allocation2 + $0x5d0] sm:$0x3] }
 0x16b   :  { %971 = vst.msk [vmem:[#allocation2 + $0xd4c] sm:$0x20] %vm13_vm0, %v958_v18   ;;  %973 = vst.msk [vmem:[#allocation2 + $0xd8b] sm:$0x40] %vm13_vm0, %v958_v18   ;;  %v3687_v39 = vld [vmem:[#allocation2 + $0x550] sm:$0x3] }
 0x16c   :  { %975 = vst.msk [vmem:[#allocation2 + $0xdca] sm:$0x80] %vm13_vm0, %v958_v18   ;;  %6306 = vst [vmem:[%s9697_s1 + $0x74] sm:$0x3] %v3015_v6  ;;  %v4599_v40 = vld [vmem:[#allocation2 + $0xa10] sm:$0x3]  ;;  %v1229_v18 = vpop.permute.xlu1 %1228   ;;  %v1208_v6 = vpop.permute.xlu0 %1207  }
 0x16d   :  { %6490 = vst [vmem:[%s9697_s1 + $0x1e4] sm:$0x3] %v4119_v7  ;;  %6442 = vst [vmem:[%s9697_s1 + $0x184] sm:$0x3] %v3831_v19  ;;  %v4647_v1 = vld [vmem:[#allocation2 + $0xa50] sm:$0x3] }
 0x16e   :  { %6450 = vst [vmem:[%s9697_s1 + $0x194] sm:$0x3] %v3879_v20  ;;  %6458 = vst [vmem:[%s9697_s1 + $0x1a4] sm:$0x3] %v3927_v21  ;;  %v4695_v3 = vld [vmem:[#allocation2 + $0xa90] sm:$0x3] }
 0x16f   :  { %6466 = vst [vmem:[%s9697_s1 + $0x1b4] sm:$0x3] %v3975_v22  ;;  %6474 = vst [vmem:[%s9697_s1 + $0x1c4] sm:$0x3] %v4023_v23  ;;  %v4743_v41 = vld [vmem:[#allocation2 + $0xad0] sm:$0x3] }
 0x170   :  { %6482 = vst [vmem:[%s9697_s1 + $0x1d4] sm:$0x3] %v4071_v24  ;;  %6498 = vst [vmem:[%s9697_s1 + $0x1f4] sm:$0x3] %v4167_v25  ;;  %v4791_v44 = vld [vmem:[#allocation2 + $0xb10] sm:$0x3]  ;;  %v1271_v23 = vpop.permute.xlu1 %1270   ;;  %v1250_v24 = vpop.permute.xlu0 %1249  }
 0x171   :  { %6378 = vst [vmem:[%s9697_s1 + $0x104] sm:$0x3] %v3447_v26  ;;  %6386 = vst [vmem:[%s9697_s1 + $0x114] sm:$0x3] %v3495_v27  ;;  %v4839_v45 = vld [vmem:[#allocation2 + $0xb50] sm:$0x3] }
 0x172   :  { %6394 = vst [vmem:[%s9697_s1 + $0x124] sm:$0x3] %v3543_v30  ;;  %1023 = vst.msk [vmem:[#allocation2 + $0x218] sm:$0x1] %vm13_vm0, %v1020_v31   ;;  %v4887_v46 = vld [vmem:[#allocation2 + $0xb90] sm:$0x3] }
 0x173   :  { %1025 = vst.msk [vmem:[#allocation2 + $0x257] sm:$0x2] %vm13_vm0, %v1020_v31   ;;  %1027 = vst.msk [vmem:[#allocation2 + $0x296] sm:$0x4] %vm13_vm0, %v1020_v31   ;;  %v4935_v49 = vld [vmem:[#allocation2 + $0xbd0] sm:$0x3] }
 0x174   :  { %1029 = vst.msk [vmem:[#allocation2 + $0x2d5] sm:$0x8] %vm13_vm0, %v1020_v31   ;;  %1031 = vst.msk [vmem:[#allocation2 + $0x314] sm:$0x10] %vm13_vm0, %v1020_v31   ;;  %v4215_v50 = vld [vmem:[#allocation2 + $0x810] sm:$0x3] }
 0x175   :  { %1033 = vst.msk [vmem:[#allocation2 + $0x353] sm:$0x20] %vm13_vm0, %v1020_v31   ;;  %1035 = vst.msk [vmem:[#allocation2 + $0x392] sm:$0x40] %vm13_vm0, %v1020_v31   ;;  %v4263_v51 = vld [vmem:[#allocation2 + $0x850] sm:$0x3] }
 0x176   :  { %1037 = vst.msk [vmem:[#allocation2 + $0x3d1] sm:$0x80] %vm13_vm0, %v1020_v31   ;;  %1002 = vst.msk [vmem:[#allocation2 + $0x18] sm:$0x1] %vm13_vm0, %v999_v34   ;;  %v4311_v52 = vld [vmem:[#allocation2 + $0x890] sm:$0x3] }
 0x177   :  { %1004 = vst.msk [vmem:[#allocation2 + $0x57] sm:$0x2] %vm13_vm0, %v999_v34   ;;  %1006 = vst.msk [vmem:[#allocation2 + $0x96] sm:$0x4] %vm13_vm0, %v999_v34   ;;  %v4359_v53 = vld [vmem:[#allocation2 + $0x8d0] sm:$0x3] }
 0x178   :  { %1008 = vst.msk [vmem:[#allocation2 + $0xd5] sm:$0x8] %vm13_vm0, %v999_v34   ;;  %1010 = vst.msk [vmem:[#allocation2 + $0x114] sm:$0x10] %vm13_vm0, %v999_v34   ;;  %v4407_v54 = vld [vmem:[#allocation2 + $0x910] sm:$0x3] }
 0x179   :  { %1012 = vst.msk [vmem:[#allocation2 + $0x153] sm:$0x20] %vm13_vm0, %v999_v34   ;;  %1014 = vst.msk [vmem:[#allocation2 + $0x192] sm:$0x40] %vm13_vm0, %v999_v34   ;;  %v4455_v28 = vld [vmem:[#allocation2 + $0x950] sm:$0x3] }
 0x17a   :  { %1016 = vst.msk [vmem:[#allocation2 + $0x1d1] sm:$0x80] %vm13_vm0, %v999_v34   ;;  %6402 = vst [vmem:[%s9697_s1 + $0x134] sm:$0x3] %v3591_v35  ;;  %v4503_v29 = vld [vmem:[#allocation2 + $0x990] sm:$0x3] }
 0x17b   :  { %6410 = vst [vmem:[%s9697_s1 + $0x144] sm:$0x3] %v3639_v36  ;;  %6426 = vst [vmem:[%s9697_s1 + $0x164] sm:$0x3] %v3735_v37  ;;  %v4551_v55 = vld [vmem:[#allocation2 + $0x9d0] sm:$0x3] }
 0x17c   :  { %6434 = vst [vmem:[%s9697_s1 + $0x174] sm:$0x3] %v3783_v38  ;;  %6418 = vst [vmem:[%s9697_s1 + $0x154] sm:$0x3] %v3687_v39  ;;  %v5367_v56 = vld [vmem:[#allocation2 + $0xe10] sm:$0x3] }
 0x17d   :  { %6570 = vst [vmem:[%s9697_s1 + $0x284] sm:$0x3] %v4599_v40  ;;  %6578 = vst [vmem:[%s9697_s1 + $0x294] sm:$0x3] %v4647_v1  ;;  %v5415_v57 = vld [vmem:[#allocation2 + $0xe50] sm:$0x3] }
 0x17e   :  { %6586 = vst [vmem:[%s9697_s1 + $0x2a4] sm:$0x3] %v4695_v3  ;;  %6594 = vst [vmem:[%s9697_s1 + $0x2b4] sm:$0x3] %v4743_v41  ;;  %v5463_v58 = vld [vmem:[#allocation2 + $0xe90] sm:$0x3]  ;;  %v1313_v41 = vpop.permute.xlu1 %1312  }
 0x17f   :  { %6602 = vst [vmem:[%s9697_s1 + $0x2c4] sm:$0x3] %v4791_v44  ;;  %6610 = vst [vmem:[%s9697_s1 + $0x2d4] sm:$0x3] %v4839_v45  ;;  %v5559_v61 = vld [vmem:[#allocation2 + $0xf10] sm:$0x3]  ;;  %v1292_v44 = vpop.permute.xlu0 %1291  }
 0x180   :  { %6618 = vst [vmem:[%s9697_s1 + $0x2e4] sm:$0x3] %v4887_v46  ;;  %1065 = vst.msk [vmem:[#allocation2 + $0x618] sm:$0x1] %vm13_vm0, %v1062_v47   ;;  %v5607_v62 = vld [vmem:[#allocation2 + $0xf50] sm:$0x3] }
 0x181   :  { %1067 = vst.msk [vmem:[#allocation2 + $0x657] sm:$0x2] %vm13_vm0, %v1062_v47   ;;  %1069 = vst.msk [vmem:[#allocation2 + $0x696] sm:$0x4] %vm13_vm0, %v1062_v47   ;;  %v5511_v63 = vld [vmem:[#allocation2 + $0xed0] sm:$0x3] }
 0x182   :  { %1071 = vst.msk [vmem:[#allocation2 + $0x6d5] sm:$0x8] %vm13_vm0, %v1062_v47   ;;  %1073 = vst.msk [vmem:[#allocation2 + $0x714] sm:$0x10] %vm13_vm0, %v1062_v47   ;;  %v5655_v0 = vld [vmem:[#allocation2 + $0xf90] sm:$0x3] }
 0x183   :  { %1075 = vst.msk [vmem:[#allocation2 + $0x753] sm:$0x20] %vm13_vm0, %v1062_v47   ;;  %1077 = vst.msk [vmem:[#allocation2 + $0x792] sm:$0x40] %vm13_vm0, %v1062_v47   ;;  %v5703_v2 = vld [vmem:[#allocation2 + $0xfd0] sm:$0x3] }
 0x184   :  { %1079 = vst.msk [vmem:[#allocation2 + $0x7d1] sm:$0x80] %vm13_vm0, %v1062_v47   ;;  %1044 = vst.msk [vmem:[#allocation2 + $0x418] sm:$0x1] %vm13_vm0, %v1041_v48   ;;  %v5319_v4 = vld [vmem:[#allocation2 + $0xdd0] sm:$0x3] }
 0x185   :  { %1046 = vst.msk [vmem:[#allocation2 + $0x457] sm:$0x2] %vm13_vm0, %v1041_v48   ;;  %1048 = vst.msk [vmem:[#allocation2 + $0x496] sm:$0x4] %vm13_vm0, %v1041_v48   ;;  %v4983_v32 = vld [vmem:[#allocation2 + $0xc10] sm:$0x3] }
 0x186   :  { %1050 = vst.msk [vmem:[#allocation2 + $0x4d5] sm:$0x8] %vm13_vm0, %v1041_v48   ;;  %1052 = vst.msk [vmem:[#allocation2 + $0x514] sm:$0x10] %vm13_vm0, %v1041_v48   ;;  %v5031_v33 = vld [vmem:[#allocation2 + $0xc50] sm:$0x3] }
 0x187   :  { %1054 = vst.msk [vmem:[#allocation2 + $0x553] sm:$0x20] %vm13_vm0, %v1041_v48   ;;  %1056 = vst.msk [vmem:[#allocation2 + $0x592] sm:$0x40] %vm13_vm0, %v1041_v48   ;;  %v5079_v5 = vld [vmem:[#allocation2 + $0xc90] sm:$0x3] }
 0x188   :  { %1058 = vst.msk [vmem:[#allocation2 + $0x5d1] sm:$0x80] %vm13_vm0, %v1041_v48   ;;  %6626 = vst [vmem:[%s9697_s1 + $0x2f4] sm:$0x3] %v4935_v49  ;;  %v5127_v8 = vld [vmem:[#allocation2 + $0xcd0] sm:$0x3] }
 0x189   :  { %6506 = vst [vmem:[%s9697_s1 + $0x204] sm:$0x3] %v4215_v50  ;;  %6514 = vst [vmem:[%s9697_s1 + $0x214] sm:$0x3] %v4263_v51  ;;  %v5175_v9 = vld [vmem:[#allocation2 + $0xd10] sm:$0x3] }
 0x18a   :  { %6522 = vst [vmem:[%s9697_s1 + $0x224] sm:$0x3] %v4311_v52  ;;  %6530 = vst [vmem:[%s9697_s1 + $0x234] sm:$0x3] %v4359_v53  ;;  %v5223_v10 = vld [vmem:[#allocation2 + $0xd50] sm:$0x3] }
 0x18b   :  { %6538 = vst [vmem:[%s9697_s1 + $0x244] sm:$0x3] %v4407_v54  ;;  %6546 = vst [vmem:[%s9697_s1 + $0x254] sm:$0x3] %v4455_v28  ;;  %v5271_v13 = vld [vmem:[#allocation2 + $0xd90] sm:$0x3] }
 0x18c   :  { %6554 = vst [vmem:[%s9697_s1 + $0x264] sm:$0x3] %v4503_v29  ;;  %6562 = vst [vmem:[%s9697_s1 + $0x274] sm:$0x3] %v4551_v55  ;;  %v8146_v16 = vld [vmem:[#allocation0 + $0x28] sm:$0xff]   ;;  %v8148_v17 = vld [vmem:[#allocation0 + $0x20] sm:$0xff]   ;;  %v1354_v55 = vpop.permute.xlu1 %1353  }
 0x18d   :  { %6698 = vst [vmem:[%s9697_s1 + $0x384] sm:$0x3] %v5367_v56  ;;  %6706 = vst [vmem:[%s9697_s1 + $0x394] sm:$0x3] %v5415_v57  ;;  %2439 = vrot.lane.b32.xlu1 %v8146_v16, %s6814_s28  ;;  %2418 = vrot.lane.b32.xlu0 %v8148_v17, %s6814_s28  ;;  %v8170_v7 = vld [vmem:[#allocation0 + $0x38] sm:$0xff]   ;;  %v8172_v19 = vld [vmem:[#allocation0 + $0x30] sm:$0xff]   ;;  %v1333_v56 = vpop.permute.xlu0 %1332  }
 0x18e   :  { %6714 = vst [vmem:[%s9697_s1 + $0x3a4] sm:$0x3] %v5463_v58  ;;  %1107 = vst.msk [vmem:[#allocation2 + $0xa18] sm:$0x1] %vm13_vm0, %v1104_v59   ;;  %v2521_v30 = vld [vmem:[#allocation0 + $0x8] sm:$0xff]   ;;  %v2500_v31 = vld [vmem:[#allocation0] sm:$0xff]  }
 0x18f   :  { %1109 = vst.msk [vmem:[#allocation2 + $0xa57] sm:$0x2] %vm13_vm0, %v1104_v59   ;;  %1111 = vst.msk [vmem:[#allocation2 + $0xa96] sm:$0x4] %vm13_vm0, %v1104_v59  }
 0x190   :  { %1113 = vst.msk [vmem:[#allocation2 + $0xad5] sm:$0x8] %vm13_vm0, %v1104_v59   ;;  %1115 = vst.msk [vmem:[#allocation2 + $0xb14] sm:$0x10] %vm13_vm0, %v1104_v59  }
 0x191   :  { %1117 = vst.msk [vmem:[#allocation2 + $0xb53] sm:$0x20] %vm13_vm0, %v1104_v59   ;;  %1119 = vst.msk [vmem:[#allocation2 + $0xb92] sm:$0x40] %vm13_vm0, %v1104_v59   ;;  %2481 = vrot.lane.b32.xlu1 %v8170_v7, %s6814_s28  ;;  %2460 = vrot.lane.b32.xlu0 %v8172_v19, %s6814_s28 }
 0x192   :  { %1121 = vst.msk [vmem:[#allocation2 + $0xbd1] sm:$0x80] %vm13_vm0, %v1104_v59   ;;  %1086 = vst.msk [vmem:[#allocation2 + $0x818] sm:$0x1] %vm13_vm0, %v1083_v60  }
 0x193   :  { %1088 = vst.msk [vmem:[#allocation2 + $0x857] sm:$0x2] %vm13_vm0, %v1083_v60   ;;  %1090 = vst.msk [vmem:[#allocation2 + $0x896] sm:$0x4] %vm13_vm0, %v1083_v60  }
 0x194   :  { %1092 = vst.msk [vmem:[#allocation2 + $0x8d5] sm:$0x8] %vm13_vm0, %v1083_v60   ;;  %1094 = vst.msk [vmem:[#allocation2 + $0x914] sm:$0x10] %vm13_vm0, %v1083_v60  }
 0x195   :  { %1096 = vst.msk [vmem:[#allocation2 + $0x953] sm:$0x20] %vm13_vm0, %v1083_v60   ;;  %1098 = vst.msk [vmem:[#allocation2 + $0x992] sm:$0x40] %vm13_vm0, %v1083_v60   ;;  %2522 = vrot.lane.b32.xlu1 %v2521_v30, %s6815_s7  ;;  %2501 = vrot.lane.b32.xlu0 %v2500_v31, %s6815_s7 }
 0x196   :  { %1100 = vst.msk [vmem:[#allocation2 + $0x9d1] sm:$0x80] %vm13_vm0, %v1083_v60   ;;  %6730 = vst [vmem:[%s9697_s1 + $0x3c4] sm:$0x3] %v5559_v61 }
 0x197   :  { %6738 = vst [vmem:[%s9697_s1 + $0x3d4] sm:$0x3] %v5607_v62  ;;  %6722 = vst [vmem:[%s9697_s1 + $0x3b4] sm:$0x3] %v5511_v63 }
 0x198   :  { %6690 = vst [vmem:[%s9697_s1 + $0x374] sm:$0x3] %v5319_v4  ;;  %6746 = vst [vmem:[%s9697_s1 + $0x3e4] sm:$0x3] %v5655_v0 }
 0x199   :  { %6754 = vst [vmem:[%s9697_s1 + $0x3f4] sm:$0x3] %v5703_v2  ;;  %6634 = vst [vmem:[%s9697_s1 + $0x304] sm:$0x3] %v4983_v32  ;;  %2564 = vrot.lane.b32.xlu1 %v8122_v42, %s6815_s7  ;;  %2543 = vrot.lane.b32.xlu0 %v8124_v43, %s6815_s7 }
 0x19a   :  { %6642 = vst [vmem:[%s9697_s1 + $0x314] sm:$0x3] %v5031_v33  ;;  %6650 = vst [vmem:[%s9697_s1 + $0x324] sm:$0x3] %v5079_v5  ;;  %v1396_v5 = vpop.permute.xlu1 %1395  }
 0x19b   :  { %6658 = vst [vmem:[%s9697_s1 + $0x334] sm:$0x3] %v5127_v8  ;;  %6666 = vst [vmem:[%s9697_s1 + $0x344] sm:$0x3] %v5175_v9  ;;  %v1375_v8 = vpop.permute.xlu0 %1374  }
 0x19c   :  { %6674 = vst [vmem:[%s9697_s1 + $0x354] sm:$0x3] %v5223_v10  ;;  %1149 = vst.msk [vmem:[#allocation2 + $0xe18] sm:$0x1] %vm13_vm0, %v1146_v11  }
 0x19d   :  { %1151 = vst.msk [vmem:[#allocation2 + $0xe57] sm:$0x2] %vm13_vm0, %v1146_v11   ;;  %1153 = vst.msk [vmem:[#allocation2 + $0xe96] sm:$0x4] %vm13_vm0, %v1146_v11   ;;  %2606 = vrot.lane.b32.xlu1 %v8146_v16, %s6815_s7  ;;  %2585 = vrot.lane.b32.xlu0 %v8148_v17, %s6815_s7 }
 0x19e   :  { %1155 = vst.msk [vmem:[#allocation2 + $0xed5] sm:$0x8] %vm13_vm0, %v1146_v11   ;;  %1157 = vst.msk [vmem:[#allocation2 + $0xf14] sm:$0x10] %vm13_vm0, %v1146_v11  }
 0x19f   :  { %1159 = vst.msk [vmem:[#allocation2 + $0xf53] sm:$0x20] %vm13_vm0, %v1146_v11   ;;  %1161 = vst.msk [vmem:[#allocation2 + $0xf92] sm:$0x40] %vm13_vm0, %v1146_v11  }
 0x1a0   :  { %1163 = vst.msk [vmem:[#allocation2 + $0xfd1] sm:$0x80] %vm13_vm0, %v1146_v11   ;;  %1128 = vst.msk [vmem:[#allocation2 + $0xc18] sm:$0x1] %vm13_vm0, %v1125_v12  }
 0x1a1   :  { %1130 = vst.msk [vmem:[#allocation2 + $0xc57] sm:$0x2] %vm13_vm0, %v1125_v12   ;;  %1132 = vst.msk [vmem:[#allocation2 + $0xc96] sm:$0x4] %vm13_vm0, %v1125_v12   ;;  %2648 = vrot.lane.b32.xlu1 %v8170_v7, %s6815_s7  ;;  %2627 = vrot.lane.b32.xlu0 %v8172_v19, %s6815_s7 }
 0x1a2   :  { %1134 = vst.msk [vmem:[#allocation2 + $0xcd5] sm:$0x8] %vm13_vm0, %v1125_v12   ;;  %1136 = vst.msk [vmem:[#allocation2 + $0xd14] sm:$0x10] %vm13_vm0, %v1125_v12  }
 0x1a3   :  { %1138 = vst.msk [vmem:[#allocation2 + $0xd53] sm:$0x20] %vm13_vm0, %v1125_v12   ;;  %1140 = vst.msk [vmem:[#allocation2 + $0xd92] sm:$0x40] %vm13_vm0, %v1125_v12  }
 0x1a4   :  { %1142 = vst.msk [vmem:[#allocation2 + $0xdd1] sm:$0x80] %vm13_vm0, %v1125_v12   ;;  %6682 = vst [vmem:[%s9697_s1 + $0x364] sm:$0x3] %v5271_v13 }
 0x1a5   :  { %1190 = vst.msk [vmem:[#allocation2 + $0x219] sm:$0x1] %vm13_vm0, %v1187_v14   ;;  %1192 = vst.msk [vmem:[#allocation2 + $0x258] sm:$0x2] %vm13_vm0, %v1187_v14  }
 0x1a6   :  { %1194 = vst.msk [vmem:[#allocation2 + $0x297] sm:$0x4] %vm13_vm0, %v1187_v14   ;;  %1196 = vst.msk [vmem:[#allocation2 + $0x2d6] sm:$0x8] %vm13_vm0, %v1187_v14  }
 0x1a7   :  { %1198 = vst.msk [vmem:[#allocation2 + $0x315] sm:$0x10] %vm13_vm0, %v1187_v14   ;;  %1200 = vst.msk [vmem:[#allocation2 + $0x354] sm:$0x20] %vm13_vm0, %v1187_v14  }
 0x1a8   :  { %1202 = vst.msk [vmem:[#allocation2 + $0x393] sm:$0x40] %vm13_vm0, %v1187_v14   ;;  %1204 = vst.msk [vmem:[#allocation2 + $0x3d2] sm:$0x80] %vm13_vm0, %v1187_v14  }
 0x1a9   :  { %1169 = vst.msk [vmem:[#allocation2 + $0x19] sm:$0x1] %vm13_vm0, %v1166_v15   ;;  %1171 = vst.msk [vmem:[#allocation2 + $0x58] sm:$0x2] %vm13_vm0, %v1166_v15  }
 0x1aa   :  { %1173 = vst.msk [vmem:[#allocation2 + $0x97] sm:$0x4] %vm13_vm0, %v1166_v15   ;;  %1175 = vst.msk [vmem:[#allocation2 + $0xd6] sm:$0x8] %vm13_vm0, %v1166_v15  }
 0x1ab   :  { %1177 = vst.msk [vmem:[#allocation2 + $0x115] sm:$0x10] %vm13_vm0, %v1166_v15   ;;  %1179 = vst.msk [vmem:[#allocation2 + $0x154] sm:$0x20] %vm13_vm0, %v1166_v15  }
 0x1ac   :  { %1181 = vst.msk [vmem:[#allocation2 + $0x193] sm:$0x40] %vm13_vm0, %v1166_v15   ;;  %1183 = vst.msk [vmem:[#allocation2 + $0x1d2] sm:$0x80] %vm13_vm0, %v1166_v15   ;;  %v3069_v20 = vld [vmem:[#allocation2 + $0x218] sm:$0x3] }
 0x1ad   :  { %1232 = vst.msk [vmem:[#allocation2 + $0x619] sm:$0x1] %vm13_vm0, %v1229_v18   ;;  %1234 = vst.msk [vmem:[#allocation2 + $0x658] sm:$0x2] %vm13_vm0, %v1229_v18   ;;  %v3117_v21 = vld [vmem:[#allocation2 + $0x258] sm:$0x3] }
 0x1ae   :  { %1236 = vst.msk [vmem:[#allocation2 + $0x697] sm:$0x4] %vm13_vm0, %v1229_v18   ;;  %1238 = vst.msk [vmem:[#allocation2 + $0x6d6] sm:$0x8] %vm13_vm0, %v1229_v18   ;;  %v3165_v22 = vld [vmem:[#allocation2 + $0x298] sm:$0x3] }
 0x1af   :  { %1240 = vst.msk [vmem:[#allocation2 + $0x715] sm:$0x10] %vm13_vm0, %v1229_v18   ;;  %1242 = vst.msk [vmem:[#allocation2 + $0x754] sm:$0x20] %vm13_vm0, %v1229_v18   ;;  %v3213_v25 = vld [vmem:[#allocation2 + $0x2d8] sm:$0x3] }
 0x1b0   :  { %1244 = vst.msk [vmem:[#allocation2 + $0x793] sm:$0x40] %vm13_vm0, %v1229_v18   ;;  %1246 = vst.msk [vmem:[#allocation2 + $0x7d2] sm:$0x80] %vm13_vm0, %v1229_v18   ;;  %v3261_v26 = vld [vmem:[#allocation2 + $0x318] sm:$0x3] }
 0x1b1   :  { %1211 = vst.msk [vmem:[#allocation2 + $0x419] sm:$0x1] %vm13_vm0, %v1208_v6   ;;  %1213 = vst.msk [vmem:[#allocation2 + $0x458] sm:$0x2] %vm13_vm0, %v1208_v6   ;;  %v3309_v27 = vld [vmem:[#allocation2 + $0x358] sm:$0x3] }
 0x1b2   :  { %1215 = vst.msk [vmem:[#allocation2 + $0x497] sm:$0x4] %vm13_vm0, %v1208_v6   ;;  %1217 = vst.msk [vmem:[#allocation2 + $0x4d6] sm:$0x8] %vm13_vm0, %v1208_v6   ;;  %v3357_v34 = vld [vmem:[#allocation2 + $0x398] sm:$0x3] }
 0x1b3   :  { %1219 = vst.msk [vmem:[#allocation2 + $0x515] sm:$0x10] %vm13_vm0, %v1208_v6   ;;  %1221 = vst.msk [vmem:[#allocation2 + $0x554] sm:$0x20] %vm13_vm0, %v1208_v6   ;;  %v3405_v35 = vld [vmem:[#allocation2 + $0x3d8] sm:$0x3] }
 0x1b4   :  { %1223 = vst.msk [vmem:[#allocation2 + $0x593] sm:$0x40] %vm13_vm0, %v1208_v6   ;;  %1225 = vst.msk [vmem:[#allocation2 + $0x5d2] sm:$0x80] %vm13_vm0, %v1208_v6   ;;  %v3021_v36 = vld [vmem:[#allocation2 + $0x1d8] sm:$0x3]  ;;  %v1438_v6 = vpop.permute.xlu1 %1437  }
 0x1b5   :  { %6315 = vst [vmem:[%s9697_s1 + $0x86] sm:$0x3] %v3069_v20  ;;  %6323 = vst [vmem:[%s9697_s1 + $0x96] sm:$0x3] %v3117_v21  ;;  %v2685_v37 = vld [vmem:[#allocation2 + $0x18] sm:$0x3]  ;;  %v1417_v20 = vpop.permute.xlu0 %1416  }
 0x1b6   :  { %6331 = vst [vmem:[%s9697_s1 + $0xa6] sm:$0x3] %v3165_v22  ;;  %1274 = vst.msk [vmem:[#allocation2 + $0xa19] sm:$0x1] %vm13_vm0, %v1271_v23   ;;  %v2733_v38 = vld [vmem:[#allocation2 + $0x58] sm:$0x3] }
 0x1b7   :  { %1276 = vst.msk [vmem:[#allocation2 + $0xa58] sm:$0x2] %vm13_vm0, %v1271_v23   ;;  %1278 = vst.msk [vmem:[#allocation2 + $0xa97] sm:$0x4] %vm13_vm0, %v1271_v23   ;;  %v2781_v39 = vld [vmem:[#allocation2 + $0x98] sm:$0x3] }
 0x1b8   :  { %1280 = vst.msk [vmem:[#allocation2 + $0xad6] sm:$0x8] %vm13_vm0, %v1271_v23   ;;  %1282 = vst.msk [vmem:[#allocation2 + $0xb15] sm:$0x10] %vm13_vm0, %v1271_v23   ;;  %v2829_v40 = vld [vmem:[#allocation2 + $0xd8] sm:$0x3] }
 0x1b9   :  { %1284 = vst.msk [vmem:[#allocation2 + $0xb54] sm:$0x20] %vm13_vm0, %v1271_v23   ;;  %1286 = vst.msk [vmem:[#allocation2 + $0xb93] sm:$0x40] %vm13_vm0, %v1271_v23   ;;  %v2877_v1 = vld [vmem:[#allocation2 + $0x118] sm:$0x3] }
 0x1ba   :  { %1288 = vst.msk [vmem:[#allocation2 + $0xbd2] sm:$0x80] %vm13_vm0, %v1271_v23   ;;  %1253 = vst.msk [vmem:[#allocation2 + $0x819] sm:$0x1] %vm13_vm0, %v1250_v24   ;;  %v2925_v3 = vld [vmem:[#allocation2 + $0x158] sm:$0x3] }
 0x1bb   :  { %1255 = vst.msk [vmem:[#allocation2 + $0x858] sm:$0x2] %vm13_vm0, %v1250_v24   ;;  %1257 = vst.msk [vmem:[#allocation2 + $0x897] sm:$0x4] %vm13_vm0, %v1250_v24   ;;  %v2973_v45 = vld [vmem:[#allocation2 + $0x198] sm:$0x3] }
 0x1bc   :  { %1259 = vst.msk [vmem:[#allocation2 + $0x8d6] sm:$0x8] %vm13_vm0, %v1250_v24   ;;  %1261 = vst.msk [vmem:[#allocation2 + $0x915] sm:$0x10] %vm13_vm0, %v1250_v24   ;;  %v4077_v46 = vld [vmem:[#allocation2 + $0x758] sm:$0x3] }
 0x1bd   :  { %1263 = vst.msk [vmem:[#allocation2 + $0x954] sm:$0x20] %vm13_vm0, %v1250_v24   ;;  %1265 = vst.msk [vmem:[#allocation2 + $0x993] sm:$0x40] %vm13_vm0, %v1250_v24   ;;  %v3837_v47 = vld [vmem:[#allocation2 + $0x618] sm:$0x3] }
 0x1be   :  { %1267 = vst.msk [vmem:[#allocation2 + $0x9d2] sm:$0x80] %vm13_vm0, %v1250_v24   ;;  %6339 = vst [vmem:[%s9697_s1 + $0xb6] sm:$0x3] %v3213_v25  ;;  %v3885_v48 = vld [vmem:[#allocation2 + $0x658] sm:$0x3] }
 0x1bf   :  { %6347 = vst [vmem:[%s9697_s1 + $0xc6] sm:$0x3] %v3261_v26  ;;  %6355 = vst [vmem:[%s9697_s1 + $0xd6] sm:$0x3] %v3309_v27  ;;  %v3933_v49 = vld [vmem:[#allocation2 + $0x698] sm:$0x3] }
 0x1c0   :  { %6307 = vst [vmem:[%s9697_s1 + $0x76] sm:$0x3] %v3021_v36  ;;  %6363 = vst [vmem:[%s9697_s1 + $0xe6] sm:$0x3] %v3357_v34  ;;  %v3981_v50 = vld [vmem:[#allocation2 + $0x6d8] sm:$0x3]  ;;  %v1459_v36 = vpop.permute.xlu0 %1458  }
 0x1c1   :  { %6371 = vst [vmem:[%s9697_s1 + $0xf6] sm:$0x3] %v3405_v35  ;;  %6251 = vst [vmem:[%s9697_s1 + $0x6] sm:$0x3] %v2685_v37  ;;  %v4029_v51 = vld [vmem:[#allocation2 + $0x718] sm:$0x3]  ;;  %v1480_v35 = vpop.permute.xlu1 %1479  }
 0x1c2   :  { %6259 = vst [vmem:[%s9697_s1 + $0x16] sm:$0x3] %v2733_v38  ;;  %6267 = vst [vmem:[%s9697_s1 + $0x26] sm:$0x3] %v2781_v39  ;;  %v4125_v52 = vld [vmem:[#allocation2 + $0x798] sm:$0x3] }
 0x1c3   :  { %6275 = vst [vmem:[%s9697_s1 + $0x36] sm:$0x3] %v2829_v40  ;;  %6283 = vst [vmem:[%s9697_s1 + $0x46] sm:$0x3] %v2877_v1  ;;  %v4173_v53 = vld [vmem:[#allocation2 + $0x7d8] sm:$0x3] }
 0x1c4   :  { %6291 = vst [vmem:[%s9697_s1 + $0x56] sm:$0x3] %v2925_v3  ;;  %1316 = vst.msk [vmem:[#allocation2 + $0xe19] sm:$0x1] %vm13_vm0, %v1313_v41   ;;  %v3453_v54 = vld [vmem:[#allocation2 + $0x418] sm:$0x3]  ;;  %v1500_v39 = vpop.permute.xlu0 %1499  }
 0x1c5   :  { %1318 = vst.msk [vmem:[#allocation2 + $0xe58] sm:$0x2] %vm13_vm0, %v1313_v41   ;;  %1320 = vst.msk [vmem:[#allocation2 + $0xe97] sm:$0x4] %vm13_vm0, %v1313_v41   ;;  %v3501_v28 = vld [vmem:[#allocation2 + $0x458] sm:$0x3]  ;;  %v1521_v38 = vpop.permute.xlu1 %1520  }
 0x1c6   :  { %1322 = vst.msk [vmem:[#allocation2 + $0xed6] sm:$0x8] %vm13_vm0, %v1313_v41   ;;  %1324 = vst.msk [vmem:[#allocation2 + $0xf15] sm:$0x10] %vm13_vm0, %v1313_v41   ;;  %v3549_v29 = vld [vmem:[#allocation2 + $0x498] sm:$0x3] }
 0x1c7   :  { %1326 = vst.msk [vmem:[#allocation2 + $0xf54] sm:$0x20] %vm13_vm0, %v1313_v41   ;;  %1328 = vst.msk [vmem:[#allocation2 + $0xf93] sm:$0x40] %vm13_vm0, %v1313_v41   ;;  %v3597_v57 = vld [vmem:[#allocation2 + $0x4d8] sm:$0x3] }
 0x1c8   :  { %1330 = vst.msk [vmem:[#allocation2 + $0xfd2] sm:$0x80] %vm13_vm0, %v1313_v41   ;;  %1295 = vst.msk [vmem:[#allocation2 + $0xc19] sm:$0x1] %vm13_vm0, %v1292_v44   ;;  %v3645_v58 = vld [vmem:[#allocation2 + $0x518] sm:$0x3]  ;;  %v1542_v1 = vpop.permute.xlu0 %1541  }
 0x1c9   :  { %1297 = vst.msk [vmem:[#allocation2 + $0xc58] sm:$0x2] %vm13_vm0, %v1292_v44   ;;  %1299 = vst.msk [vmem:[#allocation2 + $0xc97] sm:$0x4] %vm13_vm0, %v1292_v44   ;;  %v3693_v59 = vld [vmem:[#allocation2 + $0x558] sm:$0x3]  ;;  %v1563_v40 = vpop.permute.xlu1 %1562  }
 0x1ca   :  { %1301 = vst.msk [vmem:[#allocation2 + $0xcd6] sm:$0x8] %vm13_vm0, %v1292_v44   ;;  %1303 = vst.msk [vmem:[#allocation2 + $0xd15] sm:$0x10] %vm13_vm0, %v1292_v44   ;;  %v3741_v60 = vld [vmem:[#allocation2 + $0x598] sm:$0x3] }
 0x1cb   :  { %1305 = vst.msk [vmem:[#allocation2 + $0xd54] sm:$0x20] %vm13_vm0, %v1292_v44   ;;  %1307 = vst.msk [vmem:[#allocation2 + $0xd93] sm:$0x40] %vm13_vm0, %v1292_v44   ;;  %v3789_v61 = vld [vmem:[#allocation2 + $0x5d8] sm:$0x3] }
 0x1cc   :  { %1309 = vst.msk [vmem:[#allocation2 + $0xdd2] sm:$0x80] %vm13_vm0, %v1292_v44   ;;  %6299 = vst [vmem:[%s9697_s1 + $0x66] sm:$0x3] %v2973_v45  ;;  %v4605_v62 = vld [vmem:[#allocation2 + $0xa18] sm:$0x3] }
 0x1cd   :  { %6483 = vst [vmem:[%s9697_s1 + $0x1d6] sm:$0x3] %v4077_v46  ;;  %6443 = vst [vmem:[%s9697_s1 + $0x186] sm:$0x3] %v3837_v47  ;;  %v4653_v63 = vld [vmem:[#allocation2 + $0xa58] sm:$0x3]  ;;  %v1605_v45 = vpop.permute.xlu1 %1604   ;;  %v1584_v46 = vpop.permute.xlu0 %1583  }
 0x1ce   :  { %6451 = vst [vmem:[%s9697_s1 + $0x196] sm:$0x3] %v3885_v48  ;;  %6459 = vst [vmem:[%s9697_s1 + $0x1a6] sm:$0x3] %v3933_v49  ;;  %v4701_v0 = vld [vmem:[#allocation2 + $0xa98] sm:$0x3] }
 0x1cf   :  { %6467 = vst [vmem:[%s9697_s1 + $0x1b6] sm:$0x3] %v3981_v50  ;;  %6475 = vst [vmem:[%s9697_s1 + $0x1c6] sm:$0x3] %v4029_v51  ;;  %v4749_v2 = vld [vmem:[#allocation2 + $0xad8] sm:$0x3] }
 0x1d0   :  { %6491 = vst [vmem:[%s9697_s1 + $0x1e6] sm:$0x3] %v4125_v52  ;;  %6499 = vst [vmem:[%s9697_s1 + $0x1f6] sm:$0x3] %v4173_v53  ;;  %v4797_v4 = vld [vmem:[#allocation2 + $0xb18] sm:$0x3] }
 0x1d1   :  { %6379 = vst [vmem:[%s9697_s1 + $0x106] sm:$0x3] %v3453_v54  ;;  %6387 = vst [vmem:[%s9697_s1 + $0x116] sm:$0x3] %v3501_v28  ;;  %v4845_v32 = vld [vmem:[#allocation2 + $0xb58] sm:$0x3] }
 0x1d2   :  { %6395 = vst [vmem:[%s9697_s1 + $0x126] sm:$0x3] %v3549_v29  ;;  %1357 = vst.msk [vmem:[#allocation2 + $0x220] sm:$0x1] %vm13_vm0, %v1354_v55   ;;  %v4893_v33 = vld [vmem:[#allocation2 + $0xb98] sm:$0x3] }
 0x1d3   :  { %1359 = vst.msk [vmem:[#allocation2 + $0x25f] sm:$0x2] %vm13_vm0, %v1354_v55   ;;  %1361 = vst.msk [vmem:[#allocation2 + $0x29e] sm:$0x4] %vm13_vm0, %v1354_v55   ;;  %v4941_v9 = vld [vmem:[#allocation2 + $0xbd8] sm:$0x3] }
 0x1d4   :  { %1363 = vst.msk [vmem:[#allocation2 + $0x2dd] sm:$0x8] %vm13_vm0, %v1354_v55   ;;  %1365 = vst.msk [vmem:[#allocation2 + $0x31c] sm:$0x10] %vm13_vm0, %v1354_v55   ;;  %v4221_v10 = vld [vmem:[#allocation2 + $0x818] sm:$0x3] }
 0x1d5   :  { %1367 = vst.msk [vmem:[#allocation2 + $0x35b] sm:$0x20] %vm13_vm0, %v1354_v55   ;;  %1369 = vst.msk [vmem:[#allocation2 + $0x39a] sm:$0x40] %vm13_vm0, %v1354_v55   ;;  %v4269_v11 = vld [vmem:[#allocation2 + $0x858] sm:$0x3] }
 0x1d6   :  { %1371 = vst.msk [vmem:[#allocation2 + $0x3d9] sm:$0x80] %vm13_vm0, %v1354_v55   ;;  %1336 = vst.msk [vmem:[#allocation2 + $0x20] sm:$0x1] %vm13_vm0, %v1333_v56   ;;  %v4317_v12 = vld [vmem:[#allocation2 + $0x898] sm:$0x3] }
 0x1d7   :  { %1338 = vst.msk [vmem:[#allocation2 + $0x5f] sm:$0x2] %vm13_vm0, %v1333_v56   ;;  %1340 = vst.msk [vmem:[#allocation2 + $0x9e] sm:$0x4] %vm13_vm0, %v1333_v56   ;;  %v4365_v13 = vld [vmem:[#allocation2 + $0x8d8] sm:$0x3] }
 0x1d8   :  { %1342 = vst.msk [vmem:[#allocation2 + $0xdd] sm:$0x8] %vm13_vm0, %v1333_v56   ;;  %1344 = vst.msk [vmem:[#allocation2 + $0x11c] sm:$0x10] %vm13_vm0, %v1333_v56   ;;  %v4413_v42 = vld [vmem:[#allocation2 + $0x918] sm:$0x3] }
 0x1d9   :  { %1346 = vst.msk [vmem:[#allocation2 + $0x15b] sm:$0x20] %vm13_vm0, %v1333_v56   ;;  %1348 = vst.msk [vmem:[#allocation2 + $0x19a] sm:$0x40] %vm13_vm0, %v1333_v56   ;;  %v4461_v43 = vld [vmem:[#allocation2 + $0x958] sm:$0x3] }
 0x1da   :  { %1350 = vst.msk [vmem:[#allocation2 + $0x1d9] sm:$0x80] %vm13_vm0, %v1333_v56   ;;  %6403 = vst [vmem:[%s9697_s1 + $0x136] sm:$0x3] %v3597_v57  ;;  %v4509_v14 = vld [vmem:[#allocation2 + $0x998] sm:$0x3]  ;;  %v1647_v57 = vpop.permute.xlu1 %1646  }
 0x1db   :  { %6411 = vst [vmem:[%s9697_s1 + $0x146] sm:$0x3] %v3645_v58  ;;  %6419 = vst [vmem:[%s9697_s1 + $0x156] sm:$0x3] %v3693_v59  ;;  %v4557_v15 = vld [vmem:[#allocation2 + $0x9d8] sm:$0x3]  ;;  %v1626_v58 = vpop.permute.xlu0 %1625  }
 0x1dc   :  { %6427 = vst [vmem:[%s9697_s1 + $0x166] sm:$0x3] %v3741_v60  ;;  %6435 = vst [vmem:[%s9697_s1 + $0x176] sm:$0x3] %v3789_v61  ;;  %v5709_v16 = vld [vmem:[#allocation2 + $0xfd8] sm:$0x3] }
 0x1dd   :  { %6571 = vst [vmem:[%s9697_s1 + $0x286] sm:$0x3] %v4605_v62  ;;  %6579 = vst [vmem:[%s9697_s1 + $0x296] sm:$0x3] %v4653_v63  ;;  %v5373_v17 = vld [vmem:[#allocation2 + $0xe18] sm:$0x3] }
 0x1de   :  { %6587 = vst [vmem:[%s9697_s1 + $0x2a6] sm:$0x3] %v4701_v0  ;;  %6595 = vst [vmem:[%s9697_s1 + $0x2b6] sm:$0x3] %v4749_v2  ;;  %v5421_v18 = vld [vmem:[#allocation2 + $0xe58] sm:$0x3] }
 0x1df   :  { %6603 = vst [vmem:[%s9697_s1 + $0x2c6] sm:$0x3] %v4797_v4  ;;  %6611 = vst [vmem:[%s9697_s1 + $0x2d6] sm:$0x3] %v4845_v32  ;;  %v5469_v21 = vld [vmem:[#allocation2 + $0xe98] sm:$0x3] }
 0x1e0   :  { %6619 = vst [vmem:[%s9697_s1 + $0x2e6] sm:$0x3] %v4893_v33  ;;  %1399 = vst.msk [vmem:[#allocation2 + $0x620] sm:$0x1] %vm13_vm0, %v1396_v5   ;;  %v5517_v22 = vld [vmem:[#allocation2 + $0xed8] sm:$0x3] }
 0x1e1   :  { %1401 = vst.msk [vmem:[#allocation2 + $0x65f] sm:$0x2] %vm13_vm0, %v1396_v5   ;;  %1403 = vst.msk [vmem:[#allocation2 + $0x69e] sm:$0x4] %vm13_vm0, %v1396_v5   ;;  %v5565_v23 = vld [vmem:[#allocation2 + $0xf18] sm:$0x3] }
 0x1e2   :  { %1405 = vst.msk [vmem:[#allocation2 + $0x6dd] sm:$0x8] %vm13_vm0, %v1396_v5   ;;  %1407 = vst.msk [vmem:[#allocation2 + $0x71c] sm:$0x10] %vm13_vm0, %v1396_v5   ;;  %v5613_v24 = vld [vmem:[#allocation2 + $0xf58] sm:$0x3] }
 0x1e3   :  { %1409 = vst.msk [vmem:[#allocation2 + $0x75b] sm:$0x20] %vm13_vm0, %v1396_v5   ;;  %1411 = vst.msk [vmem:[#allocation2 + $0x79a] sm:$0x40] %vm13_vm0, %v1396_v5   ;;  %v5661_v25 = vld [vmem:[#allocation2 + $0xf98] sm:$0x3] }
 0x1e4   :  { %1413 = vst.msk [vmem:[#allocation2 + $0x7d9] sm:$0x80] %vm13_vm0, %v1396_v5   ;;  %1378 = vst.msk [vmem:[#allocation2 + $0x420] sm:$0x1] %vm13_vm0, %v1375_v8   ;;  %v4989_v26 = vld [vmem:[#allocation2 + $0xc18] sm:$0x3] }
 0x1e5   :  { %1380 = vst.msk [vmem:[#allocation2 + $0x45f] sm:$0x2] %vm13_vm0, %v1375_v8   ;;  %1382 = vst.msk [vmem:[#allocation2 + $0x49e] sm:$0x4] %vm13_vm0, %v1375_v8   ;;  %v5037_v7 = vld [vmem:[#allocation2 + $0xc58] sm:$0x3] }
 0x1e6   :  { %1384 = vst.msk [vmem:[#allocation2 + $0x4dd] sm:$0x8] %vm13_vm0, %v1375_v8   ;;  %1386 = vst.msk [vmem:[#allocation2 + $0x51c] sm:$0x10] %vm13_vm0, %v1375_v8   ;;  %v5085_v19 = vld [vmem:[#allocation2 + $0xc98] sm:$0x3] }
 0x1e7   :  { %1388 = vst.msk [vmem:[#allocation2 + $0x55b] sm:$0x20] %vm13_vm0, %v1375_v8   ;;  %1390 = vst.msk [vmem:[#allocation2 + $0x59a] sm:$0x40] %vm13_vm0, %v1375_v8   ;;  %v5133_v27 = vld [vmem:[#allocation2 + $0xcd8] sm:$0x3] }
 0x1e8   :  { %1392 = vst.msk [vmem:[#allocation2 + $0x5d9] sm:$0x80] %vm13_vm0, %v1375_v8   ;;  %6507 = vst [vmem:[%s9697_s1 + $0x206] sm:$0x3] %v4221_v10  ;;  %v5181_v30 = vld [vmem:[#allocation2 + $0xd18] sm:$0x3]  ;;  %v1667_v10 = vpop.permute.xlu0 %1666  }
 0x1e9   :  { %6627 = vst [vmem:[%s9697_s1 + $0x2f6] sm:$0x3] %v4941_v9  ;;  %6515 = vst [vmem:[%s9697_s1 + $0x216] sm:$0x3] %v4269_v11  ;;  %v5229_v31 = vld [vmem:[#allocation2 + $0xd58] sm:$0x3]  ;;  %v1688_v9 = vpop.permute.xlu1 %1687  }
 0x1ea   :  { %6523 = vst [vmem:[%s9697_s1 + $0x226] sm:$0x3] %v4317_v12  ;;  %6531 = vst [vmem:[%s9697_s1 + $0x236] sm:$0x3] %v4365_v13  ;;  %v5277_v34 = vld [vmem:[#allocation2 + $0xd98] sm:$0x3] }
 0x1eb   :  { %6539 = vst [vmem:[%s9697_s1 + $0x246] sm:$0x3] %v4413_v42  ;;  %6547 = vst [vmem:[%s9697_s1 + $0x256] sm:$0x3] %v4461_v43  ;;  %v5325_v37 = vld [vmem:[#allocation2 + $0xdd8] sm:$0x3] }
 0x1ec   :  { %6555 = vst [vmem:[%s9697_s1 + $0x266] sm:$0x3] %v4509_v14  ;;  %6563 = vst [vmem:[%s9697_s1 + $0x276] sm:$0x3] %v4557_v15 }
 0x1ed   :  { %6755 = vst [vmem:[%s9697_s1 + $0x3f6] sm:$0x3] %v5709_v16  ;;  %6699 = vst [vmem:[%s9697_s1 + $0x386] sm:$0x3] %v5373_v17 }
 0x1ee   :  { %6707 = vst [vmem:[%s9697_s1 + $0x396] sm:$0x3] %v5421_v18  ;;  %1441 = vst.msk [vmem:[#allocation2 + $0xa20] sm:$0x1] %vm13_vm0, %v1438_v6  }
 0x1ef   :  { %1443 = vst.msk [vmem:[#allocation2 + $0xa5f] sm:$0x2] %vm13_vm0, %v1438_v6   ;;  %1445 = vst.msk [vmem:[#allocation2 + $0xa9e] sm:$0x4] %vm13_vm0, %v1438_v6  }
 0x1f0   :  { %1447 = vst.msk [vmem:[#allocation2 + $0xadd] sm:$0x8] %vm13_vm0, %v1438_v6   ;;  %1449 = vst.msk [vmem:[#allocation2 + $0xb1c] sm:$0x10] %vm13_vm0, %v1438_v6  }
 0x1f1   :  { %1451 = vst.msk [vmem:[#allocation2 + $0xb5b] sm:$0x20] %vm13_vm0, %v1438_v6   ;;  %1453 = vst.msk [vmem:[#allocation2 + $0xb9a] sm:$0x40] %vm13_vm0, %v1438_v6  }
 0x1f2   :  { %1455 = vst.msk [vmem:[#allocation2 + $0xbd9] sm:$0x80] %vm13_vm0, %v1438_v6   ;;  %1420 = vst.msk [vmem:[#allocation2 + $0x820] sm:$0x1] %vm13_vm0, %v1417_v20  }
 0x1f3   :  { %1422 = vst.msk [vmem:[#allocation2 + $0x85f] sm:$0x2] %vm13_vm0, %v1417_v20   ;;  %1424 = vst.msk [vmem:[#allocation2 + $0x89e] sm:$0x4] %vm13_vm0, %v1417_v20  }
 0x1f4   :  { %1426 = vst.msk [vmem:[#allocation2 + $0x8dd] sm:$0x8] %vm13_vm0, %v1417_v20   ;;  %1428 = vst.msk [vmem:[#allocation2 + $0x91c] sm:$0x10] %vm13_vm0, %v1417_v20  }
 0x1f5   :  { %1430 = vst.msk [vmem:[#allocation2 + $0x95b] sm:$0x20] %vm13_vm0, %v1417_v20   ;;  %1432 = vst.msk [vmem:[#allocation2 + $0x99a] sm:$0x40] %vm13_vm0, %v1417_v20  }
 0x1f6   :  { %1434 = vst.msk [vmem:[#allocation2 + $0x9d9] sm:$0x80] %vm13_vm0, %v1417_v20   ;;  %6715 = vst [vmem:[%s9697_s1 + $0x3a6] sm:$0x3] %v5469_v21  ;;  %v1730_v21 = vpop.permute.xlu1 %1729  }
 0x1f7   :  { %6723 = vst [vmem:[%s9697_s1 + $0x3b6] sm:$0x3] %v5517_v22  ;;  %6731 = vst [vmem:[%s9697_s1 + $0x3c6] sm:$0x3] %v5565_v23  ;;  %v1709_v22 = vpop.permute.xlu0 %1708  }
 0x1f8   :  { %6739 = vst [vmem:[%s9697_s1 + $0x3d6] sm:$0x3] %v5613_v24  ;;  %6747 = vst [vmem:[%s9697_s1 + $0x3e6] sm:$0x3] %v5661_v25 }
 0x1f9   :  { %6635 = vst [vmem:[%s9697_s1 + $0x306] sm:$0x3] %v4989_v26  ;;  %6643 = vst [vmem:[%s9697_s1 + $0x316] sm:$0x3] %v5037_v7 }
 0x1fa   :  { %6651 = vst [vmem:[%s9697_s1 + $0x326] sm:$0x3] %v5085_v19  ;;  %6659 = vst [vmem:[%s9697_s1 + $0x336] sm:$0x3] %v5133_v27 }
 0x1fb   :  { %6667 = vst [vmem:[%s9697_s1 + $0x346] sm:$0x3] %v5181_v30  ;;  %6675 = vst [vmem:[%s9697_s1 + $0x356] sm:$0x3] %v5229_v31 }
 0x1fc   :  { %6683 = vst [vmem:[%s9697_s1 + $0x366] sm:$0x3] %v5277_v34  ;;  %1483 = vst.msk [vmem:[#allocation2 + $0xe20] sm:$0x1] %vm13_vm0, %v1480_v35  }
 0x1fd   :  { %1485 = vst.msk [vmem:[#allocation2 + $0xe5f] sm:$0x2] %vm13_vm0, %v1480_v35   ;;  %1487 = vst.msk [vmem:[#allocation2 + $0xe9e] sm:$0x4] %vm13_vm0, %v1480_v35  }
 0x1fe   :  { %1489 = vst.msk [vmem:[#allocation2 + $0xedd] sm:$0x8] %vm13_vm0, %v1480_v35   ;;  %1491 = vst.msk [vmem:[#allocation2 + $0xf1c] sm:$0x10] %vm13_vm0, %v1480_v35  }
 0x1ff   :  { %1493 = vst.msk [vmem:[#allocation2 + $0xf5b] sm:$0x20] %vm13_vm0, %v1480_v35   ;;  %1495 = vst.msk [vmem:[#allocation2 + $0xf9a] sm:$0x40] %vm13_vm0, %v1480_v35  }
 0x200   :  { %1497 = vst.msk [vmem:[#allocation2 + $0xfd9] sm:$0x80] %vm13_vm0, %v1480_v35   ;;  %1462 = vst.msk [vmem:[#allocation2 + $0xc20] sm:$0x1] %vm13_vm0, %v1459_v36  }
 0x201   :  { %1464 = vst.msk [vmem:[#allocation2 + $0xc5f] sm:$0x2] %vm13_vm0, %v1459_v36   ;;  %1466 = vst.msk [vmem:[#allocation2 + $0xc9e] sm:$0x4] %vm13_vm0, %v1459_v36  }
 0x202   :  { %1468 = vst.msk [vmem:[#allocation2 + $0xcdd] sm:$0x8] %vm13_vm0, %v1459_v36   ;;  %1470 = vst.msk [vmem:[#allocation2 + $0xd1c] sm:$0x10] %vm13_vm0, %v1459_v36  }
 0x203   :  { %1472 = vst.msk [vmem:[#allocation2 + $0xd5b] sm:$0x20] %vm13_vm0, %v1459_v36   ;;  %1474 = vst.msk [vmem:[#allocation2 + $0xd9a] sm:$0x40] %vm13_vm0, %v1459_v36  }
 0x204   :  { %1476 = vst.msk [vmem:[#allocation2 + $0xdd9] sm:$0x80] %vm13_vm0, %v1459_v36   ;;  %6691 = vst [vmem:[%s9697_s1 + $0x376] sm:$0x3] %v5325_v37  ;;  %v1772_v37 = vpop.permute.xlu1 %1771  }
 0x205   :  { %1524 = vst.msk [vmem:[#allocation2 + $0x221] sm:$0x1] %vm13_vm0, %v1521_v38   ;;  %1526 = vst.msk [vmem:[#allocation2 + $0x260] sm:$0x2] %vm13_vm0, %v1521_v38  }
 0x206   :  { %1528 = vst.msk [vmem:[#allocation2 + $0x29f] sm:$0x4] %vm13_vm0, %v1521_v38   ;;  %1530 = vst.msk [vmem:[#allocation2 + $0x2de] sm:$0x8] %vm13_vm0, %v1521_v38  }
 0x207   :  { %1532 = vst.msk [vmem:[#allocation2 + $0x31d] sm:$0x10] %vm13_vm0, %v1521_v38   ;;  %1534 = vst.msk [vmem:[#allocation2 + $0x35c] sm:$0x20] %vm13_vm0, %v1521_v38  }
 0x208   :  { %1536 = vst.msk [vmem:[#allocation2 + $0x39b] sm:$0x40] %vm13_vm0, %v1521_v38   ;;  %1538 = vst.msk [vmem:[#allocation2 + $0x3da] sm:$0x80] %vm13_vm0, %v1521_v38   ;;  %v1751_v38 = vpop.permute.xlu0 %1750  }
 0x209   :  { %1503 = vst.msk [vmem:[#allocation2 + $0x21] sm:$0x1] %vm13_vm0, %v1500_v39   ;;  %1505 = vst.msk [vmem:[#allocation2 + $0x60] sm:$0x2] %vm13_vm0, %v1500_v39  }
 0x20a   :  { %1507 = vst.msk [vmem:[#allocation2 + $0x9f] sm:$0x4] %vm13_vm0, %v1500_v39   ;;  %1509 = vst.msk [vmem:[#allocation2 + $0xde] sm:$0x8] %vm13_vm0, %v1500_v39  }
 0x20b   :  { %1511 = vst.msk [vmem:[#allocation2 + $0x11d] sm:$0x10] %vm13_vm0, %v1500_v39   ;;  %1513 = vst.msk [vmem:[#allocation2 + $0x15c] sm:$0x20] %vm13_vm0, %v1500_v39  }
 0x20c   :  { %1515 = vst.msk [vmem:[#allocation2 + $0x19b] sm:$0x40] %vm13_vm0, %v1500_v39   ;;  %1517 = vst.msk [vmem:[#allocation2 + $0x1da] sm:$0x80] %vm13_vm0, %v1500_v39   ;;  %v3075_v3 = vld [vmem:[#allocation2 + $0x220] sm:$0x3] }
 0x20d   :  { %1566 = vst.msk [vmem:[#allocation2 + $0x621] sm:$0x1] %vm13_vm0, %v1563_v40   ;;  %1568 = vst.msk [vmem:[#allocation2 + $0x660] sm:$0x2] %vm13_vm0, %v1563_v40   ;;  %v3123_v41 = vld [vmem:[#allocation2 + $0x260] sm:$0x3] }
 0x20e   :  { %1570 = vst.msk [vmem:[#allocation2 + $0x69f] sm:$0x4] %vm13_vm0, %v1563_v40   ;;  %1572 = vst.msk [vmem:[#allocation2 + $0x6de] sm:$0x8] %vm13_vm0, %v1563_v40   ;;  %v3171_v44 = vld [vmem:[#allocation2 + $0x2a0] sm:$0x3] }
 0x20f   :  { %1574 = vst.msk [vmem:[#allocation2 + $0x71d] sm:$0x10] %vm13_vm0, %v1563_v40   ;;  %1576 = vst.msk [vmem:[#allocation2 + $0x75c] sm:$0x20] %vm13_vm0, %v1563_v40   ;;  %v3219_v47 = vld [vmem:[#allocation2 + $0x2e0] sm:$0x3] }
 0x210   :  { %1578 = vst.msk [vmem:[#allocation2 + $0x79b] sm:$0x40] %vm13_vm0, %v1563_v40   ;;  %1580 = vst.msk [vmem:[#allocation2 + $0x7da] sm:$0x80] %vm13_vm0, %v1563_v40   ;;  %v3267_v48 = vld [vmem:[#allocation2 + $0x320] sm:$0x3] }
 0x211   :  { %1545 = vst.msk [vmem:[#allocation2 + $0x421] sm:$0x1] %vm13_vm0, %v1542_v1   ;;  %1547 = vst.msk [vmem:[#allocation2 + $0x460] sm:$0x2] %vm13_vm0, %v1542_v1   ;;  %v3315_v49 = vld [vmem:[#allocation2 + $0x360] sm:$0x3] }
 0x212   :  { %1549 = vst.msk [vmem:[#allocation2 + $0x49f] sm:$0x4] %vm13_vm0, %v1542_v1   ;;  %1551 = vst.msk [vmem:[#allocation2 + $0x4de] sm:$0x8] %vm13_vm0, %v1542_v1   ;;  %v3363_v50 = vld [vmem:[#allocation2 + $0x3a0] sm:$0x3] }
 0x213   :  { %1553 = vst.msk [vmem:[#allocation2 + $0x51d] sm:$0x10] %vm13_vm0, %v1542_v1   ;;  %1555 = vst.msk [vmem:[#allocation2 + $0x55c] sm:$0x20] %vm13_vm0, %v1542_v1   ;;  %v3411_v51 = vld [vmem:[#allocation2 + $0x3e0] sm:$0x3] }
 0x214   :  { %1557 = vst.msk [vmem:[#allocation2 + $0x59b] sm:$0x40] %vm13_vm0, %v1542_v1   ;;  %1559 = vst.msk [vmem:[#allocation2 + $0x5da] sm:$0x80] %vm13_vm0, %v1542_v1   ;;  %v2691_v52 = vld [vmem:[#allocation2 + $0x20] sm:$0x3] }
 0x215   :  { %6316 = vst [vmem:[%s9697_s1 + $0x88] sm:$0x3] %v3075_v3  ;;  %6324 = vst [vmem:[%s9697_s1 + $0x98] sm:$0x3] %v3123_v41  ;;  %v2739_v53 = vld [vmem:[#allocation2 + $0x60] sm:$0x3] }
 0x216   :  { %6332 = vst [vmem:[%s9697_s1 + $0xa8] sm:$0x3] %v3171_v44  ;;  %1608 = vst.msk [vmem:[#allocation2 + $0xa21] sm:$0x1] %vm13_vm0, %v1605_v45   ;;  %v2787_v54 = vld [vmem:[#allocation2 + $0xa0] sm:$0x3] }
 0x217   :  { %1610 = vst.msk [vmem:[#allocation2 + $0xa60] sm:$0x2] %vm13_vm0, %v1605_v45   ;;  %1612 = vst.msk [vmem:[#allocation2 + $0xa9f] sm:$0x4] %vm13_vm0, %v1605_v45   ;;  %v2835_v28 = vld [vmem:[#allocation2 + $0xe0] sm:$0x3] }
 0x218   :  { %1614 = vst.msk [vmem:[#allocation2 + $0xade] sm:$0x8] %vm13_vm0, %v1605_v45   ;;  %1616 = vst.msk [vmem:[#allocation2 + $0xb1d] sm:$0x10] %vm13_vm0, %v1605_v45   ;;  %v2883_v29 = vld [vmem:[#allocation2 + $0x120] sm:$0x3] }
 0x219   :  { %1618 = vst.msk [vmem:[#allocation2 + $0xb5c] sm:$0x20] %vm13_vm0, %v1605_v45   ;;  %1620 = vst.msk [vmem:[#allocation2 + $0xb9b] sm:$0x40] %vm13_vm0, %v1605_v45   ;;  %v2931_v55 = vld [vmem:[#allocation2 + $0x160] sm:$0x3] }
 0x21a   :  { %1622 = vst.msk [vmem:[#allocation2 + $0xbda] sm:$0x80] %vm13_vm0, %v1605_v45   ;;  %1587 = vst.msk [vmem:[#allocation2 + $0x821] sm:$0x1] %vm13_vm0, %v1584_v46   ;;  %v2979_v56 = vld [vmem:[#allocation2 + $0x1a0] sm:$0x3] }
 0x21b   :  { %1589 = vst.msk [vmem:[#allocation2 + $0x860] sm:$0x2] %vm13_vm0, %v1584_v46   ;;  %1591 = vst.msk [vmem:[#allocation2 + $0x89f] sm:$0x4] %vm13_vm0, %v1584_v46   ;;  %v3027_v59 = vld [vmem:[#allocation2 + $0x1e0] sm:$0x3] }
 0x21c   :  { %1593 = vst.msk [vmem:[#allocation2 + $0x8de] sm:$0x8] %vm13_vm0, %v1584_v46   ;;  %1595 = vst.msk [vmem:[#allocation2 + $0x91d] sm:$0x10] %vm13_vm0, %v1584_v46   ;;  %v3843_v60 = vld [vmem:[#allocation2 + $0x620] sm:$0x3] }
 0x21d   :  { %1597 = vst.msk [vmem:[#allocation2 + $0x95c] sm:$0x20] %vm13_vm0, %v1584_v46   ;;  %1599 = vst.msk [vmem:[#allocation2 + $0x99b] sm:$0x40] %vm13_vm0, %v1584_v46   ;;  %v3891_v61 = vld [vmem:[#allocation2 + $0x660] sm:$0x3] }
 0x21e   :  { %1601 = vst.msk [vmem:[#allocation2 + $0x9da] sm:$0x80] %vm13_vm0, %v1584_v46   ;;  %6340 = vst [vmem:[%s9697_s1 + $0xb8] sm:$0x3] %v3219_v47  ;;  %v3939_v62 = vld [vmem:[#allocation2 + $0x6a0] sm:$0x3] }
 0x21f   :  { %6348 = vst [vmem:[%s9697_s1 + $0xc8] sm:$0x3] %v3267_v48  ;;  %6356 = vst [vmem:[%s9697_s1 + $0xd8] sm:$0x3] %v3315_v49  ;;  %v3987_v63 = vld [vmem:[#allocation2 + $0x6e0] sm:$0x3] }
 0x220   :  { %6364 = vst [vmem:[%s9697_s1 + $0xe8] sm:$0x3] %v3363_v50  ;;  %6252 = vst [vmem:[%s9697_s1 + $0x8] sm:$0x3] %v2691_v52  ;;  %v4035_v0 = vld [vmem:[#allocation2 + $0x720] sm:$0x3]  ;;  %v1793_v52 = vpop.permute.xlu0 %1792  }
 0x221   :  { %6372 = vst [vmem:[%s9697_s1 + $0xf8] sm:$0x3] %v3411_v51  ;;  %6260 = vst [vmem:[%s9697_s1 + $0x18] sm:$0x3] %v2739_v53  ;;  %v4083_v2 = vld [vmem:[#allocation2 + $0x760] sm:$0x3]  ;;  %v1814_v51 = vpop.permute.xlu1 %1813  }
 0x222   :  { %6268 = vst [vmem:[%s9697_s1 + $0x28] sm:$0x3] %v2787_v54  ;;  %6276 = vst [vmem:[%s9697_s1 + $0x38] sm:$0x3] %v2835_v28  ;;  %v4131_v4 = vld [vmem:[#allocation2 + $0x7a0] sm:$0x3] }
 0x223   :  { %6284 = vst [vmem:[%s9697_s1 + $0x48] sm:$0x3] %v2883_v29  ;;  %6292 = vst [vmem:[%s9697_s1 + $0x58] sm:$0x3] %v2931_v55  ;;  %v4179_v32 = vld [vmem:[#allocation2 + $0x7e0] sm:$0x3] }
 0x224   :  { %6300 = vst [vmem:[%s9697_s1 + $0x68] sm:$0x3] %v2979_v56  ;;  %1650 = vst.msk [vmem:[#allocation2 + $0xe21] sm:$0x1] %vm13_vm0, %v1647_v57   ;;  %v3459_v33 = vld [vmem:[#allocation2 + $0x420] sm:$0x3]  ;;  %v1834_v28 = vpop.permute.xlu0 %1833  }
 0x225   :  { %1652 = vst.msk [vmem:[#allocation2 + $0xe60] sm:$0x2] %vm13_vm0, %v1647_v57   ;;  %1654 = vst.msk [vmem:[#allocation2 + $0xe9f] sm:$0x4] %vm13_vm0, %v1647_v57   ;;  %v3507_v5 = vld [vmem:[#allocation2 + $0x460] sm:$0x3]  ;;  %v1855_v54 = vpop.permute.xlu1 %1854  }
 0x226   :  { %1656 = vst.msk [vmem:[#allocation2 + $0xede] sm:$0x8] %vm13_vm0, %v1647_v57   ;;  %1658 = vst.msk [vmem:[#allocation2 + $0xf1d] sm:$0x10] %vm13_vm0, %v1647_v57   ;;  %v3795_v8 = vld [vmem:[#allocation2 + $0x5e0] sm:$0x3] }
 0x227   :  { %1660 = vst.msk [vmem:[#allocation2 + $0xf5c] sm:$0x20] %vm13_vm0, %v1647_v57   ;;  %1662 = vst.msk [vmem:[#allocation2 + $0xf9b] sm:$0x40] %vm13_vm0, %v1647_v57   ;;  %v3555_v11 = vld [vmem:[#allocation2 + $0x4a0] sm:$0x3] }
 0x228   :  { %1664 = vst.msk [vmem:[#allocation2 + $0xfda] sm:$0x80] %vm13_vm0, %v1647_v57   ;;  %1629 = vst.msk [vmem:[#allocation2 + $0xc21] sm:$0x1] %vm13_vm0, %v1626_v58   ;;  %v3603_v12 = vld [vmem:[#allocation2 + $0x4e0] sm:$0x3]  ;;  %v1876_v55 = vpop.permute.xlu0 %1875  }
 0x229   :  { %1631 = vst.msk [vmem:[#allocation2 + $0xc60] sm:$0x2] %vm13_vm0, %v1626_v58   ;;  %1633 = vst.msk [vmem:[#allocation2 + $0xc9f] sm:$0x4] %vm13_vm0, %v1626_v58   ;;  %v3651_v13 = vld [vmem:[#allocation2 + $0x520] sm:$0x3]  ;;  %v1897_v29 = vpop.permute.xlu1 %1896  }
 0x22a   :  { %1635 = vst.msk [vmem:[#allocation2 + $0xcde] sm:$0x8] %vm13_vm0, %v1626_v58   ;;  %1637 = vst.msk [vmem:[#allocation2 + $0xd1d] sm:$0x10] %vm13_vm0, %v1626_v58   ;;  %v3699_v42 = vld [vmem:[#allocation2 + $0x560] sm:$0x3] }
 0x22b   :  { %1639 = vst.msk [vmem:[#allocation2 + $0xd5c] sm:$0x20] %vm13_vm0, %v1626_v58   ;;  %1641 = vst.msk [vmem:[#allocation2 + $0xd9b] sm:$0x40] %vm13_vm0, %v1626_v58   ;;  %v3747_v43 = vld [vmem:[#allocation2 + $0x5a0] sm:$0x3] }
 0x22c   :  { %1643 = vst.msk [vmem:[#allocation2 + $0xdda] sm:$0x80] %vm13_vm0, %v1626_v58   ;;  %6444 = vst [vmem:[%s9697_s1 + $0x188] sm:$0x3] %v3843_v60  ;;  %v4659_v14 = vld [vmem:[#allocation2 + $0xa60] sm:$0x3]  ;;  %v1918_v60 = vpop.permute.xlu0 %1917  }
 0x22d   :  { %6452 = vst [vmem:[%s9697_s1 + $0x198] sm:$0x3] %v3891_v61  ;;  %6308 = vst [vmem:[%s9697_s1 + $0x78] sm:$0x3] %v3027_v59  ;;  %v4851_v15 = vld [vmem:[#allocation2 + $0xb60] sm:$0x3]  ;;  %v1939_v59 = vpop.permute.xlu1 %1938  }
 0x22e   :  { %6460 = vst [vmem:[%s9697_s1 + $0x1a8] sm:$0x3] %v3939_v62  ;;  %6468 = vst [vmem:[%s9697_s1 + $0x1b8] sm:$0x3] %v3987_v63  ;;  %v4899_v16 = vld [vmem:[#allocation2 + $0xba0] sm:$0x3] }
 0x22f   :  { %6476 = vst [vmem:[%s9697_s1 + $0x1c8] sm:$0x3] %v4035_v0  ;;  %6484 = vst [vmem:[%s9697_s1 + $0x1d8] sm:$0x3] %v4083_v2  ;;  %v4947_v17 = vld [vmem:[#allocation2 + $0xbe0] sm:$0x3] }
 0x230   :  { %6492 = vst [vmem:[%s9697_s1 + $0x1e8] sm:$0x3] %v4131_v4  ;;  %6500 = vst [vmem:[%s9697_s1 + $0x1f8] sm:$0x3] %v4179_v32  ;;  %v4611_v18 = vld [vmem:[#allocation2 + $0xa20] sm:$0x3] }
 0x231   :  { %6380 = vst [vmem:[%s9697_s1 + $0x108] sm:$0x3] %v3459_v33  ;;  %6388 = vst [vmem:[%s9697_s1 + $0x118] sm:$0x3] %v3507_v5  ;;  %v4707_v6 = vld [vmem:[#allocation2 + $0xaa0] sm:$0x3] }
 0x232   :  { %6436 = vst [vmem:[%s9697_s1 + $0x178] sm:$0x3] %v3795_v8  ;;  %1691 = vst.msk [vmem:[#allocation2 + $0x228] sm:$0x1] %vm13_vm0, %v1688_v9   ;;  %v4755_v20 = vld [vmem:[#allocation2 + $0xae0] sm:$0x3] }
 0x233   :  { %1693 = vst.msk [vmem:[#allocation2 + $0x267] sm:$0x2] %vm13_vm0, %v1688_v9   ;;  %1695 = vst.msk [vmem:[#allocation2 + $0x2a6] sm:$0x4] %vm13_vm0, %v1688_v9   ;;  %v4803_v23 = vld [vmem:[#allocation2 + $0xb20] sm:$0x3] }
 0x234   :  { %1697 = vst.msk [vmem:[#allocation2 + $0x2e5] sm:$0x8] %vm13_vm0, %v1688_v9   ;;  %1699 = vst.msk [vmem:[#allocation2 + $0x324] sm:$0x10] %vm13_vm0, %v1688_v9   ;;  %v4227_v24 = vld [vmem:[#allocation2 + $0x820] sm:$0x3] }
 0x235   :  { %1701 = vst.msk [vmem:[#allocation2 + $0x363] sm:$0x20] %vm13_vm0, %v1688_v9   ;;  %1703 = vst.msk [vmem:[#allocation2 + $0x3a2] sm:$0x40] %vm13_vm0, %v1688_v9   ;;  %v4275_v25 = vld [vmem:[#allocation2 + $0x860] sm:$0x3] }
 0x236   :  { %1705 = vst.msk [vmem:[#allocation2 + $0x3e1] sm:$0x80] %vm13_vm0, %v1688_v9   ;;  %1670 = vst.msk [vmem:[#allocation2 + $0x28] sm:$0x1] %vm13_vm0, %v1667_v10   ;;  %v4323_v26 = vld [vmem:[#allocation2 + $0x8a0] sm:$0x3] }
 0x237   :  { %1672 = vst.msk [vmem:[#allocation2 + $0x67] sm:$0x2] %vm13_vm0, %v1667_v10   ;;  %1674 = vst.msk [vmem:[#allocation2 + $0xa6] sm:$0x4] %vm13_vm0, %v1667_v10   ;;  %v4371_v7 = vld [vmem:[#allocation2 + $0x8e0] sm:$0x3] }
 0x238   :  { %1676 = vst.msk [vmem:[#allocation2 + $0xe5] sm:$0x8] %vm13_vm0, %v1667_v10   ;;  %1678 = vst.msk [vmem:[#allocation2 + $0x124] sm:$0x10] %vm13_vm0, %v1667_v10   ;;  %v4419_v19 = vld [vmem:[#allocation2 + $0x920] sm:$0x3] }
 0x239   :  { %1680 = vst.msk [vmem:[#allocation2 + $0x163] sm:$0x20] %vm13_vm0, %v1667_v10   ;;  %1682 = vst.msk [vmem:[#allocation2 + $0x1a2] sm:$0x40] %vm13_vm0, %v1667_v10   ;;  %v4467_v27 = vld [vmem:[#allocation2 + $0x960] sm:$0x3] }
 0x23a   :  { %1684 = vst.msk [vmem:[#allocation2 + $0x1e1] sm:$0x80] %vm13_vm0, %v1667_v10   ;;  %6396 = vst [vmem:[%s9697_s1 + $0x128] sm:$0x3] %v3555_v11  ;;  %v4515_v30 = vld [vmem:[#allocation2 + $0x9a0] sm:$0x3]  ;;  %v1981_v11 = vpop.permute.xlu1 %1980  }
 0x23b   :  { %6404 = vst [vmem:[%s9697_s1 + $0x138] sm:$0x3] %v3603_v12  ;;  %6412 = vst [vmem:[%s9697_s1 + $0x148] sm:$0x3] %v3651_v13  ;;  %v4563_v31 = vld [vmem:[#allocation2 + $0x9e0] sm:$0x3]  ;;  %v1960_v12 = vpop.permute.xlu0 %1959  }
 0x23c   :  { %6580 = vst [vmem:[%s9697_s1 + $0x298] sm:$0x3] %v4659_v14  ;;  %6420 = vst [vmem:[%s9697_s1 + $0x158] sm:$0x3] %v3699_v42  ;;  %v5379_v34 = vld [vmem:[#allocation2 + $0xe20] sm:$0x3] }
 0x23d   :  { %6428 = vst [vmem:[%s9697_s1 + $0x168] sm:$0x3] %v3747_v43  ;;  %6612 = vst [vmem:[%s9697_s1 + $0x2d8] sm:$0x3] %v4851_v15  ;;  %v5427_v35 = vld [vmem:[#allocation2 + $0xe60] sm:$0x3] }
 0x23e   :  { %6620 = vst [vmem:[%s9697_s1 + $0x2e8] sm:$0x3] %v4899_v16  ;;  %6628 = vst [vmem:[%s9697_s1 + $0x2f8] sm:$0x3] %v4947_v17  ;;  %v5475_v36 = vld [vmem:[#allocation2 + $0xea0] sm:$0x3] }
 0x23f   :  { %6572 = vst [vmem:[%s9697_s1 + $0x288] sm:$0x3] %v4611_v18  ;;  %6588 = vst [vmem:[%s9697_s1 + $0x2a8] sm:$0x3] %v4707_v6  ;;  %v5523_v39 = vld [vmem:[#allocation2 + $0xee0] sm:$0x3] }
 0x240   :  { %6596 = vst [vmem:[%s9697_s1 + $0x2b8] sm:$0x3] %v4755_v20  ;;  %1733 = vst.msk [vmem:[#allocation2 + $0x628] sm:$0x1] %vm13_vm0, %v1730_v21   ;;  %v5571_v40 = vld [vmem:[#allocation2 + $0xf20] sm:$0x3] }
 0x241   :  { %1735 = vst.msk [vmem:[#allocation2 + $0x667] sm:$0x2] %vm13_vm0, %v1730_v21   ;;  %1737 = vst.msk [vmem:[#allocation2 + $0x6a6] sm:$0x4] %vm13_vm0, %v1730_v21   ;;  %v5619_v1 = vld [vmem:[#allocation2 + $0xf60] sm:$0x3] }
 0x242   :  { %1739 = vst.msk [vmem:[#allocation2 + $0x6e5] sm:$0x8] %vm13_vm0, %v1730_v21   ;;  %1741 = vst.msk [vmem:[#allocation2 + $0x724] sm:$0x10] %vm13_vm0, %v1730_v21   ;;  %v5667_v3 = vld [vmem:[#allocation2 + $0xfa0] sm:$0x3] }
 0x243   :  { %1743 = vst.msk [vmem:[#allocation2 + $0x763] sm:$0x20] %vm13_vm0, %v1730_v21   ;;  %1745 = vst.msk [vmem:[#allocation2 + $0x7a2] sm:$0x40] %vm13_vm0, %v1730_v21   ;;  %v5715_v41 = vld [vmem:[#allocation2 + $0xfe0] sm:$0x3] }
 0x244   :  { %1747 = vst.msk [vmem:[#allocation2 + $0x7e1] sm:$0x80] %vm13_vm0, %v1730_v21   ;;  %1712 = vst.msk [vmem:[#allocation2 + $0x428] sm:$0x1] %vm13_vm0, %v1709_v22   ;;  %v4995_v44 = vld [vmem:[#allocation2 + $0xc20] sm:$0x3] }
 0x245   :  { %1714 = vst.msk [vmem:[#allocation2 + $0x467] sm:$0x2] %vm13_vm0, %v1709_v22   ;;  %1716 = vst.msk [vmem:[#allocation2 + $0x4a6] sm:$0x4] %vm13_vm0, %v1709_v22   ;;  %v5043_v45 = vld [vmem:[#allocation2 + $0xc60] sm:$0x3] }
 0x246   :  { %1718 = vst.msk [vmem:[#allocation2 + $0x4e5] sm:$0x8] %vm13_vm0, %v1709_v22   ;;  %1720 = vst.msk [vmem:[#allocation2 + $0x524] sm:$0x10] %vm13_vm0, %v1709_v22   ;;  %v5091_v46 = vld [vmem:[#allocation2 + $0xca0] sm:$0x3] }
 0x247   :  { %1722 = vst.msk [vmem:[#allocation2 + $0x563] sm:$0x20] %vm13_vm0, %v1709_v22   ;;  %1724 = vst.msk [vmem:[#allocation2 + $0x5a2] sm:$0x40] %vm13_vm0, %v1709_v22   ;;  %v5139_v47 = vld [vmem:[#allocation2 + $0xce0] sm:$0x3] }
 0x248   :  { %1726 = vst.msk [vmem:[#allocation2 + $0x5e1] sm:$0x80] %vm13_vm0, %v1709_v22   ;;  %6508 = vst [vmem:[%s9697_s1 + $0x208] sm:$0x3] %v4227_v24  ;;  %v5187_v48 = vld [vmem:[#allocation2 + $0xd20] sm:$0x3]  ;;  %v2001_v24 = vpop.permute.xlu0 %2000  }
 0x249   :  { %6604 = vst [vmem:[%s9697_s1 + $0x2c8] sm:$0x3] %v4803_v23  ;;  %6516 = vst [vmem:[%s9697_s1 + $0x218] sm:$0x3] %v4275_v25  ;;  %v5235_v49 = vld [vmem:[#allocation2 + $0xd60] sm:$0x3]  ;;  %v2022_v23 = vpop.permute.xlu1 %2021  }
 0x24a   :  { %6524 = vst [vmem:[%s9697_s1 + $0x228] sm:$0x3] %v4323_v26  ;;  %6532 = vst [vmem:[%s9697_s1 + $0x238] sm:$0x3] %v4371_v7  ;;  %v5283_v50 = vld [vmem:[#allocation2 + $0xda0] sm:$0x3] }
 0x24b   :  { %6540 = vst [vmem:[%s9697_s1 + $0x248] sm:$0x3] %v4419_v19  ;;  %6548 = vst [vmem:[%s9697_s1 + $0x258] sm:$0x3] %v4467_v27  ;;  %v5331_v53 = vld [vmem:[#allocation2 + $0xde0] sm:$0x3] }
 0x24c   :  { %6556 = vst [vmem:[%s9697_s1 + $0x268] sm:$0x3] %v4515_v30  ;;  %6564 = vst [vmem:[%s9697_s1 + $0x278] sm:$0x3] %v4563_v31 }
 0x24d   :  { %6700 = vst [vmem:[%s9697_s1 + $0x388] sm:$0x3] %v5379_v34  ;;  %6708 = vst [vmem:[%s9697_s1 + $0x398] sm:$0x3] %v5427_v35 }
 0x24e   :  { %6716 = vst [vmem:[%s9697_s1 + $0x3a8] sm:$0x3] %v5475_v36  ;;  %1775 = vst.msk [vmem:[#allocation2 + $0xa28] sm:$0x1] %vm13_vm0, %v1772_v37  }
 0x24f   :  { %1777 = vst.msk [vmem:[#allocation2 + $0xa67] sm:$0x2] %vm13_vm0, %v1772_v37   ;;  %1779 = vst.msk [vmem:[#allocation2 + $0xaa6] sm:$0x4] %vm13_vm0, %v1772_v37  }
 0x250   :  { %1781 = vst.msk [vmem:[#allocation2 + $0xae5] sm:$0x8] %vm13_vm0, %v1772_v37   ;;  %1783 = vst.msk [vmem:[#allocation2 + $0xb24] sm:$0x10] %vm13_vm0, %v1772_v37  }
 0x251   :  { %1785 = vst.msk [vmem:[#allocation2 + $0xb63] sm:$0x20] %vm13_vm0, %v1772_v37   ;;  %1787 = vst.msk [vmem:[#allocation2 + $0xba2] sm:$0x40] %vm13_vm0, %v1772_v37  }
 0x252   :  { %1789 = vst.msk [vmem:[#allocation2 + $0xbe1] sm:$0x80] %vm13_vm0, %v1772_v37   ;;  %1754 = vst.msk [vmem:[#allocation2 + $0x828] sm:$0x1] %vm13_vm0, %v1751_v38  }
 0x253   :  { %1756 = vst.msk [vmem:[#allocation2 + $0x867] sm:$0x2] %vm13_vm0, %v1751_v38   ;;  %1758 = vst.msk [vmem:[#allocation2 + $0x8a6] sm:$0x4] %vm13_vm0, %v1751_v38  }
 0x254   :  { %1760 = vst.msk [vmem:[#allocation2 + $0x8e5] sm:$0x8] %vm13_vm0, %v1751_v38   ;;  %1762 = vst.msk [vmem:[#allocation2 + $0x924] sm:$0x10] %vm13_vm0, %v1751_v38  }
 0x255   :  { %1764 = vst.msk [vmem:[#allocation2 + $0x963] sm:$0x20] %vm13_vm0, %v1751_v38   ;;  %1766 = vst.msk [vmem:[#allocation2 + $0x9a2] sm:$0x40] %vm13_vm0, %v1751_v38  }
 0x256   :  { %1768 = vst.msk [vmem:[#allocation2 + $0x9e1] sm:$0x80] %vm13_vm0, %v1751_v38   ;;  %6724 = vst [vmem:[%s9697_s1 + $0x3b8] sm:$0x3] %v5523_v39  ;;  %v2064_v39 = vpop.permute.xlu1 %2063  }
 0x257   :  { %6732 = vst [vmem:[%s9697_s1 + $0x3c8] sm:$0x3] %v5571_v40  ;;  %6740 = vst [vmem:[%s9697_s1 + $0x3d8] sm:$0x3] %v5619_v1  ;;  %v2043_v40 = vpop.permute.xlu0 %2042  }
 0x258   :  { %6748 = vst [vmem:[%s9697_s1 + $0x3e8] sm:$0x3] %v5667_v3  ;;  %6756 = vst [vmem:[%s9697_s1 + $0x3f8] sm:$0x3] %v5715_v41 }
 0x259   :  { %6636 = vst [vmem:[%s9697_s1 + $0x308] sm:$0x3] %v4995_v44  ;;  %6644 = vst [vmem:[%s9697_s1 + $0x318] sm:$0x3] %v5043_v45 }
 0x25a   :  { %6652 = vst [vmem:[%s9697_s1 + $0x328] sm:$0x3] %v5091_v46  ;;  %6660 = vst [vmem:[%s9697_s1 + $0x338] sm:$0x3] %v5139_v47 }
 0x25b   :  { %6668 = vst [vmem:[%s9697_s1 + $0x348] sm:$0x3] %v5187_v48  ;;  %6676 = vst [vmem:[%s9697_s1 + $0x358] sm:$0x3] %v5235_v49 }
 0x25c   :  { %6684 = vst [vmem:[%s9697_s1 + $0x368] sm:$0x3] %v5283_v50  ;;  %1817 = vst.msk [vmem:[#allocation2 + $0xe28] sm:$0x1] %vm13_vm0, %v1814_v51  }
 0x25d   :  { %1819 = vst.msk [vmem:[#allocation2 + $0xe67] sm:$0x2] %vm13_vm0, %v1814_v51   ;;  %1821 = vst.msk [vmem:[#allocation2 + $0xea6] sm:$0x4] %vm13_vm0, %v1814_v51  }
 0x25e   :  { %1823 = vst.msk [vmem:[#allocation2 + $0xee5] sm:$0x8] %vm13_vm0, %v1814_v51   ;;  %1825 = vst.msk [vmem:[#allocation2 + $0xf24] sm:$0x10] %vm13_vm0, %v1814_v51  }
 0x25f   :  { %1827 = vst.msk [vmem:[#allocation2 + $0xf63] sm:$0x20] %vm13_vm0, %v1814_v51   ;;  %1829 = vst.msk [vmem:[#allocation2 + $0xfa2] sm:$0x40] %vm13_vm0, %v1814_v51  }
 0x260   :  { %1831 = vst.msk [vmem:[#allocation2 + $0xfe1] sm:$0x80] %vm13_vm0, %v1814_v51   ;;  %1796 = vst.msk [vmem:[#allocation2 + $0xc28] sm:$0x1] %vm13_vm0, %v1793_v52  }
 0x261   :  { %1798 = vst.msk [vmem:[#allocation2 + $0xc67] sm:$0x2] %vm13_vm0, %v1793_v52   ;;  %1800 = vst.msk [vmem:[#allocation2 + $0xca6] sm:$0x4] %vm13_vm0, %v1793_v52  }
 0x262   :  { %1802 = vst.msk [vmem:[#allocation2 + $0xce5] sm:$0x8] %vm13_vm0, %v1793_v52   ;;  %1804 = vst.msk [vmem:[#allocation2 + $0xd24] sm:$0x10] %vm13_vm0, %v1793_v52  }
 0x263   :  { %1806 = vst.msk [vmem:[#allocation2 + $0xd63] sm:$0x20] %vm13_vm0, %v1793_v52   ;;  %1808 = vst.msk [vmem:[#allocation2 + $0xda2] sm:$0x40] %vm13_vm0, %v1793_v52  }
 0x264   :  { %1810 = vst.msk [vmem:[#allocation2 + $0xde1] sm:$0x80] %vm13_vm0, %v1793_v52   ;;  %6692 = vst [vmem:[%s9697_s1 + $0x378] sm:$0x3] %v5331_v53  ;;  %v2106_v53 = vpop.permute.xlu1 %2105  }
 0x265   :  { %1858 = vst.msk [vmem:[#allocation2 + $0x229] sm:$0x1] %vm13_vm0, %v1855_v54   ;;  %1860 = vst.msk [vmem:[#allocation2 + $0x268] sm:$0x2] %vm13_vm0, %v1855_v54  }
 0x266   :  { %1862 = vst.msk [vmem:[#allocation2 + $0x2a7] sm:$0x4] %vm13_vm0, %v1855_v54   ;;  %1864 = vst.msk [vmem:[#allocation2 + $0x2e6] sm:$0x8] %vm13_vm0, %v1855_v54  }
 0x267   :  { %1866 = vst.msk [vmem:[#allocation2 + $0x325] sm:$0x10] %vm13_vm0, %v1855_v54   ;;  %1868 = vst.msk [vmem:[#allocation2 + $0x364] sm:$0x20] %vm13_vm0, %v1855_v54  }
 0x268   :  { %1870 = vst.msk [vmem:[#allocation2 + $0x3a3] sm:$0x40] %vm13_vm0, %v1855_v54   ;;  %1872 = vst.msk [vmem:[#allocation2 + $0x3e2] sm:$0x80] %vm13_vm0, %v1855_v54   ;;  %v2085_v54 = vpop.permute.xlu0 %2084  }
 0x269   :  { %1837 = vst.msk [vmem:[#allocation2 + $0x29] sm:$0x1] %vm13_vm0, %v1834_v28   ;;  %1839 = vst.msk [vmem:[#allocation2 + $0x68] sm:$0x2] %vm13_vm0, %v1834_v28  }
 0x26a   :  { %1841 = vst.msk [vmem:[#allocation2 + $0xa7] sm:$0x4] %vm13_vm0, %v1834_v28   ;;  %1843 = vst.msk [vmem:[#allocation2 + $0xe6] sm:$0x8] %vm13_vm0, %v1834_v28  }
 0x26b   :  { %1845 = vst.msk [vmem:[#allocation2 + $0x125] sm:$0x10] %vm13_vm0, %v1834_v28   ;;  %1847 = vst.msk [vmem:[#allocation2 + $0x164] sm:$0x20] %vm13_vm0, %v1834_v28  }
 0x26c   :  { %1849 = vst.msk [vmem:[#allocation2 + $0x1a3] sm:$0x40] %vm13_vm0, %v1834_v28   ;;  %1851 = vst.msk [vmem:[#allocation2 + $0x1e2] sm:$0x80] %vm13_vm0, %v1834_v28   ;;  %v3081_v56 = vld [vmem:[#allocation2 + $0x228] sm:$0x3] }
 0x26d   :  { %1900 = vst.msk [vmem:[#allocation2 + $0x629] sm:$0x1] %vm13_vm0, %v1897_v29   ;;  %1902 = vst.msk [vmem:[#allocation2 + $0x668] sm:$0x2] %vm13_vm0, %v1897_v29   ;;  %v3129_v57 = vld [vmem:[#allocation2 + $0x268] sm:$0x3] }
 0x26e   :  { %1904 = vst.msk [vmem:[#allocation2 + $0x6a7] sm:$0x4] %vm13_vm0, %v1897_v29   ;;  %1906 = vst.msk [vmem:[#allocation2 + $0x6e6] sm:$0x8] %vm13_vm0, %v1897_v29   ;;  %v3177_v58 = vld [vmem:[#allocation2 + $0x2a8] sm:$0x3] }
 0x26f   :  { %1908 = vst.msk [vmem:[#allocation2 + $0x725] sm:$0x10] %vm13_vm0, %v1897_v29   ;;  %1910 = vst.msk [vmem:[#allocation2 + $0x764] sm:$0x20] %vm13_vm0, %v1897_v29   ;;  %v3225_v61 = vld [vmem:[#allocation2 + $0x2e8] sm:$0x3] }
 0x270   :  { %1912 = vst.msk [vmem:[#allocation2 + $0x7a3] sm:$0x40] %vm13_vm0, %v1897_v29   ;;  %1914 = vst.msk [vmem:[#allocation2 + $0x7e2] sm:$0x80] %vm13_vm0, %v1897_v29   ;;  %v3273_v62 = vld [vmem:[#allocation2 + $0x328] sm:$0x3] }
 0x271   :  { %1879 = vst.msk [vmem:[#allocation2 + $0x429] sm:$0x1] %vm13_vm0, %v1876_v55   ;;  %1881 = vst.msk [vmem:[#allocation2 + $0x468] sm:$0x2] %vm13_vm0, %v1876_v55   ;;  %v3321_v63 = vld [vmem:[#allocation2 + $0x368] sm:$0x3] }
 0x272   :  { %1883 = vst.msk [vmem:[#allocation2 + $0x4a7] sm:$0x4] %vm13_vm0, %v1876_v55   ;;  %1885 = vst.msk [vmem:[#allocation2 + $0x4e6] sm:$0x8] %vm13_vm0, %v1876_v55   ;;  %v3369_v0 = vld [vmem:[#allocation2 + $0x3a8] sm:$0x3] }
 0x273   :  { %1887 = vst.msk [vmem:[#allocation2 + $0x525] sm:$0x10] %vm13_vm0, %v1876_v55   ;;  %1889 = vst.msk [vmem:[#allocation2 + $0x564] sm:$0x20] %vm13_vm0, %v1876_v55   ;;  %v3417_v2 = vld [vmem:[#allocation2 + $0x3e8] sm:$0x3] }
 0x274   :  { %1891 = vst.msk [vmem:[#allocation2 + $0x5a3] sm:$0x40] %vm13_vm0, %v1876_v55   ;;  %1893 = vst.msk [vmem:[#allocation2 + $0x5e2] sm:$0x80] %vm13_vm0, %v1876_v55   ;;  %v2697_v4 = vld [vmem:[#allocation2 + $0x28] sm:$0x3] }
 0x275   :  { %6317 = vst [vmem:[%s9697_s1 + $0x8a] sm:$0x3] %v3081_v56  ;;  %6325 = vst [vmem:[%s9697_s1 + $0x9a] sm:$0x3] %v3129_v57  ;;  %v2745_v32 = vld [vmem:[#allocation2 + $0x68] sm:$0x3] }
 0x276   :  { %6333 = vst [vmem:[%s9697_s1 + $0xaa] sm:$0x3] %v3177_v58  ;;  %1942 = vst.msk [vmem:[#allocation2 + $0xa29] sm:$0x1] %vm13_vm0, %v1939_v59   ;;  %v2793_v33 = vld [vmem:[#allocation2 + $0xa8] sm:$0x3] }
 0x277   :  { %1944 = vst.msk [vmem:[#allocation2 + $0xa68] sm:$0x2] %vm13_vm0, %v1939_v59   ;;  %1946 = vst.msk [vmem:[#allocation2 + $0xaa7] sm:$0x4] %vm13_vm0, %v1939_v59   ;;  %v2841_v5 = vld [vmem:[#allocation2 + $0xe8] sm:$0x3] }
 0x278   :  { %1948 = vst.msk [vmem:[#allocation2 + $0xae6] sm:$0x8] %vm13_vm0, %v1939_v59   ;;  %1950 = vst.msk [vmem:[#allocation2 + $0xb25] sm:$0x10] %vm13_vm0, %v1939_v59   ;;  %v2889_v8 = vld [vmem:[#allocation2 + $0x128] sm:$0x3] }
 0x279   :  { %1952 = vst.msk [vmem:[#allocation2 + $0xb64] sm:$0x20] %vm13_vm0, %v1939_v59   ;;  %1954 = vst.msk [vmem:[#allocation2 + $0xba3] sm:$0x40] %vm13_vm0, %v1939_v59   ;;  %v2937_v9 = vld [vmem:[#allocation2 + $0x168] sm:$0x3] }
 0x27a   :  { %1956 = vst.msk [vmem:[#allocation2 + $0xbe2] sm:$0x80] %vm13_vm0, %v1939_v59   ;;  %1921 = vst.msk [vmem:[#allocation2 + $0x829] sm:$0x1] %vm13_vm0, %v1918_v60   ;;  %v2985_v10 = vld [vmem:[#allocation2 + $0x1a8] sm:$0x3] }
 0x27b   :  { %1923 = vst.msk [vmem:[#allocation2 + $0x868] sm:$0x2] %vm13_vm0, %v1918_v60   ;;  %1925 = vst.msk [vmem:[#allocation2 + $0x8a7] sm:$0x4] %vm13_vm0, %v1918_v60   ;;  %v3033_v13 = vld [vmem:[#allocation2 + $0x1e8] sm:$0x3] }
 0x27c   :  { %1927 = vst.msk [vmem:[#allocation2 + $0x8e6] sm:$0x8] %vm13_vm0, %v1918_v60   ;;  %1929 = vst.msk [vmem:[#allocation2 + $0x925] sm:$0x10] %vm13_vm0, %v1918_v60   ;;  %v4137_v42 = vld [vmem:[#allocation2 + $0x7a8] sm:$0x3] }
 0x27d   :  { %1931 = vst.msk [vmem:[#allocation2 + $0x964] sm:$0x20] %vm13_vm0, %v1918_v60   ;;  %1933 = vst.msk [vmem:[#allocation2 + $0x9a3] sm:$0x40] %vm13_vm0, %v1918_v60   ;;  %v3849_v43 = vld [vmem:[#allocation2 + $0x628] sm:$0x3] }
 0x27e   :  { %1935 = vst.msk [vmem:[#allocation2 + $0x9e2] sm:$0x80] %vm13_vm0, %v1918_v60   ;;  %6341 = vst [vmem:[%s9697_s1 + $0xba] sm:$0x3] %v3225_v61  ;;  %v3897_v14 = vld [vmem:[#allocation2 + $0x668] sm:$0x3] }
 0x27f   :  { %6349 = vst [vmem:[%s9697_s1 + $0xca] sm:$0x3] %v3273_v62  ;;  %6357 = vst [vmem:[%s9697_s1 + $0xda] sm:$0x3] %v3321_v63  ;;  %v3945_v15 = vld [vmem:[#allocation2 + $0x6a8] sm:$0x3] }
 0x280   :  { %6365 = vst [vmem:[%s9697_s1 + $0xea] sm:$0x3] %v3369_v0  ;;  %6373 = vst [vmem:[%s9697_s1 + $0xfa] sm:$0x3] %v3417_v2  ;;  %v3993_v16 = vld [vmem:[#allocation2 + $0x6e8] sm:$0x3]  ;;  %v2148_v2 = vpop.permute.xlu1 %2147  }
 0x281   :  { %6253 = vst [vmem:[%s9697_s1 + $0xa] sm:$0x3] %v2697_v4  ;;  %6261 = vst [vmem:[%s9697_s1 + $0x1a] sm:$0x3] %v2745_v32  ;;  %v4041_v17 = vld [vmem:[#allocation2 + $0x728] sm:$0x3]  ;;  %v2127_v4 = vpop.permute.xlu0 %2126  }
 0x282   :  { %6269 = vst [vmem:[%s9697_s1 + $0x2a] sm:$0x3] %v2793_v33  ;;  %6277 = vst [vmem:[%s9697_s1 + $0x3a] sm:$0x3] %v2841_v5  ;;  %v4089_v18 = vld [vmem:[#allocation2 + $0x768] sm:$0x3] }
 0x283   :  { %6285 = vst [vmem:[%s9697_s1 + $0x4a] sm:$0x3] %v2889_v8  ;;  %6293 = vst [vmem:[%s9697_s1 + $0x5a] sm:$0x3] %v2937_v9  ;;  %v4185_v6 = vld [vmem:[#allocation2 + $0x7e8] sm:$0x3] }
 0x284   :  { %6301 = vst [vmem:[%s9697_s1 + $0x6a] sm:$0x3] %v2985_v10  ;;  %1984 = vst.msk [vmem:[#allocation2 + $0xe29] sm:$0x1] %vm13_vm0, %v1981_v11   ;;  %v3465_v20 = vld [vmem:[#allocation2 + $0x428] sm:$0x3]  ;;  %v2189_v33 = vpop.permute.xlu1 %2188  }
 0x285   :  { %1986 = vst.msk [vmem:[#allocation2 + $0xe68] sm:$0x2] %vm13_vm0, %v1981_v11   ;;  %1988 = vst.msk [vmem:[#allocation2 + $0xea7] sm:$0x4] %vm13_vm0, %v1981_v11   ;;  %v3513_v21 = vld [vmem:[#allocation2 + $0x468] sm:$0x3]  ;;  %v2168_v5 = vpop.permute.xlu0 %2167  }
 0x286   :  { %1990 = vst.msk [vmem:[#allocation2 + $0xee6] sm:$0x8] %vm13_vm0, %v1981_v11   ;;  %1992 = vst.msk [vmem:[#allocation2 + $0xf25] sm:$0x10] %vm13_vm0, %v1981_v11   ;;  %v3561_v22 = vld [vmem:[#allocation2 + $0x4a8] sm:$0x3] }
 0x287   :  { %1994 = vst.msk [vmem:[#allocation2 + $0xf64] sm:$0x20] %vm13_vm0, %v1981_v11   ;;  %1996 = vst.msk [vmem:[#allocation2 + $0xfa3] sm:$0x40] %vm13_vm0, %v1981_v11   ;;  %v3609_v25 = vld [vmem:[#allocation2 + $0x4e8] sm:$0x3] }
 0x288   :  { %1998 = vst.msk [vmem:[#allocation2 + $0xfe2] sm:$0x80] %vm13_vm0, %v1981_v11   ;;  %1963 = vst.msk [vmem:[#allocation2 + $0xc29] sm:$0x1] %vm13_vm0, %v1960_v12   ;;  %v3657_v26 = vld [vmem:[#allocation2 + $0x528] sm:$0x3]  ;;  %v2231_v8 = vpop.permute.xlu1 %2230  }
 0x289   :  { %1965 = vst.msk [vmem:[#allocation2 + $0xc68] sm:$0x2] %vm13_vm0, %v1960_v12   ;;  %1967 = vst.msk [vmem:[#allocation2 + $0xca7] sm:$0x4] %vm13_vm0, %v1960_v12   ;;  %v3705_v7 = vld [vmem:[#allocation2 + $0x568] sm:$0x3]  ;;  %v2210_v9 = vpop.permute.xlu0 %2209  }
 0x28a   :  { %1969 = vst.msk [vmem:[#allocation2 + $0xce6] sm:$0x8] %vm13_vm0, %v1960_v12   ;;  %1971 = vst.msk [vmem:[#allocation2 + $0xd25] sm:$0x10] %vm13_vm0, %v1960_v12   ;;  %v3753_v19 = vld [vmem:[#allocation2 + $0x5a8] sm:$0x3] }
 0x28b   :  { %1973 = vst.msk [vmem:[#allocation2 + $0xd64] sm:$0x20] %vm13_vm0, %v1960_v12   ;;  %1975 = vst.msk [vmem:[#allocation2 + $0xda3] sm:$0x40] %vm13_vm0, %v1960_v12   ;;  %v3801_v27 = vld [vmem:[#allocation2 + $0x5e8] sm:$0x3] }
 0x28c   :  { %1977 = vst.msk [vmem:[#allocation2 + $0xde2] sm:$0x80] %vm13_vm0, %v1960_v12   ;;  %6493 = vst [vmem:[%s9697_s1 + $0x1ea] sm:$0x3] %v4137_v42  ;;  %v4617_v30 = vld [vmem:[#allocation2 + $0xa28] sm:$0x3] }
 0x28d   :  { %6309 = vst [vmem:[%s9697_s1 + $0x7a] sm:$0x3] %v3033_v13  ;;  %6445 = vst [vmem:[%s9697_s1 + $0x18a] sm:$0x3] %v3849_v43  ;;  %v4665_v31 = vld [vmem:[#allocation2 + $0xa68] sm:$0x3]  ;;  %v2273_v13 = vpop.permute.xlu1 %2272   ;;  %v2252_v42 = vpop.permute.xlu0 %2251  }
 0x28e   :  { %6453 = vst [vmem:[%s9697_s1 + $0x19a] sm:$0x3] %v3897_v14  ;;  %6461 = vst [vmem:[%s9697_s1 + $0x1aa] sm:$0x3] %v3945_v15  ;;  %v4713_v34 = vld [vmem:[#allocation2 + $0xaa8] sm:$0x3] }
 0x28f   :  { %6469 = vst [vmem:[%s9697_s1 + $0x1ba] sm:$0x3] %v3993_v16  ;;  %6477 = vst [vmem:[%s9697_s1 + $0x1ca] sm:$0x3] %v4041_v17  ;;  %v4761_v35 = vld [vmem:[#allocation2 + $0xae8] sm:$0x3] }
 0x290   :  { %6485 = vst [vmem:[%s9697_s1 + $0x1da] sm:$0x3] %v4089_v18  ;;  %6501 = vst [vmem:[%s9697_s1 + $0x1fa] sm:$0x3] %v4185_v6  ;;  %v4809_v36 = vld [vmem:[#allocation2 + $0xb28] sm:$0x3] }
 0x291   :  { %6381 = vst [vmem:[%s9697_s1 + $0x10a] sm:$0x3] %v3465_v20  ;;  %6389 = vst [vmem:[%s9697_s1 + $0x11a] sm:$0x3] %v3513_v21  ;;  %v4857_v37 = vld [vmem:[#allocation2 + $0xb68] sm:$0x3] }
 0x292   :  { %6397 = vst [vmem:[%s9697_s1 + $0x12a] sm:$0x3] %v3561_v22  ;;  %2025 = vst.msk [vmem:[#allocation2 + $0x230] sm:$0x1] %vm13_vm0, %v2022_v23   ;;  %v4905_v38 = vld [vmem:[#allocation2 + $0xba8] sm:$0x3] }
 0x293   :  { %2027 = vst.msk [vmem:[#allocation2 + $0x26f] sm:$0x2] %vm13_vm0, %v2022_v23   ;;  %2029 = vst.msk [vmem:[#allocation2 + $0x2ae] sm:$0x4] %vm13_vm0, %v2022_v23   ;;  %v4953_v1 = vld [vmem:[#allocation2 + $0xbe8] sm:$0x3] }
 0x294   :  { %2031 = vst.msk [vmem:[#allocation2 + $0x2ed] sm:$0x8] %vm13_vm0, %v2022_v23   ;;  %2033 = vst.msk [vmem:[#allocation2 + $0x32c] sm:$0x10] %vm13_vm0, %v2022_v23   ;;  %v4233_v3 = vld [vmem:[#allocation2 + $0x828] sm:$0x3] }
 0x295   :  { %2035 = vst.msk [vmem:[#allocation2 + $0x36b] sm:$0x20] %vm13_vm0, %v2022_v23   ;;  %2037 = vst.msk [vmem:[#allocation2 + $0x3aa] sm:$0x40] %vm13_vm0, %v2022_v23   ;;  %v4281_v41 = vld [vmem:[#allocation2 + $0x868] sm:$0x3] }
 0x296   :  { %2039 = vst.msk [vmem:[#allocation2 + $0x3e9] sm:$0x80] %vm13_vm0, %v2022_v23   ;;  %2004 = vst.msk [vmem:[#allocation2 + $0x30] sm:$0x1] %vm13_vm0, %v2001_v24   ;;  %v4329_v44 = vld [vmem:[#allocation2 + $0x8a8] sm:$0x3] }
 0x297   :  { %2006 = vst.msk [vmem:[#allocation2 + $0x6f] sm:$0x2] %vm13_vm0, %v2001_v24   ;;  %2008 = vst.msk [vmem:[#allocation2 + $0xae] sm:$0x4] %vm13_vm0, %v2001_v24   ;;  %v4377_v45 = vld [vmem:[#allocation2 + $0x8e8] sm:$0x3] }
 0x298   :  { %2010 = vst.msk [vmem:[#allocation2 + $0xed] sm:$0x8] %vm13_vm0, %v2001_v24   ;;  %2012 = vst.msk [vmem:[#allocation2 + $0x12c] sm:$0x10] %vm13_vm0, %v2001_v24   ;;  %v4425_v46 = vld [vmem:[#allocation2 + $0x928] sm:$0x3] }
 0x299   :  { %2014 = vst.msk [vmem:[#allocation2 + $0x16b] sm:$0x20] %vm13_vm0, %v2001_v24   ;;  %2016 = vst.msk [vmem:[#allocation2 + $0x1aa] sm:$0x40] %vm13_vm0, %v2001_v24   ;;  %v4473_v47 = vld [vmem:[#allocation2 + $0x968] sm:$0x3] }
 0x29a   :  { %2018 = vst.msk [vmem:[#allocation2 + $0x1e9] sm:$0x80] %vm13_vm0, %v2001_v24   ;;  %6405 = vst [vmem:[%s9697_s1 + $0x13a] sm:$0x3] %v3609_v25  ;;  %v4521_v48 = vld [vmem:[#allocation2 + $0x9a8] sm:$0x3]  ;;  %v2315_v25 = vpop.permute.xlu1 %2314  }
 0x29b   :  { %6413 = vst [vmem:[%s9697_s1 + $0x14a] sm:$0x3] %v3657_v26  ;;  %6421 = vst [vmem:[%s9697_s1 + $0x15a] sm:$0x3] %v3705_v7  ;;  %v4569_v49 = vld [vmem:[#allocation2 + $0x9e8] sm:$0x3]  ;;  %v2294_v26 = vpop.permute.xlu0 %2293  }
 0x29c   :  { %6429 = vst [vmem:[%s9697_s1 + $0x16a] sm:$0x3] %v3753_v19  ;;  %6437 = vst [vmem:[%s9697_s1 + $0x17a] sm:$0x3] %v3801_v27  ;;  %v5385_v50 = vld [vmem:[#allocation2 + $0xe28] sm:$0x3] }
 0x29d   :  { %6573 = vst [vmem:[%s9697_s1 + $0x28a] sm:$0x3] %v4617_v30  ;;  %6581 = vst [vmem:[%s9697_s1 + $0x29a] sm:$0x3] %v4665_v31  ;;  %v5433_v51 = vld [vmem:[#allocation2 + $0xe68] sm:$0x3] }
 0x29e   :  { %6589 = vst [vmem:[%s9697_s1 + $0x2aa] sm:$0x3] %v4713_v34  ;;  %6597 = vst [vmem:[%s9697_s1 + $0x2ba] sm:$0x3] %v4761_v35  ;;  %v5481_v52 = vld [vmem:[#allocation2 + $0xea8] sm:$0x3] }
 0x29f   :  { %6605 = vst [vmem:[%s9697_s1 + $0x2ca] sm:$0x3] %v4809_v36  ;;  %6613 = vst [vmem:[%s9697_s1 + $0x2da] sm:$0x3] %v4857_v37  ;;  %v5529_v28 = vld [vmem:[#allocation2 + $0xee8] sm:$0x3] }
 0x2a0   :  { %6621 = vst [vmem:[%s9697_s1 + $0x2ea] sm:$0x3] %v4905_v38  ;;  %2067 = vst.msk [vmem:[#allocation2 + $0x630] sm:$0x1] %vm13_vm0, %v2064_v39   ;;  %v5577_v29 = vld [vmem:[#allocation2 + $0xf28] sm:$0x3] }
 0x2a1   :  { %2069 = vst.msk [vmem:[#allocation2 + $0x66f] sm:$0x2] %vm13_vm0, %v2064_v39   ;;  %2071 = vst.msk [vmem:[#allocation2 + $0x6ae] sm:$0x4] %vm13_vm0, %v2064_v39   ;;  %v5625_v55 = vld [vmem:[#allocation2 + $0xf68] sm:$0x3] }
 0x2a2   :  { %2073 = vst.msk [vmem:[#allocation2 + $0x6ed] sm:$0x8] %vm13_vm0, %v2064_v39   ;;  %2075 = vst.msk [vmem:[#allocation2 + $0x72c] sm:$0x10] %vm13_vm0, %v2064_v39   ;;  %v5673_v56 = vld [vmem:[#allocation2 + $0xfa8] sm:$0x3] }
 0x2a3   :  { %2077 = vst.msk [vmem:[#allocation2 + $0x76b] sm:$0x20] %vm13_vm0, %v2064_v39   ;;  %2079 = vst.msk [vmem:[#allocation2 + $0x7aa] sm:$0x40] %vm13_vm0, %v2064_v39   ;;  %v5721_v57 = vld [vmem:[#allocation2 + $0xfe8] sm:$0x3] }
 0x2a4   :  { %2081 = vst.msk [vmem:[#allocation2 + $0x7e9] sm:$0x80] %vm13_vm0, %v2064_v39   ;;  %2046 = vst.msk [vmem:[#allocation2 + $0x430] sm:$0x1] %vm13_vm0, %v2043_v40   ;;  %v5337_v58 = vld [vmem:[#allocation2 + $0xde8] sm:$0x3] }
 0x2a5   :  { %2048 = vst.msk [vmem:[#allocation2 + $0x46f] sm:$0x2] %vm13_vm0, %v2043_v40   ;;  %2050 = vst.msk [vmem:[#allocation2 + $0x4ae] sm:$0x4] %vm13_vm0, %v2043_v40   ;;  %v5001_v59 = vld [vmem:[#allocation2 + $0xc28] sm:$0x3] }
 0x2a6   :  { %2052 = vst.msk [vmem:[#allocation2 + $0x4ed] sm:$0x8] %vm13_vm0, %v2043_v40   ;;  %2054 = vst.msk [vmem:[#allocation2 + $0x52c] sm:$0x10] %vm13_vm0, %v2043_v40   ;;  %v5049_v60 = vld [vmem:[#allocation2 + $0xc68] sm:$0x3] }
 0x2a7   :  { %2056 = vst.msk [vmem:[#allocation2 + $0x56b] sm:$0x20] %vm13_vm0, %v2043_v40   ;;  %2058 = vst.msk [vmem:[#allocation2 + $0x5aa] sm:$0x40] %vm13_vm0, %v2043_v40   ;;  %v5097_v61 = vld [vmem:[#allocation2 + $0xca8] sm:$0x3] }
 0x2a8   :  { %2060 = vst.msk [vmem:[#allocation2 + $0x5e9] sm:$0x80] %vm13_vm0, %v2043_v40   ;;  %6629 = vst [vmem:[%s9697_s1 + $0x2fa] sm:$0x3] %v4953_v1  ;;  %v5145_v62 = vld [vmem:[#allocation2 + $0xce8] sm:$0x3]  ;;  %v2356_v1 = vpop.permute.xlu1 %2355  }
 0x2a9   :  { %6509 = vst [vmem:[%s9697_s1 + $0x20a] sm:$0x3] %v4233_v3  ;;  %6517 = vst [vmem:[%s9697_s1 + $0x21a] sm:$0x3] %v4281_v41  ;;  %v5193_v63 = vld [vmem:[#allocation2 + $0xd28] sm:$0x3]  ;;  %v2335_v3 = vpop.permute.xlu0 %2334  }
 0x2aa   :  { %6525 = vst [vmem:[%s9697_s1 + $0x22a] sm:$0x3] %v4329_v44  ;;  %6533 = vst [vmem:[%s9697_s1 + $0x23a] sm:$0x3] %v4377_v45  ;;  %v5241_v0 = vld [vmem:[#allocation2 + $0xd68] sm:$0x3] }
 0x2ab   :  { %6541 = vst [vmem:[%s9697_s1 + $0x24a] sm:$0x3] %v4425_v46  ;;  %6549 = vst [vmem:[%s9697_s1 + $0x25a] sm:$0x3] %v4473_v47  ;;  %v5289_v32 = vld [vmem:[#allocation2 + $0xda8] sm:$0x3] }
 0x2ac   :  { %6557 = vst [vmem:[%s9697_s1 + $0x26a] sm:$0x3] %v4521_v48  ;;  %6565 = vst [vmem:[%s9697_s1 + $0x27a] sm:$0x3] %v4569_v49 }
 0x2ad   :  { %6701 = vst [vmem:[%s9697_s1 + $0x38a] sm:$0x3] %v5385_v50  ;;  %6709 = vst [vmem:[%s9697_s1 + $0x39a] sm:$0x3] %v5433_v51 }
 0x2ae   :  { %6717 = vst [vmem:[%s9697_s1 + $0x3aa] sm:$0x3] %v5481_v52  ;;  %2109 = vst.msk [vmem:[#allocation2 + $0xa30] sm:$0x1] %vm13_vm0, %v2106_v53  }
 0x2af   :  { %2111 = vst.msk [vmem:[#allocation2 + $0xa6f] sm:$0x2] %vm13_vm0, %v2106_v53   ;;  %2113 = vst.msk [vmem:[#allocation2 + $0xaae] sm:$0x4] %vm13_vm0, %v2106_v53  }
 0x2b0   :  { %2115 = vst.msk [vmem:[#allocation2 + $0xaed] sm:$0x8] %vm13_vm0, %v2106_v53   ;;  %2117 = vst.msk [vmem:[#allocation2 + $0xb2c] sm:$0x10] %vm13_vm0, %v2106_v53  }
 0x2b1   :  { %2119 = vst.msk [vmem:[#allocation2 + $0xb6b] sm:$0x20] %vm13_vm0, %v2106_v53   ;;  %2121 = vst.msk [vmem:[#allocation2 + $0xbaa] sm:$0x40] %vm13_vm0, %v2106_v53  }
 0x2b2   :  { %2123 = vst.msk [vmem:[#allocation2 + $0xbe9] sm:$0x80] %vm13_vm0, %v2106_v53   ;;  %2088 = vst.msk [vmem:[#allocation2 + $0x830] sm:$0x1] %vm13_vm0, %v2085_v54  }
 0x2b3   :  { %2090 = vst.msk [vmem:[#allocation2 + $0x86f] sm:$0x2] %vm13_vm0, %v2085_v54   ;;  %2092 = vst.msk [vmem:[#allocation2 + $0x8ae] sm:$0x4] %vm13_vm0, %v2085_v54  }
 0x2b4   :  { %2094 = vst.msk [vmem:[#allocation2 + $0x8ed] sm:$0x8] %vm13_vm0, %v2085_v54   ;;  %2096 = vst.msk [vmem:[#allocation2 + $0x92c] sm:$0x10] %vm13_vm0, %v2085_v54  }
 0x2b5   :  { %2098 = vst.msk [vmem:[#allocation2 + $0x96b] sm:$0x20] %vm13_vm0, %v2085_v54   ;;  %2100 = vst.msk [vmem:[#allocation2 + $0x9aa] sm:$0x40] %vm13_vm0, %v2085_v54  }
 0x2b6   :  { %2102 = vst.msk [vmem:[#allocation2 + $0x9e9] sm:$0x80] %vm13_vm0, %v2085_v54   ;;  %6725 = vst [vmem:[%s9697_s1 + $0x3ba] sm:$0x3] %v5529_v28  ;;  %v2398_v28 = vpop.permute.xlu1 %2397  }
 0x2b7   :  { %6733 = vst [vmem:[%s9697_s1 + $0x3ca] sm:$0x3] %v5577_v29  ;;  %6741 = vst [vmem:[%s9697_s1 + $0x3da] sm:$0x3] %v5625_v55  ;;  %v2377_v29 = vpop.permute.xlu0 %2376  }
 0x2b8   :  { %6693 = vst [vmem:[%s9697_s1 + $0x37a] sm:$0x3] %v5337_v58  ;;  %6749 = vst [vmem:[%s9697_s1 + $0x3ea] sm:$0x3] %v5673_v56 }
 0x2b9   :  { %6757 = vst [vmem:[%s9697_s1 + $0x3fa] sm:$0x3] %v5721_v57  ;;  %6637 = vst [vmem:[%s9697_s1 + $0x30a] sm:$0x3] %v5001_v59 }
 0x2ba   :  { %6645 = vst [vmem:[%s9697_s1 + $0x31a] sm:$0x3] %v5049_v60  ;;  %6653 = vst [vmem:[%s9697_s1 + $0x32a] sm:$0x3] %v5097_v61 }
 0x2bb   :  { %6661 = vst [vmem:[%s9697_s1 + $0x33a] sm:$0x3] %v5145_v62  ;;  %6669 = vst [vmem:[%s9697_s1 + $0x34a] sm:$0x3] %v5193_v63 }
 0x2bc   :  { %6677 = vst [vmem:[%s9697_s1 + $0x35a] sm:$0x3] %v5241_v0  ;;  %2151 = vst.msk [vmem:[#allocation2 + $0xe30] sm:$0x1] %vm13_vm0, %v2148_v2  }
 0x2bd   :  { %2153 = vst.msk [vmem:[#allocation2 + $0xe6f] sm:$0x2] %vm13_vm0, %v2148_v2   ;;  %2155 = vst.msk [vmem:[#allocation2 + $0xeae] sm:$0x4] %vm13_vm0, %v2148_v2  }
 0x2be   :  { %2157 = vst.msk [vmem:[#allocation2 + $0xeed] sm:$0x8] %vm13_vm0, %v2148_v2   ;;  %2159 = vst.msk [vmem:[#allocation2 + $0xf2c] sm:$0x10] %vm13_vm0, %v2148_v2  }
 0x2bf   :  { %2161 = vst.msk [vmem:[#allocation2 + $0xf6b] sm:$0x20] %vm13_vm0, %v2148_v2   ;;  %2163 = vst.msk [vmem:[#allocation2 + $0xfaa] sm:$0x40] %vm13_vm0, %v2148_v2  }
 0x2c0   :  { %2165 = vst.msk [vmem:[#allocation2 + $0xfe9] sm:$0x80] %vm13_vm0, %v2148_v2   ;;  %2130 = vst.msk [vmem:[#allocation2 + $0xc30] sm:$0x1] %vm13_vm0, %v2127_v4  }
 0x2c1   :  { %2132 = vst.msk [vmem:[#allocation2 + $0xc6f] sm:$0x2] %vm13_vm0, %v2127_v4   ;;  %2134 = vst.msk [vmem:[#allocation2 + $0xcae] sm:$0x4] %vm13_vm0, %v2127_v4  }
 0x2c2   :  { %2136 = vst.msk [vmem:[#allocation2 + $0xced] sm:$0x8] %vm13_vm0, %v2127_v4   ;;  %2138 = vst.msk [vmem:[#allocation2 + $0xd2c] sm:$0x10] %vm13_vm0, %v2127_v4  }
 0x2c3   :  { %2140 = vst.msk [vmem:[#allocation2 + $0xd6b] sm:$0x20] %vm13_vm0, %v2127_v4   ;;  %2142 = vst.msk [vmem:[#allocation2 + $0xdaa] sm:$0x40] %vm13_vm0, %v2127_v4  }
 0x2c4   :  { %2144 = vst.msk [vmem:[#allocation2 + $0xde9] sm:$0x80] %vm13_vm0, %v2127_v4   ;;  %6685 = vst [vmem:[%s9697_s1 + $0x36a] sm:$0x3] %v5289_v32  ;;  %v2440_v32 = vpop.permute.xlu1 %2439  }
 0x2c5   :  { %2192 = vst.msk [vmem:[#allocation2 + $0x231] sm:$0x1] %vm13_vm0, %v2189_v33   ;;  %2194 = vst.msk [vmem:[#allocation2 + $0x270] sm:$0x2] %vm13_vm0, %v2189_v33  }
 0x2c6   :  { %2196 = vst.msk [vmem:[#allocation2 + $0x2af] sm:$0x4] %vm13_vm0, %v2189_v33   ;;  %2198 = vst.msk [vmem:[#allocation2 + $0x2ee] sm:$0x8] %vm13_vm0, %v2189_v33  }
 0x2c7   :  { %2200 = vst.msk [vmem:[#allocation2 + $0x32d] sm:$0x10] %vm13_vm0, %v2189_v33   ;;  %2202 = vst.msk [vmem:[#allocation2 + $0x36c] sm:$0x20] %vm13_vm0, %v2189_v33  }
 0x2c8   :  { %2204 = vst.msk [vmem:[#allocation2 + $0x3ab] sm:$0x40] %vm13_vm0, %v2189_v33   ;;  %2206 = vst.msk [vmem:[#allocation2 + $0x3ea] sm:$0x80] %vm13_vm0, %v2189_v33   ;;  %v2419_v33 = vpop.permute.xlu0 %2418  }
 0x2c9   :  { %2171 = vst.msk [vmem:[#allocation2 + $0x31] sm:$0x1] %vm13_vm0, %v2168_v5   ;;  %2173 = vst.msk [vmem:[#allocation2 + $0x70] sm:$0x2] %vm13_vm0, %v2168_v5  }
 0x2ca   :  { %2175 = vst.msk [vmem:[#allocation2 + $0xaf] sm:$0x4] %vm13_vm0, %v2168_v5   ;;  %2177 = vst.msk [vmem:[#allocation2 + $0xee] sm:$0x8] %vm13_vm0, %v2168_v5  }
 0x2cb   :  { %2179 = vst.msk [vmem:[#allocation2 + $0x12d] sm:$0x10] %vm13_vm0, %v2168_v5   ;;  %2181 = vst.msk [vmem:[#allocation2 + $0x16c] sm:$0x20] %vm13_vm0, %v2168_v5  }
 0x2cc   :  { %2183 = vst.msk [vmem:[#allocation2 + $0x1ab] sm:$0x40] %vm13_vm0, %v2168_v5   ;;  %2185 = vst.msk [vmem:[#allocation2 + $0x1ea] sm:$0x80] %vm13_vm0, %v2168_v5   ;;  %v3087_v10 = vld [vmem:[#allocation2 + $0x230] sm:$0x3] }
 0x2cd   :  { %2234 = vst.msk [vmem:[#allocation2 + $0x631] sm:$0x1] %vm13_vm0, %v2231_v8   ;;  %2236 = vst.msk [vmem:[#allocation2 + $0x670] sm:$0x2] %vm13_vm0, %v2231_v8   ;;  %v3135_v11 = vld [vmem:[#allocation2 + $0x270] sm:$0x3] }
 0x2ce   :  { %2238 = vst.msk [vmem:[#allocation2 + $0x6af] sm:$0x4] %vm13_vm0, %v2231_v8   ;;  %2240 = vst.msk [vmem:[#allocation2 + $0x6ee] sm:$0x8] %vm13_vm0, %v2231_v8   ;;  %v3183_v12 = vld [vmem:[#allocation2 + $0x2b0] sm:$0x3] }
 0x2cf   :  { %2242 = vst.msk [vmem:[#allocation2 + $0x72d] sm:$0x10] %vm13_vm0, %v2231_v8   ;;  %2244 = vst.msk [vmem:[#allocation2 + $0x76c] sm:$0x20] %vm13_vm0, %v2231_v8   ;;  %v3279_v43 = vld [vmem:[#allocation2 + $0x330] sm:$0x3] }
 0x2d0   :  { %2246 = vst.msk [vmem:[#allocation2 + $0x7ab] sm:$0x40] %vm13_vm0, %v2231_v8   ;;  %2248 = vst.msk [vmem:[#allocation2 + $0x7ea] sm:$0x80] %vm13_vm0, %v2231_v8   ;;  %v3327_v14 = vld [vmem:[#allocation2 + $0x370] sm:$0x3] }
 0x2d1   :  { %2213 = vst.msk [vmem:[#allocation2 + $0x431] sm:$0x1] %vm13_vm0, %v2210_v9   ;;  %2215 = vst.msk [vmem:[#allocation2 + $0x470] sm:$0x2] %vm13_vm0, %v2210_v9   ;;  %v3375_v15 = vld [vmem:[#allocation2 + $0x3b0] sm:$0x3] }
 0x2d2   :  { %2217 = vst.msk [vmem:[#allocation2 + $0x4af] sm:$0x4] %vm13_vm0, %v2210_v9   ;;  %2219 = vst.msk [vmem:[#allocation2 + $0x4ee] sm:$0x8] %vm13_vm0, %v2210_v9   ;;  %v3231_v16 = vld [vmem:[#allocation2 + $0x2f0] sm:$0x3] }
 0x2d3   :  { %2221 = vst.msk [vmem:[#allocation2 + $0x52d] sm:$0x10] %vm13_vm0, %v2210_v9   ;;  %2223 = vst.msk [vmem:[#allocation2 + $0x56c] sm:$0x20] %vm13_vm0, %v2210_v9   ;;  %v3423_v17 = vld [vmem:[#allocation2 + $0x3f0] sm:$0x3] }
 0x2d4   :  { %2225 = vst.msk [vmem:[#allocation2 + $0x5ab] sm:$0x40] %vm13_vm0, %v2210_v9   ;;  %2227 = vst.msk [vmem:[#allocation2 + $0x5ea] sm:$0x80] %vm13_vm0, %v2210_v9   ;;  %v2703_v18 = vld [vmem:[#allocation2 + $0x30] sm:$0x3] }
 0x2d5   :  { %6318 = vst [vmem:[%s9697_s1 + $0x8c] sm:$0x3] %v3087_v10  ;;  %6326 = vst [vmem:[%s9697_s1 + $0x9c] sm:$0x3] %v3135_v11  ;;  %v2799_v6 = vld [vmem:[#allocation2 + $0xb0] sm:$0x3] }
 0x2d6   :  { %6334 = vst [vmem:[%s9697_s1 + $0xac] sm:$0x3] %v3183_v12  ;;  %2276 = vst.msk [vmem:[#allocation2 + $0xa31] sm:$0x1] %vm13_vm0, %v2273_v13   ;;  %v2895_v20 = vld [vmem:[#allocation2 + $0x130] sm:$0x3] }
 0x2d7   :  { %2278 = vst.msk [vmem:[#allocation2 + $0xa70] sm:$0x2] %vm13_vm0, %v2273_v13   ;;  %2280 = vst.msk [vmem:[#allocation2 + $0xaaf] sm:$0x4] %vm13_vm0, %v2273_v13   ;;  %v2991_v21 = vld [vmem:[#allocation2 + $0x1b0] sm:$0x3] }
 0x2d8   :  { %2282 = vst.msk [vmem:[#allocation2 + $0xaee] sm:$0x8] %vm13_vm0, %v2273_v13   ;;  %2284 = vst.msk [vmem:[#allocation2 + $0xb2d] sm:$0x10] %vm13_vm0, %v2273_v13   ;;  %v2751_v22 = vld [vmem:[#allocation2 + $0x70] sm:$0x3] }
 0x2d9   :  { %2286 = vst.msk [vmem:[#allocation2 + $0xb6c] sm:$0x20] %vm13_vm0, %v2273_v13   ;;  %2288 = vst.msk [vmem:[#allocation2 + $0xbab] sm:$0x40] %vm13_vm0, %v2273_v13   ;;  %v2847_v23 = vld [vmem:[#allocation2 + $0xf0] sm:$0x3] }
 0x2da   :  { %2290 = vst.msk [vmem:[#allocation2 + $0xbea] sm:$0x80] %vm13_vm0, %v2273_v13   ;;  %2255 = vst.msk [vmem:[#allocation2 + $0x831] sm:$0x1] %vm13_vm0, %v2252_v42   ;;  %v2943_v24 = vld [vmem:[#allocation2 + $0x170] sm:$0x3] }
 0x2db   :  { %2257 = vst.msk [vmem:[#allocation2 + $0x870] sm:$0x2] %vm13_vm0, %v2252_v42   ;;  %2259 = vst.msk [vmem:[#allocation2 + $0x8af] sm:$0x4] %vm13_vm0, %v2252_v42   ;;  %v3039_v7 = vld [vmem:[#allocation2 + $0x1f0] sm:$0x3] }
 0x2dc   :  { %2261 = vst.msk [vmem:[#allocation2 + $0x8ee] sm:$0x8] %vm13_vm0, %v2252_v42   ;;  %2263 = vst.msk [vmem:[#allocation2 + $0x92d] sm:$0x10] %vm13_vm0, %v2252_v42   ;;  %v3855_v19 = vld [vmem:[#allocation2 + $0x630] sm:$0x3] }
 0x2dd   :  { %2265 = vst.msk [vmem:[#allocation2 + $0x96c] sm:$0x20] %vm13_vm0, %v2252_v42   ;;  %2267 = vst.msk [vmem:[#allocation2 + $0x9ab] sm:$0x40] %vm13_vm0, %v2252_v42   ;;  %v3903_v27 = vld [vmem:[#allocation2 + $0x670] sm:$0x3] }
 0x2de   :  { %2269 = vst.msk [vmem:[#allocation2 + $0x9ea] sm:$0x80] %vm13_vm0, %v2252_v42   ;;  %6350 = vst [vmem:[%s9697_s1 + $0xcc] sm:$0x3] %v3279_v43  ;;  %v3999_v30 = vld [vmem:[#allocation2 + $0x6f0] sm:$0x3] }
 0x2df   :  { %6358 = vst [vmem:[%s9697_s1 + $0xdc] sm:$0x3] %v3327_v14  ;;  %6366 = vst [vmem:[%s9697_s1 + $0xec] sm:$0x3] %v3375_v15  ;;  %v4047_v31 = vld [vmem:[#allocation2 + $0x730] sm:$0x3] }
 0x2e0   :  { %6254 = vst [vmem:[%s9697_s1 + $0xc] sm:$0x3] %v2703_v18  ;;  %6342 = vst [vmem:[%s9697_s1 + $0xbc] sm:$0x3] %v3231_v16  ;;  %v4095_v34 = vld [vmem:[#allocation2 + $0x770] sm:$0x3]  ;;  %v2461_v18 = vpop.permute.xlu0 %2460  }
 0x2e1   :  { %6374 = vst [vmem:[%s9697_s1 + $0xfc] sm:$0x3] %v3423_v17  ;;  %6270 = vst [vmem:[%s9697_s1 + $0x2c] sm:$0x3] %v2799_v6  ;;  %v4143_v35 = vld [vmem:[#allocation2 + $0x7b0] sm:$0x3]  ;;  %v2482_v17 = vpop.permute.xlu1 %2481  }
 0x2e2   :  { %6286 = vst [vmem:[%s9697_s1 + $0x4c] sm:$0x3] %v2895_v20  ;;  %6302 = vst [vmem:[%s9697_s1 + $0x6c] sm:$0x3] %v2991_v21  ;;  %v3951_v36 = vld [vmem:[#allocation2 + $0x6b0] sm:$0x3] }
 0x2e3   :  { %6262 = vst [vmem:[%s9697_s1 + $0x1c] sm:$0x3] %v2751_v22  ;;  %6278 = vst [vmem:[%s9697_s1 + $0x3c] sm:$0x3] %v2847_v23  ;;  %v4191_v37 = vld [vmem:[#allocation2 + $0x7f0] sm:$0x3] }
 0x2e4   :  { %6294 = vst [vmem:[%s9697_s1 + $0x5c] sm:$0x3] %v2943_v24  ;;  %2318 = vst.msk [vmem:[#allocation2 + $0xe31] sm:$0x1] %vm13_vm0, %v2315_v25   ;;  %v3471_v38 = vld [vmem:[#allocation2 + $0x430] sm:$0x3]  ;;  %v2502_v21 = vpop.permute.xlu0 %2501  }
 0x2e5   :  { %2320 = vst.msk [vmem:[#allocation2 + $0xe70] sm:$0x2] %vm13_vm0, %v2315_v25   ;;  %2322 = vst.msk [vmem:[#allocation2 + $0xeaf] sm:$0x4] %vm13_vm0, %v2315_v25   ;;  %v3519_v39 = vld [vmem:[#allocation2 + $0x470] sm:$0x3]  ;;  %v2523_v20 = vpop.permute.xlu1 %2522  }
 0x2e6   :  { %2324 = vst.msk [vmem:[#allocation2 + $0xeee] sm:$0x8] %vm13_vm0, %v2315_v25   ;;  %2326 = vst.msk [vmem:[#allocation2 + $0xf2d] sm:$0x10] %vm13_vm0, %v2315_v25   ;;  %v3567_v40 = vld [vmem:[#allocation2 + $0x4b0] sm:$0x3] }
 0x2e7   :  { %2328 = vst.msk [vmem:[#allocation2 + $0xf6c] sm:$0x20] %vm13_vm0, %v2315_v25   ;;  %2330 = vst.msk [vmem:[#allocation2 + $0xfab] sm:$0x40] %vm13_vm0, %v2315_v25   ;;  %v3663_v41 = vld [vmem:[#allocation2 + $0x530] sm:$0x3] }
 0x2e8   :  { %2332 = vst.msk [vmem:[#allocation2 + $0xfea] sm:$0x80] %vm13_vm0, %v2315_v25   ;;  %2297 = vst.msk [vmem:[#allocation2 + $0xc31] sm:$0x1] %vm13_vm0, %v2294_v26   ;;  %v3711_v44 = vld [vmem:[#allocation2 + $0x570] sm:$0x3]  ;;  %v2544_v23 = vpop.permute.xlu0 %2543  }
 0x2e9   :  { %2299 = vst.msk [vmem:[#allocation2 + $0xc70] sm:$0x2] %vm13_vm0, %v2294_v26   ;;  %2301 = vst.msk [vmem:[#allocation2 + $0xcaf] sm:$0x4] %vm13_vm0, %v2294_v26   ;;  %v3759_v45 = vld [vmem:[#allocation2 + $0x5b0] sm:$0x3]  ;;  %v2565_v22 = vpop.permute.xlu1 %2564  }
 0x2ea   :  { %2303 = vst.msk [vmem:[#allocation2 + $0xcee] sm:$0x8] %vm13_vm0, %v2294_v26   ;;  %2305 = vst.msk [vmem:[#allocation2 + $0xd2d] sm:$0x10] %vm13_vm0, %v2294_v26   ;;  %v3615_v46 = vld [vmem:[#allocation2 + $0x4f0] sm:$0x3] }
 0x2eb   :  { %2307 = vst.msk [vmem:[#allocation2 + $0xd6c] sm:$0x20] %vm13_vm0, %v2294_v26   ;;  %2309 = vst.msk [vmem:[#allocation2 + $0xdab] sm:$0x40] %vm13_vm0, %v2294_v26   ;;  %v3807_v47 = vld [vmem:[#allocation2 + $0x5f0] sm:$0x3] }
 0x2ec   :  { %2311 = vst.msk [vmem:[#allocation2 + $0xdea] sm:$0x80] %vm13_vm0, %v2294_v26   ;;  %6446 = vst [vmem:[%s9697_s1 + $0x18c] sm:$0x3] %v3855_v19  ;;  %v4623_v48 = vld [vmem:[#allocation2 + $0xa30] sm:$0x3]  ;;  %v2586_v19 = vpop.permute.xlu0 %2585  }
 0x2ed   :  { %6454 = vst [vmem:[%s9697_s1 + $0x19c] sm:$0x3] %v3903_v27  ;;  %6310 = vst [vmem:[%s9697_s1 + $0x7c] sm:$0x3] %v3039_v7  ;;  %v4671_v49 = vld [vmem:[#allocation2 + $0xa70] sm:$0x3]  ;;  %v2607_v7 = vpop.permute.xlu1 %2606  }
 0x2ee   :  { %6470 = vst [vmem:[%s9697_s1 + $0x1bc] sm:$0x3] %v3999_v30  ;;  %6478 = vst [vmem:[%s9697_s1 + $0x1cc] sm:$0x3] %v4047_v31  ;;  %v4767_v50 = vld [vmem:[#allocation2 + $0xaf0] sm:$0x3] }
 0x2ef   :  { %6486 = vst [vmem:[%s9697_s1 + $0x1dc] sm:$0x3] %v4095_v34  ;;  %6494 = vst [vmem:[%s9697_s1 + $0x1ec] sm:$0x3] %v4143_v35  ;;  %v4719_v51 = vld [vmem:[#allocation2 + $0xab0] sm:$0x3] }
 0x2f0   :  { %6462 = vst [vmem:[%s9697_s1 + $0x1ac] sm:$0x3] %v3951_v36  ;;  %6502 = vst [vmem:[%s9697_s1 + $0x1fc] sm:$0x3] %v4191_v37  ;;  %v4815_v52 = vld [vmem:[#allocation2 + $0xb30] sm:$0x3] }
 0x2f1   :  { %6382 = vst [vmem:[%s9697_s1 + $0x10c] sm:$0x3] %v3471_v38  ;;  %6390 = vst [vmem:[%s9697_s1 + $0x11c] sm:$0x3] %v3519_v39  ;;  %v4863_v53 = vld [vmem:[#allocation2 + $0xb70] sm:$0x3] }
 0x2f2   :  { %6398 = vst [vmem:[%s9697_s1 + $0x12c] sm:$0x3] %v3567_v40  ;;  %2359 = vst.msk [vmem:[#allocation2 + $0x238] sm:$0x1] %vm13_vm0, %v2356_v1   ;;  %v4911_v54 = vld [vmem:[#allocation2 + $0xbb0] sm:$0x3] }
 0x2f3   :  { %2361 = vst.msk [vmem:[#allocation2 + $0x277] sm:$0x2] %vm13_vm0, %v2356_v1   ;;  %2363 = vst.msk [vmem:[#allocation2 + $0x2b6] sm:$0x4] %vm13_vm0, %v2356_v1   ;;  %v4959_v55 = vld [vmem:[#allocation2 + $0xbf0] sm:$0x3] }
 0x2f4   :  { %2365 = vst.msk [vmem:[#allocation2 + $0x2f5] sm:$0x8] %vm13_vm0, %v2356_v1   ;;  %2367 = vst.msk [vmem:[#allocation2 + $0x334] sm:$0x10] %vm13_vm0, %v2356_v1   ;;  %v4239_v56 = vld [vmem:[#allocation2 + $0x830] sm:$0x3] }
 0x2f5   :  { %2369 = vst.msk [vmem:[#allocation2 + $0x373] sm:$0x20] %vm13_vm0, %v2356_v1   ;;  %2371 = vst.msk [vmem:[#allocation2 + $0x3b2] sm:$0x40] %vm13_vm0, %v2356_v1   ;;  %v4335_v57 = vld [vmem:[#allocation2 + $0x8b0] sm:$0x3] }
 0x2f6   :  { %2373 = vst.msk [vmem:[#allocation2 + $0x3f1] sm:$0x80] %vm13_vm0, %v2356_v1   ;;  %2338 = vst.msk [vmem:[#allocation2 + $0x38] sm:$0x1] %vm13_vm0, %v2335_v3   ;;  %v4431_v58 = vld [vmem:[#allocation2 + $0x930] sm:$0x3] }
 0x2f7   :  { %2340 = vst.msk [vmem:[#allocation2 + $0x77] sm:$0x2] %vm13_vm0, %v2335_v3   ;;  %2342 = vst.msk [vmem:[#allocation2 + $0xb6] sm:$0x4] %vm13_vm0, %v2335_v3   ;;  %v4287_v59 = vld [vmem:[#allocation2 + $0x870] sm:$0x3] }
 0x2f8   :  { %2344 = vst.msk [vmem:[#allocation2 + $0xf5] sm:$0x8] %vm13_vm0, %v2335_v3   ;;  %2346 = vst.msk [vmem:[#allocation2 + $0x134] sm:$0x10] %vm13_vm0, %v2335_v3   ;;  %v4383_v60 = vld [vmem:[#allocation2 + $0x8f0] sm:$0x3] }
 0x2f9   :  { %2348 = vst.msk [vmem:[#allocation2 + $0x173] sm:$0x20] %vm13_vm0, %v2335_v3   ;;  %2350 = vst.msk [vmem:[#allocation2 + $0x1b2] sm:$0x40] %vm13_vm0, %v2335_v3   ;;  %v4479_v61 = vld [vmem:[#allocation2 + $0x970] sm:$0x3] }
 0x2fa   :  { %2352 = vst.msk [vmem:[#allocation2 + $0x1f1] sm:$0x80] %vm13_vm0, %v2335_v3   ;;  %6414 = vst [vmem:[%s9697_s1 + $0x14c] sm:$0x3] %v3663_v41  ;;  %v4527_v62 = vld [vmem:[#allocation2 + $0x9b0] sm:$0x3]  ;;  %v2649_v41 = vpop.permute.xlu1 %2648  }
 0x2fb   :  { %6422 = vst [vmem:[%s9697_s1 + $0x15c] sm:$0x3] %v3711_v44  ;;  %6430 = vst [vmem:[%s9697_s1 + $0x16c] sm:$0x3] %v3759_v45  ;;  %v4575_v63 = vld [vmem:[#allocation2 + $0x9f0] sm:$0x3]  ;;  %v2628_v44 = vpop.permute.xlu0 %2627  }
 0x2fc   :  { %6574 = vst [vmem:[%s9697_s1 + $0x28c] sm:$0x3] %v4623_v48  ;;  %6406 = vst [vmem:[%s9697_s1 + $0x13c] sm:$0x3] %v3615_v46  ;;  %v5391_v0 = vld [vmem:[#allocation2 + $0xe30] sm:$0x3] }
 0x2fd   :  { %6438 = vst [vmem:[%s9697_s1 + $0x17c] sm:$0x3] %v3807_v47  ;;  %6582 = vst [vmem:[%s9697_s1 + $0x29c] sm:$0x3] %v4671_v49  ;;  %v5439_v2 = vld [vmem:[#allocation2 + $0xe70] sm:$0x3] }
 0x2fe   :  { %6598 = vst [vmem:[%s9697_s1 + $0x2bc] sm:$0x3] %v4767_v50  ;;  %6590 = vst [vmem:[%s9697_s1 + $0x2ac] sm:$0x3] %v4719_v51  ;;  %v5535_v4 = vld [vmem:[#allocation2 + $0xef0] sm:$0x3] }
 0x2ff   :  { %6606 = vst [vmem:[%s9697_s1 + $0x2cc] sm:$0x3] %v4815_v52  ;;  %6614 = vst [vmem:[%s9697_s1 + $0x2dc] sm:$0x3] %v4863_v53  ;;  %v5583_v5 = vld [vmem:[#allocation2 + $0xf30] sm:$0x3] }
 0x300   :  { %6622 = vst [vmem:[%s9697_s1 + $0x2ec] sm:$0x3] %v4911_v54  ;;  %2401 = vst.msk [vmem:[#allocation2 + $0x638] sm:$0x1] %vm13_vm0, %v2398_v28   ;;  %v5631_v8 = vld [vmem:[#allocation2 + $0xf70] sm:$0x3] }
 0x301   :  { %2403 = vst.msk [vmem:[#allocation2 + $0x677] sm:$0x2] %vm13_vm0, %v2398_v28   ;;  %2405 = vst.msk [vmem:[#allocation2 + $0x6b6] sm:$0x4] %vm13_vm0, %v2398_v28   ;;  %v5487_v9 = vld [vmem:[#allocation2 + $0xeb0] sm:$0x3] }
 0x302   :  { %2407 = vst.msk [vmem:[#allocation2 + $0x6f5] sm:$0x8] %vm13_vm0, %v2398_v28   ;;  %2409 = vst.msk [vmem:[#allocation2 + $0x734] sm:$0x10] %vm13_vm0, %v2398_v28   ;;  %v5679_v10 = vld [vmem:[#allocation2 + $0xfb0] sm:$0x3] }
 0x303   :  { %2411 = vst.msk [vmem:[#allocation2 + $0x773] sm:$0x20] %vm13_vm0, %v2398_v28   ;;  %2413 = vst.msk [vmem:[#allocation2 + $0x7b2] sm:$0x40] %vm13_vm0, %v2398_v28   ;;  %v5727_v11 = vld [vmem:[#allocation2 + $0xff0] sm:$0x3] }
 0x304   :  { %2415 = vst.msk [vmem:[#allocation2 + $0x7f1] sm:$0x80] %vm13_vm0, %v2398_v28   ;;  %2380 = vst.msk [vmem:[#allocation2 + $0x438] sm:$0x1] %vm13_vm0, %v2377_v29   ;;  %v5103_v12 = vld [vmem:[#allocation2 + $0xcb0] sm:$0x3] }
 0x305   :  { %2382 = vst.msk [vmem:[#allocation2 + $0x477] sm:$0x2] %vm13_vm0, %v2377_v29   ;;  %2384 = vst.msk [vmem:[#allocation2 + $0x4b6] sm:$0x4] %vm13_vm0, %v2377_v29   ;;  %v5151_v13 = vld [vmem:[#allocation2 + $0xcf0] sm:$0x3] }
 0x306   :  { %2386 = vst.msk [vmem:[#allocation2 + $0x4f5] sm:$0x8] %vm13_vm0, %v2377_v29   ;;  %2388 = vst.msk [vmem:[#allocation2 + $0x534] sm:$0x10] %vm13_vm0, %v2377_v29   ;;  %v5247_v42 = vld [vmem:[#allocation2 + $0xd70] sm:$0x3] }
 0x307   :  { %2390 = vst.msk [vmem:[#allocation2 + $0x573] sm:$0x20] %vm13_vm0, %v2377_v29   ;;  %2392 = vst.msk [vmem:[#allocation2 + $0x5b2] sm:$0x40] %vm13_vm0, %v2377_v29   ;;  %v5295_v43 = vld [vmem:[#allocation2 + $0xdb0] sm:$0x3] }
 0x308   :  { %2394 = vst.msk [vmem:[#allocation2 + $0x5f1] sm:$0x80] %vm13_vm0, %v2377_v29   ;;  %6510 = vst [vmem:[%s9697_s1 + $0x20c] sm:$0x3] %v4239_v56  ;;  %v5007_v14 = vld [vmem:[#allocation2 + $0xc30] sm:$0x3] }
 0x309   :  { %6526 = vst [vmem:[%s9697_s1 + $0x22c] sm:$0x3] %v4335_v57  ;;  %6630 = vst [vmem:[%s9697_s1 + $0x2fc] sm:$0x3] %v4959_v55  ;;  %v5055_v15 = vld [vmem:[#allocation2 + $0xc70] sm:$0x3] }
 0x30a   :  { %6542 = vst [vmem:[%s9697_s1 + $0x24c] sm:$0x3] %v4431_v58  ;;  %6518 = vst [vmem:[%s9697_s1 + $0x21c] sm:$0x3] %v4287_v59  ;;  %v5199_v16 = vld [vmem:[#allocation2 + $0xd30] sm:$0x3] }
 0x30b   :  { %6534 = vst [vmem:[%s9697_s1 + $0x23c] sm:$0x3] %v4383_v60  ;;  %6550 = vst [vmem:[%s9697_s1 + $0x25c] sm:$0x3] %v4479_v61  ;;  %v5343_v6 = vld [vmem:[#allocation2 + $0xdf0] sm:$0x3] }
 0x30c   :  { %6558 = vst [vmem:[%s9697_s1 + $0x26c] sm:$0x3] %v4527_v62  ;;  %6566 = vst [vmem:[%s9697_s1 + $0x27c] sm:$0x3] %v4575_v63 }
 0x30d   :  { %6702 = vst [vmem:[%s9697_s1 + $0x38c] sm:$0x3] %v5391_v0  ;;  %6710 = vst [vmem:[%s9697_s1 + $0x39c] sm:$0x3] %v5439_v2 }
 0x30e   :  { %6726 = vst [vmem:[%s9697_s1 + $0x3bc] sm:$0x3] %v5535_v4  ;;  %2443 = vst.msk [vmem:[#allocation2 + $0xa38] sm:$0x1] %vm13_vm0, %v2440_v32  }
 0x30f   :  { %2445 = vst.msk [vmem:[#allocation2 + $0xa77] sm:$0x2] %vm13_vm0, %v2440_v32   ;;  %2447 = vst.msk [vmem:[#allocation2 + $0xab6] sm:$0x4] %vm13_vm0, %v2440_v32  }
 0x310   :  { %2449 = vst.msk [vmem:[#allocation2 + $0xaf5] sm:$0x8] %vm13_vm0, %v2440_v32   ;;  %2451 = vst.msk [vmem:[#allocation2 + $0xb34] sm:$0x10] %vm13_vm0, %v2440_v32  }
 0x311   :  { %2453 = vst.msk [vmem:[#allocation2 + $0xb73] sm:$0x20] %vm13_vm0, %v2440_v32   ;;  %2455 = vst.msk [vmem:[#allocation2 + $0xbb2] sm:$0x40] %vm13_vm0, %v2440_v32  }
 0x312   :  { %2457 = vst.msk [vmem:[#allocation2 + $0xbf1] sm:$0x80] %vm13_vm0, %v2440_v32   ;;  %2422 = vst.msk [vmem:[#allocation2 + $0x838] sm:$0x1] %vm13_vm0, %v2419_v33  }
 0x313   :  { %2424 = vst.msk [vmem:[#allocation2 + $0x877] sm:$0x2] %vm13_vm0, %v2419_v33   ;;  %2426 = vst.msk [vmem:[#allocation2 + $0x8b6] sm:$0x4] %vm13_vm0, %v2419_v33  }
 0x314   :  { %2428 = vst.msk [vmem:[#allocation2 + $0x8f5] sm:$0x8] %vm13_vm0, %v2419_v33   ;;  %2430 = vst.msk [vmem:[#allocation2 + $0x934] sm:$0x10] %vm13_vm0, %v2419_v33  }
 0x315   :  { %2432 = vst.msk [vmem:[#allocation2 + $0x973] sm:$0x20] %vm13_vm0, %v2419_v33   ;;  %2434 = vst.msk [vmem:[#allocation2 + $0x9b2] sm:$0x40] %vm13_vm0, %v2419_v33  }
 0x316   :  { %2436 = vst.msk [vmem:[#allocation2 + $0x9f1] sm:$0x80] %vm13_vm0, %v2419_v33   ;;  %6734 = vst [vmem:[%s9697_s1 + $0x3cc] sm:$0x3] %v5583_v5 }
 0x317   :  { %6742 = vst [vmem:[%s9697_s1 + $0x3dc] sm:$0x3] %v5631_v8  ;;  %6718 = vst [vmem:[%s9697_s1 + $0x3ac] sm:$0x3] %v5487_v9 }
 0x318   :  { %6654 = vst [vmem:[%s9697_s1 + $0x32c] sm:$0x3] %v5103_v12  ;;  %6750 = vst [vmem:[%s9697_s1 + $0x3ec] sm:$0x3] %v5679_v10 }
 0x319   :  { %6758 = vst [vmem:[%s9697_s1 + $0x3fc] sm:$0x3] %v5727_v11  ;;  %6662 = vst [vmem:[%s9697_s1 + $0x33c] sm:$0x3] %v5151_v13 }
 0x31a   :  { %6678 = vst [vmem:[%s9697_s1 + $0x35c] sm:$0x3] %v5247_v42  ;;  %6686 = vst [vmem:[%s9697_s1 + $0x36c] sm:$0x3] %v5295_v43 }
 0x31b   :  { %6638 = vst [vmem:[%s9697_s1 + $0x30c] sm:$0x3] %v5007_v14  ;;  %6646 = vst [vmem:[%s9697_s1 + $0x31c] sm:$0x3] %v5055_v15 }
 0x31c   :  { %6670 = vst [vmem:[%s9697_s1 + $0x34c] sm:$0x3] %v5199_v16  ;;  %2485 = vst.msk [vmem:[#allocation2 + $0xe38] sm:$0x1] %vm13_vm0, %v2482_v17  }
 0x31d   :  { %2487 = vst.msk [vmem:[#allocation2 + $0xe77] sm:$0x2] %vm13_vm0, %v2482_v17   ;;  %2489 = vst.msk [vmem:[#allocation2 + $0xeb6] sm:$0x4] %vm13_vm0, %v2482_v17  }
 0x31e   :  { %2491 = vst.msk [vmem:[#allocation2 + $0xef5] sm:$0x8] %vm13_vm0, %v2482_v17   ;;  %2493 = vst.msk [vmem:[#allocation2 + $0xf34] sm:$0x10] %vm13_vm0, %v2482_v17  }
 0x31f   :  { %2495 = vst.msk [vmem:[#allocation2 + $0xf73] sm:$0x20] %vm13_vm0, %v2482_v17   ;;  %2497 = vst.msk [vmem:[#allocation2 + $0xfb2] sm:$0x40] %vm13_vm0, %v2482_v17  }
 0x320   :  { %2499 = vst.msk [vmem:[#allocation2 + $0xff1] sm:$0x80] %vm13_vm0, %v2482_v17   ;;  %2464 = vst.msk [vmem:[#allocation2 + $0xc38] sm:$0x1] %vm13_vm0, %v2461_v18  }
 0x321   :  { %2466 = vst.msk [vmem:[#allocation2 + $0xc77] sm:$0x2] %vm13_vm0, %v2461_v18   ;;  %2468 = vst.msk [vmem:[#allocation2 + $0xcb6] sm:$0x4] %vm13_vm0, %v2461_v18  }
 0x322   :  { %2470 = vst.msk [vmem:[#allocation2 + $0xcf5] sm:$0x8] %vm13_vm0, %v2461_v18   ;;  %2472 = vst.msk [vmem:[#allocation2 + $0xd34] sm:$0x10] %vm13_vm0, %v2461_v18  }
 0x323   :  { %2474 = vst.msk [vmem:[#allocation2 + $0xd73] sm:$0x20] %vm13_vm0, %v2461_v18   ;;  %2476 = vst.msk [vmem:[#allocation2 + $0xdb2] sm:$0x40] %vm13_vm0, %v2461_v18  }
 0x324   :  { %2478 = vst.msk [vmem:[#allocation2 + $0xdf1] sm:$0x80] %vm13_vm0, %v2461_v18   ;;  %6694 = vst [vmem:[%s9697_s1 + $0x37c] sm:$0x3] %v5343_v6 }
 0x325   :  { %2526 = vst.msk [vmem:[#allocation2 + $0x239] sm:$0x1] %vm13_vm0, %v2523_v20   ;;  %2528 = vst.msk [vmem:[#allocation2 + $0x278] sm:$0x2] %vm13_vm0, %v2523_v20  }
 0x326   :  { %2530 = vst.msk [vmem:[#allocation2 + $0x2b7] sm:$0x4] %vm13_vm0, %v2523_v20   ;;  %2532 = vst.msk [vmem:[#allocation2 + $0x2f6] sm:$0x8] %vm13_vm0, %v2523_v20  }
 0x327   :  { %2534 = vst.msk [vmem:[#allocation2 + $0x335] sm:$0x10] %vm13_vm0, %v2523_v20   ;;  %2536 = vst.msk [vmem:[#allocation2 + $0x374] sm:$0x20] %vm13_vm0, %v2523_v20  }
 0x328   :  { %2538 = vst.msk [vmem:[#allocation2 + $0x3b3] sm:$0x40] %vm13_vm0, %v2523_v20   ;;  %2540 = vst.msk [vmem:[#allocation2 + $0x3f2] sm:$0x80] %vm13_vm0, %v2523_v20  }
 0x329   :  { %2505 = vst.msk [vmem:[#allocation2 + $0x39] sm:$0x1] %vm13_vm0, %v2502_v21   ;;  %2507 = vst.msk [vmem:[#allocation2 + $0x78] sm:$0x2] %vm13_vm0, %v2502_v21  }
 0x32a   :  { %2509 = vst.msk [vmem:[#allocation2 + $0xb7] sm:$0x4] %vm13_vm0, %v2502_v21   ;;  %2511 = vst.msk [vmem:[#allocation2 + $0xf6] sm:$0x8] %vm13_vm0, %v2502_v21  }
 0x32b   :  { %2513 = vst.msk [vmem:[#allocation2 + $0x135] sm:$0x10] %vm13_vm0, %v2502_v21   ;;  %2515 = vst.msk [vmem:[#allocation2 + $0x174] sm:$0x20] %vm13_vm0, %v2502_v21  }
 0x32c   :  { %2517 = vst.msk [vmem:[#allocation2 + $0x1b3] sm:$0x40] %vm13_vm0, %v2502_v21   ;;  %2519 = vst.msk [vmem:[#allocation2 + $0x1f2] sm:$0x80] %vm13_vm0, %v2502_v21   ;;  %v3093_v24 = vld [vmem:[#allocation2 + $0x238] sm:$0x3] }
 0x32d   :  { %2568 = vst.msk [vmem:[#allocation2 + $0x639] sm:$0x1] %vm13_vm0, %v2565_v22   ;;  %2570 = vst.msk [vmem:[#allocation2 + $0x678] sm:$0x2] %vm13_vm0, %v2565_v22   ;;  %v3141_v25 = vld [vmem:[#allocation2 + $0x278] sm:$0x3] }
 0x32e   :  { %2572 = vst.msk [vmem:[#allocation2 + $0x6b7] sm:$0x4] %vm13_vm0, %v2565_v22   ;;  %2574 = vst.msk [vmem:[#allocation2 + $0x6f6] sm:$0x8] %vm13_vm0, %v2565_v22   ;;  %v3189_v26 = vld [vmem:[#allocation2 + $0x2b8] sm:$0x3] }
 0x32f   :  { %2576 = vst.msk [vmem:[#allocation2 + $0x735] sm:$0x10] %vm13_vm0, %v2565_v22   ;;  %2578 = vst.msk [vmem:[#allocation2 + $0x774] sm:$0x20] %vm13_vm0, %v2565_v22   ;;  %v3237_v27 = vld [vmem:[#allocation2 + $0x2f8] sm:$0x3] }
 0x330   :  { %2580 = vst.msk [vmem:[#allocation2 + $0x7b3] sm:$0x40] %vm13_vm0, %v2565_v22   ;;  %2582 = vst.msk [vmem:[#allocation2 + $0x7f2] sm:$0x80] %vm13_vm0, %v2565_v22   ;;  %v3285_v30 = vld [vmem:[#allocation2 + $0x338] sm:$0x3] }
 0x331   :  { %2547 = vst.msk [vmem:[#allocation2 + $0x439] sm:$0x1] %vm13_vm0, %v2544_v23   ;;  %2549 = vst.msk [vmem:[#allocation2 + $0x478] sm:$0x2] %vm13_vm0, %v2544_v23   ;;  %v3333_v31 = vld [vmem:[#allocation2 + $0x378] sm:$0x3] }
 0x332   :  { %2551 = vst.msk [vmem:[#allocation2 + $0x4b7] sm:$0x4] %vm13_vm0, %v2544_v23   ;;  %2553 = vst.msk [vmem:[#allocation2 + $0x4f6] sm:$0x8] %vm13_vm0, %v2544_v23   ;;  %v3381_v34 = vld [vmem:[#allocation2 + $0x3b8] sm:$0x3] }
 0x333   :  { %2555 = vst.msk [vmem:[#allocation2 + $0x535] sm:$0x10] %vm13_vm0, %v2544_v23   ;;  %2557 = vst.msk [vmem:[#allocation2 + $0x574] sm:$0x20] %vm13_vm0, %v2544_v23   ;;  %v3429_v35 = vld [vmem:[#allocation2 + $0x3f8] sm:$0x3] }
 0x334   :  { %2559 = vst.msk [vmem:[#allocation2 + $0x5b3] sm:$0x40] %vm13_vm0, %v2544_v23   ;;  %2561 = vst.msk [vmem:[#allocation2 + $0x5f2] sm:$0x80] %vm13_vm0, %v2544_v23   ;;  %v2853_v36 = vld [vmem:[#allocation2 + $0xf8] sm:$0x3] }
 0x335   :  { %6319 = vst [vmem:[%s9697_s1 + $0x8e] sm:$0x3] %v3093_v24  ;;  %6327 = vst [vmem:[%s9697_s1 + $0x9e] sm:$0x3] %v3141_v25  ;;  %v2709_v37 = vld [vmem:[#allocation2 + $0x38] sm:$0x3] }
 0x336   :  { %6335 = vst [vmem:[%s9697_s1 + $0xae] sm:$0x3] %v3189_v26  ;;  %2610 = vst.msk [vmem:[#allocation2 + $0xa39] sm:$0x1] %vm13_vm0, %v2607_v7   ;;  %v2757_v38 = vld [vmem:[#allocation2 + $0x78] sm:$0x3] }
 0x337   :  { %2612 = vst.msk [vmem:[#allocation2 + $0xa78] sm:$0x2] %vm13_vm0, %v2607_v7   ;;  %2614 = vst.msk [vmem:[#allocation2 + $0xab7] sm:$0x4] %vm13_vm0, %v2607_v7   ;;  %v2805_v39 = vld [vmem:[#allocation2 + $0xb8] sm:$0x3] }
 0x338   :  { %2616 = vst.msk [vmem:[#allocation2 + $0xaf6] sm:$0x8] %vm13_vm0, %v2607_v7   ;;  %2618 = vst.msk [vmem:[#allocation2 + $0xb35] sm:$0x10] %vm13_vm0, %v2607_v7   ;;  %v2901_v40 = vld [vmem:[#allocation2 + $0x138] sm:$0x3] }
 0x339   :  { %2620 = vst.msk [vmem:[#allocation2 + $0xb74] sm:$0x20] %vm13_vm0, %v2607_v7   ;;  %2622 = vst.msk [vmem:[#allocation2 + $0xbb3] sm:$0x40] %vm13_vm0, %v2607_v7   ;;  %v2949_v1 = vld [vmem:[#allocation2 + $0x178] sm:$0x3] }
 0x33a   :  { %2624 = vst.msk [vmem:[#allocation2 + $0xbf2] sm:$0x80] %vm13_vm0, %v2607_v7   ;;  %2589 = vst.msk [vmem:[#allocation2 + $0x839] sm:$0x1] %vm13_vm0, %v2586_v19   ;;  %v2997_v3 = vld [vmem:[#allocation2 + $0x1b8] sm:$0x3] }
 0x33b   :  { %2591 = vst.msk [vmem:[#allocation2 + $0x878] sm:$0x2] %vm13_vm0, %v2586_v19   ;;  %2593 = vst.msk [vmem:[#allocation2 + $0x8b7] sm:$0x4] %vm13_vm0, %v2586_v19   ;;  %v3045_v45 = vld [vmem:[#allocation2 + $0x1f8] sm:$0x3] }
 0x33c   :  { %2595 = vst.msk [vmem:[#allocation2 + $0x8f6] sm:$0x8] %vm13_vm0, %v2586_v19   ;;  %2597 = vst.msk [vmem:[#allocation2 + $0x935] sm:$0x10] %vm13_vm0, %v2586_v19   ;;  %v3861_v46 = vld [vmem:[#allocation2 + $0x638] sm:$0x3] }
 0x33d   :  { %2599 = vst.msk [vmem:[#allocation2 + $0x974] sm:$0x20] %vm13_vm0, %v2586_v19   ;;  %2601 = vst.msk [vmem:[#allocation2 + $0x9b3] sm:$0x40] %vm13_vm0, %v2586_v19   ;;  %v4053_v47 = vld [vmem:[#allocation2 + $0x738] sm:$0x3] }
 0x33e   :  { %2603 = vst.msk [vmem:[#allocation2 + $0x9f2] sm:$0x80] %vm13_vm0, %v2586_v19   ;;  %6343 = vst [vmem:[%s9697_s1 + $0xbe] sm:$0x3] %v3237_v27  ;;  %v4101_v48 = vld [vmem:[#allocation2 + $0x778] sm:$0x3] }
 0x33f   :  { %6351 = vst [vmem:[%s9697_s1 + $0xce] sm:$0x3] %v3285_v30  ;;  %6359 = vst [vmem:[%s9697_s1 + $0xde] sm:$0x3] %v3333_v31  ;;  %v4149_v49 = vld [vmem:[#allocation2 + $0x7b8] sm:$0x3] }
 0x340   :  { %6279 = vst [vmem:[%s9697_s1 + $0x3e] sm:$0x3] %v2853_v36  ;;  %6367 = vst [vmem:[%s9697_s1 + $0xee] sm:$0x3] %v3381_v34  ;;  %v4197_v50 = vld [vmem:[#allocation2 + $0x7f8] sm:$0x3] }
 0x341   :  { %6375 = vst [vmem:[%s9697_s1 + $0xfe] sm:$0x3] %v3429_v35  ;;  %6255 = vst [vmem:[%s9697_s1 + $0xe] sm:$0x3] %v2709_v37  ;;  %v3909_v51 = vld [vmem:[#allocation2 + $0x678] sm:$0x3] }
 0x342   :  { %6263 = vst [vmem:[%s9697_s1 + $0x1e] sm:$0x3] %v2757_v38  ;;  %6271 = vst [vmem:[%s9697_s1 + $0x2e] sm:$0x3] %v2805_v39  ;;  %v3957_v52 = vld [vmem:[#allocation2 + $0x6b8] sm:$0x3] }
 0x343   :  { %6287 = vst [vmem:[%s9697_s1 + $0x4e] sm:$0x3] %v2901_v40  ;;  %6295 = vst [vmem:[%s9697_s1 + $0x5e] sm:$0x3] %v2949_v1  ;;  %v4005_v53 = vld [vmem:[#allocation2 + $0x6f8] sm:$0x3] }
 0x344   :  { %6303 = vst [vmem:[%s9697_s1 + $0x6e] sm:$0x3] %v2997_v3  ;;  %2652 = vst.msk [vmem:[#allocation2 + $0xe39] sm:$0x1] %vm13_vm0, %v2649_v41   ;;  %v3477_v54 = vld [vmem:[#allocation2 + $0x438] sm:$0x3] }
 0x345   :  { %2654 = vst.msk [vmem:[#allocation2 + $0xe78] sm:$0x2] %vm13_vm0, %v2649_v41   ;;  %2656 = vst.msk [vmem:[#allocation2 + $0xeb7] sm:$0x4] %vm13_vm0, %v2649_v41   ;;  %v3525_v28 = vld [vmem:[#allocation2 + $0x478] sm:$0x3] }
 0x346   :  { %2658 = vst.msk [vmem:[#allocation2 + $0xef6] sm:$0x8] %vm13_vm0, %v2649_v41   ;;  %2660 = vst.msk [vmem:[#allocation2 + $0xf35] sm:$0x10] %vm13_vm0, %v2649_v41   ;;  %v3573_v29 = vld [vmem:[#allocation2 + $0x4b8] sm:$0x3] }
 0x347   :  { %2662 = vst.msk [vmem:[#allocation2 + $0xf74] sm:$0x20] %vm13_vm0, %v2649_v41   ;;  %2664 = vst.msk [vmem:[#allocation2 + $0xfb3] sm:$0x40] %vm13_vm0, %v2649_v41   ;;  %v3621_v55 = vld [vmem:[#allocation2 + $0x4f8] sm:$0x3] }
 0x348   :  { %2666 = vst.msk [vmem:[#allocation2 + $0xff2] sm:$0x80] %vm13_vm0, %v2649_v41   ;;  %2631 = vst.msk [vmem:[#allocation2 + $0xc39] sm:$0x1] %vm13_vm0, %v2628_v44   ;;  %v3717_v56 = vld [vmem:[#allocation2 + $0x578] sm:$0x3] }
 0x349   :  { %2633 = vst.msk [vmem:[#allocation2 + $0xc78] sm:$0x2] %vm13_vm0, %v2628_v44   ;;  %2635 = vst.msk [vmem:[#allocation2 + $0xcb7] sm:$0x4] %vm13_vm0, %v2628_v44   ;;  %v3765_v57 = vld [vmem:[#allocation2 + $0x5b8] sm:$0x3] }
 0x34a   :  { %2637 = vst.msk [vmem:[#allocation2 + $0xcf6] sm:$0x8] %vm13_vm0, %v2628_v44   ;;  %2639 = vst.msk [vmem:[#allocation2 + $0xd35] sm:$0x10] %vm13_vm0, %v2628_v44   ;;  %v3669_v58 = vld [vmem:[#allocation2 + $0x538] sm:$0x3] }
 0x34b   :  { %2641 = vst.msk [vmem:[#allocation2 + $0xd74] sm:$0x20] %vm13_vm0, %v2628_v44   ;;  %2643 = vst.msk [vmem:[#allocation2 + $0xdb3] sm:$0x40] %vm13_vm0, %v2628_v44   ;;  %v3813_v59 = vld [vmem:[#allocation2 + $0x5f8] sm:$0x3] }
 0x34c   :  { %2645 = vst.msk [vmem:[#allocation2 + $0xdf2] sm:$0x80] %vm13_vm0, %v2628_v44   ;;  %6447 = vst [vmem:[%s9697_s1 + $0x18e] sm:$0x3] %v3861_v46  ;;  %v4629_v60 = vld [vmem:[#allocation2 + $0xa38] sm:$0x3] }
 0x34d   :  { %6479 = vst [vmem:[%s9697_s1 + $0x1ce] sm:$0x3] %v4053_v47  ;;  %6311 = vst [vmem:[%s9697_s1 + $0x7e] sm:$0x3] %v3045_v45  ;;  %v4677_v61 = vld [vmem:[#allocation2 + $0xa78] sm:$0x3] }
 0x34e   :  { %6487 = vst [vmem:[%s9697_s1 + $0x1de] sm:$0x3] %v4101_v48  ;;  %6495 = vst [vmem:[%s9697_s1 + $0x1ee] sm:$0x3] %v4149_v49  ;;  %v4725_v62 = vld [vmem:[#allocation2 + $0xab8] sm:$0x3] }
 0x34f   :  { %6503 = vst [vmem:[%s9697_s1 + $0x1fe] sm:$0x3] %v4197_v50  ;;  %6455 = vst [vmem:[%s9697_s1 + $0x19e] sm:$0x3] %v3909_v51  ;;  %v4821_v63 = vld [vmem:[#allocation2 + $0xb38] sm:$0x3] }
 0x350   :  { %6463 = vst [vmem:[%s9697_s1 + $0x1ae] sm:$0x3] %v3957_v52  ;;  %6471 = vst [vmem:[%s9697_s1 + $0x1be] sm:$0x3] %v4005_v53  ;;  %v4869_v0 = vld [vmem:[#allocation2 + $0xb78] sm:$0x3] }
 0x351   :  { %6383 = vst [vmem:[%s9697_s1 + $0x10e] sm:$0x3] %v3477_v54  ;;  %6391 = vst [vmem:[%s9697_s1 + $0x11e] sm:$0x3] %v3525_v28  ;;  %v4773_v2 = vld [vmem:[#allocation2 + $0xaf8] sm:$0x3] }
 0x352   :  { %6399 = vst [vmem:[%s9697_s1 + $0x12e] sm:$0x3] %v3573_v29  ;;  %6407 = vst [vmem:[%s9697_s1 + $0x13e] sm:$0x3] %v3621_v55  ;;  %v4917_v4 = vld [vmem:[#allocation2 + $0xbb8] sm:$0x3] }
 0x353   :  { %6423 = vst [vmem:[%s9697_s1 + $0x15e] sm:$0x3] %v3717_v56  ;;  %6431 = vst [vmem:[%s9697_s1 + $0x16e] sm:$0x3] %v3765_v57  ;;  %v4965_v32 = vld [vmem:[#allocation2 + $0xbf8] sm:$0x3] }
 0x354   :  { %6575 = vst [vmem:[%s9697_s1 + $0x28e] sm:$0x3] %v4629_v60  ;;  %6415 = vst [vmem:[%s9697_s1 + $0x14e] sm:$0x3] %v3669_v58  ;;  %v4293_v33 = vld [vmem:[#allocation2 + $0x878] sm:$0x3] }
 0x355   :  { %6439 = vst [vmem:[%s9697_s1 + $0x17e] sm:$0x3] %v3813_v59  ;;  %6583 = vst [vmem:[%s9697_s1 + $0x29e] sm:$0x3] %v4677_v61  ;;  %v4341_v5 = vld [vmem:[#allocation2 + $0x8b8] sm:$0x3] }
 0x356   :  { %6591 = vst [vmem:[%s9697_s1 + $0x2ae] sm:$0x3] %v4725_v62  ;;  %6607 = vst [vmem:[%s9697_s1 + $0x2ce] sm:$0x3] %v4821_v63  ;;  %v4389_v8 = vld [vmem:[#allocation2 + $0x8f8] sm:$0x3] }
 0x357   :  { %6615 = vst [vmem:[%s9697_s1 + $0x2de] sm:$0x3] %v4869_v0  ;;  %6599 = vst [vmem:[%s9697_s1 + $0x2be] sm:$0x3] %v4773_v2  ;;  %v4485_v9 = vld [vmem:[#allocation2 + $0x978] sm:$0x3] }
 0x358   :  { %6623 = vst [vmem:[%s9697_s1 + $0x2ee] sm:$0x3] %v4917_v4  ;;  %6519 = vst [vmem:[%s9697_s1 + $0x21e] sm:$0x3] %v4293_v33  ;;  %v4245_v10 = vld [vmem:[#allocation2 + $0x838] sm:$0x3] }
 0x359   :  { %6527 = vst [vmem:[%s9697_s1 + $0x22e] sm:$0x3] %v4341_v5  ;;  %6631 = vst [vmem:[%s9697_s1 + $0x2fe] sm:$0x3] %v4965_v32  ;;  %v4437_v11 = vld [vmem:[#allocation2 + $0x938] sm:$0x3] }
 0x35a   :  { %6535 = vst [vmem:[%s9697_s1 + $0x23e] sm:$0x3] %v4389_v8  ;;  %6551 = vst [vmem:[%s9697_s1 + $0x25e] sm:$0x3] %v4485_v9  ;;  %v4533_v12 = vld [vmem:[#allocation2 + $0x9b8] sm:$0x3] }
 0x35b   :  { %v4581_v13 = vld [vmem:[#allocation2 + $0x9f8] sm:$0x3]  ;;  %6511 = vst [vmem:[%s9697_s1 + $0x20e] sm:$0x3] %v4245_v10  ;;  %6543 = vst [vmem:[%s9697_s1 + $0x24e] sm:$0x3] %v4437_v11 }
 0x35c   :  { %v5397_v42 = vld [vmem:[#allocation2 + $0xe38] sm:$0x3]  ;;  %6559 = vst [vmem:[%s9697_s1 + $0x26e] sm:$0x3] %v4533_v12  ;;  %6567 = vst [vmem:[%s9697_s1 + $0x27e] sm:$0x3] %v4581_v13 }
 0x35d   :  { %v5445_v43 = vld [vmem:[#allocation2 + $0xe78] sm:$0x3]  ;;  %6703 = vst [vmem:[%s9697_s1 + $0x38e] sm:$0x3] %v5397_v42 }
 0x35e   :  { %v5493_v14 = vld [vmem:[#allocation2 + $0xeb8] sm:$0x3]  ;;  %6711 = vst [vmem:[%s9697_s1 + $0x39e] sm:$0x3] %v5445_v43 }
 0x35f   :  { %6719 = vst [vmem:[%s9697_s1 + $0x3ae] sm:$0x3] %v5493_v14  ;;  %v5541_v15 = vld [vmem:[#allocation2 + $0xef8] sm:$0x3] }
 0x360   :  { %v5589_v16 = vld [vmem:[#allocation2 + $0xf38] sm:$0x3]  ;;  %6727 = vst [vmem:[%s9697_s1 + $0x3be] sm:$0x3] %v5541_v15 }
 0x361   :  { %v5637_v17 = vld [vmem:[#allocation2 + $0xf78] sm:$0x3]  ;;  %6735 = vst [vmem:[%s9697_s1 + $0x3ce] sm:$0x3] %v5589_v16 }
 0x362   :  { %6743 = vst [vmem:[%s9697_s1 + $0x3de] sm:$0x3] %v5637_v17  ;;  %v5685_v18 = vld [vmem:[#allocation2 + $0xfb8] sm:$0x3] }
 0x363   :  { %v5733_v6 = vld [vmem:[#allocation2 + $0xff8] sm:$0x3]  ;;  %6751 = vst [vmem:[%s9697_s1 + $0x3ee] sm:$0x3] %v5685_v18 }
 0x364   :  { %v5013_v20 = vld [vmem:[#allocation2 + $0xc38] sm:$0x3]  ;;  %6759 = vst [vmem:[%s9697_s1 + $0x3fe] sm:$0x3] %v5733_v6 }
 0x365   :  { %6639 = vst [vmem:[%s9697_s1 + $0x30e] sm:$0x3] %v5013_v20  ;;  %v5061_v21 = vld [vmem:[#allocation2 + $0xc78] sm:$0x3] }
 0x366   :  { %v5109_v22 = vld [vmem:[#allocation2 + $0xcb8] sm:$0x3]  ;;  %6647 = vst [vmem:[%s9697_s1 + $0x31e] sm:$0x3] %v5061_v21 }
 0x367   :  { %v5157_v23 = vld [vmem:[#allocation2 + $0xcf8] sm:$0x3]  ;;  %6655 = vst [vmem:[%s9697_s1 + $0x32e] sm:$0x3] %v5109_v22 }
 0x368   :  { %6663 = vst [vmem:[%s9697_s1 + $0x33e] sm:$0x3] %v5157_v23  ;;  %v5205_v24 = vld [vmem:[#allocation2 + $0xd38] sm:$0x3] }
 0x369   :  { %v5253_v25 = vld [vmem:[#allocation2 + $0xd78] sm:$0x3]  ;;  %6671 = vst [vmem:[%s9697_s1 + $0x34e] sm:$0x3] %v5205_v24 }
 0x36a   :  { %v5301_v26 = vld [vmem:[#allocation2 + $0xdb8] sm:$0x3]  ;;  %6679 = vst [vmem:[%s9697_s1 + $0x35e] sm:$0x3] %v5253_v25 }
 0x36b   :  { %6687 = vst [vmem:[%s9697_s1 + $0x36e] sm:$0x3] %v5301_v26  ;;  %v5349_v7 = vld [vmem:[#allocation2 + $0xdf8] sm:$0x3] }
 0x36c   :  { %6695 = vst [vmem:[%s9697_s1 + $0x37e] sm:$0x3] %v5349_v7 }
 0x36d   :  { %5738 = vsyncpa [#allocation1], 1 }

// kernel: prompt_encoder_forward.1
= control target key start
LH: loop header
LB: loop body
LE: loop exit
PB: predicated region body
PF: predicated region fallthrough
CT: control target
= control target key end

     0   :  { %v2715_v0 = vmov 7   ;;  %v2721_v2 = vmov 2   ;;  %v2713_v10 = vmov 9   ;;  %v2723_v11 = vmov 1   ;;  %s2706_s1 = inlined_call_operand.vmem [shape: f32[96,128], index: 1, kind: input, shape index: {}]   ;;  %s2707_s0 = inlined_call_operand.vmem [shape: f32[16,8], index: 0, kind: input, shape index: {}]   ;;  %s2708_s2 = inlined_call_operand.vmem [shape: f32[16,128], index: 2, kind: input, shape index: {}]   ;;  %s2709_s3 = inlined_call_operand.vmem [shape: f32[16,128], index: 3, kind: output, shape index: {0}]   ;;  %s2710_s4 = inlined_call_operand.vmem [shape: f32[2,32,64], index: 4, kind: output, shape index: {1}]  }
   0x1   :  { %1596 = vset.pattern.permute.xlu0 %v2715_v0  ;;  %v1728_v1 = vld [vmem:[%s2706_s1 + $0x18] sm:$0xff]  ;;  %1572 = vset.pattern.permute.xlu1 %v2721_v2  ;;  %v1734_v3 = vld [vmem:[%s2707_s0 + $0x8] sm:$0xff]  ;;  %v1739_v4 = vld [vmem:[%s2707_s0] sm:$0xff]  ;;  %v2712_v16 = vmov 10   ;;  %v2722_v17 = vmov 12   ;;  %v2719_v18 = vmov 3  }
   0x2   :  { %821 = vperm.xlu0 %1596, %v1728_v1   ;;  %287 = vperm.xlu1 %1572, %v1734_v3   ;;  %v18_v5 = vadd.f32 0.5, %v1739_v4  ;;  %v19_v6 = vadd.f32 0.5, %v1734_v3  ;;  %v1748_v7 = vld [vmem:[%s2706_s1 + $0x10] sm:$0xff]  ;;  %v2724_v19 = vmov 13   ;;  %v2718_v20 = vmov 4   ;;  %v1781_v28 = vld [vmem:[%s2706_s1 + $0x28] sm:$0xff] }
   0x3   :  { %v2725_v21 = vmov 15   ;;  %v1686_v22 = vmov 0   ;;  %v2717_v23 = vmov 5   ;;  %v2716_v24 = vmov 6   ;;  %v380_v25 = vld [vmem:[%s2706_s1 + $0x40] sm:$0xf] }
   0x4   :  { %v20_v8 = vmul.f32 0.03125, %v18_v5  ;;  %v21_v9 = vmul.f32 0.03125, %v19_v6  ;;  %v277_v26 = vsub.f32 1.0, %v1739_v4  ;;  %v278_v27 = vsub.f32 1.0, %v1734_v3  ;;  %v446_v29 = vld [vmem:[%s2706_s1 + $0x8] sm:$0xf] }
   0x5   :  { %v1794_v30 = vld [vmem:[%s2706_s1 + $0x20] sm:$0xff]  ;;  %v395_v31 = vld [vmem:[%s2706_s1 + $0x48] sm:$0xff]  ;;  %v1804_v32 = vld [vmem:[%s2706_s1 + $0x38] sm:$0xff]  ;;  %v2714_v46 = vmov 8   ;;  %vm492_vm15 = vcmask 1043456  }
   0x6   :  { %1598 = vset.pattern.permute.xlu0 %v2713_v10  ;;  %1573 = vset.pattern.permute.xlu1 %v2723_v11  ;;  %v22_v12 = vmul.f32 2.0, %v20_v8  ;;  %v23_v13 = vmul.f32 2.0, %v21_v9  ;;  %v394_v33 = vld [vmem:[%s2706_s1 + $0x40] sm:$0xff]  ;;  %v424_v34 = vld [vmem:[%s2706_s1 + $0x50] sm:$0xff]  ;;  %v425_v37 = vld [vmem:[%s2706_s1 + $0x58] sm:$0xff] }
   0x7   :  { %849 = vperm.xlu0 %1598, %v1748_v7   ;;  %v1506_v49 = vld [vmem:[%s2706_s1 + $0x1] ss:$0 sm:$0xff]  ;;  %v1505_v50 = vld [vmem:[%s2706_s1] ss:$0 sm:$0xff]  ;;  %v1507_v56 = vld [vmem:[%s2706_s1 + $0x2] ss:$0 sm:$0xff] }
   0x8   :  { %v1503_v14 = vadd.f32 -1.0, %v22_v12  ;;  %v1504_v15 = vadd.f32 -1.0, %v23_v13 }
   0xa   :  { %45 = vperm.xlu1 %1573, %v1503_v14  }
   0xb   :  { %1601 = vset.pattern.permute.xlu0 %v2712_v16 }
   0xc   :  { %869 = vperm.xlu0 %1601, %v1728_v1  }
   0xe   :  { %49 = vperm.xlu1 %1573, %v1504_v15  }
  0x10   :  { %1603 = vset.pattern.permute.xlu0 %v2722_v17 }
  0x11   :  { %897 = vperm.xlu0 %1603, %v1748_v7  }
  0x12   :  { %1574 = vset.pattern.permute.xlu1 %v2719_v18 }
  0x13   :  { %298 = vperm.xlu1 %1574, %v1739_v4  }
  0x15   :  { %1606 = vset.pattern.permute.xlu0 %v2724_v19 }
  0x16   :  { %915 = vperm.xlu0 %1606, %v1728_v1  }
  0x17   :  { %1575 = vset.pattern.permute.xlu1 %v2718_v20 }
  0x18   :  { %315 = vperm.xlu1 %1575, %v1739_v4  }
  0x1a   :  { %1608 = vset.pattern.permute.xlu0 %v2725_v21 }
  0x1b   :  { %941 = vperm.xlu0 %1608, %v1748_v7  }
  0x1c   :  { %319 = vperm.xlu1 %1575, %v1734_v3  }
  0x1f   :  { %1609 = vset.pattern.permute.xlu0 %v1686_v22 }
  0x20   :  { %29 = vperm.xlu0 %1609, %v1503_v14   ;;  %1576 = vset.pattern.permute.xlu1 %v2717_v23  ;;  %v2711_v14 = vmov 11  }
  0x21   :  { %334 = vperm.xlu1 %1576, %v1734_v3  }
  0x24   :  { %34 = vperm.xlu0 %1609, %v1504_v15  }
  0x25   :  { %1577 = vset.pattern.permute.xlu1 %v2716_v24 }
  0x26   :  { %349 = vperm.xlu1 %1577, %v1739_v4  }
  0x28   :  { %383 = vperm.xlu0 %1609, %v380_v25  }
  0x2a   :  { %1578 = vset.pattern.permute.xlu1 %v2721_v2 }
  0x2b   :  { %366 = vperm.xlu1 %1578, %v277_v26  }
  0x2c   :  { %710 = vperm.xlu0 %1609, %v1748_v7  }
  0x2f   :  { %371 = vperm.xlu1 %1578, %v278_v27  }
  0x30   :  { %1024 = vperm.xlu0 %1609, %v1781_v28  }
  0x33   :  { %1579 = vset.pattern.permute.xlu1 %v2723_v11 }
  0x34   :  { %1612 = vset.pattern.permute.xlu0 %v2723_v11  ;;  %387 = vperm.xlu1 %1579, %v380_v25  }
  0x35   :  { %453 = vperm.xlu0 %1612, %v446_v29  }
  0x38   :  { %1580 = vset.pattern.permute.xlu1 %v2721_v2 }
  0x39   :  { %729 = vperm.xlu0 %1612, %v1728_v1   ;;  %391 = vperm.xlu1 %1580, %v380_v25  }
  0x3d   :  { %1046 = vperm.xlu0 %1612, %v1794_v30   ;;  %1581 = vset.pattern.permute.xlu1 %v2719_v18 }
  0x3e   :  { %403 = vperm.xlu1 %1581, %v395_v31  }
  0x41   :  { %1058 = vperm.xlu0 %1612, %v1804_v32  }
  0x42   :  { %1582 = vset.pattern.permute.xlu1 %v2718_v20 }
  0x43   :  { %407 = vperm.xlu1 %1582, %v394_v33  }
  0x45   :  { %1614 = vset.pattern.permute.xlu0 %v2721_v2 }
  0x46   :  { %282 = vperm.xlu0 %1614, %v1739_v4  }
  0x47   :  { %1583 = vset.pattern.permute.xlu1 %v2717_v23 }
  0x48   :  { %415 = vperm.xlu1 %1583, %v394_v33  }
  0x4a   :  { %1078 = vperm.xlu0 %1614, %v1781_v28  }
  0x4c   :  { %419 = vperm.xlu1 %1583, %v395_v31  }
  0x4e   :  { %1616 = vset.pattern.permute.xlu0 %v2719_v18 }
  0x4f   :  { %302 = vperm.xlu0 %1616, %v1734_v3  }
  0x50   :  { %1584 = vset.pattern.permute.xlu1 %v2716_v24 }
  0x51   :  { %433 = vperm.xlu1 %1584, %v395_v31  }
  0x53   :  { %398 = vperm.xlu0 %1616, %v394_v33  }
  0x55   :  { %438 = vperm.xlu1 %1584, %v424_v34  }
  0x57   :  { %755 = vperm.xlu0 %1616, %v1748_v7  }
  0x59   :  { %1585 = vset.pattern.permute.xlu1 %v1686_v22 }
  0x5a   :  { %449 = vperm.xlu1 %1585, %v446_v29  }
  0x5b   :  { %1098 = vperm.xlu0 %1616, %v1794_v30  }
  0x5e   :  { %1586 = vset.pattern.permute.xlu1 %v2721_v2 }
  0x5f   :  { %1110 = vperm.xlu0 %1616, %v1804_v32   ;;  %457 = vperm.xlu1 %1586, %v446_v29  }
  0x63   :  { %1618 = vset.pattern.permute.xlu0 %v2718_v20  ;;  %1587 = vset.pattern.permute.xlu1 %v2719_v18 }
  0x64   :  { %411 = vperm.xlu0 %1618, %v395_v31   ;;  %461 = vperm.xlu1 %1587, %v446_v29  }
  0x68   :  { %777 = vperm.xlu0 %1618, %v1728_v1   ;;  %1588 = vset.pattern.permute.xlu1 %v1686_v22 }
  0x69   :  { %715 = vperm.xlu1 %1588, %v1728_v1  }
  0x6c   :  { %1134 = vperm.xlu0 %1618, %v1781_v28  }
  0x6d   :  { %1589 = vset.pattern.permute.xlu1 %v2723_v11 }
  0x6e   :  { %725 = vperm.xlu1 %1589, %v1748_v7  }
  0x70   :  { %1620 = vset.pattern.permute.xlu0 %v2717_v23 }
  0x71   :  { %330 = vperm.xlu0 %1620, %v1739_v4  }
  0x72   :  { %1590 = vset.pattern.permute.xlu1 %v2721_v2 }
  0x73   :  { %741 = vperm.xlu1 %1590, %v1748_v7  }
  0x75   :  { %1154 = vperm.xlu0 %1620, %v1794_v30  }
  0x77   :  { %745 = vperm.xlu1 %1590, %v1728_v1  }
  0x79   :  { %1166 = vperm.xlu0 %1620, %v1804_v32  }
  0x7b   :  { %1591 = vset.pattern.permute.xlu1 %v2719_v18 }
  0x7c   :  { %759 = vperm.xlu1 %1591, %v1728_v1  }
  0x7d   :  { %1622 = vset.pattern.permute.xlu0 %v2716_v24 }
  0x7e   :  { %353 = vperm.xlu0 %1622, %v1734_v3  }
  0x80   :  { %1592 = vset.pattern.permute.xlu1 %v2718_v20 }
  0x81   :  { %773 = vperm.xlu1 %1592, %v1748_v7   ;;  %v1847_v35 = vpop.permute.xlu0 %821  ;;  %v1849_v36 = vpop.permute.xlu1 %287 }
  0x82   :  { %428 = vperm.xlu0 %1622, %v394_v33  }
  0x85   :  { %1593 = vset.pattern.permute.xlu1 %v2717_v23 }
  0x86   :  { %787 = vperm.xlu1 %1593, %v1748_v7   ;;  %v1856_v38 = vpop.permute.xlu0 %849  ;;  %443 = vperm.xlu0 %1622, %v425_v37  }
  0x89   :  { %v46_v39 = vpop.permute.xlu1 %45 }
  0x8a   :  { %791 = vperm.xlu1 %1593, %v1728_v1   ;;  %803 = vperm.xlu0 %1622, %v1748_v7   ;;  %v56_v52 = vmul.f32 %v1506_v49, %v46_v39 }
  0x8b   :  { %v1860_v40 = vpop.permute.xlu0 %869 }
  0x8c   :  { %2731 = vst [vmem:[#allocation2_spill] sm:$0xff] %v1860_v40 }
  0x8d   :  { %v50_v41 = vpop.permute.xlu1 %49 }
  0x8e   :  { %1594 = vset.pattern.permute.xlu1 %v2716_v24  ;;  %1186 = vperm.xlu0 %1622, %v1781_v28   ;;  %v57_v58 = vmul.f32 %v1506_v49, %v50_v41 }
  0x8f   :  { %807 = vperm.xlu1 %1594, %v1728_v1  }
  0x90   :  { %v1865_v42 = vpop.permute.xlu0 %897 }
  0x91   :  { %2732 = vst [vmem:[#allocation3_spill] sm:$0xff] %v1865_v42 }
  0x92   :  { %v1867_v43 = vpop.permute.xlu1 %298  ;;  %1624 = vset.pattern.permute.xlu0 %v2715_v0 }
  0x93   :  { %1595 = vset.pattern.permute.xlu1 %v2715_v0  ;;  %1206 = vperm.xlu0 %1624, %v1794_v30  }
  0x94   :  { %817 = vperm.xlu1 %1595, %v1748_v7  }
  0x95   :  { %v1873_v44 = vpop.permute.xlu0 %915 }
  0x96   :  { %2733 = vst [vmem:[#allocation4_spill] sm:$0xff] %v1873_v44 }
  0x97   :  { %v1875_v45 = vpop.permute.xlu1 %315  ;;  %1218 = vperm.xlu0 %1624, %v1804_v32  }
  0x98   :  { %1597 = vset.pattern.permute.xlu1 %v2714_v46 }
  0x99   :  { %835 = vperm.xlu1 %1597, %v1748_v7  }
  0x9a   :  { %v1880_v47 = vpop.permute.xlu0 %941 }
  0x9b   :  { %2734 = vst [vmem:[#allocation5_spill] sm:$0xff] %v1880_v47  ;;  %v1882_v48 = vpop.permute.xlu1 %319  ;;  %1627 = vset.pattern.permute.xlu0 %v2714_v46 }
  0x9c   :  { %1242 = vperm.xlu0 %1627, %v1781_v28  }
  0x9d   :  { %839 = vperm.xlu1 %1597, %v1728_v1  }
  0x9f   :  { %v30_v51 = vpop.permute.xlu0 %29 }
  0xa0   :  { %v41_v53 = vmul.f32 %v1505_v50, %v30_v51  ;;  %v1893_v54 = vpop.permute.xlu1 %334  ;;  %1628 = vset.pattern.permute.xlu0 %v2713_v10 }
  0xa1   :  { %1599 = vset.pattern.permute.xlu1 %v2713_v10  ;;  %1262 = vperm.xlu0 %1628, %v1794_v30  }
  0xa2   :  { %v58_v55 = vadd.f32 %v56_v52, %v41_v53  ;;  %853 = vperm.xlu1 %1599, %v1728_v1  }
  0xa3   :  { %v35_v57 = vpop.permute.xlu0 %34 }
  0xa4   :  { %v60_v59 = vmul.f32 6.2831855, %v58_v55  ;;  %v42_v60 = vmul.f32 %v1505_v50, %v35_v57 }
  0xa5   :  { %v1902_v61 = vpop.permute.xlu1 %349  ;;  %1274 = vperm.xlu0 %1628, %v1804_v32  }
  0xa6   :  { %v1905_v62 = vadd.f32 %v1507_v56, %v60_v59  ;;  %v59_v63 = vadd.f32 %v57_v58, %v42_v60  ;;  %1600 = vset.pattern.permute.xlu1 %v2712_v16 }
  0xa7   :  { %865 = vperm.xlu1 %1600, %v1748_v7   ;;  %v1909_v3 = vpop.permute.xlu0 %383 }
  0xa8   :  { %v72_v4 = vand.u32 2139095040, %v1905_v62  ;;  %v61_v5 = vmul.f32 6.2831855, %v59_v63  ;;  %v69_v6 = vand.u32 2147483647, %v1905_v62  ;;  %vm71_vm12 = vcmp.lt.s32.totalorder %v1905_v62, 0 }
  0xa9   :  { %1631 = vset.pattern.permute.xlu0 %v2712_v16  ;;  %v1691_v63 = vmov 683565275   ;;  %v1696_v16 = vmov 1326507024  }
  0xaa   :  { %v73_v8 = vshrl.u32 %v72_v4, 23  ;;  %v1914_v9 = vadd.f32 %v1507_v56, %v61_v5  ;;  %v1916_v12 = vpop.permute.xlu1 %366  ;;  %1294 = vperm.xlu0 %1631, %v1781_v28   ;;  %v76_v13 = vand.u32 8388607, %v69_v6  ;;  %v1692_v5 = vmov 2475754826  }
  0xab   :  { %1602 = vset.pattern.permute.xlu1 %v2711_v14  ;;  %v1922_v15 = vpop.permute.xlu0 %710  ;;  %vm2107_vm13 = vcmp.le.f32.partialorder %v69_v6, 0.7853982 }
  0xac   :  { %v1508_v25 = vadd.s32 4294967169, %v73_v8  ;;  %v176_v26 = vand.u32 2139095040, %v1914_v9  ;;  %879 = vperm.xlu1 %1602, %v1748_v7   ;;  %v2720_v27 = vand.u32 2147483647, %v1914_v9  ;;  %v77_v34 = vor.u32 8388608, %v76_v13 }
  0xad   :  { %v1693_v13 = vmov 2131351028  }
  0xae   :  { %v79_v29 = vadd.s32 1, %v1508_v25  ;;  %v177_v31 = vshrl.u32 %v176_v26, 23  ;;  %v1927_v33 = vpop.permute.xlu1 %371  ;;  %1632 = vset.pattern.permute.xlu0 %v2711_v14  ;;  %v180_v37 = vand.u32 8388607, %v2720_v27  ;;  %v1936_v53 = vshll.u32 %v77_v34, 8 }
  0xaf   :  { %v1932_v39 = vpop.permute.xlu0 %1024  ;;  %1314 = vperm.xlu0 %1632, %v1794_v30  }
  0xb0   :  { %2735 = vst [vmem:[#allocation6_spill] sm:$0xff] %v1932_v39  ;;  %vm80_vm0 = vcmp.gt.s32.totalorder %v79_v29, 0  ;;  %v1512_v41 = vadd.s32 4294967169, %v177_v31  ;;  %883 = vperm.xlu1 %1602, %v1728_v1   ;;  %v181_v50 = vor.u32 8388608, %v180_v37  ;;  %v1694_v31 = vmov 2102212464  }
  0xb1   :  { %v81_v49 = vsel %vm80_vm0, %v79_v29, 0  ;;  %v1695_v37 = vmov 920167782  }
  0xb2   :  { %v83_v51 = vand.u32 31, %v81_v49  ;;  %v183_v52 = vadd.s32 1, %v1512_v41  ;;  %v1941_v56 = vshrl.u32 %v81_v49, 5  ;;  %v1943_v58 = vshll.u32 %v181_v50, 8 }
  0xb3   :  { %v1938_v55 = vpop.permute.xlu1 %387  ;;  %1326 = vperm.xlu0 %1632, %v1804_v32  }
  0xb4   :  { %v84_v57 = vsub.s32 32, %v83_v51  ;;  %vm184_vm1 = vcmp.gt.s32.totalorder %v183_v52, 0  ;;  %1604 = vset.pattern.permute.xlu1 %v2722_v17  ;;  %v1946_v59 = vpop.permute.xlu0 %453  ;;  %v86_v4 = vshll.u32 %v1691_v63, %v83_v51  ;;  %v89_v8 = vshll.u32 %v1692_v5, %v83_v51 }
  0xb5   :  { %v185_v60 = vsel %vm184_vm1, %v183_v52, 0  ;;  %v92_v25 = vshll.u32 %v1693_v13, %v83_v51  ;;  %901 = vperm.xlu1 %1604, %v1728_v1   ;;  %v95_v34 = vshll.u32 %v1694_v31, %v83_v51  ;;  %v98_v41 = vshll.u32 %v1695_v37, %v83_v51 }
  0xb6   :  { %v1949_v26 = vand.u32 31, %v185_v60  ;;  %v87_v29 = vshrl.u32 %v1692_v5, %v84_v57  ;;  %v90_v49 = vshrl.u32 %v1693_v13, %v84_v57  ;;  %v93_v50 = vshrl.u32 %v1694_v31, %v84_v57 }
  0xb7   :  { %v96_v14 = vshrl.u32 %v1695_v37, %v84_v57  ;;  %v99_v52 = vshrl.u32 %v1696_v16, %v84_v57  ;;  %1635 = vset.pattern.permute.xlu0 %v2722_v17  ;;  %v1952_v10 = vshrl.u32 %v185_v60, 5  ;;  %v85_v0 = vshrl.u32 %v1691_v63, %v84_v57 }
  0xb8   :  { %v188_v46 = vsub.s32 32, %v1949_v26  ;;  %v88_v24 = vor.u32 %v87_v29, %v86_v4  ;;  %v1955_v23 = vpop.permute.xlu1 %391  ;;  %v1957_v20 = vpop.permute.xlu0 %729  ;;  %1350 = vperm.xlu0 %1635, %v1781_v28   ;;  %v91_v51 = vor.u32 %v90_v49, %v89_v8  ;;  %v94_v18 = vor.u32 %v93_v50, %v92_v25 }
  0xb9   :  { %v97_v27 = vor.u32 %v96_v14, %v95_v34  ;;  %v100_v2 = vor.u32 %v99_v52, %v98_v41  ;;  %1605 = vset.pattern.permute.xlu1 %v2724_v19  ;;  %vm101_vm2 = vcmp.lt.s32.totalorder %v1941_v56, 1  ;;  %vm102_vm3 = vcmp.lt.s32.totalorder %v1941_v56, 2 }
  0xba   :  { %vm103_vm4 = vcmp.lt.s32.totalorder %v1941_v56, 3  ;;  %vm104_vm5 = vcmp.lt.s32.totalorder %v1941_v56, 4  ;;  %911 = vperm.xlu1 %1605, %v1748_v7   ;;  %v109_v60 = vsel %vm101_vm2, %v88_v24, %v91_v51  ;;  %v113_v29 = vsel %vm101_vm2, %v91_v51, %v94_v18 }
  0xbb   :  { %v106_v57 = vsel %vm104_vm5, %v94_v18, 2102212464  ;;  %v110_v4 = vsel %vm104_vm5, %v97_v27, 920167782  ;;  %v105_v8 = vsel %vm101_vm2, %v85_v0, %v88_v24  ;;  %v114_v34 = vsel %vm104_vm5, %v100_v2, 1326507024 }
  0xbc   :  { %v107_v25 = vsel %vm103_vm4, %v91_v51, %v106_v57  ;;  %v111_v14 = vsel %vm103_vm4, %v94_v18, %v110_v4  ;;  %v1966_v41 = vpop.permute.xlu0 %1046  ;;  %1636 = vset.pattern.permute.xlu0 %v2724_v19  ;;  %v115_v50 = vsel %vm103_vm4, %v97_v27, %v114_v34  ;;  %v190_v52 = vshll.u32 %v1691_v63, %v1949_v26 }
  0xbd   :  { %2736 = vst [vmem:[#allocation7_spill] sm:$0xff] %v1966_v41  ;;  %v112_v49 = vsel %vm102_vm3, %v109_v60, %v111_v14  ;;  %v191_v17 = vshrl.u32 %v1692_v5, %v188_v46  ;;  %v1972_v11 = vpop.permute.xlu1 %403  ;;  %1370 = vperm.xlu0 %1636, %v1794_v30   ;;  %v116_v0 = vsel %vm102_vm3, %v113_v29, %v115_v50  ;;  %v2726_v51 = vmov 14  }
  0xbe   :  { %2737 = vst [vmem:[#allocation8_spill] sm:$0xff] %v1972_v11  ;;  %v1978_v2 = vmul.u32.u64.low %v1936_v53, %v112_v49  ;;  %v1979_v18 = vmul.u32.u64.high %v1936_v53, %v112_v49, %v1978_v2  ;;  %v189_v24 = vshrl.u32 %v1691_v63, %v188_v46  ;;  %1607 = vset.pattern.permute.xlu1 %v2726_v51  ;;  %v108_v27 = vsel %vm102_vm3, %v105_v8, %v107_v25 }
  0xbf   :  { %v1986_v57 = vmul.u32.u64.low %v1936_v53, %v116_v0  ;;  %v1987_v60 = vmul.u32.u64.high %v1936_v53, %v116_v0, %v1986_v57  ;;  %v192_v4 = vor.u32 %v191_v17, %v190_v52  ;;  %927 = vperm.xlu1 %1607, %v1748_v7   ;;  %v193_v29 = vshll.u32 %v1692_v5, %v1949_v26 }
  0xc0   :  { %v194_v14 = vshrl.u32 %v1693_v13, %v188_v46  ;;  %v196_v34 = vshll.u32 %v1693_v13, %v1949_v26  ;;  %v197_v49 = vshrl.u32 %v1694_v31, %v188_v46  ;;  %v1992_v63 = vpop.permute.xlu0 %1058  ;;  %v199_v50 = vshll.u32 %v1694_v31, %v1949_v26 }
  0xc1   :  { %2738 = vst [vmem:[#allocation9_spill] sm:$0xff] %v1992_v63  ;;  %v200_v19 = vshrl.u32 %v1695_v37, %v188_v46  ;;  %v202_v56 = vshll.u32 %v1695_v37, %v1949_v26  ;;  %v203_v8 = vshrl.u32 %v1696_v16, %v188_v46  ;;  %1382 = vperm.xlu0 %1636, %v1804_v32   ;;  %v127_v7 = vadd.s32 1, %v1979_v18 }
  0xc2   :  { %v124_v17 = vmul.u32 %v1936_v53, %v108_v27  ;;  %v195_v25 = vor.u32 %v194_v14, %v193_v29  ;;  %v198_v5 = vor.u32 %v197_v49, %v196_v34  ;;  %v1999_v52 = vpop.permute.xlu1 %407  ;;  %vm126_vm6 = vc.u32 %v1987_v60, %v1978_v2 }
  0xc3   :  { %2739 = vst [vmem:[#allocation10_spill] sm:$0xff] %v1999_v52  ;;  %v201_v13 = vor.u32 %v200_v19, %v199_v50  ;;  %v204_v0 = vor.u32 %v203_v8, %v202_v56  ;;  %vm205_vm7 = vcmp.lt.s32.totalorder %v1952_v10, 1  ;;  %931 = vperm.xlu1 %1607, %v1728_v1   ;;  %v128_v16 = vsel %vm126_vm6, %v127_v7, %v1979_v18 }
  0xc4   :  { %vm206_vm8 = vcmp.lt.s32.totalorder %v1952_v10, 2  ;;  %vm207_vm9 = vcmp.lt.s32.totalorder %v1952_v10, 3  ;;  %vm208_vm10 = vcmp.lt.s32.totalorder %v1952_v10, 4  ;;  %v129_v46 = vadd.s32 %v128_v16, %v124_v17 }
  0xc5   :  { %v210_v53 = vsel %vm208_vm10, %v198_v5, 2102212464  ;;  %v213_v26 = vsel %vm205_vm7, %v192_v4, %v195_v25  ;;  %v214_v31 = vsel %vm208_vm10, %v201_v13, 920167782  ;;  %v2009_v37 = vpop.permute.xlu0 %282  ;;  %1639 = vset.pattern.permute.xlu0 %v2726_v51  ;;  %v209_v19 = vsel %vm205_vm7, %v189_v24, %v192_v4 }
  0xc6   :  { %v215_v27 = vsel %vm207_vm9, %v198_v5, %v214_v31  ;;  %v217_v57 = vsel %vm205_vm7, %v195_v25, %v198_v5  ;;  %v218_v18 = vsel %vm208_vm10, %v204_v0, 1326507024  ;;  %1402 = vperm.xlu0 %1639, %v1781_v28   ;;  %v130_v29 = vadd.s32 536870912, %v129_v46  ;;  %v2058_v31 = vld [vmem:[%s2706_s1 + $0x30] sm:$0xff] }
  0xc7   :  { %v211_v14 = vsel %vm207_vm9, %v195_v25, %v210_v53  ;;  %v216_v34 = vsel %vm206_vm8, %v213_v26, %v215_v27  ;;  %v219_v49 = vsel %vm207_vm9, %v201_v13, %v218_v18  ;;  %1610 = vset.pattern.permute.xlu1 %v2725_v21  ;;  %v2022_v24 = vpop.permute.xlu1 %415  ;;  %vm175_vm2 = vcmp.lt.s32.totalorder %v1914_v9, 0 }
  0xc8   :  { %2740 = vst [vmem:[#allocation11_spill] sm:$0xff] %v2022_v24  ;;  %v220_v4 = vsel %vm206_vm8, %v217_v57, %v219_v49  ;;  %v2027_v50 = vmul.u32.u64.low %v1943_v58, %v216_v34  ;;  %v2028_v56 = vmul.u32.u64.high %v1943_v58, %v216_v34, %v2027_v50  ;;  %945 = vperm.xlu1 %1610, %v1728_v1   ;;  %v131_v8 = vshrl.u32 %v130_v29, 30  ;;  %v2078_v49 = vld [vmem:[%s2706_s1 + $0x4] ss:$0 sm:$0xff] }
  0xc9   :  { %v2033_v17 = vmul.u32.u64.low %v1943_v58, %v220_v4  ;;  %v2034_v7 = vmul.u32.u64.high %v1943_v58, %v220_v4, %v2033_v17  ;;  %v2036_v25 = vpop.permute.xlu0 %1078  ;;  %v212_v5 = vsel %vm206_vm8, %v209_v19, %v211_v14  ;;  %v2071_v14 = vld [vmem:[%s2706_s1 + $0x3] ss:$0 sm:$0xff]  ;;  %vm161_vm4 = vweird.f32 %v1905_v62 }
  0xca   :  { %2741 = vst [vmem:[#allocation12_spill] sm:$0xff] %v2036_v25  ;;  %1640 = vset.pattern.permute.xlu0 %v2725_v21  ;;  %v132_v13 = vshll.u32 %v131_v8, 30  ;;  %v231_v16 = vadd.s32 1, %v2028_v56  ;;  %v228_v53 = vmul.u32 %v1943_v58, %v212_v5  ;;  %v155_v57 = vsub.s32 4, %v131_v8  ;;  %v1522_v17 = vld [vmem:[%s2708_s2 + $0x1] ss:$0 sm:$0xff] }
  0xcb   :  { %v2041_v0 = vpop.permute.xlu1 %419  ;;  %1422 = vperm.xlu0 %1640, %v1794_v30   ;;  %vm230_vm11 = vc.u32 %v2034_v7, %v2027_v50  ;;  %v1526_v5 = vld [vmem:[%s2708_s2 + $0x5] ss:$0 sm:$0xff]  ;;  %v476_v6 = vmul.f32 %v1522_v17, %v1946_v59  ;;  %v2748_v17 = vmov 1   ;;  %vm265_vm7 = vweird.f32 %v1914_v9 }
  0xcc   :  { %2742 = vst [vmem:[#allocation13_spill] sm:$0xff] %v2041_v0  ;;  %1611 = vset.pattern.permute.xlu1 %v1686_v22  ;;  %v2046_v1 = vsub.s32 %v129_v46, %v132_v13  ;;  %v232_v10 = vsel %vm230_vm11, %v231_v16, %v2028_v56  ;;  %v156_v13 = vsel %vm71_vm12, %v155_v57, %v131_v8  ;;  %v1525_v57 = vld [vmem:[%s2708_s2 + $0x4] ss:$0 sm:$0xff]  ;;  %vm1469_vm11 = vcmask 523264  }
  0xcd   :  { %1019 = vperm.xlu1 %1611, %v1794_v30   ;;  %v233_v46 = vadd.s32 %v232_v10, %v228_v53  ;;  %v1530_v53 = vld [vmem:[%s2708_s2 + $0x9] ss:$0 sm:$0xff]  ;;  %v2098_v10 = vmul.f32 %v2071_v14, %v1849_v36  ;;  %v2115_v36 = vmul.f32 %v2078_v49, %v1867_v43  ;;  %v538_v51 = vmul.f32 %v1526_v5, %v1946_v59  ;;  %v1533_v43 = vld [vmem:[%s2708_s2 + $0xc] ss:$0 sm:$0xff] }
  0xce   :  { %v2053_v26 = vpop.permute.xlu0 %302  ;;  %v135_v22 = vsub.s32 0, %v2046_v1 }
  0xcf   :  { %1434 = vperm.xlu0 %1640, %v1804_v32   ;;  %v234_v27 = vadd.s32 536870912, %v233_v46 }
  0xd0   :  { %v2062_v58 = vpop.permute.xlu1 %433  ;;  %v1509_v19 = vmin.u32 %v135_v22, %v2046_v1 }
  0xd1   :  { %2743 = vst [vmem:[#allocation14_spill] sm:$0xff] %v2062_v58  ;;  %1029 = vperm.xlu1 %1611, %v2058_v31   ;;  %v2073_v34 = vshrl.u32 %v234_v27, 30  ;;  %v125_v27 = vadd.s32 %v1978_v2, %v1987_v60  ;;  %v1529_v2 = vld [vmem:[%s2708_s2 + $0x8] ss:$0 sm:$0xff]  ;;  %v158_v58 = vsel %vm2107_vm13, 0, %v156_v13 }
  0xd2   :  { %v2066_v18 = vpop.permute.xlu0 %398  ;;  %v137_v29 = vclz %v1509_v19  ;;  %v1521_v19 = vld [vmem:[%s2708_s2] ss:$0 sm:$0xff]  ;;  %v1518_v13 = vld [vmem:[%s2706_s1 + $0x5] ss:$0 sm:$0xff] }
  0xd3   :  { %2744 = vst [vmem:[#allocation15_spill] sm:$0xff] %v2066_v18  ;;  %v236_v16 = vshll.u32 %v2073_v34, 30 }
  0xd4   :  { %v2080_v4 = vpop.permute.xlu1 %438  ;;  %v1510_v56 = vadd.s32 4294967294, %v137_v29 }
  0xd5   :  { %2745 = vst [vmem:[#allocation16_spill] sm:$0xff] %v2080_v4  ;;  %1034 = vperm.xlu1 %1611, %v1804_v32   ;;  %v2120_v21 = vsub.s32 %v233_v46, %v236_v16  ;;  %v1534_v46 = vld [vmem:[%s2708_s2 + $0xd] ss:$0 sm:$0xff] }
  0xd6   :  { %v2100_v22 = vpop.permute.xlu0 %755  ;;  %vm1511_vm14 = vcmp.lt.s32.totalorder %v1510_v56, 0 }
  0xd7   :  { %v140_v29 = vsel %vm1511_vm14, 0, %v1510_v56  ;;  %v598_v56 = vmul.f32 %v1530_v53, %v1946_v59  ;;  %v239_v25 = vsub.s32 0, %v2120_v21 }
  0xd8   :  { %v141_v60 = vsub.s32 32, %v140_v29  ;;  %v145_v4 = vsub.s32 4294967266, %v140_v29  ;;  %v142_v16 = vshll.u32 %v2046_v1, %v140_v29  ;;  %v658_v1 = vmul.f32 %v1534_v46, %v1946_v59 }
  0xd9   :  { %1613 = vset.pattern.permute.xlu1 %v2748_v17  ;;  %v450_v5 = vpop.permute.xlu1 %449  ;;  %v1513_v17 = vmin.u32 %v239_v25, %v2120_v21  ;;  %v2159_v25 = vld [vmem:[%s2706_s1 + $0x7] ss:$0 sm:$0xff]  ;;  %v2162_v59 = vmul.f32 %v1518_v13, %v1875_v45  ;;  %v1527_v45 = vld [vmem:[%s2708_s2 + $0x6] ss:$0 sm:$0xff] }
  0xda   :  { %v469_v41 = vmul.f32 %v1521_v19, %v450_v5  ;;  %v531_v39 = vmul.f32 %v1525_v57, %v450_v5  ;;  %1050 = vperm.xlu1 %1613, %v1781_v28   ;;  %v2140_v63 = vpop.permute.xlu0 %1098  ;;  %v143_v0 = vshrl.u32 %v125_v27, %v141_v60  ;;  %v146_v24 = vadd.s32 127, %v145_v4  ;;  %v2152_v57 = vld [vmem:[%s2706_s1 + $0x6] ss:$0 sm:$0xff] }
  0xdb   :  { %2749 = vst [vmem:[#allocation17_spill] sm:$0xff] %v2140_v63  ;;  %v591_v53 = vmul.f32 %v1529_v2, %v450_v5  ;;  %v651_v52 = vmul.f32 %v1533_v43, %v450_v5  ;;  %v241_v2 = vclz %v1513_v17  ;;  %v1528_v17 = vld [vmem:[%s2708_s2 + $0x7] ss:$0 sm:$0xff] }
  0xdc   :  { %v470_v29 = vadd.f32 %v469_v41, %v1909_v3  ;;  %v532_v19 = vadd.f32 %v531_v39, %v1909_v3  ;;  %v144_v63 = vor.u32 %v143_v0, %v142_v16  ;;  %v147_v11 = vshll.u32 %v146_v24, 23  ;;  %v1523_v24 = vld [vmem:[%s2708_s2 + $0x2] ss:$0 sm:$0xff] }
  0xdd   :  { %v592_v27 = vadd.f32 %v591_v53, %v1909_v3  ;;  %v652_v4 = vadd.f32 %v651_v52, %v1909_v3  ;;  %v2165_v39 = vmul.f32 %v1518_v13, %v1882_v48  ;;  %v162_v41 = vadd.s32 3, %v158_v58  ;;  %v1531_v48 = vld [vmem:[%s2708_s2 + $0xa] ss:$0 sm:$0xff] }
  0xde   :  { %1054 = vperm.xlu1 %1613, %v2058_v31   ;;  %v458_v3 = vpop.permute.xlu1 %457  ;;  %v2171_v52 = vpop.permute.xlu0 %1110  ;;  %v148_v0 = vor.u32 4788187, %v147_v11  ;;  %v477_v43 = vadd.f32 %v476_v6, %v470_v29  ;;  %v539_v60 = vadd.f32 %v538_v51, %v532_v19  ;;  %v2181_v58 = vmul.f32 %v2152_v57, %v1893_v54  ;;  %v1535_v11 = vld [vmem:[%s2708_s2 + $0xe] ss:$0 sm:$0xff]  ;;  %v1524_v51 = vld [vmem:[%s2708_s2 + $0x3] ss:$0 sm:$0xff] }
  0xdf   :  { %2750 = vst [vmem:[#allocation18_spill] sm:$0xff] %v2171_v52  ;;  %v1514_v46 = vadd.s32 4294967294, %v241_v2  ;;  %v599_v5 = vadd.f32 %v598_v56, %v592_v27  ;;  %v659_v16 = vadd.f32 %v658_v1, %v652_v4  ;;  %v2191_v6 = vmul.f32 %v2159_v25, %v1902_v61  ;;  %v1532_v1 = vld [vmem:[%s2708_s2 + $0xb] ss:$0 sm:$0xff] }
  0xe0   :  { %v149_v13 = vand.u32 2147483647, %v148_v0  ;;  %v151_v53 = vcvt.s32.f32 %v144_v63  ;;  %v229_v54 = vadd.s32 %v2027_v50, %v2034_v7  ;;  %v294_v56 = vmul.f32 %v2071_v14, %v2009_v37  ;;  %v1536_v37 = vld [vmem:[%s2708_s2 + $0xf] ss:$0 sm:$0xff] }
  0xe1   :  { %v2203_v29 = vand.u32 3, %v162_v41  ;;  %vm1515_vm0 = vcmp.lt.s32.totalorder %v1514_v46, 0  ;;  %v483_v63 = vmul.f32 %v1523_v24, %v458_v3  ;;  %v2751_v19 = vmov 2  }
  0xe2   :  { %1615 = vset.pattern.permute.xlu1 %v2751_v19  ;;  %v152_v50 = vmul.f32 %v151_v53, %v149_v13  ;;  %v244_v7 = vsel %vm1515_vm0, 0, %v1514_v46  ;;  %v545_v14 = vmul.f32 %v1527_v45, %v458_v3  ;;  %v605_v27 = vmul.f32 %v1531_v48, %v458_v3 }
  0xe3   :  { %1074 = vperm.xlu1 %1615, %v1794_v30   ;;  %v462_v4 = vpop.permute.xlu1 %461  ;;  %v2211_v2 = vpop.permute.xlu0 %411  ;;  %v245_v41 = vsub.s32 32, %v244_v7  ;;  %v249_v0 = vsub.s32 4294967266, %v244_v7  ;;  %v665_v52 = vmul.f32 %v1535_v11, %v458_v3  ;;  %v246_v42 = vshll.u32 %v2120_v21, %v244_v7 }
  0xe4   :  { %2752 = vst [vmem:[#allocation19_spill] sm:$0xff] %v2211_v2  ;;  %v489_v61 = vmul.f32 %v1524_v51, %v462_v4  ;;  %v153_v24 = vxor.u32 2147483648, %v152_v50  ;;  %v551_v18 = vmul.f32 %v1528_v17, %v462_v4  ;;  %v611_v19 = vmul.f32 %v1532_v1, %v462_v4 }
  0xe5   :  { %v671_v47 = vmul.f32 %v1536_v37, %v462_v4  ;;  %v247_v44 = vshrl.u32 %v229_v54, %v245_v41  ;;  %v250_v13 = vadd.s32 127, %v249_v0  ;;  %v2753_v37 = vand.u32 2147483647, %v1914_v9 }
  0xe6   :  { %v490_v46 = vadd.f32 %v489_v61, %v483_v63  ;;  %v154_v45 = vsel %vm71_vm12, %v153_v24, %v152_v50  ;;  %v552_v48 = vadd.f32 %v551_v18, %v545_v14  ;;  %v612_v53 = vadd.f32 %v611_v19, %v605_v27 }
  0xe7   :  { %v672_v40 = vadd.f32 %v671_v47, %v665_v52  ;;  %1082 = vperm.xlu1 %1615, %v2058_v31   ;;  %v2217_v2 = vpop.permute.xlu0 %777  ;;  %v157_v3 = vsel %vm2107_vm13, %v1905_v62, %v154_v45  ;;  %v248_v11 = vor.u32 %v247_v44, %v246_v42  ;;  %v251_v51 = vshll.u32 %v250_v13, 23 }
  0xe8   :  { %v2222_v21 = vadd.f32 %v490_v46, %v477_v43  ;;  %v2224_v54 = vpop.permute.xlu1 %715  ;;  %1642 = vcosq.f32 %v157_v3  ;;  %v2226_v17 = vadd.f32 %v552_v48, %v539_v60  ;;  %v2228_v18 = vadd.f32 %v612_v53, %v599_v5 }
  0xe9   :  { %v2230_v47 = vadd.f32 %v672_v40, %v659_v16  ;;  %1644 = vsinq.f32 %v157_v3  ;;  %v252_v52 = vor.u32 4788187, %v251_v51  ;;  %v255_v1 = vcvt.s32.f32 %v248_v11 }
  0xea   :  { %v493_v8 = vsel %vm492_vm15, %v2222_v21, 0.0  ;;  %v554_v42 = vsel %vm492_vm15, %v2226_v17, 0.0  ;;  %v614_v44 = vsel %vm492_vm15, %v2228_v18, 0.0  ;;  %vm2245_vm1 = vcmp.le.f32.partialorder %v2753_v37, 0.7853982 }
  0xeb   :  { %v494_v61 = vrot.slane %v493_v8, 4  ;;  %v674_v43 = vsel %vm492_vm15, %v2230_v47, 0.0  ;;  %1086 = vperm.xlu1 %1615, %v1804_v32   ;;  %v2241_v40 = vpop.permute.xlu0 %1134  ;;  %v253_v60 = vand.u32 2147483647, %v252_v52  ;;  %v555_v5 = vrot.slane %v554_v42, 4 }
  0xec   :  { %v615_v16 = vrot.slane %v614_v44, 4  ;;  %v675_v63 = vrot.slane %v674_v43, 4  ;;  %v311_v7 = vadd.f32 %v2115_v36, %v294_v56  ;;  %vm164_vm3 = vcmp.lt.s32.totalorder %v2203_v29, 2 }
  0xed   :  { %v495_v14 = vadd.f32 %v494_v61, %v493_v8  ;;  %v2251_v27 = vpop.permute.xlu1 %725  ;;  %v256_v32 = vmul.f32 %v255_v1, %v253_v60  ;;  %v556_v4 = vadd.f32 %v555_v5, %v554_v42  ;;  %v2756_v24 = vsub.s32 4, %v2073_v34 }
  0xee   :  { %v616_v41 = vadd.f32 %v615_v16, %v614_v44  ;;  %v676_v0 = vadd.f32 %v675_v63, %v674_v43  ;;  %v310_v13 = vmul.f32 %v2078_v49, %v2053_v26  ;;  %v2757_v36 = vmov 3  }
  0xef   :  { %v260_v19 = vsel %vm175_vm2, %v2756_v24, %v2073_v34  ;;  %v496_v46 = vrot.slane %v495_v14, 2  ;;  %1617 = vset.pattern.permute.xlu1 %v2757_v36  ;;  %v257_v56 = vxor.u32 2147483648, %v256_v32  ;;  %v557_v45 = vrot.slane %v556_v4, 2 }
  0xf0   :  { %v617_v48 = vrot.slane %v616_v41, 2  ;;  %v677_v53 = vrot.slane %v676_v0, 2  ;;  %v331_v3 = vpop.permute.xlu0 %330  ;;  %1102 = vperm.xlu1 %1617, %v1781_v28   ;;  %vm165_vm5 = vcmp.eq.s32.totalorder %v2203_v29, 0  ;;  %vm168_vm6 = vcmp.eq.s32.totalorder %v2203_v29, 2 }
  0xf1   :  { %v497_v34 = vadd.f32 %v496_v46, %v495_v14  ;;  %v341_v11 = vmul.f32 %v2152_v57, %v331_v3  ;;  %v258_v26 = vsel %vm175_vm2, %v257_v56, %v256_v32  ;;  %v558_v49 = vadd.f32 %v557_v45, %v556_v4 }
  0xf2   :  { %v618_v51 = vadd.f32 %v617_v48, %v616_v41  ;;  %v678_v52 = vadd.f32 %v677_v53, %v676_v0  ;;  %v2269_v1 = vpop.permute.xlu1 %741  ;;  %v1643_v8 = vpop.eup %1642  ;;  %v261_v28 = vsel %vm2245_vm1, %v1914_v9, %v258_v26  ;;  %v262_v61 = vsel %vm2245_vm1, 0, %v260_v19 }
  0xf3   :  { %v498_v42 = vrot.slane %v497_v34, 1  ;;  %v343_v44 = vadd.f32 %v341_v11, %v2162_v59  ;;  %v1645_v57 = vpop.eup %1644  ;;  %v169_v43 = vxor.u32 2147483648, %v1643_v8  ;;  %1646 = vcosq.f32 %v261_v28 }
  0xf4   :  { %v559_v60 = vrot.slane %v558_v49, 1  ;;  %v619_v5 = vrot.slane %v618_v51, 1  ;;  %1106 = vperm.xlu1 %1617, %v2058_v31   ;;  %v2278_v16 = vpop.permute.xlu0 %1154  ;;  %v166_v63 = vxor.u32 2147483648, %v1645_v57  ;;  %1648 = vsinq.f32 %v261_v28 }
  0xf5   :  { %v499_v37 = vadd.f32 %v498_v42, %v497_v34  ;;  %v679_v14 = vrot.slane %v678_v52, 1  ;;  %v170_v50 = vsel %vm168_vm6, %v169_v43, %v1645_v57  ;;  %v345_v41 = vadd.f32 %v343_v44, %v311_v7 }
  0xf6   :  { %v560_v32 = vadd.f32 %v559_v60, %v558_v49  ;;  %v620_v4 = vadd.f32 %v619_v5, %v618_v51  ;;  %v2282_v59 = vpop.permute.xlu1 %745  ;;  %v167_v0 = vsel %vm165_vm5, %v1643_v8, %v166_v63  ;;  %v266_v24 = vadd.s32 3, %v262_v61 }
  0xf7   :  { %v501_v19 = vmul.f32 0.25, %v499_v37  ;;  %v680_v46 = vadd.f32 %v679_v14, %v678_v52  ;;  %v171_v36 = vsel %vm164_vm3, %v167_v0, %v170_v50  ;;  %v2758_v48 = vmov 4  }
  0xf8   :  { %v561_v56 = vmul.f32 0.25, %v560_v32  ;;  %v621_v45 = vmul.f32 0.25, %v620_v4  ;;  %1619 = vset.pattern.permute.xlu1 %v2758_v48  ;;  %v2289_v53 = vpop.permute.xlu0 %1166  ;;  %v362_v3 = vadd.f32 %v2191_v6, %v345_v41  ;;  %v172_v7 = vsel %vm161_vm4, nan, %v171_v36  ;;  %v2336_v41 = vld [vmem:[%s2706_s1 + $0x38] sm:$0xff] }
  0xf9   :  { %v312_v34 = vadd.f32 %v310_v13, %v2098_v10  ;;  %v2296_v11 = vsub.f32 %v2222_v21, %v501_v19  ;;  %v681_v26 = vmul.f32 0.25, %v680_v46  ;;  %1130 = vperm.xlu1 %1619, %v1794_v30   ;;  %v374_v29 = vmul.f32 %v1916_v12, %v172_v7 }
  0xfa   :  { %v2301_v49 = vsub.f32 %v2226_v17, %v561_v56  ;;  %v2304_v51 = vsub.f32 %v2228_v18, %v621_v45  ;;  %v344_v10 = vadd.f32 %v2181_v58, %v2165_v39  ;;  %v267_v30 = vand.u32 3, %v266_v24 }
  0xfb   :  { %v503_v62 = vmul.f32 %v2296_v11, %v2296_v11  ;;  %v2309_v6 = vsub.f32 %v2230_v47, %v681_v26  ;;  %v2313_v21 = vpop.permute.xlu1 %759  ;;  %v376_v18 = vadd.f32 %v374_v29, %v362_v3 }
  0xfc   :  { %v563_v12 = vmul.f32 %v2301_v49, %v2301_v49  ;;  %v623_v17 = vmul.f32 %v2304_v51, %v2304_v51  ;;  %v346_v8 = vadd.f32 %v344_v10, %v312_v34  ;;  %vm272_vm8 = vcmp.eq.s32.totalorder %v267_v30, 2 }
  0xfd   :  { %v504_v13 = vsel %vm492_vm15, %v503_v62, 0.0  ;;  %v683_v47 = vmul.f32 %v2309_v6, %v2309_v6  ;;  %v354_v52 = vpop.permute.xlu0 %353  ;;  %1138 = vperm.xlu1 %1619, %v2058_v31   ;;  %v1647_v39 = vpop.eup %1646  ;;  %378 = vst [vmem:[%s2709_s3] sm:$0xff] %v376_v18  ;;  %vm269_vm9 = vcmp.eq.s32.totalorder %v267_v30, 0  ;;  %vm268_vm10 = vcmp.lt.s32.totalorder %v267_v30, 2 }
  0xfe   :  { %v505_v58 = vrot.slane %v504_v13, 4  ;;  %v564_v28 = vsel %vm492_vm15, %v563_v12, 0.0  ;;  %v624_v61 = vsel %vm492_vm15, %v623_v17, 0.0  ;;  %v361_v42 = vmul.f32 %v2159_v25, %v354_v52  ;;  %v1649_v44 = vpop.eup %1648  ;;  %v2348_v17 = vld [vmem:[%s2706_s1 + $0x28] sm:$0xff] }
  0xff   :  { %v273_v57 = vxor.u32 2147483648, %v1647_v39  ;;  %v565_v43 = vrot.slane %v564_v28, 4  ;;  %v625_v60 = vrot.slane %v624_v61, 4  ;;  %v684_v5 = vsel %vm492_vm15, %v683_v47, 0.0 }
 0x100   :  { %v270_v63 = vxor.u32 2147483648, %v1649_v44  ;;  %v506_v37 = vadd.f32 %v505_v58, %v504_v13  ;;  %v685_v14 = vrot.slane %v684_v5, 4  ;;  %v2331_v50 = vpop.permute.xlu1 %773  ;;  %v363_v45 = vadd.f32 %v361_v42, %v346_v8 }
 0x101   :  { %v274_v32 = vsel %vm272_vm8, %v273_v57, %v1649_v44  ;;  %v566_v4 = vadd.f32 %v565_v43, %v564_v28  ;;  %v626_v25 = vadd.f32 %v625_v60, %v624_v61  ;;  %1142 = vperm.xlu1 %1619, %v2336_v41   ;;  %v2759_v62 = vmov 5  }
 0x102   :  { %v271_v0 = vsel %vm269_vm9, %v1647_v39, %v270_v63  ;;  %v507_v24 = vrot.slane %v506_v37, 2  ;;  %v686_v19 = vadd.f32 %v685_v14, %v684_v5  ;;  %v2760_v63 = vmov 6   ;;  %v2363_v14 = vld [vmem:[%s2706_s1 + $0x20] sm:$0xff] }
 0x103   :  { %v275_v46 = vsel %vm268_vm10, %v271_v0, %v274_v32  ;;  %v567_v36 = vrot.slane %v566_v4, 2  ;;  %v627_v56 = vrot.slane %v626_v25, 2 }
 0x104   :  { %v276_v48 = vsel %vm265_vm7, nan, %v275_v46  ;;  %v508_v3 = vadd.f32 %v507_v24, %v506_v37  ;;  %v687_v7 = vrot.slane %v686_v19, 2 }
 0x105   :  { %v375_v34 = vmul.f32 %v1927_v33, %v276_v48  ;;  %v568_v26 = vadd.f32 %v567_v36, %v566_v4  ;;  %v628_v29 = vadd.f32 %v627_v56, %v626_v25  ;;  %1621 = vset.pattern.permute.xlu1 %v2759_v62  ;;  %v2343_v10 = vpop.permute.xlu1 %787  ;;  %v2761_v48 = vmov 7  }
 0x106   :  { %v509_v30 = vrot.slane %v508_v3, 1  ;;  %v688_v12 = vadd.f32 %v687_v7, %v686_v19  ;;  %1158 = vperm.xlu1 %1621, %v2348_v17  }
 0x107   :  { %v569_v9 = vrot.slane %v568_v26, 1  ;;  %v629_v18 = vrot.slane %v628_v29, 1  ;;  %v377_v13 = vadd.f32 %v375_v34, %v363_v45 }
 0x108   :  { %v510_v47 = vadd.f32 %v509_v30, %v508_v3  ;;  %v689_v33 = vrot.slane %v688_v12, 1 }
 0x109   :  { %v570_v52 = vadd.f32 %v569_v9, %v568_v26  ;;  %v630_v8 = vadd.f32 %v629_v18, %v628_v29  ;;  %379 = vst [vmem:[%s2709_s3 + $0x8] sm:$0xff] %v377_v13  ;;  %v2354_v39 = vpop.permute.xlu1 %791 }
 0x10a   :  { %v511_v58 = vmul.f32 0.25, %v510_v47  ;;  %v690_v28 = vadd.f32 %v689_v33, %v688_v12  ;;  %1162 = vperm.xlu1 %1621, %v2058_v31  }
 0x10b   :  { %v571_v61 = vmul.f32 0.25, %v570_v52  ;;  %v631_v42 = vmul.f32 0.25, %v630_v8 }
 0x10c   :  { %v512_v44 = vadd.f32 1e-06, %v511_v58  ;;  %v691_v57 = vmul.f32 0.25, %v690_v28  ;;  %v2762_v28 = vmov 8  }
 0x10d   :  { %v572_v43 = vadd.f32 1e-06, %v571_v61  ;;  %v632_v60 = vadd.f32 1e-06, %v631_v42 }
 0x10e   :  { %1650 = vrsqrt.f32 %v512_v44  ;;  %v692_v5 = vadd.f32 1e-06, %v691_v57  ;;  %1623 = vset.pattern.permute.xlu1 %v2760_v63  ;;  %v2358_v37 = vpop.permute.xlu1 %807 }
 0x10f   :  { %1652 = vrsqrt.f32 %v572_v43  ;;  %1182 = vperm.xlu1 %1623, %v2363_v14  }
 0x110   :  { %1654 = vrsqrt.f32 %v632_v60 }
 0x111   :  { %1656 = vrsqrt.f32 %v692_v5 }
 0x113   :  { %1190 = vperm.xlu1 %1623, %v2058_v31   ;;  %v2367_v32 = vpop.permute.xlu1 %817 }
 0x117   :  { %1194 = vperm.xlu1 %1623, %v2336_v41  }
 0x118   :  { %v1651_v4 = vpop.eup %1650  ;;  %v2370_v25 = vpop.permute.xlu1 %835 }
 0x119   :  { %v1653_v0 = vpop.eup %1652  ;;  %v514_v24 = vmul.f32 %v1651_v4, %v2296_v11 }
 0x11a   :  { %v1655_v19 = vpop.eup %1654  ;;  %v574_v46 = vmul.f32 %v1653_v0, %v2301_v49  ;;  %v718_v0 = vlaneseq }
 0x11b   :  { %v1657_v36 = vpop.eup %1656  ;;  %v515_v56 = vmul.f32 %v514_v24, %v1938_v55  ;;  %v634_v45 = vmul.f32 %v1655_v19, %v2304_v51  ;;  %1625 = vset.pattern.permute.xlu1 %v2761_v48 }
 0x11c   :  { %v575_v3 = vmul.f32 %v574_v46, %v1938_v55  ;;  %v694_v7 = vmul.f32 %v1657_v36, %v2309_v6  ;;  %1210 = vperm.xlu1 %1625, %v2348_v17   ;;  %v2380_v34 = vpop.permute.xlu1 %839  ;;  %v2399_v19 = vshrl.u32 %v718_v0, 7  ;;  %v2763_v36 = vmov 9  }
 0x11d   :  { %v516_v11 = vadd.f32 %v515_v56, %v1955_v23  ;;  %v635_v26 = vmul.f32 %v634_v45, %v1938_v55 }
 0x11e   :  { %v576_v49 = vadd.f32 %v575_v3, %v1955_v23  ;;  %v695_v29 = vmul.f32 %v694_v7, %v1938_v55  ;;  %v2406_v45 = vsub.s32 0, %v2399_v19  ;;  %v2409_v48 = vsub.s32 1, %v2399_v19 }
 0x11f   :  { %v518_v62 = vmul.f32 0.044715, %v516_v11  ;;  %v636_v51 = vadd.f32 %v635_v26, %v1955_v23  ;;  %v517_v7 = vmul.f32 0.5, %v516_v11 }
 0x120   :  { %v578_v30 = vmul.f32 0.044715, %v576_v49  ;;  %v696_v12 = vadd.f32 %v695_v29, %v1955_v23  ;;  %1214 = vperm.xlu1 %1625, %v2058_v31   ;;  %v2412_v29 = vsub.s32 2, %v2399_v19 }
 0x121   :  { %v519_v6 = vmul.f32 %v518_v62, %v516_v11  ;;  %v638_v9 = vmul.f32 0.044715, %v636_v51  ;;  %v2389_v18 = vpop.permute.xlu1 %853  ;;  %v2415_v62 = vsub.s32 3, %v2399_v19 }
 0x122   :  { %v579_v13 = vmul.f32 %v578_v30, %v576_v49  ;;  %v698_v47 = vmul.f32 0.044715, %v696_v12 }
 0x123   :  { %v520_v33 = vmul.f32 %v519_v6, %v516_v11  ;;  %v639_v52 = vmul.f32 %v638_v9, %v636_v51  ;;  %v577_v9 = vmul.f32 0.5, %v576_v49 }
 0x124   :  { %v580_v8 = vmul.f32 %v579_v13, %v576_v49  ;;  %v699_v58 = vmul.f32 %v698_v47, %v696_v12  ;;  %1626 = vset.pattern.permute.xlu1 %v2762_v28 }
 0x125   :  { %v521_v55 = vadd.f32 %v520_v33, %v516_v11  ;;  %v640_v61 = vmul.f32 %v639_v52, %v636_v51  ;;  %1238 = vperm.xlu1 %1626, %v2363_v14   ;;  %v637_v33 = vmul.f32 0.5, %v636_v51 }
 0x126   :  { %v581_v42 = vadd.f32 %v580_v8, %v576_v49  ;;  %v700_v23 = vmul.f32 %v699_v58, %v696_v12  ;;  %v2393_v44 = vpop.permute.xlu1 %865  ;;  %v2419_v8 = vpop.permute.xlu0 %428  ;;  %v697_v58 = vmul.f32 0.5, %v696_v12 }
 0x127   :  { %v522_v57 = vmul.f32 0.7978846, %v521_v55  ;;  %v641_v43 = vadd.f32 %v640_v61, %v636_v51 }
 0x128   :  { %v582_v60 = vmul.f32 0.7978846, %v581_v42  ;;  %v701_v5 = vadd.f32 %v700_v23, %v696_v12 }
 0x129   :  { %1658 = vtanh.f32 %v522_v57  ;;  %v642_v63 = vmul.f32 0.7978846, %v641_v43  ;;  %1246 = vperm.xlu1 %1626, %v2058_v31  }
 0x12a   :  { %1660 = vtanh.f32 %v582_v60  ;;  %v702_v4 = vmul.f32 0.7978846, %v701_v5 }
 0x12b   :  { %1662 = vtanh.f32 %v642_v63  ;;  %v2396_v24 = vpop.permute.xlu1 %879 }
 0x12c   :  { %1664 = vtanh.f32 %v702_v4 }
 0x12d   :  { %1250 = vperm.xlu1 %1626, %v2336_v41  }
 0x12f   :  { %v2401_v46 = vpop.permute.xlu1 %883 }
 0x131   :  { %1629 = vset.pattern.permute.xlu1 %v2763_v36  ;;  %v2764_v36 = vmov 10  }
 0x132   :  { %1266 = vperm.xlu1 %1629, %v2348_v17  }
 0x133   :  { %v1659_v56 = vpop.eup %1658 }
 0x134   :  { %v1661_v3 = vpop.eup %1660  ;;  %v524_v26 = vadd.f32 1.0, %v1659_v56  ;;  %v2417_v30 = vpop.permute.xlu1 %901 }
 0x135   :  { %v1663_v6 = vpop.eup %1662  ;;  %v584_v13 = vadd.f32 1.0, %v1661_v3 }
 0x136   :  { %v1665_v47 = vpop.eup %1664  ;;  %v525_v52 = vmul.f32 %v524_v26, %v517_v7  ;;  %1270 = vperm.xlu1 %1629, %v2058_v31   ;;  %v644_v11 = vadd.f32 1.0, %v1663_v6 }
 0x137   :  { %v704_v28 = vadd.f32 1.0, %v1665_v47  ;;  %v585_v55 = vmul.f32 %v584_v13, %v577_v9  ;;  %v2442_v9 = vpop.permute.xlu0 %443 }
 0x138   :  { %v721_v61 = vrot.slane %v525_v52, %v2406_v45  ;;  %v735_v42 = vrot.slane %v525_v52, %v2409_v48  ;;  %v751_v23 = vrot.slane %v525_v52, %v2412_v29  ;;  %v765_v49 = vrot.slane %v525_v52, %v2415_v62 }
 0x139   :  { %v783_v57 = vrot.slane %v585_v55, %v2406_v45  ;;  %v797_v51 = vrot.slane %v585_v55, %v2409_v48  ;;  %v813_v43 = vrot.slane %v585_v55, %v2412_v29  ;;  %v827_v60 = vrot.slane %v585_v55, %v2415_v62  ;;  %v912_v5 = vpop.permute.xlu1 %911 }
 0x13a   :  { %v737_v12 = vmul.f32 %v735_v42, %v1957_v20  ;;  %v723_v63 = vmul.f32 %v721_v61, %v2224_v54  ;;  %v722_v4 = vmul.f32 %v721_v61, %v1922_v15  ;;  %v736_v0 = vmul.f32 %v735_v42, %v2251_v27  ;;  %1630 = vset.pattern.permute.xlu1 %v2764_v36 }
 0x13b   :  { %v785_v56 = vmul.f32 %v783_v57, %v2217_v2  ;;  %v766_v3 = vmul.f32 %v765_v49, %v2100_v22  ;;  %v752_v7 = vmul.f32 %v751_v23, %v2269_v1  ;;  %v753_v26 = vmul.f32 %v751_v23, %v2282_v59  ;;  %1290 = vperm.xlu1 %1630, %v2363_v14  }
 0x13c   :  { %v739_v6 = vadd.f32 %v737_v12, %v723_v63  ;;  %v738_v20 = vadd.f32 %v736_v0, %v722_v4  ;;  %v767_v54 = vmul.f32 %v765_v49, %v2313_v21  ;;  %v784_v15 = vmul.f32 %v783_v57, %v2331_v50  ;;  %v2765_v0 = vld [vmem:[#allocation2_spill] sm:$0xff] }
 0x13d   :  { %v768_v27 = vadd.f32 %v766_v3, %v752_v7  ;;  %v798_v13 = vmul.f32 %v797_v51, %v2343_v10  ;;  %v799_v2 = vmul.f32 %v797_v51, %v2354_v39  ;;  %v829_v22 = vmul.f32 %v827_v60, %v1847_v35  ;;  %v804_v51 = vpop.permute.xlu0 %803  ;;  %v2766_v7 = vld [vmem:[#allocation4_spill] sm:$0xff] }
 0x13e   :  { %v769_v1 = vadd.f32 %v767_v54, %v753_v26  ;;  %v815_v59 = vmul.f32 %v813_v43, %v2358_v37  ;;  %v828_v47 = vmul.f32 %v827_v60, %v2367_v32  ;;  %v645_v52 = vmul.f32 %v644_v11, %v637_v33  ;;  %v928_v55 = vpop.permute.xlu1 %927  ;;  %v2767_v54 = vld [vmem:[#allocation3_spill] sm:$0xff] }
 0x13f   :  { %v770_v61 = vadd.f32 %v768_v27, %v738_v20  ;;  %v800_v21 = vadd.f32 %v798_v13, %v784_v15  ;;  %v801_v42 = vadd.f32 %v799_v2, %v785_v56  ;;  %v705_v50 = vmul.f32 %v704_v28, %v697_v58  ;;  %1298 = vperm.xlu1 %1630, %v2058_v31  }
 0x140   :  { %v771_v23 = vadd.f32 %v769_v1, %v739_v6  ;;  %v831_v49 = vadd.f32 %v829_v22, %v815_v59  ;;  %v845_v10 = vrot.slane %v645_v52, %v2406_v45  ;;  %v859_v39 = vrot.slane %v645_v52, %v2409_v48 }
 0x141   :  { %v875_v35 = vrot.slane %v645_v52, %v2412_v29  ;;  %v889_v37 = vrot.slane %v645_v52, %v2415_v62  ;;  %v907_v32 = vrot.slane %v705_v50, %v2406_v45  ;;  %v921_v33 = vrot.slane %v705_v50, %v2409_v48 }
 0x142   :  { %v833_v11 = vadd.f32 %v831_v49, %v801_v42  ;;  %v860_v57 = vmul.f32 %v859_v39, %v1856_v38  ;;  %v846_v58 = vmul.f32 %v845_v10, %v2370_v25  ;;  %v847_v28 = vmul.f32 %v845_v10, %v2380_v34  ;;  %v932_v60 = vpop.permute.xlu1 %931 }
 0x143   :  { %v861_v12 = vmul.f32 %v859_v39, %v2389_v18  ;;  %v876_v63 = vmul.f32 %v875_v35, %v2393_v44  ;;  %v890_v4 = vmul.f32 %v889_v37, %v2396_v24  ;;  %v877_v36 = vmul.f32 %v875_v35, %v2765_v0  ;;  %1302 = vperm.xlu1 %1630, %v2336_v41  }
 0x144   :  { %v959_v56 = vadd.f32 %v833_v11, %v771_v23  ;;  %v862_v3 = vadd.f32 %v860_v57, %v846_v58  ;;  %v891_v38 = vmul.f32 %v889_v37, %v2401_v46  ;;  %v923_v25 = vmul.f32 %v921_v33, %v2766_v7 }
 0x145   :  { %v863_v26 = vadd.f32 %v861_v12, %v847_v28  ;;  %v892_v34 = vadd.f32 %v890_v4, %v876_v63  ;;  %v909_v6 = vmul.f32 %v907_v32, %v2417_v30  ;;  %v814_v20 = vmul.f32 %v813_v43, %v804_v51  ;;  %v2769_v43 = vld [vmem:[#allocation5_spill] sm:$0xff]  ;;  %v2772_v28 = vld [vmem:[#allocation8_spill] sm:$0xff] }
 0x146   :  { %v893_v18 = vadd.f32 %v891_v38, %v877_v36  ;;  %v908_v44 = vmul.f32 %v907_v32, %v2767_v54  ;;  %v922_v15 = vmul.f32 %v921_v33, %v912_v5  ;;  %v937_v24 = vrot.slane %v705_v50, %v2412_v29 }
 0x147   :  { %v894_v27 = vadd.f32 %v892_v34, %v862_v3  ;;  %v925_v13 = vadd.f32 %v923_v25, %v909_v6  ;;  %v830_v2 = vadd.f32 %v828_v47, %v814_v20  ;;  %v951_v22 = vrot.slane %v705_v50, %v2415_v62  ;;  %v946_v46 = vpop.permute.xlu1 %945 }
 0x148   :  { %v2768_v1 = vmov 11   ;;  %v895_v59 = vadd.f32 %v893_v18, %v863_v26  ;;  %v938_v52 = vmul.f32 %v937_v24, %v928_v55  ;;  %v939_v23 = vmul.f32 %v937_v24, %v932_v60 }
 0x149   :  { %1633 = vset.pattern.permute.xlu1 %v2768_v1  ;;  %v832_v30 = vadd.f32 %v830_v2, %v800_v21  ;;  %v952_v42 = vmul.f32 %v951_v22, %v2769_v43  ;;  %v953_v49 = vmul.f32 %v951_v22, %v946_v46  ;;  %v924_v10 = vadd.f32 %v922_v15, %v908_v44 }
 0x14a   :  { %1318 = vperm.xlu1 %1633, %v2348_v17   ;;  %v2770_v55 = vmov 12   ;;  %v2774_v18 = vmov 14  }
 0x14b   :  { %v958_v5 = vadd.f32 %v832_v30, %v770_v61  ;;  %v954_v39 = vadd.f32 %v952_v42, %v938_v52  ;;  %v955_v35 = vadd.f32 %v953_v49, %v939_v23  ;;  %v2771_v61 = vld [vmem:[#allocation15_spill] sm:$0xff]  ;;  %v2775_v52 = vmov 15  }
 0x14c   :  { %v2474_v47 = vpop.permute.xlu1 %1019 }
 0x14d   :  { %v956_v50 = vadd.f32 %v954_v39, %v924_v10  ;;  %v957_v37 = vadd.f32 %v955_v35, %v925_v13  ;;  %v2776_v35 = vld [vmem:[#allocation10_spill] sm:$0xff] }
 0x14e   :  { %1322 = vperm.xlu1 %1633, %v2058_v31  }
 0x14f   :  { %v960_v32 = vadd.f32 %v956_v50, %v894_v27  ;;  %v961_v33 = vadd.f32 %v957_v37, %v895_v59  ;;  %v2777_v37 = vld [vmem:[#allocation19_spill] sm:$0xff] }
 0x150   :  { %v2477_v11 = vpop.permute.xlu1 %1029 }
 0x151   :  { %v962_v21 = vadd.f32 %v960_v32, %v958_v5  ;;  %v963_v57 = vadd.f32 %v961_v33, %v959_v56  ;;  %v2773_v56 = vmov 13  }
 0x152   :  { %1634 = vset.pattern.permute.xlu1 %v2770_v55  ;;  %v2778_v55 = vld [vmem:[#allocation11_spill] sm:$0xff] }
 0x153   :  { %1346 = vperm.xlu1 %1634, %v2363_v14   ;;  %v964_v58 = vadd.f32 %v962_v21, %v2771_v61  ;;  %v965_v51 = vadd.f32 %v963_v57, %v2772_v28  ;;  %v2779_v57 = vld [vmem:[#allocation13_spill] sm:$0xff] }
 0x154   :  { %v2482_v60 = vpop.permute.xlu1 %1034 }
 0x155   :  { %v966_v12 = vadd.f32 %v965_v51, %v964_v58 }
 0x157   :  { %1354 = vperm.xlu1 %1634, %v2058_v31   ;;  %v967_v63 = vrot.slane %v966_v12, 4 }
 0x159   :  { %v968_v4 = vadd.f32 %v967_v63, %v966_v12  ;;  %v2486_v0 = vpop.permute.xlu1 %1050 }
 0x15b   :  { %1358 = vperm.xlu1 %1634, %v2336_v41   ;;  %v969_v36 = vrot.slane %v968_v4, 2 }
 0x15d   :  { %v970_v3 = vadd.f32 %v969_v36, %v968_v4  ;;  %v2489_v38 = vpop.permute.xlu1 %1054 }
 0x15f   :  { %1637 = vset.pattern.permute.xlu1 %v2773_v56  ;;  %v971_v7 = vrot.slane %v970_v3, 1 }
 0x160   :  { %1374 = vperm.xlu1 %1637, %v2348_v17  }
 0x161   :  { %v972_v25 = vadd.f32 %v971_v7, %v970_v3 }
 0x162   :  { %v2493_v26 = vpop.permute.xlu1 %1074 }
 0x163   :  { %v974_v34 = vmul.f32 0.0625, %v972_v25 }
 0x164   :  { %1378 = vperm.xlu1 %1637, %v2058_v31  }
 0x165   :  { %v975_v6 = vsub.f32 %v964_v58, %v974_v34  ;;  %v976_v20 = vsub.f32 %v965_v51, %v974_v34  ;;  %v1187_v34 = vpop.permute.xlu0 %1186 }
 0x166   :  { %v2496_v54 = vpop.permute.xlu1 %1082 }
 0x167   :  { %v977_v44 = vmul.f32 %v975_v6, %v975_v6  ;;  %v978_v15 = vmul.f32 %v976_v20, %v976_v20 }
 0x168   :  { %1638 = vset.pattern.permute.xlu1 %v2774_v18 }
 0x169   :  { %1398 = vperm.xlu1 %1638, %v2363_v14   ;;  %v979_v24 = vadd.f32 %v978_v15, %v977_v44  ;;  %v1207_v18 = vpop.permute.xlu0 %1206 }
 0x16a   :  { %v2499_v27 = vpop.permute.xlu1 %1086 }
 0x16b   :  { %v980_v13 = vrot.slane %v979_v24, 4 }
 0x16d   :  { %1406 = vperm.xlu1 %1638, %v2058_v31   ;;  %v981_v2 = vadd.f32 %v980_v13, %v979_v24  ;;  %v1675_v31 = vld [vmem:[%s2706_s1 + $0x30] sm:$0xff]  ;;  %s1698_s1 = smov 64  }
 0x16f   :  { %v982_v22 = vrot.slane %v981_v2, 2  ;;  %v2503_v1 = vpop.permute.xlu1 %1102 }
 0x171   :  { %1410 = vperm.xlu1 %1638, %v2336_v41   ;;  %v983_v46 = vadd.f32 %v982_v22, %v981_v2 }
 0x173   :  { %v984_v59 = vrot.slane %v983_v46, 1  ;;  %v2506_v30 = vpop.permute.xlu1 %1106 }
 0x175   :  { %1641 = vset.pattern.permute.xlu1 %v2775_v52  ;;  %v985_v14 = vadd.f32 %v984_v59, %v983_v46  ;;  %v2727_v46 = vsub.s32 6, %v2399_v19  ;;  %v1219_v59 = vpop.permute.xlu0 %1218  ;;  %v2728_v52 = vsub.s32 7, %v2399_v19 }
 0x176   :  { %1426 = vperm.xlu1 %1641, %v2348_v17  }
 0x177   :  { %v986_v43 = vmul.f32 0.0625, %v985_v14  ;;  %v2730_v14 = vsub.s32 4, %v2399_v19 }
 0x178   :  { %v2512_v42 = vpop.permute.xlu1 %1130 }
 0x179   :  { %v987_v41 = vadd.f32 1e-06, %v986_v43 }
 0x17a   :  { %1430 = vperm.xlu1 %1641, %v1675_v31  }
 0x17b   :  { %1666 = vrsqrt.f32 %v987_v41 }
 0x17c   :  { %v2514_v23 = vpop.permute.xlu1 %1138 }
 0x180   :  { %v2516_v49 = vpop.permute.xlu1 %1142 }
 0x185   :  { %v1667_v5 = vpop.eup %1666  ;;  %v2518_v10 = vpop.permute.xlu1 %1158 }
 0x186   :  { %v989_v39 = vmul.f32 %v1667_v5, %v975_v6  ;;  %v990_v17 = vmul.f32 %v1667_v5, %v976_v20 }
 0x188   :  { %v991_v50 = vmul.f32 %v989_v39, %v2776_v35  ;;  %v992_v32 = vmul.f32 %v990_v17, %v2777_v37  ;;  %v2729_v39 = vsub.s32 5, %v2399_v19 }
 0x189   :  { %v2522_v33 = vpop.permute.xlu1 %1162 }
 0x18a   :  { %v993_v21 = vadd.f32 %v991_v50, %v2778_v55  ;;  %v2526_v61 = vadd.f32 %v992_v32, %v2779_v57  ;;  %v2780_v50 = vld [vmem:[#allocation9_spill] sm:$0xff] }
 0x18c   :  { %v997_v58 = vmul.f32 0.044715, %v993_v21  ;;  %v998_v12 = vmul.f32 0.044715, %v2526_v61  ;;  %v995_v13 = vmul.f32 0.5, %v993_v21 }
 0x18e   :  { %v999_v28 = vmul.f32 %v997_v58, %v993_v21  ;;  %v2528_v51 = vpop.permute.xlu1 %1182  ;;  %v1000_v3 = vmul.f32 %v998_v12, %v2526_v61 }
 0x190   :  { %v1001_v63 = vmul.f32 %v999_v28, %v993_v21  ;;  %v1002_v25 = vmul.f32 %v1000_v3, %v2526_v61 }
 0x192   :  { %v1003_v4 = vadd.f32 %v1001_v63, %v993_v21  ;;  %v2531_v36 = vpop.permute.xlu1 %1190  ;;  %v1004_v6 = vadd.f32 %v1002_v25, %v2526_v61  ;;  %v2781_v21 = vld [vmem:[#allocation6_spill] sm:$0xff] }
 0x194   :  { %v1005_v56 = vmul.f32 0.7978846, %v1003_v4  ;;  %v1006_v44 = vmul.f32 0.7978846, %v1004_v6 }
 0x196   :  { %1668 = vtanh.f32 %v1005_v56  ;;  %v2534_v7 = vpop.permute.xlu1 %1194  ;;  %v2782_v56 = vld [vmem:[#allocation7_spill] sm:$0xff] }
 0x197   :  { %1670 = vtanh.f32 %v1006_v44  ;;  %v2784_v44 = vld [vmem:[#allocation18_spill] sm:$0xff] }
 0x19b   :  { %v2538_v20 = vpop.permute.xlu1 %1210 }
 0x19f   :  { %v2540_v15 = vpop.permute.xlu1 %1214 }
 0x1a0   :  { %v1669_v24 = vpop.eup %1668 }
 0x1a1   :  { %v1009_v2 = vadd.f32 1.0, %v1669_v24 }
 0x1a3   :  { %v1011_v22 = vmul.f32 %v1009_v2, %v995_v13 }
 0x1a4   :  { %v2545_v43 = vpop.permute.xlu1 %1238 }
 0x1a5   :  { %v1040_v31 = vrot.slane %v1011_v22, %v2406_v45  ;;  %v1064_v41 = vrot.slane %v1011_v22, %v2409_v48  ;;  %v1092_v5 = vrot.slane %v1011_v22, %v2412_v29  ;;  %v1116_v17 = vrot.slane %v1011_v22, %v2415_v62 }
 0x1a6   :  { %v1200_v32 = vrot.slane %v1011_v22, %v2727_v46  ;;  %v1148_v4 = vrot.slane %v1011_v22, %v2730_v14  ;;  %v1172_v3 = vrot.slane %v1011_v22, %v2729_v39 }
 0x1a7   :  { %v1043_v35 = vmul.f32 %v1040_v31, %v2477_v11  ;;  %v1068_v37 = vmul.f32 %v1064_v41, %v2780_v50  ;;  %v1044_v55 = vmul.f32 %v1040_v31, %v2482_v60  ;;  %v1042_v57 = vmul.f32 %v1040_v31, %v2781_v21  ;;  %v2569_v60 = vpop.permute.xlu0 %1242  ;;  %v2785_v50 = vld [vmem:[#allocation12_spill] sm:$0xff] }
 0x1a8   :  { %v1066_v58 = vmul.f32 %v1064_v41, %v2486_v0  ;;  %v1067_v28 = vmul.f32 %v1064_v41, %v2489_v38  ;;  %v2560_v12 = vpop.permute.xlu1 %1246  ;;  %v1095_v63 = vmul.f32 %v1092_v5, %v2496_v54  ;;  %v1224_v11 = vrot.slane %v1011_v22, %v2728_v52  ;;  %v2783_v38 = vld [vmem:[#allocation17_spill] sm:$0xff] }
 0x1a9   :  { %v1065_v25 = vmul.f32 %v1064_v41, %v2782_v56  ;;  %v1041_v0 = vmul.f32 %v1040_v31, %v2474_v47  ;;  %v1117_v6 = vmul.f32 %v1116_v17, %v2783_v38  ;;  %v1120_v24 = vmul.f32 %v1116_v17, %v2784_v44  ;;  %v1671_v41 = vpop.eup %1670 }
 0x1aa   :  { %v1072_v54 = vadd.f32 %v1068_v37, %v1044_v55  ;;  %v1096_v13 = vmul.f32 %v1092_v5, %v2499_v27  ;;  %v1202_v2 = vmul.f32 %v1200_v32, %v1187_v34  ;;  %v1094_v21 = vmul.f32 %v1092_v5, %v2785_v50 }
 0x1ab   :  { %v1070_v46 = vadd.f32 %v1066_v58, %v1042_v57  ;;  %v1071_v52 = vadd.f32 %v1067_v28, %v1043_v35  ;;  %v1118_v22 = vmul.f32 %v1116_v17, %v2503_v1  ;;  %v1119_v39 = vmul.f32 %v1116_v17, %v2506_v30  ;;  %v2585_v58 = vpop.permute.xlu0 %1262 }
 0x1ac   :  { %v2579_v14 = vpop.permute.xlu1 %1250  ;;  %v1093_v47 = vmul.f32 %v1092_v5, %v2493_v26  ;;  %v1124_v31 = vadd.f32 %v1120_v24, %v1096_v13  ;;  %v1173_v56 = vmul.f32 %v1172_v3, %v2278_v16  ;;  %v1149_v37 = vmul.f32 %v1148_v4, %v2512_v42 }
 0x1ad   :  { %v1122_v27 = vadd.f32 %v1118_v22, %v1094_v21  ;;  %v1123_v34 = vadd.f32 %v1119_v39, %v1095_v63  ;;  %v1151_v55 = vmul.f32 %v1148_v4, %v2514_v23  ;;  %v1176_v1 = vmul.f32 %v1172_v3, %v2289_v53 }
 0x1ae   :  { %v1128_v57 = vadd.f32 %v1124_v31, %v1072_v54  ;;  %v1177_v35 = vadd.f32 %v1173_v56, %v1149_v37  ;;  %v1010_v30 = vadd.f32 1.0, %v1671_v41  ;;  %v1152_v26 = vmul.f32 %v1148_v4, %v2516_v49 }
 0x1af   :  { %v1126_v17 = vadd.f32 %v1122_v27, %v1070_v46  ;;  %v1127_v28 = vadd.f32 %v1123_v34, %v1071_v52  ;;  %v1069_v5 = vadd.f32 %v1065_v25, %v1041_v0  ;;  %v1121_v38 = vadd.f32 %v1117_v6, %v1093_v47  ;;  %v2597_v6 = vpop.permute.xlu0 %1274 }
 0x1b0   :  { %v1225_v16 = vmul.f32 %v1224_v11, %v1207_v18  ;;  %v1150_v42 = vmul.f32 %v1148_v4, %v2241_v40  ;;  %v996_v23 = vmul.f32 0.5, %v2526_v61  ;;  %v1180_v39 = vadd.f32 %v1176_v1, %v1152_v26 }
 0x1b1   :  { %v2590_v44 = vpop.permute.xlu1 %1266  ;;  %v1174_v63 = vmul.f32 %v1172_v3, %v2518_v10  ;;  %v1175_v24 = vmul.f32 %v1172_v3, %v2522_v33  ;;  %v1228_v53 = vmul.f32 %v1224_v11, %v1219_v59  ;;  %v1201_v46 = vmul.f32 %v1200_v32, %v2528_v51 }
 0x1b2   :  { %v1203_v52 = vmul.f32 %v1200_v32, %v2531_v36  ;;  %v1012_v49 = vmul.f32 %v1010_v30, %v996_v23  ;;  %v1125_v18 = vadd.f32 %v1121_v38, %v1069_v5  ;;  %v1204_v4 = vmul.f32 %v1200_v32, %v2534_v7 }
 0x1b3   :  { %v1178_v25 = vadd.f32 %v1174_v63, %v1150_v42  ;;  %v1179_v0 = vadd.f32 %v1175_v24, %v1151_v55  ;;  %v1229_v40 = vadd.f32 %v1225_v16, %v1201_v46  ;;  %v1226_v54 = vmul.f32 %v1224_v11, %v2538_v20 }
 0x1b4   :  { %v1227_v10 = vmul.f32 %v1224_v11, %v2540_v15  ;;  %v1232_v59 = vadd.f32 %v1228_v53, %v1204_v4  ;;  %v2603_v51 = vrot.slane %v1012_v49, %v2406_v45  ;;  %v2606_v13 = vrot.slane %v1012_v49, %v2409_v48  ;;  %v1295_v15 = vpop.permute.xlu0 %1294 }
 0x1b5   :  { %v1271_v61 = vpop.permute.xlu1 %1270  ;;  %v1233_v33 = vadd.f32 %v1229_v40, %v1177_v35  ;;  %v1230_v36 = vadd.f32 %v1226_v54, %v1202_v2  ;;  %v1308_v34 = vrot.slane %v1012_v49, %v2412_v29  ;;  %v2786_v29 = vsub.s32 4, %v2399_v19 }
 0x1b6   :  { %v1231_v3 = vadd.f32 %v1227_v10, %v1203_v52  ;;  %v1236_v21 = vadd.f32 %v1232_v59, %v1180_v39  ;;  %v1259_v20 = vmul.f32 %v2603_v51, %v2560_v12  ;;  %v1283_v45 = vmul.f32 %v2606_v13, %v1271_v61 }
 0x1b7   :  { %v2608_v50 = vadd.f32 %v1233_v33, %v1125_v18  ;;  %v1234_v22 = vadd.f32 %v1230_v36, %v1178_v25  ;;  %v1332_v12 = vrot.slane %v1012_v49, %v2415_v62  ;;  %v2629_v62 = vrot.slane %v1012_v49, %v2786_v29 }
 0x1b8   :  { %v1235_v7 = vadd.f32 %v1231_v3, %v1179_v0  ;;  %v2612_v11 = vadd.f32 %v1236_v21, %v1128_v57  ;;  %v1287_v48 = vadd.f32 %v1283_v45, %v1259_v20  ;;  %v1315_v31 = vpop.permute.xlu0 %1314  ;;  %v2787_v63 = vsub.s32 5, %v2399_v19 }
 0x1b9   :  { %v2615_v41 = vadd.f32 %v1234_v22, %v1126_v17  ;;  %v2788_v53 = vsub.s32 7, %v2399_v19  ;;  %v1281_v25 = vmul.f32 %v2606_v13, %v2585_v58  ;;  %v1333_v0 = vmul.f32 %v1332_v12, %v1315_v31 }
 0x1ba   :  { %v1291_v32 = vpop.permute.xlu1 %1290  ;;  %v2617_v2 = vadd.f32 %v1235_v7, %v1127_v28  ;;  %v1388_v24 = vrot.slane %v1012_v49, %v2787_v63  ;;  %v2789_v18 = vsub.s32 6, %v2399_v19  ;;  %v1257_v61 = vmul.f32 %v2603_v51, %v2545_v43 }
 0x1bb   :  { %v2635_v46 = vrot.slane %v1012_v49, %v2788_v53  ;;  %v1309_v52 = vmul.f32 %v1308_v34, %v1291_v32  ;;  %v1260_v43 = vmul.f32 %v2603_v51, %v2579_v14  ;;  %v1284_v31 = vmul.f32 %v2606_v13, %v2597_v6 }
 0x1bc   :  { %v1327_v37 = vpop.permute.xlu0 %1326  ;;  %v1416_v40 = vrot.slane %v1012_v49, %v2789_v18  ;;  %v1285_v21 = vadd.f32 %v1281_v25, %v1257_v61  ;;  %v1310_v29 = vmul.f32 %v1308_v34, %v1295_v15 }
 0x1bd   :  { %v1337_v36 = vadd.f32 %v1333_v0, %v1309_v52  ;;  %v1336_v45 = vmul.f32 %v1332_v12, %v1327_v37  ;;  %v1282_v37 = vmul.f32 %v2606_v13, %v2590_v44  ;;  %v1288_v14 = vadd.f32 %v1284_v31, %v1260_v43 }
 0x1be   :  { %v1299_v47 = vpop.permute.xlu1 %1298 }
 0x1bf   :  { %v1311_v35 = vmul.f32 %v1308_v34, %v1299_v47  ;;  %v1341_v32 = vadd.f32 %v1337_v36, %v1285_v21 }
 0x1c0   :  { %v2621_v1 = vpop.permute.xlu0 %1350 }
 0x1c1   :  { %v1366_v13 = vmul.f32 %v2629_v62, %v2621_v1 }
 0x1c2   :  { %v1303_v56 = vpop.permute.xlu1 %1302 }
 0x1c3   :  { %v1312_v19 = vmul.f32 %v1308_v34, %v1303_v56 }
 0x1c4   :  { %v1371_v26 = vpop.permute.xlu0 %1370 }
 0x1c5   :  { %v1389_v33 = vmul.f32 %v1388_v24, %v1371_v26 }
 0x1c8   :  { %v1383_v16 = vpop.permute.xlu0 %1382 }
 0x1c9   :  { %v1319_v27 = vpop.permute.xlu1 %1318 }
 0x1cc   :  { %v1403_v23 = vpop.permute.xlu0 %1402 }
 0x1cd   :  { %v1323_v55 = vpop.permute.xlu1 %1322 }
 0x1ce   :  { %v1335_v57 = vmul.f32 %v1332_v12, %v1323_v55  ;;  %v1392_v55 = vmul.f32 %v1388_v24, %v1383_v16  ;;  %v1258_v16 = vmul.f32 %v2603_v51, %v2569_v60 }
 0x1d0   :  { %v1339_v30 = vadd.f32 %v1335_v57, %v1311_v35  ;;  %v1423_v4 = vpop.permute.xlu0 %1422  ;;  %v1286_v15 = vadd.f32 %v1282_v37, %v1258_v16 }
 0x1d1   :  { %v1441_v59 = vmul.f32 %v2635_v46, %v1423_v4 }
 0x1d2   :  { %v2623_v17 = vadd.f32 %v1339_v30, %v1287_v48  ;;  %v1347_v28 = vpop.permute.xlu1 %1346  ;;  %v1340_v30 = vadd.f32 %v1336_v45, %v1312_v19 }
 0x1d3   :  { %v1365_v54 = vmul.f32 %v2629_v62, %v1347_v28  ;;  %v1334_v28 = vmul.f32 %v1332_v12, %v1319_v27 }
 0x1d4   :  { %v1435_v20 = vpop.permute.xlu0 %1434  ;;  %v1344_v52 = vadd.f32 %v1340_v30, %v1288_v14 }
 0x1d5   :  { %v1393_v22 = vadd.f32 %v1389_v33, %v1365_v54  ;;  %v1444_v35 = vmul.f32 %v2635_v46, %v1435_v20  ;;  %v1338_v25 = vadd.f32 %v1334_v28, %v1310_v29 }
 0x1d6   :  { %v2625_v5 = vpop.permute.xlu1 %1354 }
 0x1d7   :  { %v1367_v4 = vmul.f32 %v2629_v62, %v2625_v5  ;;  %v2790_v5 = vld [vmem:[#allocation14_spill] sm:$0xff] }
 0x1da   :  { %v1359_v38 = vpop.permute.xlu1 %1358 }
 0x1db   :  { %v1368_v48 = vmul.f32 %v2629_v62, %v1359_v38 }
 0x1dd   :  { %v1396_v38 = vadd.f32 %v1392_v55, %v1368_v48 }
 0x1df   :  { %v1375_v42 = vpop.permute.xlu1 %1374 }
 0x1e0   :  { %v1390_v6 = vmul.f32 %v1388_v24, %v1375_v42  ;;  %v1342_v42 = vadd.f32 %v1338_v25, %v1286_v15 }
 0x1e2   :  { %v1394_v51 = vadd.f32 %v1390_v6, %v1366_v13 }
 0x1e3   :  { %v1379_v39 = vpop.permute.xlu1 %1378 }
 0x1e4   :  { %v1391_v34 = vmul.f32 %v1388_v24, %v1379_v39 }
 0x1e8   :  { %v1399_v10 = vpop.permute.xlu1 %1398 }
 0x1e9   :  { %v1417_v3 = vmul.f32 %v1416_v40, %v1399_v10 }
 0x1eb   :  { %v1445_v7 = vadd.f32 %v1441_v59, %v1417_v3 }
 0x1ec   :  { %v1407_v58 = vpop.permute.xlu1 %1406 }
 0x1ed   :  { %v1449_v49 = vadd.f32 %v1445_v7, %v1393_v22  ;;  %v1419_v61 = vmul.f32 %v1416_v40, %v1407_v58 }
 0x1ef   :  { %v1457_v47 = vadd.f32 %v1449_v49, %v1341_v32 }
 0x1f0   :  { %v1411_v57 = vpop.permute.xlu1 %1410 }
 0x1f1   :  { %v1461_v26 = vadd.f32 %v1457_v47, %v2608_v50  ;;  %v1420_v56 = vmul.f32 %v1416_v40, %v1411_v57 }
 0x1f3   :  { %v1448_v63 = vadd.f32 %v1444_v35, %v1420_v56  ;;  %v1465_v53 = vadd.f32 %v1461_v26, %v2419_v8  ;;  %v1418_v8 = vmul.f32 %v1416_v40, %v1403_v23  ;;  %v1395_v23 = vadd.f32 %v1391_v34, %v1367_v4 }
 0x1f5   :  { %v1452_v27 = vadd.f32 %v1448_v63, %v1396_v38  ;;  %1478 = vrot.lane.b32.xlu1 %v1465_v53, %s1698_s1  ;;  %1470 = vst.msk [vmem:[%s2710_s4] sm:$0xff] %vm1469_vm11, %v1465_v53  ;;  %v1427_v44 = vpop.permute.xlu1 %1426 }
 0x1f6   :  { %v1442_v50 = vmul.f32 %v2635_v46, %v1427_v44 }
 0x1f7   :  { %v1460_v60 = vadd.f32 %v1452_v27, %v1344_v52 }
 0x1f8   :  { %v1446_v12 = vadd.f32 %v1442_v50, %v1418_v8 }
 0x1f9   :  { %v1431_v0 = vpop.permute.xlu1 %1430  ;;  %v1464_v18 = vadd.f32 %v1460_v60, %v2612_v11 }
 0x1fa   :  { %v1450_v54 = vadd.f32 %v1446_v12, %v1394_v51  ;;  %v1443_v10 = vmul.f32 %v2635_v46, %v1431_v0 }
 0x1fb   :  { %v1468_v1 = vadd.f32 %v1464_v18, %v2442_v9  ;;  %v2791_v9 = vld [vmem:[#allocation16_spill] sm:$0xff] }
 0x1fc   :  { %v1458_v33 = vadd.f32 %v1450_v54, %v1342_v42  ;;  %v1447_v59 = vadd.f32 %v1443_v10, %v1419_v61 }
 0x1fd   :  { %1473 = vst.msk [vmem:[%s2710_s4 + $0x18] sm:$0xff] %vm1469_vm11, %v1468_v1 }
 0x1fe   :  { %v1451_v39 = vadd.f32 %v1447_v59, %v1395_v23  ;;  %v1462_v11 = vadd.f32 %v1458_v33, %v2615_v41 }
 0x200   :  { %v1459_v24 = vadd.f32 %v1451_v39, %v2623_v17  ;;  %v1466_v62 = vadd.f32 %v1462_v11, %v2790_v5 }
 0x202   :  { %v1463_v40 = vadd.f32 %v1459_v24, %v2617_v2  ;;  %1480 = vrot.lane.b32.xlu0 %v1466_v62, %s1698_s1  ;;  %1471 = vst.msk [vmem:[%s2710_s4 + $0x8] sm:$0xff] %vm1469_vm11, %v1466_v62 }
 0x204   :  { %v1467_v46 = vadd.f32 %v1463_v40, %v2791_v9 }
 0x206   :  { %1484 = vrot.lane.b32.xlu0 %v1468_v1, %s1698_s1  ;;  %1482 = vrot.lane.b32.xlu1 %v1467_v46, %s1698_s1  ;;  %1472 = vst.msk [vmem:[%s2710_s4 + $0x10] sm:$0xff] %vm1469_vm11, %v1467_v46 }
 0x267   :  { %v1479_v41 = vpop.permute.xlu1 %1478 }
 0x268   :  { %1537 = vst.msk [vmem:[%s2710_s4 + $0x20] sm:$0xff] %vm1469_vm11, %v1479_v41 }
 0x274   :  { %v1481_v2 = vpop.permute.xlu0 %1480 }
 0x275   :  { %1538 = vst.msk [vmem:[%s2710_s4 + $0x28] sm:$0xff] %vm1469_vm11, %v1481_v2 }
 0x278   :  { %v1485_v17 = vpop.permute.xlu0 %1484  ;;  %v1483_v36 = vpop.permute.xlu1 %1482 }
 0x279   :  { %1540 = vst.msk [vmem:[%s2710_s4 + $0x38] sm:$0xff] %vm1469_vm11, %v1485_v17  ;;  %1539 = vst.msk [vmem:[%s2710_s4 + $0x30] sm:$0xff] %vm1469_vm11, %v1483_v36 }

</bundles_post_ra>
